<compile_context>
chip_gen: v5e
topology: v5e:2x2
jax: 0.10.0
libtpu: 0.0.40
codegen_flags: <defaults>
</compile_context>

<pallas_src>
import functools

import jax
import jax.numpy as jnp
from jax import lax
from jax.experimental import pallas as pl
from jax.experimental.pallas import tpu as pltpu


def _round_up(x: int, m: int) -> int:
    return (x + m - 1) // m * m


def _pick_tiling():
    """Generation-aware defaults: big row tiles on 128-MiB VMEM parts (v5e/v6e),
    smaller tiles + lower scoped-VMEM limit on v7x (64 MiB per TensorCore)."""
    try:
        cap = pltpu.get_tpu_info().vmem_capacity_bytes
    except Exception:  # pragma: no cover - conservative fallback
        cap = 64 * 1024 * 1024
    if cap >= 100 * 1024 * 1024:
        return 32, 96 * 1024 * 1024
    return 16, 48 * 1024 * 1024


def _bottleneck_kernel(x_hbm, w1_ref, b1_ref, w2_ref, b2_ref, out_ref,
                       xbuf, p1_ref, p2_ref, dma_sem,
                       *, real_h: int, real_w: int, shortcut: bool):
    """One (batch, row-tile) grid step.

    x_hbm  : (N, Hpad+4, Wp, Cp) bf16  full padded input, resident in HBM (pl.ANY)
    w1_ref : (3, 3*Cp, Cmp)      bf16  cv1 weights (BN scale folded), per-dy dx-im2col
    b1_ref : (1, Cmp)            f32   cv1 folded BN shift
    w2_ref : (3, 3*Cmp, Cop)     bf16  cv2 weights (BN scale folded), per-dy dx-im2col
    b2_ref : (1, Cop)            f32   cv2 folded BN shift
    out_ref: (TH, Wp, Cop)       f32
    xbuf   : (TH+4, Wp, Cp)      bf16  VMEM input halo window (manual DMA target)
    p1_ref : (TH+4, Wp, 3*Cp)    bf16  VMEM dx-tap slab for cv1
    p2_ref : (TH+2, Wp, 3*Cmp)   bf16  VMEM dx-tap slab for cv2
    dma_sem: DMA semaphore
    """
    TH, Wp, Cop = out_ref.shape
    Cp = xbuf.shape[-1]
    Cmp = b1_ref.shape[-1]
    M1 = TH + 2                       # rows of the intermediate (1-row halo for cv2)
    R1 = TH + 4                       # rows of the input window (2-row halo each side)
    n = pl.program_id(0)
    h = pl.program_id(1)

    # ---- fetch the (TH+4)-row halo window straight from HBM (no stacked copies) ----
    cp = pltpu.make_async_copy(x_hbm.at[n, pl.ds(h * TH, R1)], xbuf, dma_sem)
    cp.start()
    cp.wait()

    def fill_dx_slab(p_ref, v, c, rows):
        # p_ref[r, j, t*c:(t+1)*c] = v[r, j + t - 1, :]  (zero when j+t-1 is outside
        # [0, Wp)).  All tap column offsets are lane-aligned (c % 128 == 0); only the
        # two 1-sublane edge columns need a tiny zero store.
        zcol = jnp.zeros((rows, 1, c), v.dtype)
        p_ref[:, :, c:2 * c] = v                               # dx = 0 (center) tap
        p_ref[:, 1:Wp, 0:c] = v[:, 0:Wp - 1, :]                # dx = -1 tap
        p_ref[:, 0:1, 0:c] = zcol
        p_ref[:, 0:Wp - 1, 2 * c:3 * c] = v[:, 1:Wp, :]        # dx = +1 tap
        p_ref[:, Wp - 1:Wp, 2 * c:3 * c] = zcol

    # -------- cv1: three accumulated (M1*Wp, 3*Cp) x (3*Cp, Cmp) MXU matmuls --------
    fill_dx_slab(p1_ref, xbuf[...], Cp, R1)
    acc1 = jnp.zeros((M1 * Wp, Cmp), jnp.float32)
    for dy in range(3):
        acc1 = acc1 + jnp.dot(
            p1_ref[dy:dy + M1, :, :].reshape(M1 * Wp, 3 * Cp),
            w1_ref[dy],
            preferred_element_type=jnp.float32)
    y1 = acc1 + b1_ref[...]                       # folded BN shift (scale already in w1)
    y1 = y1 * pl.reciprocal(1.0 + jnp.exp(-y1), approx=True)   # SiLU (exp + vrcp on EUP)
    y1 = y1.reshape(M1, Wp, Cmp)

    # Rows/cols of the intermediate outside the real image are cv2's zero padding
    # (covers the image border, rows added when H was padded to a multiple of TH,
    # and columns added when W was padded to a multiple of 8).
    r = lax.broadcasted_iota(jnp.int32, (M1, 1, 1), 0)
    g = h * TH - 1 + r                            # global row index of y1's local row r
    valid = (g >= 0) & (g < real_h)
    if real_w != Wp:
        col = lax.broadcasted_iota(jnp.int32, (1, Wp, 1), 1)
        valid = valid & (col < real_w)
    y1 = jnp.where(valid, y1, 0.0)

    # -------- cv2: three accumulated (TH*Wp, 3*Cmp) x (3*Cmp, Cop) MXU matmuls -------
    fill_dx_slab(p2_ref, y1.astype(jnp.bfloat16), Cmp, M1)
    acc2 = jnp.zeros((TH * Wp, Cop), jnp.float32)
    for dy in range(3):
        acc2 = acc2 + jnp.dot(
            p2_ref[dy:dy + TH, :, :].reshape(TH * Wp, 3 * Cmp),
            w2_ref[dy],
            preferred_element_type=jnp.float32)
    y2 = acc2 + b2_ref[...]
    y2 = y2 * pl.reciprocal(1.0 + jnp.exp(-y2), approx=True)
    y2 = y2.reshape(TH, Wp, Cop)

    if shortcut:
        # Residual straight from the already-resident bf16 input window (Cp == Cop
        # because shortcut requires ch_in == ch_out). No separate f32 residual stream.
        y2 = y2 + xbuf[2:TH + 2, :, :].astype(jnp.float32)

    out_ref[...] = y2.astype(out_ref.dtype)


def bottleneck_pallas(x_nchw, params, *, shortcut: bool,
                      row_tile: int | None = None,
                      vmem_limit_bytes: int | None = None):
    """x_nchw: (N, Cin, H, W) float32 -> (N, Cout, H, W) float32."""
    w1, s1, b1, w2, s2, b2 = params   # w: (3,3,Cin,Cmid)/(3,3,Cmid,Cout); s/b: (1,C)
    N, Cin, H, W = x_nchw.shape
    Cmid = w1.shape[3]
    Cout = w2.shape[3]
    if shortcut and Cin != Cout:
        raise ValueError("shortcut requires ch_in == ch_out")

    LANE, SUB = 128, 8
    Cp = _round_up(Cin, LANE)
    Cmp = _round_up(Cmid, LANE)
    Cop = _round_up(Cout, LANE)
    Wp = _round_up(W, SUB)            # sublane-aligned width -> reshapes are layout no-ops

    th_auto, vmem_auto = _pick_tiling()
    TH = min(row_tile if row_tile is not None else th_auto, H)
    vmem_limit = vmem_limit_bytes if vmem_limit_bytes is not None else vmem_auto
    Hpad = _round_up(H, TH)
    HT = Hpad // TH

    # ---- glue: NCHW -> NHWC, pad rows (2-row conv halo + H padding), width, channels.
    # Single padded bf16 array stays in HBM; the kernel DMAs overlapping windows itself.
    x_nhwc = jnp.transpose(x_nchw, (0, 2, 3, 1))                       # (N,H,W,Cin)
    x_hbm = jnp.pad(x_nhwc, ((0, 0), (2, Hpad - H + 2),
                             (0, Wp - W), (0, Cp - Cin))).astype(jnp.bfloat16)

    # ---- fold BN scale into weights, pad channels, per-dy dx-im2col layout, bf16 ----
    w1f = jnp.pad(w1 * s1.reshape(1, 1, 1, Cmid),
                  ((0, 0), (0, 0), (0, Cp - Cin), (0, Cmp - Cmid)))
    w1f = w1f.reshape(3, 3 * Cp, Cmp).astype(jnp.bfloat16)             # (dy, dx*ci, co)
    b1f = jnp.pad(b1, ((0, 0), (0, Cmp - Cmid)))                       # (1, Cmp) f32
    w2f = jnp.pad(w2 * s2.reshape(1, 1, 1, Cout),
                  ((0, 0), (0, 0), (0, Cmp - Cmid), (0, Cop - Cout)))
    w2f = w2f.reshape(3, 3 * Cmp, Cop).astype(jnp.bfloat16)
    b2f = jnp.pad(b2, ((0, 0), (0, Cop - Cout)))                       # (1, Cop) f32

    kernel = functools.partial(_bottleneck_kernel, real_h=H, real_w=W,
                               shortcut=shortcut)

    out_nhwc = pl.pallas_call(
        kernel,
        out_shape=jax.ShapeDtypeStruct((N, Hpad, Wp, Cop), jnp.float32),
        grid=(N, HT),
        in_specs=[
            pl.BlockSpec(memory_space=pl.ANY),                         # x: manual DMA
            pl.BlockSpec((3, 3 * Cp, Cmp), lambda n, hh: (0, 0, 0)),
            pl.BlockSpec((1, Cmp), lambda n, hh: (0, 0)),
            pl.BlockSpec((3, 3 * Cmp, Cop), lambda n, hh: (0, 0, 0)),
            pl.BlockSpec((1, Cop), lambda n, hh: (0, 0)),
        ],
        out_specs=pl.BlockSpec((None, TH, Wp, Cop), lambda n, hh: (n, hh, 0, 0)),
        scratch_shapes=[
            pltpu.VMEM((TH + 4, Wp, Cp), jnp.bfloat16),       # input halo window
            pltpu.VMEM((TH + 4, Wp, 3 * Cp), jnp.bfloat16),   # cv1 dx-tap slab
            pltpu.VMEM((TH + 2, Wp, 3 * Cmp), jnp.bfloat16),  # cv2 dx-tap slab
            pltpu.SemaphoreType.DMA,
        ],
        compiler_params=pltpu.CompilerParams(
            dimension_semantics=("parallel", "parallel"),
            vmem_limit_bytes=vmem_limit),
    )(x_hbm, w1f, b1f, w2f, b2f)

    # glue: drop H/W/channel padding, NHWC -> NCHW
    # (a stacked-Bottleneck variant would keep NHWC/bf16 to skip these per-layer.)
    out = out_nhwc[:, :H, :W, :Cout]
    return jnp.transpose(out, (0, 3, 1, 2))


def make_params(key, ch_in, ch_out, e=0.5, eps=1e-5):
    """Deterministic synthetic parameters (matches Bottleneck.__init__ shapes)."""
    c_ = int(ch_out * e)
    ks = jax.random.split(key, 10)

    # conv weights, PyTorch layout (Cout, Cin, kh, kw) -> kernel layout (kh, kw, Cin, Cout)
    w1_t = jax.random.normal(ks[0], (c_, ch_in, 3, 3), jnp.float32) * 0.1
    w2_t = jax.random.normal(ks[1], (ch_out, c_, 3, 3), jnp.float32) * 0.1
    w1 = jnp.transpose(w1_t, (2, 3, 1, 0))
    w2 = jnp.transpose(w2_t, (2, 3, 1, 0))

    # BatchNorm (inference) params
    g1 = 1.0 + 0.1 * jax.random.normal(ks[2], (c_,), jnp.float32)
    be1 = 0.1 * jax.random.normal(ks[3], (c_,), jnp.float32)
    m1 = 0.1 * jax.random.normal(ks[4], (c_,), jnp.float32)
    v1 = jnp.abs(jax.random.normal(ks[5], (c_,), jnp.float32)) + 0.5

    g2 = 1.0 + 0.1 * jax.random.normal(ks[6], (ch_out,), jnp.float32)
    be2 = 0.1 * jax.random.normal(ks[7], (ch_out,), jnp.float32)
    m2 = 0.1 * jax.random.normal(ks[8], (ch_out,), jnp.float32)
    v2 = jnp.abs(jax.random.normal(ks[9], (ch_out,), jnp.float32)) + 0.5

    # fold BN into per-channel scale/shift
    s1 = (g1 / jnp.sqrt(v1 + eps)).reshape(1, c_)
    b1 = (be1 - m1 * g1 / jnp.sqrt(v1 + eps)).reshape(1, c_)
    s2 = (g2 / jnp.sqrt(v2 + eps)).reshape(1, ch_out)
    b2 = (be2 - m2 * g2 / jnp.sqrt(v2 + eps)).reshape(1, ch_out)

    return (w1, s1, b1, w2, s2, b2)


def bottleneck_ref(x_nchw, params, *, shortcut: bool):
    """Pure-JAX NCHW reference (mirrors the PyTorch forward, BN in eval mode)."""
    w1, s1, b1, w2, s2, b2 = params

    def conv_bn_silu(x, w_khkwio, s, b):
        w_oihw = jnp.transpose(w_khkwio, (3, 2, 0, 1))
        y = lax.conv_general_dilated(
            x, w_oihw, window_strides=(1, 1), padding=((1, 1), (1, 1)),
            dimension_numbers=("NCHW", "OIHW", "NCHW"))
        y = y * s.reshape(1, -1, 1, 1) + b.reshape(1, -1, 1, 1)
        return y * jax.nn.sigmoid(y)

    y = conv_bn_silu(x_nchw, w1, s1, b1)
    y = conv_bn_silu(y, w2, s2, b2)
    return x_nchw + y if shortcut else y


if __name__ == "__main__":
    key = jax.random.PRNGKey(0)
    k_x, k_p, k_p2 = jax.random.split(key, 3)

    N, C, H, W = 2, 4, 16, 16
    x = jax.random.normal(k_x, (N, C, H, W), jnp.float32)

    # Test 1: ch_in == ch_out -> shortcut active (Bottleneck default)
    params = make_params(k_p, ch_in=C, ch_out=C, e=0.5)
    sc = True and (C == C)
    out = jax.block_until_ready(bottleneck_pallas(x, params, shortcut=sc))
    ref = bottleneck_ref(x, params, shortcut=sc)
    assert out.shape == (N, C, H, W)
    # bf16 MXU operands + bf16 residual + approx reciprocal -> relaxed tolerance
    assert jnp.allclose(out, ref, atol=4e-2, rtol=4e-2), (
        f"max abs err {jnp.max(jnp.abs(out - ref))}")

    # Test 2: ch_in != ch_out -> shortcut disabled in the module
    C_out2 = 8
    params2 = make_params(k_p2, ch_in=C, ch_out=C_out2, e=0.5)
    sc2 = True and (C == C_out2)
    out2 = jax.block_until_ready(bottleneck_pallas(x, params2, shortcut=sc2))
    ref2 = bottleneck_ref(x, params2, shortcut=sc2)
    assert out2.shape == (N, C_out2, H, W)
    assert jnp.allclose(out2, ref2, atol=4e-2, rtol=4e-2), (
        f"max abs err {jnp.max(jnp.abs(out2 - ref2))}")

    print("KERNEL_OK")
</pallas_src>

<mosaic_0001>
module attributes {stable_mosaic.version = 11 : i64} {
  func.func @_bottleneck_kernel(%arg0: i32, %arg1: i32, %arg2: memref<2x20x16x128xbf16, #tpu.memory_space<any>>, %arg3: memref<3x384x128xbf16, #tpu.memory_space<vmem>>, %arg4: memref<1x128xf32, #tpu.memory_space<vmem>>, %arg5: memref<3x384x128xbf16, #tpu.memory_space<vmem>>, %arg6: memref<1x128xf32, #tpu.memory_space<vmem>>, %arg7: memref<1x16x16x128xf32, #tpu.memory_space<vmem>>, %arg8: memref<20x16x128xbf16, #tpu.memory_space<vmem>>, %arg9: memref<20x16x384xbf16, #tpu.memory_space<vmem>>, %arg10: memref<18x16x384xbf16, #tpu.memory_space<vmem>>, %arg11: memref<!tpu.dma_semaphore, #tpu.memory_space<semaphore_mem>>) attributes {dimension_semantics = [#tpu.dimension_semantics<parallel>, #tpu.dimension_semantics<parallel>], iteration_bounds = array<i64: 2, 1>, scalar_prefetch = 0 : i64, scratch_operands = 4 : i64, tpu.core_type = #tpu.core_type<tc>, window_params = [{}, {pipeline_mode = #tpu.pipeline_mode<synchronous>, transform_indices = @transform_1, window_bounds = array<i64: 3, 384, 128>}, {pipeline_mode = #tpu.pipeline_mode<synchronous>, transform_indices = @transform_2, window_bounds = array<i64: 1, 128>}, {pipeline_mode = #tpu.pipeline_mode<synchronous>, transform_indices = @transform_3, window_bounds = array<i64: 3, 384, 128>}, {pipeline_mode = #tpu.pipeline_mode<synchronous>, transform_indices = @transform_4, window_bounds = array<i64: 1, 128>}, {transform_indices = @transform_5, window_bounds = array<i64: 1, 16, 16, 128>}]} {
    %c16_i32 = arith.constant 16 : i32
    %0 = arith.muli %arg1, %c16_i32 : i32
    %c0_i32 = arith.constant 0 : i32
    %c0_i32_0 = arith.constant 0 : i32
    %1 = tpu.memref_slice %arg2[%arg0, %0, %c0_i32, %c0_i32_0] : memref<2x20x16x128xbf16, #tpu.memory_space<any>> -> memref<1x20x16x128xbf16, #tpu.memory_space<any>>
    %2 = tpu.memref_squeeze %1 : memref<1x20x16x128xbf16, #tpu.memory_space<any>> -> memref<20x16x128xbf16, #tpu.memory_space<any>>
    tpu.enqueue_dma source(%2 : memref<20x16x128xbf16, #tpu.memory_space<any>>) target(%arg8 : memref<20x16x128xbf16, #tpu.memory_space<vmem>>) target_semaphore(%arg11 : memref<!tpu.dma_semaphore, #tpu.memory_space<semaphore_mem>>)
    %c0_i32_1 = arith.constant 0 : i32
    %c0_i32_2 = arith.constant 0 : i32
    %3 = tpu.memref_slice %arg2[%arg0, %0, %c0_i32_1, %c0_i32_2] : memref<2x20x16x128xbf16, #tpu.memory_space<any>> -> memref<1x20x16x128xbf16, #tpu.memory_space<any>>
    %4 = tpu.memref_squeeze %3 : memref<1x20x16x128xbf16, #tpu.memory_space<any>> -> memref<20x16x128xbf16, #tpu.memory_space<any>>
    tpu.wait_dma2 semaphore(%arg11 : memref<!tpu.dma_semaphore, #tpu.memory_space<semaphore_mem>>) src(%4 : memref<20x16x128xbf16, #tpu.memory_space<any>>) dst(%arg8 : memref<20x16x128xbf16, #tpu.memory_space<vmem>>)
    %c0 = arith.constant 0 : index
    %c0_3 = arith.constant 0 : index
    %c0_4 = arith.constant 0 : index
    %5 = vector.load %arg8[%c0, %c0_3, %c0_4] : memref<20x16x128xbf16, #tpu.memory_space<vmem>>, vector<20x16x128xbf16>
    %cst = arith.constant 0.000000e+00 : bf16
    %6 = vector.broadcast %cst : bf16 to vector<20x1x128xbf16>
    %c0_5 = arith.constant 0 : index
    %c0_6 = arith.constant 0 : index
    %c128 = arith.constant 128 : index
    %7 = vector.load %arg9[%c0_5, %c0_6, %c128] : memref<20x16x384xbf16, #tpu.memory_space<vmem>>, vector<20x16x128xbf16>
    tpu.vector_store %arg9[%c0_5, %c0_6, %c128], %5 {strides = array<i32>} : memref<20x16x384xbf16, #tpu.memory_space<vmem>>, vector<20x16x128xbf16>,
    %8 = vector.extract_strided_slice %5 {offsets = [0, 0, 0], sizes = [20, 15, 128], strides = [1, 1, 1]} : vector<20x16x128xbf16> to vector<20x15x128xbf16>
    %c0_7 = arith.constant 0 : index
    %c1 = arith.constant 1 : index
    %c0_8 = arith.constant 0 : index
    %9 = vector.load %arg9[%c0_7, %c1, %c0_8] : memref<20x16x384xbf16, #tpu.memory_space<vmem>>, vector<20x15x128xbf16>
    tpu.vector_store %arg9[%c0_7, %c1, %c0_8], %8 {strides = array<i32>} : memref<20x16x384xbf16, #tpu.memory_space<vmem>>, vector<20x15x128xbf16>,
    %c0_9 = arith.constant 0 : index
    %c0_10 = arith.constant 0 : index
    %c0_11 = arith.constant 0 : index
    %10 = vector.load %arg9[%c0_9, %c0_10, %c0_11] : memref<20x16x384xbf16, #tpu.memory_space<vmem>>, vector<20x1x128xbf16>
    tpu.vector_store %arg9[%c0_9, %c0_10, %c0_11], %6 {strides = array<i32>} : memref<20x16x384xbf16, #tpu.memory_space<vmem>>, vector<20x1x128xbf16>,
    %11 = vector.extract_strided_slice %5 {offsets = [0, 1, 0], sizes = [20, 15, 128], strides = [1, 1, 1]} : vector<20x16x128xbf16> to vector<20x15x128xbf16>
    %c0_12 = arith.constant 0 : index
    %c0_13 = arith.constant 0 : index
    %c256 = arith.constant 256 : index
    %12 = vector.load %arg9[%c0_12, %c0_13, %c256] : memref<20x16x384xbf16, #tpu.memory_space<vmem>>, vector<20x15x128xbf16>
    tpu.vector_store %arg9[%c0_12, %c0_13, %c256], %11 {strides = array<i32>} : memref<20x16x384xbf16, #tpu.memory_space<vmem>>, vector<20x15x128xbf16>,
    %c0_14 = arith.constant 0 : index
    %c15 = arith.constant 15 : index
    %c256_15 = arith.constant 256 : index
    %13 = vector.load %arg9[%c0_14, %c15, %c256_15] : memref<20x16x384xbf16, #tpu.memory_space<vmem>>, vector<20x1x128xbf16>
    tpu.vector_store %arg9[%c0_14, %c15, %c256_15], %6 {strides = array<i32>} : memref<20x16x384xbf16, #tpu.memory_space<vmem>>, vector<20x1x128xbf16>,
    %cst_16 = arith.constant 0.000000e+00 : f32
    %14 = vector.broadcast %cst_16 : f32 to vector<288x128xf32>
    %c0_17 = arith.constant 0 : index
    %c0_18 = arith.constant 0 : index
    %c0_19 = arith.constant 0 : index
    %15 = vector.load %arg9[%c0_17, %c0_18, %c0_19] : memref<20x16x384xbf16, #tpu.memory_space<vmem>>, vector<18x16x384xbf16>
    %16 = vector.shape_cast %15 : vector<18x16x384xbf16> to vector<288x384xbf16>
    %c0_20 = arith.constant 0 : index
    %c0_21 = arith.constant 0 : index
    %c0_22 = arith.constant 0 : index
    %17 = vector.load %arg3[%c0_20, %c0_21, %c0_22] : memref<3x384x128xbf16, #tpu.memory_space<vmem>>, vector<1x384x128xbf16>
    %18 = vector.shape_cast %17 : vector<1x384x128xbf16> to vector<384x128xbf16>
    %cst_23 = arith.constant dense<0.000000e+00> : vector<288x128xf32>
    %19 = tpu.matmul %16, %18, %cst_23 {dimension_numbers = #tpu.dot_dimension_numbers<[1], [0], [0], [1], [0, 0, 1, 1], [], []>} : vector<288x384xbf16>, vector<384x128xbf16>, vector<288x128xf32> -> vector<288x128xf32>
    %20 = arith.addf %14, %19 : vector<288x128xf32>
    %c1_24 = arith.constant 1 : index
    %c0_25 = arith.constant 0 : index
    %c0_26 = arith.constant 0 : index
    %21 = vector.load %arg9[%c1_24, %c0_25, %c0_26] : memref<20x16x384xbf16, #tpu.memory_space<vmem>>, vector<18x16x384xbf16>
    %22 = vector.shape_cast %21 : vector<18x16x384xbf16> to vector<288x384xbf16>
    %c1_27 = arith.constant 1 : index
    %c0_28 = arith.constant 0 : index
    %c0_29 = arith.constant 0 : index
    %23 = vector.load %arg3[%c1_27, %c0_28, %c0_29] : memref<3x384x128xbf16, #tpu.memory_space<vmem>>, vector<1x384x128xbf16>
    %24 = vector.shape_cast %23 : vector<1x384x128xbf16> to vector<384x128xbf16>
    %cst_30 = arith.constant dense<0.000000e+00> : vector<288x128xf32>
    %25 = tpu.matmul %22, %24, %cst_30 {dimension_numbers = #tpu.dot_dimension_numbers<[1], [0], [0], [1], [0, 0, 1, 1], [], []>} : vector<288x384xbf16>, vector<384x128xbf16>, vector<288x128xf32> -> vector<288x128xf32>
    %26 = arith.addf %20, %25 : vector<288x128xf32>
    %c2 = arith.constant 2 : index
    %c0_31 = arith.constant 0 : index
    %c0_32 = arith.constant 0 : index
    %27 = vector.load %arg9[%c2, %c0_31, %c0_32] : memref<20x16x384xbf16, #tpu.memory_space<vmem>>, vector<18x16x384xbf16>
    %28 = vector.shape_cast %27 : vector<18x16x384xbf16> to vector<288x384xbf16>
    %c2_33 = arith.constant 2 : index
    %c0_34 = arith.constant 0 : index
    %c0_35 = arith.constant 0 : index
    %29 = vector.load %arg3[%c2_33, %c0_34, %c0_35] : memref<3x384x128xbf16, #tpu.memory_space<vmem>>, vector<1x384x128xbf16>
    %30 = vector.shape_cast %29 : vector<1x384x128xbf16> to vector<384x128xbf16>
    %cst_36 = arith.constant dense<0.000000e+00> : vector<288x128xf32>
    %31 = tpu.matmul %28, %30, %cst_36 {dimension_numbers = #tpu.dot_dimension_numbers<[1], [0], [0], [1], [0, 0, 1, 1], [], []>} : vector<288x384xbf16>, vector<384x128xbf16>, vector<288x128xf32> -> vector<288x128xf32>
    %32 = arith.addf %26, %31 : vector<288x128xf32>
    %c0_37 = arith.constant 0 : index
    %c0_38 = arith.constant 0 : index
    %33 = vector.load %arg4[%c0_37, %c0_38] : memref<1x128xf32, #tpu.memory_space<vmem>>, vector<1x128xf32>
    %34 = vector.broadcast %33 : vector<1x128xf32> to vector<288x128xf32>
    %35 = arith.addf %32, %34 : vector<288x128xf32>
    %cst_39 = arith.constant 0.000000e+00 : f32
    %36 = vector.broadcast %cst_39 : f32 to vector<288x128xf32>
    %37 = arith.subf %36, %35 : vector<288x128xf32>
    %38 = math.exp %37 : vector<288x128xf32>
    %cst_40 = arith.constant 1.000000e+00 : f32
    %39 = vector.broadcast %cst_40 : f32 to vector<288x128xf32>
    %40 = arith.addf %39, %38 : vector<288x128xf32>
    %41 = tpu.reciprocal %40 {approx = true} : vector<288x128xf32> -> vector<288x128xf32>
    %42 = arith.mulf %35, %41 : vector<288x128xf32>
    %43 = vector.shape_cast %42 : vector<288x128xf32> to vector<18x16x128xf32>
    %44 = tpu.iota {dimensions = array<i32: 0>} : vector<18x1x1xi32>
    %c16_i32_41 = arith.constant 16 : i32
    %45 = arith.muli %arg1, %c16_i32_41 : i32
    %c1_i32 = arith.constant 1 : i32
    %46 = arith.subi %45, %c1_i32 : i32
    %47 = vector.broadcast %46 : i32 to vector<18x1x1xi32>
    %48 = arith.addi %47, %44 : vector<18x1x1xi32>
    %c0_i32_42 = arith.constant 0 : i32
    %49 = vector.broadcast %c0_i32_42 : i32 to vector<18x1x1xi32>
    %50 = arith.cmpi sge, %48, %49 : vector<18x1x1xi32>
    %c16_i32_43 = arith.constant 16 : i32
    %51 = vector.broadcast %c16_i32_43 : i32 to vector<18x1x1xi32>
    %52 = arith.cmpi slt, %48, %51 : vector<18x1x1xi32>
    %53 = arith.andi %50, %52 : vector<18x1x1xi1>
    %cst_44 = arith.constant 0.000000e+00 : f32
    %54 = vector.shape_cast %53 : vector<18x1x1xi1> to vector<18x1x1xi1>
    %55 = vector.broadcast %54 : vector<18x1x1xi1> to vector<18x16x128xi1>
    %56 = vector.broadcast %cst_44 : f32 to vector<18x16x128xf32>
    %57 = arith.select %55, %43, %56 : vector<18x16x128xi1>, vector<18x16x128xf32>
    %58 = arith.truncf %57 : vector<18x16x128xf32> to vector<18x16x128xbf16>
    %cst_45 = arith.constant 0.000000e+00 : bf16
    %59 = vector.broadcast %cst_45 : bf16 to vector<18x1x128xbf16>
    %c0_46 = arith.constant 0 : index
    %c0_47 = arith.constant 0 : index
    %c128_48 = arith.constant 128 : index
    %60 = vector.load %arg10[%c0_46, %c0_47, %c128_48] : memref<18x16x384xbf16, #tpu.memory_space<vmem>>, vector<18x16x128xbf16>
    tpu.vector_store %arg10[%c0_46, %c0_47, %c128_48], %58 {strides = array<i32>} : memref<18x16x384xbf16, #tpu.memory_space<vmem>>, vector<18x16x128xbf16>,
    %61 = vector.extract_strided_slice %58 {offsets = [0, 0, 0], sizes = [18, 15, 128], strides = [1, 1, 1]} : vector<18x16x128xbf16> to vector<18x15x128xbf16>
    %c0_49 = arith.constant 0 : index
    %c1_50 = arith.constant 1 : index
    %c0_51 = arith.constant 0 : index
    %62 = vector.load %arg10[%c0_49, %c1_50, %c0_51] : memref<18x16x384xbf16, #tpu.memory_space<vmem>>, vector<18x15x128xbf16>
    tpu.vector_store %arg10[%c0_49, %c1_50, %c0_51], %61 {strides = array<i32>} : memref<18x16x384xbf16, #tpu.memory_space<vmem>>, vector<18x15x128xbf16>,
    %c0_52 = arith.constant 0 : index
    %c0_53 = arith.constant 0 : index
    %c0_54 = arith.constant 0 : index
    %63 = vector.load %arg10[%c0_52, %c0_53, %c0_54] : memref<18x16x384xbf16, #tpu.memory_space<vmem>>, vector<18x1x128xbf16>
    tpu.vector_store %arg10[%c0_52, %c0_53, %c0_54], %59 {strides = array<i32>} : memref<18x16x384xbf16, #tpu.memory_space<vmem>>, vector<18x1x128xbf16>,
    %64 = vector.extract_strided_slice %58 {offsets = [0, 1, 0], sizes = [18, 15, 128], strides = [1, 1, 1]} : vector<18x16x128xbf16> to vector<18x15x128xbf16>
    %c0_55 = arith.constant 0 : index
    %c0_56 = arith.constant 0 : index
    %c256_57 = arith.constant 256 : index
    %65 = vector.load %arg10[%c0_55, %c0_56, %c256_57] : memref<18x16x384xbf16, #tpu.memory_space<vmem>>, vector<18x15x128xbf16>
    tpu.vector_store %arg10[%c0_55, %c0_56, %c256_57], %64 {strides = array<i32>} : memref<18x16x384xbf16, #tpu.memory_space<vmem>>, vector<18x15x128xbf16>,
    %c0_58 = arith.constant 0 : index
    %c15_59 = arith.constant 15 : index
    %c256_60 = arith.constant 256 : index
    %66 = vector.load %arg10[%c0_58, %c15_59, %c256_60] : memref<18x16x384xbf16, #tpu.memory_space<vmem>>, vector<18x1x128xbf16>
    tpu.vector_store %arg10[%c0_58, %c15_59, %c256_60], %59 {strides = array<i32>} : memref<18x16x384xbf16, #tpu.memory_space<vmem>>, vector<18x1x128xbf16>,
    %cst_61 = arith.constant 0.000000e+00 : f32
    %67 = vector.broadcast %cst_61 : f32 to vector<256x128xf32>
    %c0_62 = arith.constant 0 : index
    %c0_63 = arith.constant 0 : index
    %c0_64 = arith.constant 0 : index
    %68 = vector.load %arg10[%c0_62, %c0_63, %c0_64] : memref<18x16x384xbf16, #tpu.memory_space<vmem>>, vector<16x16x384xbf16>
    %69 = vector.shape_cast %68 : vector<16x16x384xbf16> to vector<256x384xbf16>
    %c0_65 = arith.constant 0 : index
    %c0_66 = arith.constant 0 : index
    %c0_67 = arith.constant 0 : index
    %70 = vector.load %arg5[%c0_65, %c0_66, %c0_67] : memref<3x384x128xbf16, #tpu.memory_space<vmem>>, vector<1x384x128xbf16>
    %71 = vector.shape_cast %70 : vector<1x384x128xbf16> to vector<384x128xbf16>
    %cst_68 = arith.constant dense<0.000000e+00> : vector<256x128xf32>
    %72 = tpu.matmul %69, %71, %cst_68 {dimension_numbers = #tpu.dot_dimension_numbers<[1], [0], [0], [1], [0, 0, 1, 1], [], []>} : vector<256x384xbf16>, vector<384x128xbf16>, vector<256x128xf32> -> vector<256x128xf32>
    %73 = arith.addf %67, %72 : vector<256x128xf32>
    %c1_69 = arith.constant 1 : index
    %c0_70 = arith.constant 0 : index
    %c0_71 = arith.constant 0 : index
    %74 = vector.load %arg10[%c1_69, %c0_70, %c0_71] : memref<18x16x384xbf16, #tpu.memory_space<vmem>>, vector<16x16x384xbf16>
    %75 = vector.shape_cast %74 : vector<16x16x384xbf16> to vector<256x384xbf16>
    %c1_72 = arith.constant 1 : index
    %c0_73 = arith.constant 0 : index
    %c0_74 = arith.constant 0 : index
    %76 = vector.load %arg5[%c1_72, %c0_73, %c0_74] : memref<3x384x128xbf16, #tpu.memory_space<vmem>>, vector<1x384x128xbf16>
    %77 = vector.shape_cast %76 : vector<1x384x128xbf16> to vector<384x128xbf16>
    %cst_75 = arith.constant dense<0.000000e+00> : vector<256x128xf32>
    %78 = tpu.matmul %75, %77, %cst_75 {dimension_numbers = #tpu.dot_dimension_numbers<[1], [0], [0], [1], [0, 0, 1, 1], [], []>} : vector<256x384xbf16>, vector<384x128xbf16>, vector<256x128xf32> -> vector<256x128xf32>
    %79 = arith.addf %73, %78 : vector<256x128xf32>
    %c2_76 = arith.constant 2 : index
    %c0_77 = arith.constant 0 : index
    %c0_78 = arith.constant 0 : index
    %80 = vector.load %arg10[%c2_76, %c0_77, %c0_78] : memref<18x16x384xbf16, #tpu.memory_space<vmem>>, vector<16x16x384xbf16>
    %81 = vector.shape_cast %80 : vector<16x16x384xbf16> to vector<256x384xbf16>
    %c2_79 = arith.constant 2 : index
    %c0_80 = arith.constant 0 : index
    %c0_81 = arith.constant 0 : index
    %82 = vector.load %arg5[%c2_79, %c0_80, %c0_81] : memref<3x384x128xbf16, #tpu.memory_space<vmem>>, vector<1x384x128xbf16>
    %83 = vector.shape_cast %82 : vector<1x384x128xbf16> to vector<384x128xbf16>
    %cst_82 = arith.constant dense<0.000000e+00> : vector<256x128xf32>
    %84 = tpu.matmul %81, %83, %cst_82 {dimension_numbers = #tpu.dot_dimension_numbers<[1], [0], [0], [1], [0, 0, 1, 1], [], []>} : vector<256x384xbf16>, vector<384x128xbf16>, vector<256x128xf32> -> vector<256x128xf32>
    %85 = arith.addf %79, %84 : vector<256x128xf32>
    %c0_83 = arith.constant 0 : index
    %c0_84 = arith.constant 0 : index
    %86 = vector.load %arg6[%c0_83, %c0_84] : memref<1x128xf32, #tpu.memory_space<vmem>>, vector<1x128xf32>
    %87 = vector.broadcast %86 : vector<1x128xf32> to vector<256x128xf32>
    %88 = arith.addf %85, %87 : vector<256x128xf32>
    %cst_85 = arith.constant 0.000000e+00 : f32
    %89 = vector.broadcast %cst_85 : f32 to vector<256x128xf32>
    %90 = arith.subf %89, %88 : vector<256x128xf32>
    %91 = math.exp %90 : vector<256x128xf32>
    %cst_86 = arith.constant 1.000000e+00 : f32
    %92 = vector.broadcast %cst_86 : f32 to vector<256x128xf32>
    %93 = arith.addf %92, %91 : vector<256x128xf32>
    %94 = tpu.reciprocal %93 {approx = true} : vector<256x128xf32> -> vector<256x128xf32>
    %95 = arith.mulf %88, %94 : vector<256x128xf32>
    %96 = vector.shape_cast %95 : vector<256x128xf32> to vector<16x16x128xf32>
    %c2_87 = arith.constant 2 : index
    %c0_88 = arith.constant 0 : index
    %c0_89 = arith.constant 0 : index
    %97 = vector.load %arg8[%c2_87, %c0_88, %c0_89] : memref<20x16x128xbf16, #tpu.memory_space<vmem>>, vector<16x16x128xbf16>
    %98 = arith.extf %97 : vector<16x16x128xbf16> to vector<16x16x128xf32>
    %99 = arith.addf %96, %98 : vector<16x16x128xf32>
    %c0_90 = arith.constant 0 : index
    %c0_91 = arith.constant 0 : index
    %c0_92 = arith.constant 0 : index
    %c0_93 = arith.constant 0 : index
    %100 = vector.load %arg7[%c0_90, %c0_91, %c0_92, %c0_93] : memref<1x16x16x128xf32, #tpu.memory_space<vmem>>, vector<1x16x16x128xf32>
    %101 = vector.shape_cast %100 : vector<1x16x16x128xf32> to vector<16x16x128xf32>
    %102 = vector.shape_cast %99 : vector<16x16x128xf32> to vector<1x16x16x128xf32>
    tpu.vector_store %arg7[%c0_90, %c0_91, %c0_92, %c0_93], %102 {strides = array<i32>} : memref<1x16x16x128xf32, #tpu.memory_space<vmem>>, vector<1x16x16x128xf32>,
    return
  }
  func.func @transform_1(%arg0: i32, %arg1: i32) -> (i32, i32, i32) {
    %c0_i32 = arith.constant 0 : i32
    %c0_i32_0 = arith.constant 0 : i32
    %c0_i32_1 = arith.constant 0 : i32
    %c0_i32_2 = arith.constant 0 : i32
    return %c0_i32, %c0_i32_0, %c0_i32_1 : i32, i32, i32
  }
  func.func @transform_2(%arg0: i32, %arg1: i32) -> (i32, i32) {
    %c0_i32 = arith.constant 0 : i32
    %c0_i32_0 = arith.constant 0 : i32
    %c0_i32_1 = arith.constant 0 : i32
    return %c0_i32, %c0_i32_0 : i32, i32
  }
  func.func @transform_3(%arg0: i32, %arg1: i32) -> (i32, i32, i32) {
    %c0_i32 = arith.constant 0 : i32
    %c0_i32_0 = arith.constant 0 : i32
    %c0_i32_1 = arith.constant 0 : i32
    %c0_i32_2 = arith.constant 0 : i32
    return %c0_i32, %c0_i32_0, %c0_i32_1 : i32, i32, i32
  }
  func.func @transform_4(%arg0: i32, %arg1: i32) -> (i32, i32) {
    %c0_i32 = arith.constant 0 : i32
    %c0_i32_0 = arith.constant 0 : i32
    %c0_i32_1 = arith.constant 0 : i32
    return %c0_i32, %c0_i32_0 : i32, i32
  }
  func.func @transform_5(%arg0: i32, %arg1: i32) -> (i32, i32, i32, i32) {
    %c0_i32 = arith.constant 0 : i32
    %c0_i32_0 = arith.constant 0 : i32
    %c0_i32_1 = arith.constant 0 : i32
    return %arg0, %arg1, %c0_i32, %c0_i32_0 : i32, i32, i32, i32
  }
}

</mosaic_0001>

<bundles_post_ra>
// kernel: tpu_custom_call.1
= control target key start
LH: loop header
LB: loop body
LE: loop exit
PB: predicated region body
PF: predicated region fallthrough
CT: control target
= control target key end

     0   :  { %s13084_s0 = inlined_call_operand.hbm [shape: bf16[2,20,16,128], index: 0, kind: input, shape index: {}]   ;;  %s13085_s1 = inlined_call_operand.hbm [shape: bf16[3,384,128], index: 1, kind: input, shape index: {}]   ;;  %s13086_s2 = inlined_call_operand.vmem [shape: f32[1,128], index: 2, kind: input, shape index: {}]   ;;  %s13087_s3 = inlined_call_operand.hbm [shape: bf16[3,384,128], index: 3, kind: input, shape index: {}]   ;;  %s13088_s4 = inlined_call_operand.vmem [shape: f32[1,128], index: 4, kind: input, shape index: {}]   ;;  %s13089_s5 = inlined_call_operand.hbm [shape: f32[2,16,16,128], index: 5, kind: output, shape index: {}]  }
   0x1   :  { %13141 = sst [smem:[#allocation57_spill]] %s13085_s1 }
   0x2   :  { %10 = vsyncpa [#allocation7], 0 }
   0x3   :  { %11 = vsyncpa [#allocation10], 0 }
   0x4   :  { %12 = vsyncpa [#allocation8], 0 }
   0x5   :  { %14 = vsyncpa [#allocation8 + $0x1], 0  ;;  %s10803_s18 = smov 0   ;;  %s10805_s19 = smov 0  }
   0x6   :  { %s10807_s20 = smov 0   ;;  %s10809_s21 = smov 0  }
   0x7   :  { %s10811_s22 = smov 0   ;;  %s10813_s23 = smov 0  }
   0x8 LB: > { %s7883_s24 = sadd.s32 4294967295, %s10762_s23   ;;  %s7884_s25 = sadd.s32 4294967294, %s10762_s23   ;;  %s10762_s23 = sphi %s10813_s23, %s20_s23   ;;  %s10758_s22 = sphi %s10811_s22, %s13343_s22   ;;  %s10754_s21 = sphi %s10809_s21, %s13342_s21   ;;  %s10750_s20 = sphi %s10807_s20, %s13341_s20   ;;  %s10746_s19 = sphi %s10805_s19, %s13340_s19   ;;  %s10742_s18 = sphi %s10803_s18, %s13339_s18  }
   0x9   : > { %s32_s26 = sadd.s32 1, %s10758_s22  ;;  %s125_s27 = sadd.s32 1, %s10750_s20 }
   0xa   : > { %p34_p0 = scmp.ge.s32.totalorder %s32_s26, 2  ;;  %p135_p1 = scmp.ne.s32.totalorder %s10750_s20, %s10746_s19 }
   0xb   : > { %p136_p2 = scmp.eq.s32.totalorder %s7883_s24, 1  ;;  %p141_p3 = scmp.ne.s32.totalorder %s10746_s19, %s10742_s18 }
   0xc   : > { %s13345_s26 = smov (%p34_p0, %s32_s26), 0  ;;  %p142_p5 = scmp.eq.s32.totalorder %s7884_s25, 1 }
   0xd   : > { %p10843_p4 = por %p136_p2, %p135_p1  ;;  %s120_s29 = ssub.s32 %s10758_s22, %s13345_s26 }
   0xe   : > { %p7885_p6 = scmp.ge.s32.totalorder %s10762_s23, 1  ;;  %p123_p7 = scmp.eq.s32.totalorder %s120_s29, 0 }
   0xf   : > { %p10850_p8 = por %p142_p5, %p141_p3  ;;  %p149_p9 = scmp.lt.s32.totalorder %s10762_s23, 3 }
  0x10   : > { %s10856_s6 = scalar_select %p123_p7, %s10750_s20, %s125_s27  }
  0x11   : > { %p10858_p10 = pnand %p7885_p6, %p149_p9  ;;  %p10862_p11 = scmp.eq.s32.totalorder %s7883_s24, 0 }
  0x12   : > { %s13146_s1 = sld [smem:[#allocation57_spill]]  ;;  %s10764_s12 = smov [#allocation6]  }
  0x13   : > { %p10256_p12 = pneg %p10858_p10  ;;  %s162_s13 = sshll.u32 %s10764_s12, 4  ;;  %s163_s13 = int_to_ptr.vmem [resolvable:$true] %s162_s13 }
  0x14   : > { %s177_s16 = sshll.u32 %s13087_s3, 4  ;;  %s10765_s17 = smov 64   ;;  %s178_s16 = int_to_ptr.hbm [resolvable:$true] %s177_s16 }
  0x15   : > { %p10257_p13 = pnand %p10862_p11, %p10256_p12  ;;  %s10766_s24 = smov 4  }
  0x16   : > { %s10767_s25 = smov [#allocation9]   ;;  %198 = sbr.rel (%p10858_p10) target bundleno = 1903 (0x76f), region = 36 }
  0x17   : > { %s179_s27 = sshll.u32 %s10767_s25, 4  ;;  %s180_s27 = int_to_ptr.vmem [resolvable:$true] %s179_s27 }
  0x18   : > { %s160_s11 = sshll.u32 %s13146_s1, 4  ;;  %s161_s11 = int_to_ptr.hbm [resolvable:$true] %s160_s11 }
  0x19   : > { %10259 = dma.hbm_to_vmem [thread:$0]  (!%p10257_p13), %s161_s11, 9216, %s163_s13, [#allocation7], %s10765_s17, %s10765_s17, %s10766_s24  }
  0x1a   : > { %10262 = dma.hbm_to_vmem [thread:$0]  (!%p10257_p13), %s178_s16, 9216, %s180_s27, [#allocation10], %s10765_s17, %s10765_s17, %s10766_s24  }
  0x1b   : > { %10727 = dma.done.wait (%p10862_p11), [#allocation7], 9216  }
  0x1c   : > { %10729 = vsyncadd (%p10862_p11), [#allocation7], 4294958080 }
  0x1d   : > { %10731 = dma.done.wait (%p10862_p11), [#allocation10], 9216  }
  0x1e   : > { %10733 = vsyncadd (%p10862_p11), [#allocation10], 4294958080  ;;  %s222_s29 = sand.u32 1, %s10746_s19   ;;  %s9699_s9 = smul.u32 160, %s10754_s21 }
  0x1f   : > { %s7891_s7 = sshll.u32 %s222_s29, 8  ;;  %s10768_s14 = smov [#allocation2]  }
  0x20   : > { %s232_s12 = scalar_lea.hbm %s13084_s0, %s9699_s9  ;;  %s242_s15 = sshll.u32 %s10768_s14, 4  ;;  %s243_s15 = int_to_ptr.vmem [resolvable:$true] %s242_s15 }
  0x21   : > { %s240_s13 = sshll.u32 %s232_s12, 4  ;;  %s10654_s25 = scalar_lea.hbm %s13084_s0, 320  ;;  %s241_s13 = int_to_ptr.hbm [resolvable:$true] %s240_s13 }
  0x22   : > { %s10650_s16 = sshra.s32 %s241_s13, 4  ;;  %s10651_s16 = int_to_ptr.hbm [resolvable:$true] %s10650_s16 }
  0x23   : > { %s10652_s8 = scalar_lea.hbm %s10651_s16, 160  ;;  %p10655_p1 = scmp.lt.s32.totalorder %s10651_s16, %s13084_s0 }
  0x24   : > { %p10653_p0 = scmp.ne.s32.totalorder %s10651_s16, %s10652_s8  ;;  %p10656_p2 = scmp.lt.s32.totalorder %s10654_s25, %s10652_s8 }
  0x26   : > { %p10657_p3 = por %p10656_p2, %p10655_p1 }
  0x28   : > { %p10658_p5 = pnand %p10657_p3, %p10653_p0 }
  0x2a   : > { %10661 = shalt.err (!%p10658_p5)  }
  0x2b   : > { %245 = dma.hbm_to_vmem [thread:$0]  %s241_s13, 2560, %s243_s15, [#allocation5] }
  0x2c   : > { %s10899_s9 = scalar_lea.vmem [#allocation11], %s7891_s7 }
  0x2d   : > { %10734 = dma.done.wait [#allocation5], 2560 }
  0x2e   : > { %10735 = vsyncadd [#allocation5], 4294964736  ;;  %v9839_v0 = vld [vmem:[#allocation6 + $0xf8] sm:$0xff]  ;;  %v9838_v2 = vld [vmem:[#allocation6 + $0xf0] sm:$0xff]  ;;  %vm331_vm0 = vsmask.f32 256 }
  0x2f   : > { %v9847_v1 = vld [vmem:[#allocation6 + $0x138] sm:$0xff]  ;;  %1880 = vmatpush.bf16.msra.mxu0 %v9839_v0  ;;  %v9846_v3 = vld [vmem:[#allocation6 + $0x130] sm:$0xff]  ;;  %vm332_vm1 = vsmask.f32 4368  ;;  %vm694_vm2 = vcmask 1043456   ;;  %v9837_v6 = vld [vmem:[#allocation6 + $0xe8] sm:$0xff] }
  0x30   : > { %1979 = vmatpush.bf16.msra.mxu1 %v9847_v1  ;;  %10230 = vmatpush.bf16.msra.mxu3 %v9847_v1  ;;  %v10901_v4 = vld [vmem:[#allocation2 + $0x8] sm:$0xf]  ;;  %v254_v5 = vld [vmem:[#allocation2 + $0xc] sm:$0xf]  ;;  %vm695_vm3 = vsmask.f32 7938  ;;  %vm10912_vm4 = vmor %vm331_vm0, %vm332_vm1 }
  0x31   : > { %v9845_v7 = vld [vmem:[#allocation6 + $0x128] sm:$0xff]  ;;  %v13118_v8 = vshrl.u32 %v10901_v4, 16  ;;  %v13117_v9 = vshll.u32 %v10901_v4, 16  ;;  %v359_v10 = vshrl.u32 %v254_v5, 16  ;;  %v362_v11 = vshll.u32 %v254_v5, 16  ;;  %vm10920_vm5 = vmand %vm694_vm2, %vm695_vm3  ;;  %v9836_v21 = vld [vmem:[#allocation6 + $0xe0] sm:$0xff] }
  0x32   : > { %293 = vst [vmem:[#allocation3 + $0x1c] sm:$0xf] %v10901_v4  ;;  %v10906_v12 = vld [vmem:[#allocation2 + $0x60] sm:$0xf]  ;;  %v10908_v13 = vld [vmem:[#allocation2 + $0x64] sm:$0xf] }
  0x33   : > { %1881 = vmatpush.bf16.msra.mxu0 %v9838_v2  ;;  %v13147_v14 = vmov 0  ;;  %v353_v15 = vrot.slane %v13118_v8, 7  ;;  %v361_v16 = vrot.slane %v359_v10, 7  ;;  %294 = vst [vmem:[#allocation3 + $0x28] sm:$0xf] %v254_v5  ;;  %v13150_v17 = vmov 0 }
  0x34   : > { %1980 = vmatpush.bf16.msra.mxu1 %v9846_v3  ;;  %10231 = vmatpush.bf16.msra.mxu3 %v9846_v3  ;;  %v13148_v14 = vsel %vm10912_vm4, 4294967295, %v13147_v14  ;;  %v13151_v17 = vsel %vm10920_vm5, 4294967295, %v13150_v17  ;;  %v701_v18 = vld [vmem:[#allocation3 + $0x18] sm:$0xf]  ;;  %v10924_v19 = vrot.slane %v362_v11, 5  ;;  %v10926_v20 = vrot.slane %v359_v10, 4 }
  0x35   : > { %13149 = vst [vmem:[#allocation20_spill] sm:$0xff] %v13148_v14  ;;  %v9844_v22 = vld [vmem:[#allocation6 + $0x120] sm:$0xff]  ;;  %v356_v23 = vor.u32 %v13117_v9, %v353_v15  ;;  %v357_v24 = vrot.slane %v353_v15, 4  ;;  %v364_v25 = vor.u32 %v362_v11, %v361_v16  ;;  %v10932_v26 = vld [vmem:[#allocation6 + $0x178] sm:$0xff]  ;;  %vm777_vm6 = vcmask 1040384   ;;  %v9834_v45 = vld [vmem:[#allocation6 + $0xd0] sm:$0xff] }
  0x36   : > { %13152 = vst [vmem:[#allocation21_spill] sm:$0xff] %v13151_v17  ;;  %v10936_v28 = vld [vmem:[#allocation2 + $0x10] sm:$0xf]  ;;  %v10942_v31 = vld [vmem:[#allocation2 + $0x14] sm:$0xf]  ;;  %10238 = vmatpush.bf16.msra.mxu2 %v10932_v26  ;;  %v9835_v33 = vld [vmem:[#allocation6 + $0xd8] sm:$0xff] }
  0x37   : > { %315 = vst [vmem:[#allocation3 + $0x124] sm:$0xf] %v10906_v12  ;;  %1882 = vmatpush.bf16.msra.mxu0 %v9837_v6  ;;  %v365_v29 = vsel %vm10912_vm4, %v357_v24, %v364_v25  ;;  %v702_v30 = vsel %vm10920_vm5, %v356_v23, %v701_v18  ;;  %v13111_v32 = vshrl.u32 %v10936_v28, 16  ;;  %v9843_v34 = vld [vmem:[#allocation6 + $0x118] sm:$0xff]  ;;  %v13110_v35 = vshll.u32 %v10936_v28, 16  ;;  %vm10957_vm7 = vmand %vm777_vm6, %vm331_vm0  ;;  %v9842_v46 = vld [vmem:[#allocation6 + $0x110] sm:$0xff] }
  0x38   : > { %1981 = vmatpush.bf16.msra.mxu1 %v9845_v7  ;;  %316 = vst [vmem:[#allocation3 + $0x130] sm:$0xf] %v10908_v13  ;;  %10232 = vmatpush.bf16.msra.mxu3 %v9845_v7  ;;  %v13113_v36 = vshrl.u32 %v10942_v31, 16  ;;  %v13112_v38 = vshll.u32 %v10942_v31, 16  ;;  %v705_v40 = vld [vmem:[#allocation3 + $0x30] sm:$0xf] }
  0x39   : > { %703 = vst [vmem:[#allocation3 + $0x18] sm:$0xf] %v702_v30  ;;  %v369_v37 = vrot.slane %v13111_v32, 7  ;;  %v13153_v41 = vmov 0  ;;  %v10963_v44 = vld [vmem:[#allocation2 + $0x68] sm:$0xf] }
  0x3a   : > { %704 = vst [vmem:[#allocation3 + $0x24] sm:$0xf] %v365_v29  ;;  %v377_v39 = vrot.slane %v13113_v36, 7  ;;  %v13154_v41 = vsel %vm10957_vm7, 4294967295, %v13153_v41  ;;  %v10967_v48 = vld [vmem:[#allocation2 + $0x6c] sm:$0xf] }
  0x3b   : > { %1883 = vmatpush.bf16.msra.mxu0 %v9836_v21  ;;  %295 = vst [vmem:[#allocation3 + $0x34] sm:$0xf] %v10936_v28  ;;  %v372_v42 = vor.u32 %v13110_v35, %v369_v37  ;;  %v373_v43 = vrot.slane %v369_v37, 4  ;;  %v10975_v52 = vld [vmem:[#allocation2 + $0x18] sm:$0xf]  ;;  %v9832_v0 = vld [vmem:[#allocation6 + $0xc0] sm:$0xff] }
  0x3c   : > { %1982 = vmatpush.bf16.msra.mxu1 %v9844_v22  ;;  %10233 = vmatpush.bf16.msra.mxu3 %v9844_v22  ;;  %296 = vst [vmem:[#allocation3 + $0x40] sm:$0xf] %v10942_v31  ;;  %v380_v47 = vor.u32 %v13112_v38, %v377_v39  ;;  %v9833_v54 = vld [vmem:[#allocation6 + $0xc8] sm:$0xff]  ;;  %v13107_v57 = vshrl.u32 %v10975_v52, 16  ;;  %v13106_v58 = vshll.u32 %v10975_v52, 16  ;;  %v9840_v3 = vld [vmem:[#allocation6 + $0x100] sm:$0xff] }
  0x3d   : > { %13155 = vst [vmem:[#allocation22_spill] sm:$0xff] %v13154_v41  ;;  %v706_v49 = vsel %vm10920_vm5, %v372_v42, %v705_v40  ;;  %v9841_v55 = vld [vmem:[#allocation6 + $0x108] sm:$0xff]  ;;  %v7897_v60 = vld [vmem:[#allocation3 + $0x24] sm:$0xf0]  ;;  %v10991_v7 = vld [vmem:[#allocation2 + $0x70] sm:$0xf] }
  0x3e   : > { %317 = vst [vmem:[#allocation3 + $0x13c] sm:$0xf] %v10963_v44  ;;  %v381_v51 = vsel %vm10912_vm4, %v373_v43, %v380_v47  ;;  %v10979_v56 = vld [vmem:[#allocation2 + $0x1c] sm:$0xf]  ;;  %v9811_v61 = vld [vmem:[#allocation3 + $0x124] sm:$0xf] }
  0x3f   : > { %1884 = vmatpush.bf16.msra.mxu0 %v9835_v33  ;;  %318 = vst [vmem:[#allocation3 + $0x148] sm:$0xf] %v10967_v48  ;;  %v9778_v59 = vld [vmem:[#allocation3 + $0x1c] sm:$0xf]  ;;  %v13109_v62 = vshrl.u32 %v10979_v56, 16  ;;  %v13108_v63 = vshll.u32 %v10979_v56, 16 }
  0x40   : > { %1983 = vmatpush.bf16.msra.mxu1 %v9843_v34  ;;  %10234 = vmatpush.bf16.msra.mxu3 %v9843_v34  ;;  %v782_v50 = vld [vmem:[#allocation3 + $0x18] sm:$0x1]  ;;  %707 = vst [vmem:[#allocation3 + $0x30] sm:$0xf] %v706_v49  ;;  %v8029_v1 = vld [vmem:[#allocation3 + $0x12c] sm:$0xf0]  ;;  %v7900_v24 = vor.u32 %v9778_v59, %v7897_v60 }
  0x41   : > { %v783_v53 = vsel %vm10957_vm7, 0, %v782_v50  ;;  %708 = vst [vmem:[#allocation3 + $0x3c] sm:$0xf] %v381_v51  ;;  %v385_v2 = vrot.slane %v13107_v57, 7  ;;  %v393_v5 = vrot.slane %v13109_v62, 7  ;;  %v8032_v25 = vor.u32 %v9811_v61, %v8029_v1  ;;  %v9854_v42 = vld [vmem:[#allocation6 + $0x170] sm:$0xff] }
  0x42   : > { %784 = vst [vmem:[#allocation3 + $0x18] sm:$0x1] %v783_v53  ;;  %v709_v6 = vld [vmem:[#allocation3 + $0x48] sm:$0xf]  ;;  %v9779_v10 = vld [vmem:[#allocation3 + $0x20] sm:$0xf0]  ;;  %10239 = vmatpush.bf16.msra.mxu2 %v9854_v42 }
  0x43   : > { %1885 = vmatpush.bf16.msra.mxu0 %v9834_v45  ;;  %297 = vst [vmem:[#allocation3 + $0x4c] sm:$0xf] %v10975_v52  ;;  %v388_v15 = vor.u32 %v13106_v58, %v385_v2  ;;  %v389_v16 = vrot.slane %v385_v2, 4  ;;  %v396_v21 = vor.u32 %v13108_v63, %v393_v5  ;;  %v10999_v22 = vld [vmem:[#allocation2 + $0x74] sm:$0xf]  ;;  %vm1143_vm12 = vcmask 1043459  }
  0x44   : > { %1984 = vmatpush.bf16.msra.mxu1 %v9842_v46  ;;  %10235 = vmatpush.bf16.msra.mxu3 %v9842_v46  ;;  %298 = vst [vmem:[#allocation3 + $0x58] sm:$0xf] %v10979_v56  ;;  %v11004_v30 = vld [vmem:[#allocation2 + $0x20] sm:$0xf]  ;;  %v11011_v39 = vld [vmem:[#allocation2 + $0x24] sm:$0xf] }
  0x45   : > { %319 = vst [vmem:[#allocation3 + $0x154] sm:$0xf] %v10991_v7  ;;  %v710_v29 = vsel %vm10920_vm5, %v388_v15, %v709_v6  ;;  %v397_v34 = vsel %vm10912_vm4, %v389_v16, %v396_v21  ;;  %v13103_v37 = vshrl.u32 %v11004_v30, 16  ;;  %v13102_v40 = vshll.u32 %v11004_v30, 16  ;;  %v713_v46 = vld [vmem:[#allocation3 + $0x60] sm:$0xf] }
  0x46   : > { %711 = vst [vmem:[#allocation3 + $0x48] sm:$0xf] %v710_v29  ;;  %v13105_v45 = vshrl.u32 %v11011_v39, 16  ;;  %v11030_v59 = vld [vmem:[#allocation2 + $0x78] sm:$0xf]  ;;  %s10150_s17 = sshll.u32 %s10754_s21, 8 }
  0x47   : > { %1886 = vmatpush.bf16.msra.mxu0 %v9833_v54  ;;  %v785_v11 = vld [vmem:[#allocation3 + $0x30] sm:$0x1]  ;;  %712 = vst [vmem:[#allocation3 + $0x54] sm:$0xf] %v397_v34  ;;  %v401_v43 = vrot.slane %v13103_v37, 7  ;;  %s7785_s27 = scalar_lea.hbm %s13089_s5, %s10150_s17  ;;  %s7786_s1 = sshll.u32 %s10899_s9, 4  ;;  %s7787_s1 = int_to_ptr.vmem [resolvable:$true] %s7786_s1 }
  0x48   : > { %1985 = vmatpush.bf16.msra.mxu1 %v9841_v55  ;;  %10236 = vmatpush.bf16.msra.mxu3 %v9841_v55  ;;  %v786_v18 = vsel %vm10957_vm7, 0, %v785_v11  ;;  %320 = vst [vmem:[#allocation3 + $0x160] sm:$0xf] %v10999_v22  ;;  %v409_v50 = vrot.slane %v13105_v45, 7  ;;  %v9781_v60 = vld [vmem:[#allocation3 + $0x34] sm:$0xf] }
  0x49   : > { %v7895_v23 = vld [vmem:[#allocation3 + $0x18] sm:$0xf]  ;;  %787 = vst [vmem:[#allocation3 + $0x30] sm:$0x1] %v786_v18  ;;  %v404_v47 = vor.u32 %v13102_v40, %v401_v43  ;;  %v405_v49 = vrot.slane %v401_v43, 4  ;;  %s7788_s7 = sshll.u32 %s7785_s27, 4  ;;  %s7789_s7 = int_to_ptr.hbm [resolvable:$true] %s7788_s7 }
  0x4a   : > { %v7896_v33 = vor.u32 %v9779_v10, %v7895_v23  ;;  %299 = vst [vmem:[#allocation3 + $0x64] sm:$0xf] %v11004_v30  ;;  %v7909_v61 = vld [vmem:[#allocation3 + $0x3c] sm:$0xf0]  ;;  %v11034_v1 = vld [vmem:[#allocation2 + $0x7c] sm:$0xf] }
  0x4b   : > { %1887 = vmatpush.bf16.msra.mxu0 %v9832_v0  ;;  %300 = vst [vmem:[#allocation3 + $0x70] sm:$0xf] %v11011_v39  ;;  %v714_v55 = vsel %vm10920_vm5, %v404_v47, %v713_v46  ;;  %v11036_v2 = vld [vmem:[#allocation2 + $0x28] sm:$0xf]  ;;  %v9814_v5 = vld [vmem:[#allocation3 + $0x13c] sm:$0xf]  ;;  %v7912_v21 = vor.u32 %v9781_v60, %v7909_v61 }
  0x4c   : > { %1986 = vmatpush.bf16.msra.mxu1 %v9840_v3  ;;  %10237 = vmatpush.bf16.msra.mxu3 %v9840_v3  ;;  %715 = vst [vmem:[#allocation3 + $0x60] sm:$0xf] %v714_v55  ;;  %v9782_v3 = vld [vmem:[#allocation3 + $0x38] sm:$0xf0]  ;;  %v13096_v6 = vshrl.u32 %v11036_v2, 16  ;;  %v13094_v11 = vshll.u32 %v11036_v2, 16 }
  0x4d   : > { %v788_v51 = vld [vmem:[#allocation3 + $0x48] sm:$0x1]  ;;  %321 = vst [vmem:[#allocation3 + $0x16c] sm:$0xf] %v11030_v59  ;;  %v11049_v34 = vld [vmem:[#allocation2 + $0x2c] sm:$0xf] }
  0x4e   : > { %1888 = vmatmul.bf16.vlgmr.msra.gmra.mxu0 %v7896_v33  ;;  %v789_v53 = vsel %vm10957_vm7, 0, %v788_v51  ;;  %v8041_v15 = vld [vmem:[#allocation3 + $0x144] sm:$0xf0]  ;;  %322 = vst [vmem:[#allocation3 + $0x178] sm:$0xf] %v11034_v1  ;;  %v417_v16 = vrot.slane %v13096_v6, 7 }
  0x4f   : > { %2078 = vmatpush.bf16.msrb.mxu0 %v10932_v26  ;;  %1987 = vmatmul.bf16.vlgmr.msra.gmra.mxu1 %v7900_v24  ;;  %v13104_v26 = vshll.u32 %v11011_v39, 16  ;;  %790 = vst [vmem:[#allocation3 + $0x48] sm:$0x1] %v789_v53  ;;  %v717_v24 = vld [vmem:[#allocation3 + $0x78] sm:$0xf]  ;;  %v13101_v43 = vshrl.u32 %v11049_v34, 16 }
  0x50   : > { %2042 = vmatmul.bf16.vlgmr.msra.gmra.mxu3 %v8032_v25  ;;  %v7907_v10 = vld [vmem:[#allocation3 + $0x30] sm:$0xf]  ;;  %301 = vst [vmem:[#allocation3 + $0x7c] sm:$0xf] %v11036_v2  ;;  %v420_v23 = vor.u32 %v13094_v11, %v417_v16  ;;  %v8044_v25 = vor.u32 %v9814_v5, %v8041_v15  ;;  %v421_v46 = vrot.slane %v417_v16, 4  ;;  %v9761_v11 = vld [vmem:[#allocation6 + $0x38] sm:$0xff] }
  0x51   : > { %v412_v54 = vor.u32 %v13104_v26, %v409_v50  ;;  %v7908_v18 = vor.u32 %v9782_v3, %v7907_v10  ;;  %v425_v47 = vrot.slane %v13101_v43, 7  ;;  %302 = vst [vmem:[#allocation3 + $0x88] sm:$0xf] %v11049_v34  ;;  %v11060_v51 = vld [vmem:[#allocation2 + $0x80] sm:$0xf]  ;;  %v9852_v6 = vld [vmem:[#allocation6 + $0x160] sm:$0xff]  ;;  %2609 = vmatpush.bf16.msrb.mxu3 %v9761_v11 }
  0x52   : > { %v11062_v53 = vld [vmem:[#allocation2 + $0x84] sm:$0xf]  ;;  %v9784_v55 = vld [vmem:[#allocation3 + $0x4c] sm:$0xf]  ;;  %v7921_v60 = vld [vmem:[#allocation3 + $0x54] sm:$0xf0] }
  0x53   : > { %2079 = vmatpush.bf16.msrb.mxu0 %v9854_v42  ;;  %v413_v0 = vsel %vm10912_vm4, %v405_v49, %v412_v54  ;;  %v791_v29 = vld [vmem:[#allocation3 + $0x60] sm:$0x1]  ;;  %v718_v42 = vsel %vm10920_vm5, %v420_v23, %v717_v24  ;;  %v13100_v49 = vshll.u32 %v11049_v34, 16  ;;  %v11064_v54 = vld [vmem:[#allocation2 + $0x30] sm:$0xf]  ;;  %s7771_s10 = scalar_lea.sflag [#allocation8], %s222_s29 }
  0x54   : > { %716 = vst [vmem:[#allocation3 + $0x6c] sm:$0xf] %v413_v0  ;;  %v792_v33 = vsel %vm10957_vm7, 0, %v791_v29  ;;  %v13091_v0 = vshrl.u32 %v11064_v54, 16  ;;  %v9785_v5 = vld [vmem:[#allocation3 + $0x50] sm:$0xf0]  ;;  %v7924_v29 = vor.u32 %v9784_v55, %v7921_v60 }
  0x55   : > { %793 = vst [vmem:[#allocation3 + $0x60] sm:$0x1] %v792_v33  ;;  %v428_v50 = vor.u32 %v13100_v49, %v425_v47  ;;  %v9817_v10 = vld [vmem:[#allocation3 + $0x154] sm:$0xf]  ;;  %v721_v33 = vld [vmem:[#allocation3 + $0x90] sm:$0xf] }
  0x56   : > { %719 = vst [vmem:[#allocation3 + $0x78] sm:$0xf] %v718_v42  ;;  %v7919_v3 = vld [vmem:[#allocation3 + $0x48] sm:$0xf]  ;;  %v433_v16 = vrot.slane %v13091_v0, 7  ;;  %s10688_s21 = sshra.s32 %s7789_s7, 4  ;;  %s10689_s21 = int_to_ptr.hbm [resolvable:$true] %s10688_s21 }
  0x57   : > { %v429_v61 = vsel %vm10912_vm4, %v421_v46, %v428_v50  ;;  %323 = vst [vmem:[#allocation3 + $0x184] sm:$0xf] %v11060_v51  ;;  %v11081_v47 = vld [vmem:[#allocation2 + $0x34] sm:$0xf]  ;;  %v9853_v50 = vld [vmem:[#allocation6 + $0x168] sm:$0xff]  ;;  %s10690_s11 = scalar_lea.hbm %s10689_s21, 256  ;;  %p10695_p10 = scmp.lt.s32.totalorder %s10689_s21, %s13089_s5 }
  0x58   : > { %720 = vst [vmem:[#allocation3 + $0x84] sm:$0xf] %v429_v61  ;;  %v13093_v61 = vshrl.u32 %v11081_v47, 16  ;;  %2080 = vmatpush.bf16.msrb.mxu0 %v9853_v50  ;;  %v437_v55 = vrot.slane %v433_v16, 4  ;;  %10240 = vmatpush.bf16.msra.mxu2 %v9853_v50  ;;  %vm839_vm8 = vsmask.f32 3328  ;;  %p10691_p6 = scmp.ne.s32.totalorder %s10689_s21, %s10690_s11 }
  0x59   : > { %324 = vst [vmem:[#allocation3 + $0x190] sm:$0xf] %v11062_v53  ;;  %v11144_v58 = vld [vmem:[#allocation2] sm:$0xf]  ;;  %vm11148_vm9 = vmand %vm694_vm2, %vm839_vm8  ;;  %vm840_vm10 = vsmask.f32 7440 }
  0x5a   : > { %303 = vst [vmem:[#allocation3 + $0x94] sm:$0xf] %v11064_v54  ;;  %v441_v60 = vrot.slane %v13093_v61, 7  ;;  %v11111_v61 = vld [vmem:[#allocation2 + $0x3c] sm:$0xf]  ;;  %v13114_v63 = vshll.u32 %v11144_v58, 16  ;;  %vm11168_vm11 = vmor %vm839_vm8, %vm840_vm10  ;;  %p10692_p7 = pnand %p10691_p6, %p10843_p4 }
  0x5b   : > { %304 = vst [vmem:[#allocation3 + $0xa0] sm:$0xf] %v11081_v47  ;;  %vm1144_vm13 = vsmask.f32 7950  ;;  %v1068_v14 = vld [vmem:[#allocation3 + $0x2c] sm:$0xf] }
  0x5c   : > { %v7931_v50 = vld [vmem:[#allocation3 + $0x60] sm:$0xf]  ;;  %10241 = vmatpush.bf16.msra.mxu2 %v9852_v6  ;;  %306 = vst [vmem:[#allocation3 + $0xb8] sm:$0xf] %v11111_v61  ;;  %2081 = vmatpush.bf16.msrb.mxu0 %v9852_v6  ;;  %vm11179_vm14 = vmand %vm1143_vm12, %vm1144_vm13  ;;  %p10693_p9 = pneg %p10692_p7  ;;  %s10694_s14 = scalar_lea.hbm %s13089_s5, 512 }
  0x5d   : > { %v794_v15 = vld [vmem:[#allocation3 + $0x78] sm:$0x1]  ;;  %291 = vst [vmem:[#allocation3 + $0x4] sm:$0xf] %v11144_v58  ;;  %p10696_p11 = scmp.lt.s32.totalorder %s10694_s14, %s10690_s11 }
  0x5e   : > { %1893 = vmatmul.bf16.gmra.mxu0 %v7908_v18  ;;  %v13090_v18 = vshll.u32 %v11064_v54, 16  ;;  %v795_v23 = vsel %vm10957_vm7, 0, %v794_v15  ;;  %v13092_v15 = vshll.u32 %v11081_v47, 16  ;;  %v9823_v43 = vld [vmem:[#allocation3 + $0x184] sm:$0xf] }
  0x5f   : > { %1992 = vmatmul.bf16.gmra.mxu1 %v7912_v21  ;;  %v8053_v21 = vld [vmem:[#allocation3 + $0x15c] sm:$0xf0]  ;;  %796 = vst [vmem:[#allocation3 + $0x78] sm:$0x1] %v795_v23  ;;  %v9788_v23 = vld [vmem:[#allocation3 + $0x68] sm:$0xf0]  ;;  %p10697_p12 = por %p10696_p11, %p10695_p10 }
  0x60   : > { %2047 = vmatmul.bf16.gmra.mxu3 %v8044_v25  ;;  %v436_v24 = vor.u32 %v13090_v18, %v433_v16  ;;  %v7920_v25 = vor.u32 %v9785_v5, %v7919_v3  ;;  %v8056_v42 = vor.u32 %v9817_v10, %v8053_v21  ;;  %v444_v3 = vor.u32 %v13092_v15, %v441_v60  ;;  %v11090_v10 = vld [vmem:[#allocation2 + $0x88] sm:$0xf]  ;;  %v11092_v21 = vld [vmem:[#allocation2 + $0x8c] sm:$0xf]  ;;  %v8065_v18 = vld [vmem:[#allocation3 + $0x174] sm:$0xf0] }
  0x61   : > { %325 = vst [vmem:[#allocation3 + $0x19c] sm:$0xf] %v11090_v10  ;;  %v9791_v6 = vld [vmem:[#allocation3 + $0x80] sm:$0xf0]  ;;  %v8077_v40 = vld [vmem:[#allocation3 + $0x18c] sm:$0xf0]  ;;  %p10698_p13 = pnand %p10697_p12, %p10693_p9 }
  0x62   : > { %v722_v46 = vsel %vm10920_vm5, %v436_v24, %v721_v33  ;;  %v9787_v24 = vld [vmem:[#allocation3 + $0x64] sm:$0xf]  ;;  %v11099_v33 = vld [vmem:[#allocation2 + $0x38] sm:$0xf]  ;;  %326 = vst [vmem:[#allocation3 + $0x1a8] sm:$0xf] %v11092_v21  ;;  %v8080_v38 = vor.u32 %v9823_v43, %v8077_v40 }
  0x63   : > { %723 = vst [vmem:[#allocation3 + $0x90] sm:$0xf] %v722_v46  ;;  %v13095_v46 = vshrl.u32 %v11099_v33, 16  ;;  %v13097_v60 = vshll.u32 %v11099_v33, 16  ;;  %v697_v40 = vld [vmem:[#allocation3] sm:$0xf] }
  0x64   : > { %305 = vst [vmem:[#allocation3 + $0xac] sm:$0xf] %v11099_v33  ;;  %v9757_v43 = vld [vmem:[#allocation6 + $0x18] sm:$0xff] }
  0x6a   : > { %v797_v5 = vld [vmem:[#allocation3 + $0x90] sm:$0x1] }
  0x6b   : > { %v798_v16 = vsel %vm10957_vm7, 0, %v797_v5 }
  0x6c   : > { %799 = vst [vmem:[#allocation3 + $0x90] sm:$0x1] %v798_v16 }
  0x6e   : > { %1898 = vmatmul.bf16.gmra.mxu0 %v7920_v25  ;;  %v7933_v25 = vld [vmem:[#allocation3 + $0x6c] sm:$0xf0] }
  0x6f   : > { %1997 = vmatmul.bf16.gmra.mxu1 %v7924_v29  ;;  %v445_v29 = vsel %vm10912_vm4, %v437_v55, %v444_v3  ;;  %v449_v55 = vrot.slane %v13095_v46, 7  ;;  %v7932_v3 = vor.u32 %v9788_v23, %v7931_v50  ;;  %v7936_v5 = vor.u32 %v9787_v24, %v7933_v25  ;;  %v9760_v23 = vld [vmem:[#allocation6 + $0x30] sm:$0xff] }
  0x70   : > { %2052 = vmatmul.bf16.gmra.mxu3 %v8056_v42  ;;  %v9820_v42 = vld [vmem:[#allocation3 + $0x16c] sm:$0xf]  ;;  %724 = vst [vmem:[#allocation3 + $0x9c] sm:$0xf] %v445_v29  ;;  %v725_v29 = vld [vmem:[#allocation3 + $0xa8] sm:$0xf] }
  0x71   : > { %v452_v0 = vor.u32 %v13097_v60, %v449_v55  ;;  %v8068_v15 = vor.u32 %v9820_v42, %v8065_v18  ;;  %v13098_v46 = vshrl.u32 %v11111_v61, 16  ;;  %v453_v24 = vrot.slane %v449_v55, 4  ;;  %v11118_v42 = vld [vmem:[#allocation2 + $0x44] sm:$0xf]  ;;  %v11127_v60 = vld [vmem:[#allocation2 + $0x94] sm:$0xf]  ;;  %2610 = vmatpush.bf16.msrb.mxu3 %v9760_v23 }
  0x72   : > { %v13099_v18 = vshll.u32 %v11111_v61, 16  ;;  %v471_v11 = vshrl.u32 %v11118_v42, 16  ;;  %v474_v55 = vshll.u32 %v11118_v42, 16  ;;  %308 = vst [vmem:[#allocation3 + $0xd0] sm:$0xf] %v11118_v42 }
  0x73   : > { %v726_v16 = vsel %vm10920_vm5, %v452_v0, %v725_v29  ;;  %v457_v25 = vrot.slane %v13098_v46, 7  ;;  %v9851_v0 = vld [vmem:[#allocation6 + $0x158] sm:$0xff]  ;;  %328 = vst [vmem:[#allocation3 + $0x1c0] sm:$0xf] %v11127_v60 }
  0x74   : > { %727 = vst [vmem:[#allocation3 + $0xa8] sm:$0xf] %v726_v16  ;;  %v11125_v16 = vld [vmem:[#allocation2 + $0x90] sm:$0xf]  ;;  %v11136_v49 = vrot.slane %v474_v55, 5  ;;  %10242 = vmatpush.bf16.msra.mxu2 %v9851_v0  ;;  %v920_v23 = vrot.slane %v471_v11, 4  ;;  %2082 = vmatpush.bf16.msrb.mxu0 %v9851_v0 }
  0x75   : > { %v460_v50 = vor.u32 %v13099_v18, %v457_v25  ;;  %327 = vst [vmem:[#allocation3 + $0x1b4] sm:$0xf] %v11125_v16  ;;  %v267_v18 = vld [vmem:[#allocation2 + $0x40] sm:$0xf]  ;;  %v1096_v0 = vld [vmem:[#allocation3 + $0xd4] sm:$0xf] }
  0x76   : > { %v463_v37 = vshrl.u32 %v267_v18, 16  ;;  %v921_v26 = vor.u32 %v920_v23, %v11136_v49  ;;  %307 = vst [vmem:[#allocation3 + $0xc4] sm:$0xf] %v267_v18 }
  0x77   : > { %v461_v46 = vsel %vm10912_vm4, %v453_v24, %v460_v50  ;;  %v7943_v24 = vld [vmem:[#allocation3 + $0x78] sm:$0xf]  ;;  %v466_v50 = vshll.u32 %v267_v18, 16 }
  0x78   : > { %728 = vst [vmem:[#allocation3 + $0xb4] sm:$0xf] %v461_v46  ;;  %v11142_v45 = vrot.slane %v463_v37, 7  ;;  %v13156_v46 = vmov 0  ;;  %v7944_v62 = vor.u32 %v9791_v6, %v7943_v24  ;;  %v914_v23 = vrot.slane %v463_v37, 4 }
  0x79   : > { %v13157_v46 = vsel %vm11148_vm9, 4294967295, %v13156_v46  ;;  %v915_v35 = vrot.slane %v466_v50, 5  ;;  %v922_v32 = vrot.slane %v921_v26, 4  ;;  %v9850_v26 = vld [vmem:[#allocation6 + $0x150] sm:$0xff] }
  0x7a   : > { %13158 = vst [vmem:[#allocation23_spill] sm:$0xff] %v13157_v46  ;;  %10243 = vmatpush.bf16.msra.mxu2 %v9850_v26  ;;  %2083 = vmatpush.bf16.msrb.mxu0 %v9850_v26 }
  0x7b   : > { %v800_v29 = vld [vmem:[#allocation3 + $0xa8] sm:$0x1]  ;;  %v1097_v18 = vsel %vm11148_vm9, %v922_v32, %v1096_v0  ;;  %v916_v36 = vor.u32 %v915_v35, %v914_v23  ;;  %v13159_v32 = vmov 0  ;;  %v11172_v35 = vld [vmem:[#allocation2 + $0x4] sm:$0xf]  ;;  %v13162_v23 = vmov 0 }
  0x7c   : > { %v801_v25 = vsel %vm10957_vm7, 0, %v800_v29  ;;  %v9758_v29 = vld [vmem:[#allocation6 + $0x20] sm:$0xff]  ;;  %1098 = vst [vmem:[#allocation3 + $0xd4] sm:$0xf] %v1097_v18  ;;  %v13160_v32 = vsel %vm11168_vm11, 4294967295, %v13159_v32  ;;  %v13163_v23 = vsel %vm11179_vm14, 4294967295, %v13162_v23 }
  0x7d   : > { %802 = vst [vmem:[#allocation3 + $0xa8] sm:$0x1] %v801_v25  ;;  %v13115_v25 = vshrl.u32 %v11144_v58, 16  ;;  %v473_v18 = vrot.slane %v471_v11, 7 }
  0x7e   : > { %1903 = vmatmul.bf16.gmra.mxu0 %v7932_v3  ;;  %v9790_v3 = vld [vmem:[#allocation3 + $0x7c] sm:$0xf]  ;;  %13161 = vst [vmem:[#allocation24_spill] sm:$0xff] %v13160_v32  ;;  %v9920_v32 = vld [vmem:[#allocation6 + $0x1d0] sm:$0xff] }
  0x7f   : > { %2002 = vmatmul.bf16.gmra.mxu1 %v7936_v5  ;;  %v7945_v5 = vld [vmem:[#allocation3 + $0x84] sm:$0xf0]  ;;  %13164 = vst [vmem:[#allocation25_spill] sm:$0xff] %v13163_v23  ;;  %v476_v11 = vor.u32 %v474_v55, %v473_v18  ;;  %v9928_v23 = vld [vmem:[#allocation6 + $0x210] sm:$0xff] }
  0x80   : > { %2057 = vmatmul.bf16.gmra.mxu3 %v8068_v15  ;;  %v9759_v15 = vld [vmem:[#allocation6 + $0x28] sm:$0xff]  ;;  %v7948_v57 = vor.u32 %v9790_v3, %v7945_v5  ;;  %v468_v3 = vor.u32 %v466_v50, %v11142_v45  ;;  %v729_v5 = vld [vmem:[#allocation3 + $0xc0] sm:$0xf]  ;;  %v9848_v50 = vld [vmem:[#allocation6 + $0x140] sm:$0xff]  ;;  %292 = vst [vmem:[#allocation3 + $0x10] sm:$0xf] %v11172_v35 }
  0x81   : > { %2611 = vmatpush.bf16.msrb.mxu3 %v9759_v15  ;;  %v11157_v15 = vrot.slane %v13115_v25, 7  ;;  %v8089_v18 = vld [vmem:[#allocation3 + $0x1a4] sm:$0xf0]  ;;  %v9754_v25 = vld [vmem:[#allocation6] sm:$0xff] }
  0x82   : > { %v730_v6 = vsel %vm10920_vm5, %v468_v3, %v729_v5  ;;  %v469_v3 = vrot.slane %v11142_v45, 4  ;;  %v9793_v5 = vld [vmem:[#allocation3 + $0x94] sm:$0xf] }
  0x83   : > { %v340_v37 = vor.u32 %v13114_v63, %v11157_v15  ;;  %731 = vst [vmem:[#allocation3 + $0xc0] sm:$0xf] %v730_v6  ;;  %v341_v26 = vrot.slane %v11157_v15, 4  ;;  %v270_v15 = vld [vmem:[#allocation2 + $0x4c] sm:$0xf] }
  0x84   : > { %v7955_v63 = vld [vmem:[#allocation3 + $0x90] sm:$0xf]  ;;  %v487_v55 = vshrl.u32 %v270_v15, 16  ;;  %v490_v8 = vshll.u32 %v270_v15, 16  ;;  %310 = vst [vmem:[#allocation3 + $0xe8] sm:$0xf] %v270_v15 }
  0x85   : > { %2612 = vmatpush.bf16.msrb.mxu3 %v9758_v29  ;;  %v698_v24 = vsel %vm10920_vm5, %v340_v37, %v697_v40  ;;  %v9755_v29 = vld [vmem:[#allocation6 + $0x8] sm:$0xff]  ;;  %v7957_v37 = vld [vmem:[#allocation3 + $0x9c] sm:$0xf0]  ;;  %v1170_v40 = vld [vmem:[#allocation3 + $0xd4] sm:$0x8] }
  0x86   : > { %699 = vst [vmem:[#allocation3] sm:$0xf] %v698_v24  ;;  %v1171_v45 = vsel %vm11179_vm14, 0, %v1170_v40  ;;  %v269_v24 = vld [vmem:[#allocation2 + $0x48] sm:$0xf]  ;;  %v7960_v9 = vor.u32 %v9793_v5, %v7957_v37  ;;  %v929_v27 = vrot.slane %v487_v55, 4 }
  0x87   : > { %1172 = vst [vmem:[#allocation3 + $0xd4] sm:$0x8] %v1171_v45  ;;  %v482_v42 = vshll.u32 %v269_v24, 16 }
  0x88   : > { %309 = vst [vmem:[#allocation3 + $0xdc] sm:$0xf] %v269_v24 }
  0x89   : > { %2613 = vmatpush.bf16.msrb.mxu3 %v9757_v43  ;;  %v9794_v43 = vld [vmem:[#allocation3 + $0x98] sm:$0xf0]  ;;  %v924_v37 = vrot.slane %v482_v42, 5 }
  0x8a   : > { %v803_v45 = vld [vmem:[#allocation3 + $0xc0] sm:$0x1] }
  0x8e   : > { %1908 = vmatmul.bf16.gmra.mxu0 %v7944_v62  ;;  %v917_v62 = vrot.slane %v916_v36, 4  ;;  %v13116_v36 = vshrl.u32 %v11172_v35, 16 }
  0x8f   : > { %2007 = vmatmul.bf16.gmra.mxu1 %v7948_v57  ;;  %v9849_v57 = vld [vmem:[#allocation6 + $0x148] sm:$0xff] }
  0x90   : > { %2062 = vmatmul.bf16.gmra.mxu3 %v8080_v38  ;;  %v9756_v38 = vld [vmem:[#allocation6 + $0x10] sm:$0xff]  ;;  %v919_v0 = vsel %vm11168_vm11, %v917_v62, %v11136_v49  ;;  %v13119_v49 = vshll.u32 %v11172_v35, 16  ;;  %10244 = vmatpush.bf16.msra.mxu2 %v9849_v57  ;;  %v345_v6 = vrot.slane %v13116_v36, 7  ;;  %v9826_v62 = vld [vmem:[#allocation3 + $0x19c] sm:$0xf] }
  0x91   : > { %1095 = vst [vmem:[#allocation3 + $0xc8] sm:$0xf] %v919_v0  ;;  %2614 = vmatpush.bf16.msrb.mxu3 %v9756_v38  ;;  %v479_v0 = vshrl.u32 %v269_v24, 16  ;;  %2084 = vmatpush.bf16.msrb.mxu0 %v9849_v57  ;;  %v477_v38 = vsel %vm10912_vm4, %v469_v3, %v476_v11  ;;  %v7956_v3 = vor.u32 %v9794_v43, %v7955_v63  ;;  %v804_v11 = vsel %vm10957_vm7, 0, %v803_v45  ;;  %v733_v43 = vld [vmem:[#allocation3 + $0xd8] sm:$0xf] }
  0x92   : > { %v348_v40 = vor.u32 %v13119_v49, %v345_v6  ;;  %732 = vst [vmem:[#allocation3 + $0xcc] sm:$0xf] %v477_v38  ;;  %v779_v6 = vld [vmem:[#allocation3] sm:$0x1]  ;;  %v8092_v38 = vor.u32 %v9826_v62, %v8089_v18  ;;  %v927_v63 = vrot.slane %v490_v8, 5 }
  0x93   : > { %v481_v36 = vrot.slane %v479_v0, 7  ;;  %v923_v24 = vrot.slane %v479_v0, 4  ;;  %805 = vst [vmem:[#allocation3 + $0xc0] sm:$0x1] %v804_v11  ;;  %v1100_v45 = vld [vmem:[#allocation3 + $0xec] sm:$0xf] }
  0x94   : > { %10245 = vmatpush.bf16.msra.mxu2 %v9848_v50  ;;  %v349_v57 = vsel %vm10912_vm4, %v341_v26, %v348_v40  ;;  %v9801_v26 = vld [vmem:[#allocation3 + $0xd0] sm:$0xf0]  ;;  %v930_v18 = vor.u32 %v929_v27, %v927_v63 }
  0x95   : > { %2615 = vmatpush.bf16.msrb.mxu3 %v9755_v29  ;;  %700 = vst [vmem:[#allocation3 + $0xc] sm:$0xf] %v349_v57  ;;  %v484_v49 = vor.u32 %v482_v42, %v481_v36  ;;  %2085 = vmatpush.bf16.msrb.mxu0 %v9848_v50  ;;  %v780_v29 = vsel %vm10957_vm7, 0, %v779_v6  ;;  %v925_v15 = vor.u32 %v924_v37, %v923_v24  ;;  %v11208_v50 = vld [vmem:[#allocation2 + $0x54] sm:$0xf]  ;;  %v485_v11 = vrot.slane %v481_v36, 4 }
  0x96   : > { %781 = vst [vmem:[#allocation3] sm:$0x1] %v780_v29  ;;  %v503_v42 = vshrl.u32 %v11208_v50, 16  ;;  %v506_v57 = vshll.u32 %v11208_v50, 16  ;;  %v7967_v29 = vld [vmem:[#allocation3 + $0xa8] sm:$0xf] }
  0x97   : > { %v734_v0 = vsel %vm10920_vm5, %v484_v49, %v733_v43  ;;  %v926_v62 = vrot.slane %v925_v15, 4  ;;  %312 = vst [vmem:[#allocation3 + $0x100] sm:$0xf] %v11208_v50  ;;  %v9797_v37 = vld [vmem:[#allocation3 + $0xb0] sm:$0xf0] }
  0x98   : > { %v7987_v5 = vld [vmem:[#allocation3 + $0xc8] sm:$0xf]  ;;  %735 = vst [vmem:[#allocation3 + $0xd8] sm:$0xf] %v734_v0  ;;  %v938_v49 = vrot.slane %v503_v42, 4  ;;  %v936_v24 = vrot.slane %v506_v57, 5 }
  0x99   : > { %2616 = vmatpush.bf16.msrb.mxu3 %v9754_v25  ;;  %v7988_v40 = vor.u32 %v9801_v26, %v7987_v5  ;;  %v489_v25 = vrot.slane %v487_v55, 7  ;;  %v9796_v26 = vld [vmem:[#allocation3 + $0xac] sm:$0xf]  ;;  %v7969_v15 = vld [vmem:[#allocation3 + $0xb4] sm:$0xf0] }
  0x9a   : > { %v939_v5 = vor.u32 %v938_v49, %v936_v24  ;;  %v1104_v36 = vld [vmem:[#allocation3 + $0x104] sm:$0xf] }
  0x9b   : > { %2121 = vmatmul.bf16.vlgmr.msra.gmra.mxu2 %v7988_v40  ;;  %v492_v6 = vor.u32 %v490_v8, %v489_v25 }
  0x9c   : > { %v940_v40 = vrot.slane %v939_v5, 4 }
  0x9d   : > { %v493_v55 = vsel %vm10912_vm4, %v485_v11, %v492_v6  ;;  %v737_v6 = vld [vmem:[#allocation3 + $0xf0] sm:$0xf] }
  0x9e   : > { %1913 = vmatmul.bf16.gmra.mxu0 %v7956_v3  ;;  %v931_v3 = vrot.slane %v930_v18, 4  ;;  %736 = vst [vmem:[#allocation3 + $0xe4] sm:$0xf] %v493_v55  ;;  %v8101_v18 = vld [vmem:[#allocation3 + $0x1bc] sm:$0xf0] }
  0x9f   : > { %2012 = vmatmul.bf16.gmra.mxu1 %v7960_v9  ;;  %v928_v9 = vsel %vm11168_vm11, %v926_v62, %v927_v63  ;;  %v806_v43 = vld [vmem:[#allocation3 + $0xd8] sm:$0x1]  ;;  %v9829_v62 = vld [vmem:[#allocation3 + $0x1b4] sm:$0xf] }
  0xa0   : > { %2067 = vmatmul.bf16.gmra.mxu3 %v8092_v38  ;;  %1099 = vst [vmem:[#allocation3 + $0xe0] sm:$0xf] %v928_v9  ;;  %v1101_v27 = vsel %vm11148_vm9, %v931_v3, %v1100_v45  ;;  %v271_v38 = vld [vmem:[#allocation2 + $0x50] sm:$0xf]  ;;  %v807_v8 = vsel %vm10957_vm7, 0, %v806_v43  ;;  %v1105_v45 = vsel %vm11148_vm9, %v940_v40, %v1104_v36  ;;  %v7968_v9 = vor.u32 %v9797_v37, %v7967_v29 }
  0xa1   : > { %1102 = vst [vmem:[#allocation3 + $0xec] sm:$0xf] %v1101_v27  ;;  %v495_v63 = vshrl.u32 %v271_v38, 16  ;;  %v498_v0 = vshll.u32 %v271_v38, 16  ;;  %v7972_v3 = vor.u32 %v9796_v26, %v7969_v15  ;;  %v8104_v27 = vor.u32 %v9829_v62, %v8101_v18  ;;  %v11227_v29 = vld [vmem:[#allocation2 + $0x5c] sm:$0xf] }
  0xa2   : > { %311 = vst [vmem:[#allocation3 + $0xf4] sm:$0xf] %v271_v38  ;;  %v505_v15 = vrot.slane %v503_v42, 7 }
  0xa3   : > { %v497_v50 = vrot.slane %v495_v63, 7  ;;  %808 = vst [vmem:[#allocation3 + $0xd8] sm:$0x1] %v807_v8  ;;  %v932_v49 = vrot.slane %v495_v63, 4  ;;  %v933_v11 = vrot.slane %v498_v0, 5  ;;  %v519_v63 = vshrl.u32 %v11227_v29, 16 }
  0xa4   : > { %1106 = vst [vmem:[#allocation3 + $0x104] sm:$0xf] %v1105_v45  ;;  %v522_v8 = vshll.u32 %v11227_v29, 16  ;;  %v508_v18 = vor.u32 %v506_v57, %v505_v15  ;;  %v1108_v57 = vld [vmem:[#allocation3 + $0x11c] sm:$0xf] }
  0xa5   : > { %v500_v25 = vor.u32 %v498_v0, %v497_v50  ;;  %v934_v43 = vor.u32 %v933_v11, %v932_v49  ;;  %314 = vst [vmem:[#allocation3 + $0x118] sm:$0xf] %v11227_v29  ;;  %v501_v62 = vrot.slane %v497_v50, 4  ;;  %v947_v45 = vrot.slane %v519_v63, 4  ;;  %v9800_v49 = vld [vmem:[#allocation3 + $0xc8] sm:$0xf0] }
  0xa6   : > { %v9799_v11 = vld [vmem:[#allocation3 + $0xc4] sm:$0xf] }
  0xa7   : > { %v738_v5 = vsel %vm10920_vm5, %v500_v25, %v737_v6  ;;  %v935_v40 = vrot.slane %v934_v43, 4  ;;  %v7999_v0 = vld [vmem:[#allocation3 + $0xe0] sm:$0xf]  ;;  %v945_v25 = vrot.slane %v522_v8, 5  ;;  %v509_v42 = vsel %vm10912_vm4, %v501_v62, %v508_v18  ;;  %v7981_v6 = vld [vmem:[#allocation3 + $0xcc] sm:$0xf0] }
  0xa8   : > { %v1173_v55 = vld [vmem:[#allocation3 + $0xec] sm:$0x8]  ;;  %739 = vst [vmem:[#allocation3 + $0xf0] sm:$0xf] %v738_v5  ;;  %v7984_v62 = vor.u32 %v9799_v11, %v7981_v6 }
  0xa9   : > { %v1174_v38 = vsel %vm11179_vm14, 0, %v1173_v55  ;;  %v937_v37 = vsel %vm11168_vm11, %v935_v40, %v936_v24  ;;  %v273_v24 = vld [vmem:[#allocation2 + $0x58] sm:$0xf]  ;;  %740 = vst [vmem:[#allocation3 + $0xfc] sm:$0xf] %v509_v42  ;;  %v535_v42 = vshrl.u32 %v10908_v13, 16 }
  0xaa   : > { %1175 = vst [vmem:[#allocation3 + $0xec] sm:$0x8] %v1174_v38  ;;  %v511_v5 = vshrl.u32 %v273_v24, 16  ;;  %v948_v38 = vor.u32 %v947_v45, %v945_v25  ;;  %v514_v43 = vshll.u32 %v273_v24, 16 }
  0xab   : > { %v1176_v26 = vld [vmem:[#allocation3 + $0x104] sm:$0x8]  ;;  %1103 = vst [vmem:[#allocation3 + $0xf8] sm:$0xf] %v937_v37  ;;  %v8207_v37 = vld [vmem:[#allocation3] sm:$0xf] }
  0xac   : > { %v1177_v36 = vsel %vm11179_vm14, 0, %v1176_v26  ;;  %313 = vst [vmem:[#allocation3 + $0x10c] sm:$0xf] %v273_v24  ;;  %v949_v40 = vrot.slane %v948_v38, 4  ;;  %v513_v29 = vrot.slane %v511_v5, 7  ;;  %v941_v18 = vrot.slane %v511_v5, 4 }
  0xad   : > { %1178 = vst [vmem:[#allocation3 + $0x104] sm:$0x8] %v1177_v36  ;;  %v9701_v26 = vld [vmem:[#allocation3 + $0x8] sm:$0xf0]  ;;  %v942_v45 = vrot.slane %v514_v43, 5  ;;  %v538_v38 = vshll.u32 %v10908_v13, 16 }
  0xae   : > { %1918 = vmatmul.bf16.gmra.mxu0 %v7968_v9  ;;  %v1109_v15 = vsel %vm11148_vm9, %v949_v40, %v1108_v57  ;;  %v516_v36 = vor.u32 %v514_v43, %v513_v29  ;;  %v521_v57 = vrot.slane %v519_v63, 7  ;;  %v530_v43 = vshll.u32 %v10906_v12, 16 }
  0xaf   : > { %2017 = vmatmul.bf16.gmra.mxu1 %v7972_v3  ;;  %v7979_v3 = vld [vmem:[#allocation3 + $0xc0] sm:$0xf]  ;;  %v809_v55 = vld [vmem:[#allocation3 + $0xf0] sm:$0x1]  ;;  %1110 = vst [vmem:[#allocation3 + $0x11c] sm:$0xf] %v1109_v15 }
  0xb0   : > { %2072 = vmatmul.bf16.gmra.mxu3 %v8104_v27  ;;  %v810_v50 = vsel %vm10957_vm7, 0, %v809_v55  ;;  %v8208_v55 = vor.u32 %v9701_v26, %v8207_v37  ;;  %v954_v37 = vrot.slane %v538_v38, 5  ;;  %v517_v15 = vrot.slane %v513_v29, 4 }
  0xb1   : > { %v9804_v9 = vld [vmem:[#allocation3 + $0xe8] sm:$0xf0]  ;;  %811 = vst [vmem:[#allocation3 + $0xf0] sm:$0x1] %v810_v50 }
  0xb2   : > { %v8000_v27 = vor.u32 %v9804_v9, %v7999_v0  ;;  %v7980_v0 = vor.u32 %v9800_v49, %v7979_v3  ;;  %v741_v9 = vld [vmem:[#allocation3 + $0x108] sm:$0xf]  ;;  %v527_v3 = vshrl.u32 %v10906_v12, 16  ;;  %v956_v49 = vrot.slane %v535_v42, 4  ;;  %v8011_v11 = vld [vmem:[#allocation3 + $0xf8] sm:$0xf] }
  0xb3   : > { %v742_v24 = vsel %vm10920_vm5, %v516_v36, %v741_v9  ;;  %v524_v36 = vor.u32 %v522_v8, %v521_v57  ;;  %v951_v12 = vrot.slane %v530_v43, 5  ;;  %v7991_v8 = vld [vmem:[#allocation3 + $0xd8] sm:$0xf] }
  0xb4   : > { %2126 = vmatmul.bf16.gmra.mxu2 %v8000_v27  ;;  %v943_v27 = vor.u32 %v942_v45, %v941_v18  ;;  %743 = vst [vmem:[#allocation3 + $0x108] sm:$0xf] %v742_v24  ;;  %v9807_v6 = vld [vmem:[#allocation3 + $0x100] sm:$0xf0]  ;;  %v957_v18 = vor.u32 %v956_v49, %v954_v37  ;;  %v950_v45 = vrot.slane %v527_v3, 4 }
  0xb5   : > { %v9803_v24 = vld [vmem:[#allocation3 + $0xe0] sm:$0xf0] }
  0xb6   : > { %v944_v50 = vrot.slane %v943_v27, 4  ;;  %v1179_v40 = vld [vmem:[#allocation3 + $0x11c] sm:$0x8]  ;;  %v1112_v27 = vld [vmem:[#allocation3 + $0x134] sm:$0xf] }
  0xb7   : > { %v1180_v26 = vsel %vm11179_vm14, 0, %v1179_v40  ;;  %v745_v40 = vld [vmem:[#allocation3 + $0x120] sm:$0xf]  ;;  %v9732_v46 = vld [vmem:[#allocation3 + $0x100] sm:$0xf0] }
  0xb8   : > { %v946_v5 = vsel %vm11168_vm11, %v944_v50, %v945_v25  ;;  %1181 = vst [vmem:[#allocation3 + $0x11c] sm:$0x8] %v1180_v26  ;;  %v525_v25 = vsel %vm10912_vm4, %v517_v15, %v524_v36  ;;  %v9802_v50 = vld [vmem:[#allocation3 + $0xdc] sm:$0xf]  ;;  %v551_v26 = vshrl.u32 %v10967_v48, 16 }
  0xb9   : > { %1107 = vst [vmem:[#allocation3 + $0x110] sm:$0xf] %v946_v5  ;;  %v9704_v5 = vld [vmem:[#allocation3 + $0x20] sm:$0xf0] }
  0xba   : > { %744 = vst [vmem:[#allocation3 + $0x114] sm:$0xf] %v525_v25  ;;  %v952_v25 = vor.u32 %v951_v12, %v950_v45  ;;  %v546_v12 = vshll.u32 %v10963_v44, 16 }
  0xbb   : > { %v812_v63 = vld [vmem:[#allocation3 + $0x108] sm:$0x1] }
  0xbc   : > { %v813_v9 = vsel %vm10957_vm7, 0, %v812_v63  ;;  %v537_v63 = vrot.slane %v535_v42, 7 }
  0xbd   : > { %814 = vst [vmem:[#allocation3 + $0x108] sm:$0x1] %v813_v9  ;;  %v953_v9 = vrot.slane %v952_v25, 4  ;;  %v960_v25 = vrot.slane %v546_v12, 5 }
  0xbe   : > { %1923 = vmatmul.bf16.gmra.mxu0 %v7980_v0  ;;  %v529_v0 = vrot.slane %v527_v3, 7  ;;  %v7992_v3 = vor.u32 %v9803_v24, %v7991_v8  ;;  %v965_v24 = vrot.slane %v551_v26, 4 }
  0xbf   : > { %2022 = vmatmul.bf16.gmra.mxu1 %v7984_v62  ;;  %v8012_v62 = vor.u32 %v9807_v6, %v8011_v11  ;;  %v7993_v11 = vld [vmem:[#allocation3 + $0xe4] sm:$0xf0]  ;;  %v8219_v6 = vld [vmem:[#allocation3 + $0x18] sm:$0xf] }
  0xc0   : > { %2617 = vmatmul.bf16.vlgmr.msrb.gmra.mxu3 %v8208_v55  ;;  %v958_v55 = vrot.slane %v957_v18, 4  ;;  %v532_v29 = vor.u32 %v530_v43, %v529_v0  ;;  %v7996_v57 = vor.u32 %v9802_v50, %v7993_v11  ;;  %v8220_v18 = vor.u32 %v9704_v5, %v8219_v6  ;;  %v8023_v8 = vld [vmem:[#allocation3 + $0x110] sm:$0xf]  ;;  %v9810_v50 = vld [vmem:[#allocation3 + $0x118] sm:$0xf0] }
  0xc1   : > { %v955_v11 = vsel %vm11168_vm11, %v953_v9, %v954_v37  ;;  %v540_v6 = vor.u32 %v538_v38, %v537_v63  ;;  %v9805_v9 = vld [vmem:[#allocation3 + $0xf4] sm:$0xf]  ;;  %v1116_v38 = vld [vmem:[#allocation3 + $0x14c] sm:$0xf]  ;;  %v8003_v63 = vld [vmem:[#allocation3 + $0xf0] sm:$0xf] }
  0xc2   : > { %v1113_v49 = vsel %vm11148_vm9, %v958_v55, %v1112_v27  ;;  %v746_v43 = vsel %vm10920_vm5, %v532_v29, %v745_v40  ;;  %v543_v55 = vshrl.u32 %v10963_v44, 16  ;;  %1111 = vst [vmem:[#allocation3 + $0x128] sm:$0xf] %v955_v11 }
  0xc3   : > { %1114 = vst [vmem:[#allocation3 + $0x134] sm:$0xf] %v1113_v49  ;;  %v533_v49 = vrot.slane %v529_v0, 4 }
  0xc4   : > { %2131 = vmatmul.bf16.gmra.mxu2 %v8012_v62  ;;  %v554_v62 = vshll.u32 %v10967_v48, 16  ;;  %747 = vst [vmem:[#allocation3 + $0x120] sm:$0xf] %v746_v43  ;;  %v11276_v5 = vrot.slane %v543_v55, 7 }
  0xc6   : > { %v963_v42 = vrot.slane %v554_v62, 5  ;;  %v548_v0 = vor.u32 %v546_v12, %v11276_v5  ;;  %v549_v48 = vrot.slane %v11276_v5, 4  ;;  %v9809_v5 = vld [vmem:[#allocation3 + $0x110] sm:$0xf0] }
  0xc8   : > { %v966_v40 = vor.u32 %v965_v24, %v963_v42 }
  0xca   : > { %v1182_v27 = vld [vmem:[#allocation3 + $0x134] sm:$0x8]  ;;  %v967_v43 = vrot.slane %v966_v40, 4  ;;  %v553_v40 = vrot.slane %v551_v26, 7 }
  0xcb   : > { %v1889_v15 = vpop.f32.mrf.mxu0  ;;  %v1183_v45 = vsel %vm11179_vm14, 0, %v1182_v27  ;;  %v815_v44 = vld [vmem:[#allocation3 + $0x120] sm:$0x1] }
  0xcc   : > { %v1988_v36 = vpop.f32.mrf.mxu1  ;;  %1184 = vst [vmem:[#allocation3 + $0x134] sm:$0x8] %v1183_v45  ;;  %v541_v15 = vsel %vm10912_vm4, %v533_v49, %v540_v6  ;;  %v816_v13 = vsel %vm10957_vm7, 0, %v815_v44  ;;  %v8005_v27 = vld [vmem:[#allocation3 + $0xfc] sm:$0xf0]  ;;  %v1117_v24 = vsel %vm11148_vm9, %v967_v43, %v1116_v38  ;;  %v567_v6 = vshrl.u32 %v10999_v22, 16 }
  0xcd   : > { %v959_v36 = vrot.slane %v543_v55, 4  ;;  %748 = vst [vmem:[#allocation3 + $0x12c] sm:$0xf] %v541_v15  ;;  %v8231_v55 = vld [vmem:[#allocation3 + $0x30] sm:$0xf]  ;;  %v8008_v45 = vor.u32 %v9805_v9, %v8005_v27  ;;  %v13120_v43 = vshll.u32 %v10999_v22, 16 }
  0xce   : > { %1928 = vmatmul.bf16.gmra.mxu0 %v7992_v3  ;;  %817 = vst [vmem:[#allocation3 + $0x120] sm:$0x1] %v816_v13  ;;  %v749_v49 = vld [vmem:[#allocation3 + $0x138] sm:$0xf]  ;;  %v559_v9 = vshrl.u32 %v10991_v7, 16  ;;  %v974_v13 = vrot.slane %v567_v6, 4 }
  0xcf   : > { %2027 = vmatmul.bf16.gmra.mxu1 %v7996_v57  ;;  %v8024_v57 = vor.u32 %v9810_v50, %v8023_v8  ;;  %v9707_v8 = vld [vmem:[#allocation3 + $0x38] sm:$0xf0]  ;;  %1118 = vst [vmem:[#allocation3 + $0x14c] sm:$0xf] %v1117_v24  ;;  %v961_v44 = vor.u32 %v960_v25, %v959_v36  ;;  %v8035_v27 = vld [vmem:[#allocation3 + $0x128] sm:$0xf] }
  0xd0   : > { %2622 = vmatmul.bf16.gmra.mxu3 %v8220_v18  ;;  %v9806_v18 = vld [vmem:[#allocation3 + $0xf8] sm:$0xf0]  ;;  %v8232_v12 = vor.u32 %v9707_v8, %v8231_v55  ;;  %v562_v25 = vshll.u32 %v10991_v7, 16  ;;  %v972_v24 = vrot.slane %v13120_v43, 5 }
  0xd1   : > { %v8004_v11 = vor.u32 %v9806_v18, %v8003_v63  ;;  %v962_v18 = vrot.slane %v961_v44, 4  ;;  %v556_v63 = vor.u32 %v554_v62, %v553_v40  ;;  %v11306_v62 = vrot.slane %v559_v9, 7  ;;  %v1120_v40 = vld [vmem:[#allocation3 + $0x164] sm:$0xf] }
  0xd3   : > { %v11272_v29 = vpop.f32.mrf.mxu3  ;;  %v1891_v3 = vpop.f32.mrf.mxu0  ;;  %v964_v26 = vsel %vm11168_vm11, %v962_v18, %v963_v42  ;;  %v557_v7 = vsel %vm10912_vm4, %v549_v48, %v556_v63  ;;  %v564_v44 = vor.u32 %v562_v25, %v11306_v62  ;;  %v8015_v18 = vld [vmem:[#allocation3 + $0x108] sm:$0xf]  ;;  %v753_v48 = vld [vmem:[#allocation3 + $0x150] sm:$0xf] }
  0xd4   : > { %v1990_v37 = vpop.f32.mrf.mxu1  ;;  %2136 = vmatmul.bf16.gmra.mxu2 %v8024_v57  ;;  %v750_v57 = vsel %vm10920_vm5, %v548_v0, %v749_v49  ;;  %v9813_v0 = vld [vmem:[#allocation3 + $0x130] sm:$0xf0]  ;;  %1115 = vst [vmem:[#allocation3 + $0x140] sm:$0xf] %v964_v26  ;;  %v8243_v63 = vld [vmem:[#allocation3 + $0x48] sm:$0xf]  ;;  %v8016_v26 = vor.u32 %v9809_v5, %v8015_v18 }
  0xd5   : > { %751 = vst [vmem:[#allocation3 + $0x138] sm:$0xf] %v750_v57  ;;  %v8036_v42 = vor.u32 %v9813_v0, %v8035_v27  ;;  %v8017_v27 = vld [vmem:[#allocation3 + $0x114] sm:$0xf0]  ;;  %v575_v18 = vshrl.u32 %v11030_v59, 16 }
  0xd6   : > { %v1185_v38 = vld [vmem:[#allocation3 + $0x14c] sm:$0x8]  ;;  %752 = vst [vmem:[#allocation3 + $0x144] sm:$0xf] %v557_v7 }
  0xd7   : > { %v1186_v36 = vsel %vm11179_vm14, 0, %v1185_v38  ;;  %v9808_v38 = vld [vmem:[#allocation3 + $0x10c] sm:$0xf] }
  0xd8   : > { %1187 = vst [vmem:[#allocation3 + $0x14c] sm:$0x8] %v1186_v36  ;;  %v8020_v36 = vor.u32 %v9808_v38, %v8017_v27 }
  0xdb   : > { %v11285_v50 = vpop.f32.mrf.mxu3  ;;  %v1894_v3 = vpop.f32.mrf.mxu0 }
  0xdc   : > { %13165 = vst [vmem:[#allocation26_spill] sm:$0xff] %v11285_v50  ;;  %v1993_v37 = vpop.f32.mrf.mxu1  ;;  %v818_v49 = vld [vmem:[#allocation3 + $0x138] sm:$0x1] }
  0xdd   : > { %v11290_v15 = vadd.f32 %v1993_v37, %v1894_v3  ;;  %v968_v3 = vrot.slane %v559_v9, 4  ;;  %v969_v37 = vrot.slane %v562_v25, 5  ;;  %v9710_v9 = vld [vmem:[#allocation3 + $0x50] sm:$0xf0] }
  0xde   : > { %1933 = vmatmul.bf16.gmra.mxu0 %v8004_v11  ;;  %v8244_v25 = vor.u32 %v9710_v9, %v8243_v63  ;;  %v8047_v9 = vld [vmem:[#allocation3 + $0x140] sm:$0xf] }
  0xdf   : > { %2032 = vmatmul.bf16.gmra.mxu1 %v8008_v45  ;;  %v975_v45 = vor.u32 %v974_v13, %v972_v24 }
  0xe0   : > { %2627 = vmatmul.bf16.gmra.mxu3 %v8232_v12  ;;  %v819_v12 = vsel %vm10957_vm7, 0, %v818_v49 }
  0xe1   : > { %v976_v57 = vrot.slane %v975_v45, 4  ;;  %820 = vst [vmem:[#allocation3 + $0x138] sm:$0x1] %v819_v12  ;;  %v583_v45 = vshrl.u32 %v11034_v1, 16  ;;  %v754_v12 = vsel %vm10920_vm5, %v564_v44, %v753_v48  ;;  %v9816_v44 = vld [vmem:[#allocation3 + $0x148] sm:$0xf0] }
  0xe2   : > { %755 = vst [vmem:[#allocation3 + $0x150] sm:$0xf] %v754_v12  ;;  %v578_v48 = vshll.u32 %v11030_v59, 16 }
  0xe3   : > { %v11303_v55 = vpop.f32.mrf.mxu3  ;;  %v11308_v8 = vpop.f32.mrf.mxu0  ;;  %v1121_v13 = vsel %vm11148_vm9, %v976_v57, %v1120_v40  ;;  %v970_v57 = vor.u32 %v969_v37, %v968_v3  ;;  %v586_v40 = vshll.u32 %v11034_v1, 16  ;;  %v983_v38 = vrot.slane %v583_v45, 4 }
  0xe4   : > { %v11310_v11 = vpop.f32.mrf.mxu1  ;;  %2141 = vmatmul.bf16.gmra.mxu2 %v8036_v42  ;;  %1122 = vst [vmem:[#allocation3 + $0x164] sm:$0xf] %v1121_v13  ;;  %v569_v42 = vrot.slane %v567_v6, 7  ;;  %v13167_v13 = vshll.u32 %v10999_v22, 16  ;;  %v978_v59 = vrot.slane %v578_v48, 5 }
  0xe5   : > { %v971_v5 = vrot.slane %v970_v57, 4  ;;  %v981_v3 = vrot.slane %v586_v40, 5 }
  0xe6   : > { %v572_v63 = vor.u32 %v13167_v13, %v569_v42  ;;  %v8027_v13 = vld [vmem:[#allocation3 + $0x120] sm:$0xf] }
  0xe7   : > { %v973_v6 = vsel %vm11168_vm11, %v971_v5, %v972_v24 }
  0xe8   : > { %1119 = vst [vmem:[#allocation3 + $0x158] sm:$0xf] %v973_v6  ;;  %v9812_v6 = vld [vmem:[#allocation3 + $0x128] sm:$0xf0] }
  0xe9   : > { %v821_v12 = vld [vmem:[#allocation3 + $0x150] sm:$0x1] }
  0xea   : > { %v822_v42 = vsel %vm10957_vm7, 0, %v821_v12 }
  0xeb   : > { %v11319_v0 = vpop.f32.mrf.mxu3  ;;  %v1899_v7 = vpop.f32.mrf.mxu0  ;;  %v1188_v27 = vld [vmem:[#allocation3 + $0x164] sm:$0x8]  ;;  %823 = vst [vmem:[#allocation3 + $0x150] sm:$0x1] %v822_v42 }
  0xec   : > { %13166 = vst [vmem:[#allocation27_spill] sm:$0xff] %v11319_v0  ;;  %v1998_v49 = vpop.f32.mrf.mxu1  ;;  %v1189_v1 = vsel %vm11179_vm14, 0, %v1188_v27  ;;  %v977_v27 = vrot.slane %v575_v18, 4 }
  0xed   : > { %v11324_v43 = vadd.f32 %v1998_v49, %v1899_v7  ;;  %1190 = vst [vmem:[#allocation3 + $0x164] sm:$0x8] %v1189_v1  ;;  %v8048_v49 = vor.u32 %v9816_v44, %v8047_v9  ;;  %v8255_v9 = vld [vmem:[#allocation3 + $0x60] sm:$0xf]  ;;  %v9713_v44 = vld [vmem:[#allocation3 + $0x68] sm:$0xf0]  ;;  %v8028_v1 = vor.u32 %v9812_v6, %v8027_v13 }
  0xee   : > { %1938 = vmatmul.bf16.gmra.mxu0 %v8016_v26  ;;  %v565_v26 = vrot.slane %v11306_v62, 4  ;;  %v1124_v62 = vld [vmem:[#allocation3 + $0x17c] sm:$0xf]  ;;  %v8256_v42 = vor.u32 %v9713_v44, %v8255_v9  ;;  %v979_v0 = vor.u32 %v978_v59, %v977_v27  ;;  %v591_v13 = vshrl.u32 %v11060_v51, 16 }
  0xef   : > { %2037 = vmatmul.bf16.gmra.mxu1 %v8020_v36  ;;  %v577_v36 = vrot.slane %v575_v18, 7  ;;  %v8059_v50 = vld [vmem:[#allocation3 + $0x158] sm:$0xf]  ;;  %v594_v44 = vshll.u32 %v11060_v51, 16 }
  0xf0   : > { %2632 = vmatmul.bf16.gmra.mxu3 %v8244_v25  ;;  %v984_v25 = vor.u32 %v983_v38, %v981_v3  ;;  %v573_v24 = vsel %vm10912_vm4, %v565_v26, %v572_v63  ;;  %v757_v26 = vld [vmem:[#allocation3 + $0x168] sm:$0xf]  ;;  %v593_v59 = vrot.slane %v591_v13, 7 }
  0xf1   : > { %756 = vst [vmem:[#allocation3 + $0x15c] sm:$0xf] %v573_v24  ;;  %v580_v5 = vor.u32 %v578_v48, %v577_v36  ;;  %v585_v48 = vrot.slane %v583_v45, 7  ;;  %v987_v51 = vrot.slane %v594_v44, 5 }
  0xf2   : > { %v985_v57 = vrot.slane %v984_v25, 4  ;;  %v599_v25 = vshrl.u32 %v11062_v53, 16 }
  0xf3   : > { %v11334_v37 = vpop.f32.mrf.mxu3  ;;  %v11338_v22 = vpop.f32.mrf.mxu0  ;;  %v758_v18 = vsel %vm10920_vm5, %v580_v5, %v757_v26 }
  0xf4   : > { %v11340_v7 = vpop.f32.mrf.mxu1  ;;  %2146 = vmatmul.bf16.gmra.mxu2 %v8048_v49  ;;  %v1125_v38 = vsel %vm11148_vm9, %v985_v57, %v1124_v62  ;;  %v602_v57 = vshll.u32 %v11062_v53, 16  ;;  %759 = vst [vmem:[#allocation3 + $0x168] sm:$0xf] %v758_v18  ;;  %v980_v62 = vrot.slane %v979_v0, 4  ;;  %v992_v6 = vrot.slane %v599_v25, 4 }
  0xf5   : > { %1126 = vst [vmem:[#allocation3 + $0x17c] sm:$0xf] %v1125_v38  ;;  %v9819_v9 = vld [vmem:[#allocation3 + $0x160] sm:$0xf0]  ;;  %v581_v0 = vrot.slane %v577_v36, 4 }
  0xf6   : > { %v982_v5 = vsel %vm11168_vm11, %v980_v62, %v981_v3  ;;  %v990_v27 = vrot.slane %v602_v57, 5  ;;  %v8060_v26 = vor.u32 %v9819_v9, %v8059_v50  ;;  %v1128_v36 = vld [vmem:[#allocation3 + $0x194] sm:$0xf]  ;;  %v986_v62 = vrot.slane %v591_v13, 4  ;;  %v9716_v9 = vld [vmem:[#allocation3 + $0x80] sm:$0xf0] }
  0xf7   : > { %1123 = vst [vmem:[#allocation3 + $0x170] sm:$0xf] %v982_v5  ;;  %v9815_v5 = vld [vmem:[#allocation3 + $0x140] sm:$0xf0] }
  0xfb   : > { %v11348_v63 = vpop.f32.mrf.mxu3  ;;  %v1904_v24 = vpop.f32.mrf.mxu0 }
  0xfc   : > { %13168 = vst [vmem:[#allocation28_spill] sm:$0xff] %v11348_v63  ;;  %v2003_v12 = vpop.f32.mrf.mxu1  ;;  %v1191_v38 = vld [vmem:[#allocation3 + $0x17c] sm:$0x8]  ;;  %v588_v63 = vor.u32 %v586_v40, %v585_v48  ;;  %v596_v48 = vor.u32 %v594_v44, %v593_v59  ;;  %v601_v44 = vrot.slane %v599_v25, 7 }
  0xfd   : > { %v11353_v49 = vadd.f32 %v2003_v12, %v1904_v24  ;;  %v1192_v45 = vsel %vm11179_vm14, 0, %v1191_v38  ;;  %v993_v24 = vor.u32 %v992_v6, %v990_v27  ;;  %v824_v12 = vld [vmem:[#allocation3 + $0x168] sm:$0x1]  ;;  %v8039_v38 = vld [vmem:[#allocation3 + $0x138] sm:$0xf] }
  0xfe   : > { %1943 = vmatmul.bf16.gmra.mxu0 %v8028_v1  ;;  %1193 = vst [vmem:[#allocation3 + $0x17c] sm:$0x8] %v1192_v45  ;;  %v589_v3 = vsel %vm10912_vm4, %v581_v0, %v588_v63  ;;  %v8267_v6 = vld [vmem:[#allocation3 + $0x78] sm:$0xf]  ;;  %v8040_v45 = vor.u32 %v9815_v5, %v8039_v38  ;;  %v761_v0 = vld [vmem:[#allocation3 + $0x180] sm:$0xf] }
  0xff   : > { %760 = vst [vmem:[#allocation3 + $0x174] sm:$0xf] %v589_v3  ;;  %v994_v18 = vrot.slane %v993_v24, 4  ;;  %v615_v24 = vshrl.u32 %v11092_v21, 16  ;;  %v762_v13 = vsel %vm10920_vm5, %v596_v48, %v761_v0  ;;  %v607_v38 = vshrl.u32 %v11090_v10, 16 }
 0x100   : > { %2637 = vmatmul.bf16.gmra.mxu3 %v8256_v42  ;;  %v825_v42 = vsel %vm10957_vm7, 0, %v824_v12  ;;  %763 = vst [vmem:[#allocation3 + $0x180] sm:$0xf] %v762_v13 }
 0x101   : > { %826 = vst [vmem:[#allocation3 + $0x168] sm:$0x1] %v825_v42  ;;  %v1129_v50 = vsel %vm11148_vm9, %v994_v18, %v1128_v36  ;;  %v8268_v42 = vor.u32 %v9716_v9, %v8267_v6  ;;  %v618_v18 = vshll.u32 %v11092_v21, 16  ;;  %v1001_v5 = vrot.slane %v615_v24, 4 }
 0x102   : > { %1130 = vst [vmem:[#allocation3 + $0x194] sm:$0xf] %v1129_v50  ;;  %v610_v9 = vshll.u32 %v11090_v10, 16 }
 0x103   : > { %v11361_v53 = vpop.f32.mrf.mxu3  ;;  %v11364_v1 = vpop.f32.mrf.mxu0 }
 0x104   : > { %13169 = vst [vmem:[#allocation29_spill] sm:$0xff] %v11364_v1  ;;  %v11366_v40 = vpop.f32.mrf.mxu1  ;;  %2151 = vmatmul.bf16.gmra.mxu2 %v8060_v26  ;;  %v8071_v1 = vld [vmem:[#allocation3 + $0x170] sm:$0xf]  ;;  %v996_v10 = vrot.slane %v610_v9, 5 }
 0x105   : > { %13170 = vst [vmem:[#allocation30_spill] sm:$0xff] %v11366_v40  ;;  %v988_v40 = vor.u32 %v987_v51, %v986_v62  ;;  %v9822_v6 = vld [vmem:[#allocation3 + $0x178] sm:$0xf0]  ;;  %v999_v62 = vrot.slane %v618_v18, 5  ;;  %v609_v51 = vrot.slane %v607_v38, 7 }
 0x106   : > { %v8072_v0 = vor.u32 %v9822_v6, %v8071_v1  ;;  %v9719_v6 = vld [vmem:[#allocation3 + $0x98] sm:$0xf0] }
 0x107   : > { %v989_v36 = vrot.slane %v988_v40, 4  ;;  %v597_v40 = vrot.slane %v593_v59, 4  ;;  %v1132_v59 = vld [vmem:[#allocation3 + $0x1ac] sm:$0xf] }
 0x109   : > { %v1194_v50 = vld [vmem:[#allocation3 + $0x194] sm:$0x8]  ;;  %v991_v48 = vsel %vm11168_vm11, %v989_v36, %v990_v27  ;;  %v995_v36 = vrot.slane %v607_v38, 4 }
 0x10a   : > { %v1195_v25 = vsel %vm11179_vm14, 0, %v1194_v50  ;;  %1127 = vst [vmem:[#allocation3 + $0x188] sm:$0xf] %v991_v48  ;;  %v8051_v50 = vld [vmem:[#allocation3 + $0x150] sm:$0xf] }
 0x10b   : > { %v11374_v63 = vpop.f32.mrf.mxu3  ;;  %v1909_v3 = vpop.f32.mrf.mxu0  ;;  %1196 = vst [vmem:[#allocation3 + $0x194] sm:$0x8] %v1195_v25  ;;  %v9818_v48 = vld [vmem:[#allocation3 + $0x158] sm:$0xf0] }
 0x10c   : > { %13171 = vst [vmem:[#allocation31_spill] sm:$0xff] %v11374_v63  ;;  %v2008_v12 = vpop.f32.mrf.mxu1  ;;  %v604_v63 = vor.u32 %v602_v57, %v601_v44  ;;  %v612_v44 = vor.u32 %v610_v9, %v609_v51  ;;  %v8052_v25 = vor.u32 %v9818_v48, %v8051_v50  ;;  %v617_v9 = vrot.slane %v615_v24, 7 }
 0x10d   : > { %v11379_v26 = vadd.f32 %v2008_v12, %v1909_v3  ;;  %v1002_v3 = vor.u32 %v1001_v5, %v999_v62  ;;  %v827_v12 = vld [vmem:[#allocation3 + $0x180] sm:$0x1]  ;;  %v8279_v5 = vld [vmem:[#allocation3 + $0x90] sm:$0xf] }
 0x10e   : > { %1948 = vmatmul.bf16.gmra.mxu0 %v8040_v45  ;;  %v605_v27 = vsel %vm10912_vm4, %v597_v40, %v604_v63  ;;  %v765_v40 = vld [vmem:[#allocation3 + $0x198] sm:$0xf] }
 0x10f   : > { %764 = vst [vmem:[#allocation3 + $0x18c] sm:$0xf] %v605_v27  ;;  %v1003_v13 = vrot.slane %v1002_v3, 4  ;;  %v766_v38 = vsel %vm10920_vm5, %v612_v44, %v765_v40 }
 0x110   : > { %2642 = vmatmul.bf16.gmra.mxu3 %v8268_v42  ;;  %v828_v42 = vsel %vm10957_vm7, 0, %v827_v12  ;;  %v8280_v12 = vor.u32 %v9719_v6, %v8279_v5  ;;  %767 = vst [vmem:[#allocation3 + $0x198] sm:$0xf] %v766_v38  ;;  %v13121_v6 = vshll.u32 %v11125_v16, 16  ;;  %v8063_v38 = vld [vmem:[#allocation3 + $0x168] sm:$0xf] }
 0x111   : > { %829 = vst [vmem:[#allocation3 + $0x180] sm:$0x1] %v828_v42  ;;  %v1133_v1 = vsel %vm11148_vm9, %v1003_v13, %v1132_v59  ;;  %v13122_v59 = vshrl.u32 %v11125_v16, 16  ;;  %v8083_v50 = vld [vmem:[#allocation3 + $0x188] sm:$0xf] }
 0x112   : > { %1134 = vst [vmem:[#allocation3 + $0x1ac] sm:$0xf] %v1133_v1  ;;  %v9825_v48 = vld [vmem:[#allocation3 + $0x190] sm:$0xf0] }
 0x113   : > { %v11387_v21 = vpop.f32.mrf.mxu3  ;;  %v11390_v45 = vpop.f32.mrf.mxu0  ;;  %v8084_v40 = vor.u32 %v9825_v48, %v8083_v50  ;;  %v769_v48 = vld [vmem:[#allocation3 + $0x1b0] sm:$0xf] }
 0x114   : > { %v11392_v57 = vpop.f32.mrf.mxu1  ;;  %2156 = vmatmul.bf16.gmra.mxu2 %v8072_v0  ;;  %v997_v0 = vor.u32 %v996_v10, %v995_v36  ;;  %v613_v36 = vrot.slane %v609_v51, 4  ;;  %v625_v10 = vrot.slane %v13122_v59, 7 }
 0x116   : > { %v998_v13 = vrot.slane %v997_v0, 4  ;;  %v628_v51 = vor.u32 %v13121_v6, %v625_v10  ;;  %v13123_v0 = vshrl.u32 %v11127_v60, 16  ;;  %v629_v59 = vrot.slane %v625_v10, 4  ;;  %v9824_v10 = vld [vmem:[#allocation3 + $0x188] sm:$0xf0] }
 0x118   : > { %v1000_v5 = vsel %vm11168_vm11, %v998_v13, %v999_v62  ;;  %v8291_v13 = vld [vmem:[#allocation3 + $0xa8] sm:$0xf] }
 0x119   : > { %v1197_v1 = vld [vmem:[#allocation3 + $0x1ac] sm:$0x8]  ;;  %1131 = vst [vmem:[#allocation3 + $0x1a0] sm:$0xf] %v1000_v5 }
 0x11a   : > { %v1198_v44 = vsel %vm11179_vm14, 0, %v1197_v1  ;;  %v9722_v1 = vld [vmem:[#allocation3 + $0xb0] sm:$0xf0] }
 0x11b   : > { %v11400_v63 = vpop.f32.mrf.mxu3  ;;  %v1914_v27 = vpop.f32.mrf.mxu0  ;;  %1199 = vst [vmem:[#allocation3 + $0x1ac] sm:$0x8] %v1198_v44 }
 0x11c   : > { %13172 = vst [vmem:[#allocation32_spill] sm:$0xff] %v11400_v63  ;;  %v2013_v3 = vpop.f32.mrf.mxu1  ;;  %v620_v63 = vor.u32 %v618_v18, %v617_v9  ;;  %v9821_v9 = vld [vmem:[#allocation3 + $0x170] sm:$0xf0] }
 0x11d   : > { %v11404_v42 = vadd.f32 %v2013_v3, %v1914_v27  ;;  %v830_v27 = vld [vmem:[#allocation3 + $0x198] sm:$0x1] }
 0x11e   : > { %1953 = vmatmul.bf16.gmra.mxu0 %v8052_v25  ;;  %v621_v62 = vsel %vm10912_vm4, %v613_v36, %v620_v63  ;;  %v831_v3 = vsel %vm10957_vm7, 0, %v830_v27  ;;  %v8064_v63 = vor.u32 %v9821_v9, %v8063_v38  ;;  %v8292_v36 = vor.u32 %v9722_v1, %v8291_v13 }
 0x11f   : > { %768 = vst [vmem:[#allocation3 + $0x1a4] sm:$0xf] %v621_v62  ;;  %v770_v62 = vsel %vm10920_vm5, %v628_v51, %v769_v48  ;;  %v633_v27 = vrot.slane %v13123_v0, 7 }
 0x120   : > { %2647 = vmatmul.bf16.gmra.mxu3 %v8280_v12  ;;  %v2122_v12 = vpop.f32.mrf.mxu2  ;;  %832 = vst [vmem:[#allocation3 + $0x198] sm:$0x1] %v831_v3  ;;  %v13124_v3 = vshll.u32 %v11127_v60, 16  ;;  %v8095_v6 = vld [vmem:[#allocation3 + $0x1a0] sm:$0xf] }
 0x121   : > { %771 = vst [vmem:[#allocation3 + $0x1b0] sm:$0xf] %v770_v62 }
 0x122   : > { %v636_v38 = vor.u32 %v13124_v3, %v633_v27  ;;  %v9828_v13 = vld [vmem:[#allocation3 + $0x1a8] sm:$0xf0]  ;;  %v8075_v27 = vld [vmem:[#allocation3 + $0x180] sm:$0xf] }
 0x123   : > { %v11411_v24 = vpop.f32.mrf.mxu3  ;;  %v11416_v25 = vpop.f32.mrf.mxu0  ;;  %v8096_v0 = vor.u32 %v9828_v13, %v8095_v6  ;;  %v9725_v3 = vld [vmem:[#allocation3 + $0xc8] sm:$0xf0]  ;;  %v8076_v6 = vor.u32 %v9824_v10, %v8075_v27 }
 0x124   : > { %v11418_v18 = vpop.f32.mrf.mxu1  ;;  %2161 = vmatmul.bf16.gmra.mxu2 %v8084_v40 }
 0x128   : > { %v11438_v9 = vpop.f32.mrf.mxu2 }
 0x129   : > { %13174 = vst [vmem:[#allocation34_spill] sm:$0xff] %v11438_v9 }
 0x12b   : > { %v11427_v50 = vpop.f32.mrf.mxu3  ;;  %v1919_v5 = vpop.f32.mrf.mxu0 }
 0x12c   : > { %13173 = vst [vmem:[#allocation33_spill] sm:$0xff] %v11427_v50  ;;  %v2018_v44 = vpop.f32.mrf.mxu1 }
 0x12d   : > { %v11434_v40 = vadd.f32 %v2018_v44, %v1919_v5  ;;  %v637_v5 = vsel %vm10912_vm4, %v629_v59, %v636_v38  ;;  %v833_v44 = vld [vmem:[#allocation3 + $0x1b0] sm:$0x1] }
 0x12e   : > { %1958 = vmatmul.bf16.gmra.mxu0 %v8064_v63  ;;  %772 = vst [vmem:[#allocation3 + $0x1bc] sm:$0xf] %v637_v5  ;;  %v834_v63 = vsel %vm10957_vm7, 0, %v833_v44 }
 0x12f   : > { %835 = vst [vmem:[#allocation3 + $0x1b0] sm:$0x1] %v834_v63  ;;  %v13176_v63 = vshrl.u32 %v10901_v4, 16 }
 0x130   : > { %2652 = vmatmul.bf16.gmra.mxu3 %v8292_v36  ;;  %v13175_v36 = vor.u32 %v10926_v20, %v10924_v19  ;;  %v13177_v20 = vshll.u32 %v10901_v4, 16 }
 0x131   : > { %v851_v41 = vrot.slane %v13176_v63, 4 }
 0x132   : > { %v859_v62 = vrot.slane %v13175_v36, 4  ;;  %v852_v36 = vrot.slane %v13177_v20, 5  ;;  %v9728_v20 = vld [vmem:[#allocation3 + $0xe0] sm:$0xf0] }
 0x133   : > { %v2073_v1 = vpop.f32.mrf.mxu3  ;;  %v11440_v51 = vpop.f32.mrf.mxu0 }
 0x134   : > { %v11442_v48 = vpop.f32.mrf.mxu1  ;;  %2166 = vmatmul.bf16.gmra.mxu2 %v8096_v0  ;;  %v8303_v1 = vld [vmem:[#allocation3 + $0xc0] sm:$0xf]  ;;  %v1069_v44 = vsel %vm11148_vm9, %v859_v62, %v1068_v14 }
 0x135   : > { %v8304_v5 = vor.u32 %v9725_v3, %v8303_v1  ;;  %1070 = vst [vmem:[#allocation3 + $0x2c] sm:$0xf] %v1069_v44  ;;  %v13179_v1 = vshrl.u32 %v10942_v31, 16  ;;  %v8315_v44 = vld [vmem:[#allocation3 + $0xd8] sm:$0xf] }
 0x137   : > { %v2127_v13 = vpop.f32.mrf.mxu2  ;;  %v866_v14 = vrot.slane %v13179_v1, 4 }
 0x13b   : > { %v2075_v17 = vpop.f32.mrf.mxu3  ;;  %v1924_v59 = vpop.f32.mrf.mxu0 }
 0x13c   : > { %v2023_v38 = vpop.f32.mrf.mxu1  ;;  %v853_v17 = vor.u32 %v852_v36, %v851_v41 }
 0x13d   : > { %v2024_v50 = vadd.f32 %v2023_v38, %v1924_v59  ;;  %v8087_v59 = vld [vmem:[#allocation3 + $0x198] sm:$0xf]  ;;  %v9827_v38 = vld [vmem:[#allocation3 + $0x1a0] sm:$0xf0] }
 0x13e   : > { %1963 = vmatmul.bf16.gmra.mxu0 %v8076_v6  ;;  %v854_v3 = vrot.slane %v853_v17, 4 }
 0x13f   : > { %v11457_v0 = vadd.f32 %v2122_v12, %v2024_v50  ;;  %v11459_v10 = vpop.f32.mrf.mxu2  ;;  %v1149_v12 = vld [vmem:[#allocation3 + $0x2c] sm:$0x8]  ;;  %v13182_v50 = vshll.u32 %v10942_v31, 16 }
 0x140   : > { %2657 = vmatmul.bf16.gmra.mxu3 %v8304_v5  ;;  %13178 = vst [vmem:[#allocation35_spill] sm:$0xff] %v11459_v10  ;;  %v856_v4 = vsel %vm11168_vm11, %v854_v3, %v10924_v19  ;;  %v1150_v41 = vsel %vm11179_vm14, 0, %v1149_v12  ;;  %v1072_v10 = vld [vmem:[#allocation3 + $0x44] sm:$0xf] }
 0x141   : > { %1067 = vst [vmem:[#allocation3 + $0x20] sm:$0xf] %v856_v4  ;;  %v864_v6 = vrot.slane %v13182_v50, 5  ;;  %v8316_v4 = vor.u32 %v9728_v20, %v8315_v44  ;;  %v13184_v50 = vshll.u32 %v10936_v28, 16  ;;  %v13186_v20 = vshrl.u32 %v10979_v56, 16 }
 0x142   : > { %1151 = vst [vmem:[#allocation3 + $0x2c] sm:$0x8] %v1150_v41 }
 0x143   : > { %v2618_v27 = vpop.f32.mrf.mxu3  ;;  %v11463_v62 = vpop.f32.mrf.mxu0  ;;  %v867_v5 = vor.u32 %v866_v14, %v864_v6  ;;  %v13183_v14 = vshrl.u32 %v10936_v28, 16 }
 0x144   : > { %13180 = vst [vmem:[#allocation36_spill] sm:$0xff] %v11463_v62  ;;  %v11465_v63 = vpop.f32.mrf.mxu1  ;;  %v8088_v27 = vor.u32 %v9827_v38, %v8087_v59  ;;  %v9769_v59 = vld [vmem:[#allocation6 + $0x78] sm:$0xff] }
 0x145   : > { %13181 = vst [vmem:[#allocation37_spill] sm:$0xff] %v11465_v63  ;;  %v868_v36 = vrot.slane %v867_v5, 4  ;;  %v860_v41 = vrot.slane %v13183_v14, 4  ;;  %v861_v5 = vrot.slane %v13184_v50, 5  ;;  %2708 = vmatpush.bf16.msra.mxu0 %v9769_v59  ;;  %v9830_v14 = vld [vmem:[#allocation3 + $0x1b8] sm:$0xf0] }
 0x146   : > { %v8327_v50 = vld [vmem:[#allocation3 + $0xf0] sm:$0xf] }
 0x147   : > { %v2132_v1 = vpop.f32.mrf.mxu2  ;;  %v1073_v12 = vsel %vm11148_vm9, %v868_v36, %v1072_v10  ;;  %v862_v38 = vor.u32 %v861_v5, %v860_v41  ;;  %v9731_v5 = vld [vmem:[#allocation3 + $0xf8] sm:$0xf0] }
 0x148   : > { %1074 = vst [vmem:[#allocation3 + $0x44] sm:$0xf] %v1073_v12  ;;  %v8099_v12 = vld [vmem:[#allocation3 + $0x1b0] sm:$0xf] }
 0x149   : > { %v863_v10 = vrot.slane %v862_v38, 4 }
 0x14b   : > { %v2620_v17 = vpop.f32.mrf.mxu3  ;;  %v1929_v19 = vpop.f32.mrf.mxu0  ;;  %v865_v28 = vsel %vm11168_vm11, %v863_v10, %v864_v6  ;;  %v1076_v6 = vld [vmem:[#allocation3 + $0x5c] sm:$0xf] }
 0x14c   : > { %v2028_v3 = vpop.f32.mrf.mxu1  ;;  %1071 = vst [vmem:[#allocation3 + $0x38] sm:$0xf] %v865_v28 }
 0x14d   : > { %v2029_v9 = vadd.f32 %v2028_v3, %v1929_v19  ;;  %v13189_v3 = vshll.u32 %v10979_v56, 16 }
 0x14e   : > { %1968 = vmatmul.bf16.gmra.mxu0 %v8088_v27 }
 0x14f   : > { %v11476_v31 = vadd.f32 %v2127_v13, %v2029_v9  ;;  %v11484_v44 = vpop.f32.mrf.mxu2  ;;  %v875_v9 = vrot.slane %v13186_v20, 4  ;;  %v1152_v27 = vld [vmem:[#allocation3 + $0x44] sm:$0x8]  ;;  %v8100_v20 = vor.u32 %v9830_v14, %v8099_v12  ;;  %v13191_v12 = vshll.u32 %v10975_v52, 16 }
 0x150   : > { %2662 = vmatmul.bf16.gmra.mxu3 %v8316_v4  ;;  %13185 = vst [vmem:[#allocation38_spill] sm:$0xff] %v11484_v44  ;;  %v1153_v19 = vsel %vm11179_vm14, 0, %v1152_v27  ;;  %v873_v4 = vrot.slane %v13189_v3, 5  ;;  %v9768_v3 = vld [vmem:[#allocation6 + $0x70] sm:$0xff] }
 0x151   : > { %1154 = vst [vmem:[#allocation3 + $0x44] sm:$0x8] %v1153_v19  ;;  %2709 = vmatpush.bf16.msra.mxu0 %v9768_v3  ;;  %v870_v14 = vrot.slane %v13191_v12, 5  ;;  %v9780_v3 = vld [vmem:[#allocation3 + $0x28] sm:$0xf0] }
 0x152   : > { %v876_v41 = vor.u32 %v875_v9, %v873_v4  ;;  %v13190_v9 = vshrl.u32 %v10975_v52, 16  ;;  %v9734_v12 = vld [vmem:[#allocation3 + $0x110] sm:$0xf0] }
 0x153   : > { %v11482_v17 = vpop.f32.mrf.mxu3  ;;  %v11488_v13 = vpop.f32.mrf.mxu0 }
 0x154   : > { %13187 = vst [vmem:[#allocation39_spill] sm:$0xff] %v11488_v13  ;;  %v11490_v36 = vpop.f32.mrf.mxu1  ;;  %v877_v59 = vrot.slane %v876_v41, 4  ;;  %v869_v41 = vrot.slane %v13190_v9, 4 }
 0x155   : > { %13188 = vst [vmem:[#allocation40_spill] sm:$0xff] %v11490_v36  ;;  %v8328_v36 = vor.u32 %v9731_v5, %v8327_v50  ;;  %v13193_v5 = vshrl.u32 %v11011_v39, 16 }
 0x156   : > { %v1077_v27 = vsel %vm11148_vm9, %v877_v59, %v1076_v6  ;;  %v871_v13 = vor.u32 %v870_v14, %v869_v41  ;;  %v8339_v41 = vld [vmem:[#allocation3 + $0x108] sm:$0xf] }
 0x157   : > { %v2137_v44 = vpop.f32.mrf.mxu2  ;;  %1078 = vst [vmem:[#allocation3 + $0x5c] sm:$0xf] %v1077_v27  ;;  %v884_v59 = vrot.slane %v13193_v5, 4 }
 0x15b   : > { %v11498_v38 = vpop.f32.mrf.mxu3  ;;  %v1934_v10 = vpop.f32.mrf.mxu0 }
 0x15c   : > { %v2033_v28 = vpop.f32.mrf.mxu1 }
 0x15d   : > { %v2034_v56 = vadd.f32 %v2033_v28, %v1934_v10  ;;  %v13196_v28 = vshll.u32 %v11011_v39, 16 }
 0x15e   : > { %1973 = vmatmul.bf16.gmra.mxu0 %v8100_v20  ;;  %v872_v20 = vrot.slane %v871_v13, 4  ;;  %v1155_v10 = vld [vmem:[#allocation3 + $0x5c] sm:$0x8] }
 0x15f   : > { %v11502_v19 = vadd.f32 %v2132_v1, %v2034_v56  ;;  %v11510_v50 = vpop.f32.mrf.mxu2  ;;  %v1156_v52 = vsel %vm11179_vm14, 0, %v1155_v10  ;;  %v882_v27 = vrot.slane %v13196_v28, 5  ;;  %v7903_v56 = vld [vmem:[#allocation3 + $0x20] sm:$0xf]  ;;  %v8340_v10 = vor.u32 %v9734_v12, %v8339_v41 }
 0x160   : > { %2667 = vmatmul.bf16.gmra.mxu3 %v8328_v36  ;;  %13192 = vst [vmem:[#allocation41_spill] sm:$0xff] %v11510_v50  ;;  %v874_v36 = vsel %vm11168_vm11, %v872_v20, %v873_v4  ;;  %v7904_v13 = vor.u32 %v9780_v3, %v7903_v56  ;;  %v1080_v4 = vld [vmem:[#allocation3 + $0x74] sm:$0xf]  ;;  %v13198_v56 = vshll.u32 %v11004_v30, 16 }
 0x161   : > { %1075 = vst [vmem:[#allocation3 + $0x50] sm:$0xf] %v874_v36  ;;  %v885_v9 = vor.u32 %v884_v59, %v882_v27  ;;  %v13197_v59 = vshrl.u32 %v11004_v30, 16 }
 0x162   : > { %1157 = vst [vmem:[#allocation3 + $0x5c] sm:$0x8] %v1156_v52  ;;  %v879_v3 = vrot.slane %v13198_v56, 5  ;;  %v9737_v56 = vld [vmem:[#allocation3 + $0x128] sm:$0xf0] }
 0x163   : > { %v11508_v63 = vpop.f32.mrf.mxu3  ;;  %v11514_v6 = vpop.f32.mrf.mxu0  ;;  %v886_v14 = vrot.slane %v885_v9, 4  ;;  %v878_v28 = vrot.slane %v13197_v59, 4 }
 0x164   : > { %13194 = vst [vmem:[#allocation42_spill] sm:$0xff] %v11514_v6  ;;  %v11516_v1 = vpop.f32.mrf.mxu1 }
 0x165   : > { %13195 = vst [vmem:[#allocation43_spill] sm:$0xff] %v11516_v1  ;;  %v9767_v1 = vld [vmem:[#allocation6 + $0x68] sm:$0xff]  ;;  %v1081_v39 = vsel %vm11148_vm9, %v886_v14, %v1080_v4  ;;  %v880_v9 = vor.u32 %v879_v3, %v878_v28  ;;  %v13202_v4 = vshll.u32 %v11049_v34, 16  ;;  %v8351_v28 = vld [vmem:[#allocation3 + $0x120] sm:$0xf] }
 0x166   : > { %2710 = vmatpush.bf16.msra.mxu0 %v9767_v1  ;;  %1082 = vst [vmem:[#allocation3 + $0x74] sm:$0xf] %v1081_v39  ;;  %v7915_v39 = vld [vmem:[#allocation3 + $0x38] sm:$0xf] }
 0x167   : > { %v2142_v50 = vpop.f32.mrf.mxu2  ;;  %v881_v12 = vrot.slane %v880_v9, 4 }
 0x16b   : > { %v11524_v5 = vpop.f32.mrf.mxu3  ;;  %v1939_v20 = vpop.f32.mrf.mxu0 }
 0x16c   : > { %v2038_v6 = vpop.f32.mrf.mxu1 }
 0x16d   : > { %v2039_v36 = vadd.f32 %v2038_v6, %v1939_v20  ;;  %v13200_v6 = vshrl.u32 %v11049_v34, 16  ;;  %v891_v20 = vrot.slane %v13202_v4, 5 }
 0x16e   : > { %2086 = vmatmul.bf16.vlgmr.msrb.gmra.mxu0 %v7904_v13  ;;  %v883_v13 = vsel %vm11168_vm11, %v881_v12, %v882_v27  ;;  %v1084_v27 = vld [vmem:[#allocation3 + $0x8c] sm:$0xf] }
 0x16f   : > { %v11528_v52 = vadd.f32 %v2137_v44, %v2039_v36  ;;  %v11536_v41 = vpop.f32.mrf.mxu2  ;;  %v893_v1 = vrot.slane %v13200_v6, 4  ;;  %v1158_v44 = vld [vmem:[#allocation3 + $0x74] sm:$0x8]  ;;  %1079 = vst [vmem:[#allocation3 + $0x68] sm:$0xf] %v883_v13 }
 0x170   : > { %2672 = vmatmul.bf16.gmra.mxu3 %v8340_v10  ;;  %13199 = vst [vmem:[#allocation44_spill] sm:$0xff] %v11536_v41  ;;  %v1159_v30 = vsel %vm11179_vm14, 0, %v1158_v44  ;;  %v9766_v10 = vld [vmem:[#allocation6 + $0x60] sm:$0xff]  ;;  %v9783_v36 = vld [vmem:[#allocation3 + $0x40] sm:$0xf0]  ;;  %v8352_v41 = vor.u32 %v9737_v56, %v8351_v28  ;;  %v13205_v56 = vshrl.u32 %v11081_v47, 16 }
 0x171   : > { %1160 = vst [vmem:[#allocation3 + $0x74] sm:$0x8] %v1159_v30  ;;  %v894_v59 = vor.u32 %v893_v1, %v891_v20  ;;  %2711 = vmatpush.bf16.msra.mxu0 %v9766_v10  ;;  %v7916_v6 = vor.u32 %v9783_v36, %v7915_v39  ;;  %v13203_v1 = vshrl.u32 %v11036_v2, 16  ;;  %v13204_v10 = vshll.u32 %v11036_v2, 16 }
 0x173   : > { %v11534_v62 = vpop.f32.mrf.mxu3  ;;  %v11540_v14 = vpop.f32.mrf.mxu0  ;;  %v895_v3 = vrot.slane %v894_v59, 4  ;;  %v887_v4 = vrot.slane %v13203_v1, 4  ;;  %v888_v59 = vrot.slane %v13204_v10, 5  ;;  %v9786_v1 = vld [vmem:[#allocation3 + $0x58] sm:$0xf0] }
 0x174   : > { %13201 = vst [vmem:[#allocation45_spill] sm:$0xff] %v11540_v14  ;;  %v8363_v10 = vld [vmem:[#allocation3 + $0x138] sm:$0xf] }
 0x175   : > { %v1085_v34 = vsel %vm11148_vm9, %v895_v3, %v1084_v27  ;;  %v889_v39 = vor.u32 %v888_v59, %v887_v4  ;;  %v902_v3 = vrot.slane %v13205_v56, 4  ;;  %v9740_v59 = vld [vmem:[#allocation3 + $0x140] sm:$0xf0] }
 0x176   : > { %1086 = vst [vmem:[#allocation3 + $0x8c] sm:$0xf] %v1085_v34  ;;  %v9765_v34 = vld [vmem:[#allocation6 + $0x58] sm:$0xff]  ;;  %v1088_v56 = vld [vmem:[#allocation3 + $0xa4] sm:$0xf] }
 0x177   : > { %v2147_v44 = vpop.f32.mrf.mxu2  ;;  %v890_v28 = vrot.slane %v889_v39, 4  ;;  %2712 = vmatpush.bf16.msra.mxu0 %v9765_v34  ;;  %v13210_v34 = vshll.u32 %v11064_v54, 16 }
 0x17b   : > { %v11548_v9 = vpop.f32.mrf.mxu3  ;;  %v1944_v12 = vpop.f32.mrf.mxu0 }
 0x17c   : > { %v2044_v13 = vadd.f32 %v11272_v29, %v1944_v12  ;;  %v892_v29 = vsel %vm11168_vm11, %v890_v28, %v891_v20 }
 0x17d   : > { %1083 = vst [vmem:[#allocation3 + $0x80] sm:$0xf] %v892_v29 }
 0x17e   : > { %v11553_v30 = vadd.f32 %v2142_v50, %v2044_v13  ;;  %2091 = vmatmul.bf16.gmra.mxu0 %v7916_v6  ;;  %v1161_v50 = vld [vmem:[#allocation3 + $0x8c] sm:$0x8]  ;;  %v7927_v13 = vld [vmem:[#allocation3 + $0x50] sm:$0xf] }
 0x17f   : > { %v11567_v6 = vpop.f32.mrf.mxu2  ;;  %v1162_v2 = vsel %vm11179_vm14, 0, %v1161_v50  ;;  %v7928_v28 = vor.u32 %v9786_v1, %v7927_v13 }
 0x180   : > { %2677 = vmatmul.bf16.gmra.mxu3 %v8352_v41  ;;  %13207 = vst [vmem:[#allocation47_spill] sm:$0xff] %v11567_v6  ;;  %v13208_v41 = vshll.u32 %v11081_v47, 16  ;;  %v8364_v6 = vor.u32 %v9740_v59, %v8363_v10  ;;  %v13211_v59 = vshrl.u32 %v11111_v61, 16 }
 0x181   : > { %1163 = vst [vmem:[#allocation3 + $0x8c] sm:$0x8] %v1162_v2 }
 0x182   : > { %v900_v12 = vrot.slane %v13208_v41, 5 }
 0x183   : > { %v11559_v36 = vpop.f32.mrf.mxu3  ;;  %v11563_v27 = vpop.f32.mrf.mxu0 }
 0x184   : > { %13206 = vst [vmem:[#allocation46_spill] sm:$0xff] %v11563_v27  ;;  %v903_v4 = vor.u32 %v902_v3, %v900_v12  ;;  %v13209_v3 = vshrl.u32 %v11064_v54, 16 }
 0x186   : > { %v904_v39 = vrot.slane %v903_v4, 4  ;;  %v896_v41 = vrot.slane %v13209_v3, 4  ;;  %v897_v4 = vrot.slane %v13210_v34, 5  ;;  %v9743_v34 = vld [vmem:[#allocation3 + $0x158] sm:$0xf0] }
 0x187   : > { %v2152_v13 = vpop.f32.mrf.mxu2 }
 0x188   : > { %v1089_v50 = vsel %vm11148_vm9, %v904_v39, %v1088_v56  ;;  %v898_v1 = vor.u32 %v897_v4, %v896_v41  ;;  %v911_v39 = vrot.slane %v13211_v59, 4  ;;  %v8375_v41 = vld [vmem:[#allocation3 + $0x150] sm:$0xf] }
 0x189   : > { %1090 = vst [vmem:[#allocation3 + $0xa4] sm:$0xf] %v1089_v50  ;;  %v7939_v50 = vld [vmem:[#allocation3 + $0x68] sm:$0xf] }
 0x18a   : > { %v899_v10 = vrot.slane %v898_v1, 4 }
 0x18b   : > { %v11573_v20 = vpop.f32.mrf.mxu3  ;;  %v1949_v29 = vpop.f32.mrf.mxu0 }
 0x18c   : > { %v2049_v47 = vadd.f32 %v11303_v55, %v1949_v29 }
 0x18e   : > { %v11578_v2 = vadd.f32 %v2147_v44, %v2049_v47  ;;  %2096 = vmatmul.bf16.gmra.mxu0 %v7928_v28  ;;  %v9764_v44 = vld [vmem:[#allocation6 + $0x50] sm:$0xff]  ;;  %v901_v28 = vsel %vm11168_vm11, %v899_v10, %v900_v12  ;;  %v9789_v47 = vld [vmem:[#allocation3 + $0x70] sm:$0xf0]  ;;  %v1092_v10 = vld [vmem:[#allocation3 + $0xbc] sm:$0xf] }
 0x18f   : > { %1087 = vst [vmem:[#allocation3 + $0x98] sm:$0xf] %v901_v28  ;;  %2713 = vmatpush.bf16.msra.mxu0 %v9764_v44  ;;  %v11596_v4 = vpop.f32.mrf.mxu2  ;;  %v7940_v12 = vor.u32 %v9789_v47, %v7939_v50  ;;  %v9777_v50 = vld [vmem:[#allocation6 + $0xb8] sm:$0xff] }
 0x190   : > { %2682 = vmatmul.bf16.gmra.mxu3 %v8364_v6  ;;  %v1164_v56 = vld [vmem:[#allocation3 + $0xa4] sm:$0x8]  ;;  %v13213_v6 = vshll.u32 %v11111_v61, 16  ;;  %13214 = vst [vmem:[#allocation49_spill] sm:$0xff] %v11596_v4  ;;  %2807 = vmatpush.bf16.msrb.mxu1 %v9777_v50  ;;  %v9775_v50 = vld [vmem:[#allocation6 + $0xa8] sm:$0xff] }
 0x191   : > { %v1165_v54 = vsel %vm11179_vm14, 0, %v1164_v56 }
 0x192   : > { %v909_v29 = vrot.slane %v13213_v6, 5  ;;  %1166 = vst [vmem:[#allocation3 + $0xa4] sm:$0x8] %v1165_v54  ;;  %v13216_v6 = vshll.u32 %v11099_v33, 16 }
 0x193   : > { %v11584_v27 = vpop.f32.mrf.mxu3  ;;  %v11588_v55 = vpop.f32.mrf.mxu0 }
 0x194   : > { %13212 = vst [vmem:[#allocation48_spill] sm:$0xff] %v11588_v55  ;;  %v912_v3 = vor.u32 %v911_v39, %v909_v29  ;;  %v8376_v55 = vor.u32 %v9743_v34, %v8375_v41  ;;  %v13215_v39 = vshrl.u32 %v11099_v33, 16 }
 0x196   : > { %v913_v1 = vrot.slane %v912_v3, 4  ;;  %v905_v54 = vrot.slane %v13215_v39, 4  ;;  %v906_v3 = vrot.slane %v13216_v6, 5  ;;  %v13219_v39 = vshrl.u32 %v11172_v35, 16  ;;  %v8387_v6 = vld [vmem:[#allocation3 + $0x168] sm:$0xf] }
 0x198   : > { %v1093_v61 = vsel %vm11148_vm9, %v913_v1, %v1092_v10  ;;  %v907_v47 = vor.u32 %v906_v3, %v905_v54  ;;  %v9763_v1 = vld [vmem:[#allocation6 + $0x48] sm:$0xff]  ;;  %v848_v54 = vrot.slane %v13219_v39, 4  ;;  %v9746_v3 = vld [vmem:[#allocation3 + $0x170] sm:$0xf0] }
 0x199   : > { %1094 = vst [vmem:[#allocation3 + $0xbc] sm:$0xf] %v1093_v61  ;;  %2714 = vmatpush.bf16.msra.mxu0 %v9763_v1  ;;  %v13218_v61 = vshll.u32 %v11172_v35, 16  ;;  %v9762_v39 = vld [vmem:[#allocation6 + $0x40] sm:$0xff] }
 0x19a   : > { %v908_v41 = vrot.slane %v907_v47, 4 }
 0x19b   : > { %v11598_v59 = vpop.f32.mrf.mxu3  ;;  %v1954_v28 = vpop.f32.mrf.mxu0 }
 0x19c   : > { %v2054_v44 = vadd.f32 %v11334_v37, %v1954_v28  ;;  %v2157_v37 = vpop.f32.mrf.mxu2  ;;  %v9792_v28 = vld [vmem:[#allocation3 + $0x88] sm:$0xf0] }
 0x19d   : > { %2715 = vmatpush.bf16.msra.mxu0 %v9762_v39  ;;  %v8399_v39 = vld [vmem:[#allocation3 + $0x180] sm:$0xf] }
 0x19e   : > { %v11603_v56 = vadd.f32 %v2152_v13, %v2054_v44  ;;  %2101 = vmatmul.bf16.gmra.mxu0 %v7940_v12  ;;  %v9776_v13 = vld [vmem:[#allocation6 + $0xb0] sm:$0xff]  ;;  %v910_v12 = vsel %vm11168_vm11, %v908_v41, %v909_v29  ;;  %v846_v44 = vrot.slane %v13218_v61, 5 }
 0x19f   : > { %1091 = vst [vmem:[#allocation3 + $0xb0] sm:$0xf] %v910_v12  ;;  %2808 = vmatpush.bf16.msrb.mxu1 %v9776_v13  ;;  %v8388_v12 = vor.u32 %v9746_v3, %v8387_v6 }
 0x1a0   : > { %2687 = vmatmul.bf16.gmra.mxu3 %v8376_v55  ;;  %v1167_v10 = vld [vmem:[#allocation3 + $0xbc] sm:$0x8]  ;;  %v7951_v55 = vld [vmem:[#allocation3 + $0x80] sm:$0xf]  ;;  %v849_v29 = vor.u32 %v848_v54, %v846_v44 }
 0x1a1   : > { %v1168_v33 = vsel %vm11179_vm14, 0, %v1167_v10  ;;  %v7952_v41 = vor.u32 %v9792_v28, %v7951_v55  ;;  %v9773_v55 = vld [vmem:[#allocation6 + $0x98] sm:$0xff]  ;;  %v13221_v28 = vshrl.u32 %v11144_v58, 16 }
 0x1a2   : > { %1169 = vst [vmem:[#allocation3 + $0xbc] sm:$0x8] %v1168_v33  ;;  %v850_v13 = vrot.slane %v849_v29, 4  ;;  %v9774_v33 = vld [vmem:[#allocation6 + $0xa0] sm:$0xff]  ;;  %v9772_v29 = vld [vmem:[#allocation6 + $0x90] sm:$0xff] }
 0x1a3   : > { %v11609_v4 = vpop.f32.mrf.mxu3  ;;  %v11611_v34 = vpop.f32.mrf.mxu0  ;;  %2809 = vmatpush.bf16.msrb.mxu1 %v9775_v50  ;;  %v842_v54 = vrot.slane %v13221_v28, 4 }
 0x1a4   : > { %13217 = vst [vmem:[#allocation50_spill] sm:$0xff] %v11611_v34  ;;  %v1064_v34 = vld [vmem:[#allocation3 + $0x14] sm:$0xf]  ;;  %v11624_v14 = vpop.f32.mrf.mxu2 }
 0x1a5   : > { %13220 = vst [vmem:[#allocation51_spill] sm:$0xff] %v11624_v14  ;;  %v1065_v35 = vsel %vm11148_vm9, %v850_v13, %v1064_v34  ;;  %v9925_v13 = vld [vmem:[#allocation6 + $0x1f8] sm:$0xff] }
 0x1a6   : > { %1066 = vst [vmem:[#allocation3 + $0x14] sm:$0xf] %v1065_v35  ;;  %v9795_v35 = vld [vmem:[#allocation3 + $0xa0] sm:$0xf0]  ;;  %3559 = vmatpush.bf16.msra.mxu3 %v9925_v13 }
 0x1a7   : > { %2810 = vmatpush.bf16.msrb.mxu1 %v9774_v33 }
 0x1ab   : > { %v11621_v47 = vpop.f32.mrf.mxu3  ;;  %v1959_v1 = vpop.f32.mrf.mxu0  ;;  %2811 = vmatpush.bf16.msrb.mxu1 %v9773_v55  ;;  %v9771_v55 = vld [vmem:[#allocation6 + $0x88] sm:$0xff] }
 0x1ac   : > { %v2059_v10 = vadd.f32 %v11361_v53, %v1959_v1  ;;  %v13222_v53 = vshll.u32 %v11144_v58, 16  ;;  %v2162_v33 = vpop.f32.mrf.mxu2 }
 0x1ad   : > { %v1146_v1 = vld [vmem:[#allocation3 + $0x14] sm:$0x8] }
 0x1ae   : > { %v11628_v61 = vadd.f32 %v2157_v37, %v2059_v10  ;;  %2106 = vmatmul.bf16.gmra.mxu0 %v7952_v41  ;;  %v843_v6 = vrot.slane %v13222_v53, 5  ;;  %v1147_v58 = vsel %vm11179_vm14, 0, %v1146_v1 }
 0x1af   : > { %2812 = vmatpush.bf16.msrb.mxu1 %v9772_v29  ;;  %1148 = vst [vmem:[#allocation3 + $0x14] sm:$0x8] %v1147_v58  ;;  %v9933_v29 = vld [vmem:[#allocation6 + $0x238] sm:$0xff] }
 0x1b0   : > { %2692 = vmatmul.bf16.gmra.mxu3 %v8388_v12  ;;  %v844_v50 = vor.u32 %v843_v6, %v842_v54  ;;  %v7963_v12 = vld [vmem:[#allocation3 + $0x98] sm:$0xf]  ;;  %3658 = vmatpush.bf16.msrb.mxu0 %v9933_v29  ;;  %v9917_v29 = vld [vmem:[#allocation6 + $0x1b8] sm:$0xff] }
 0x1b1   : > { %v7964_v54 = vor.u32 %v9795_v35, %v7963_v12  ;;  %3460 = vmatpush.bf16.msrb.mxu2 %v9917_v29 }
 0x1b2   : > { %v845_v41 = vrot.slane %v844_v50, 4 }
 0x1b3   : > { %v2653_v3 = vpop.f32.mrf.mxu3  ;;  %v11637_v37 = vpop.f32.mrf.mxu0  ;;  %2813 = vmatpush.bf16.msrb.mxu1 %v9771_v55 }
 0x1b4   : > { %v11635_v34 = vadd.f32 %v2653_v3, %v11457_v0  ;;  %13223 = vst [vmem:[#allocation52_spill] sm:$0xff] %v11637_v37  ;;  %v847_v10 = vsel %vm11168_vm11, %v845_v41, %v846_v44  ;;  %v9749_v0 = vld [vmem:[#allocation3 + $0x188] sm:$0xf0]  ;;  %v9770_v3 = vld [vmem:[#allocation6 + $0x80] sm:$0xff] }
 0x1b5   : > { %1062 = vst [vmem:[#allocation3 + $0x8] sm:$0xf] %v847_v10  ;;  %v8400_v6 = vor.u32 %v9749_v0, %v8399_v39  ;;  %v11648_v10 = vpop.f32.mrf.mxu2 }
 0x1b6   : > { %v9702_v1 = vld [vmem:[#allocation3 + $0x10] sm:$0xf0]  ;;  %13224 = vst [vmem:[#allocation53_spill] sm:$0xff] %v11648_v10  ;;  %v8221_v10 = vld [vmem:[#allocation3 + $0x24] sm:$0xf0] }
 0x1b7   : > { %2814 = vmatpush.bf16.msrb.mxu1 %v9770_v3  ;;  %v8227_v3 = vld [vmem:[#allocation3 + $0x20] sm:$0xf] }
 0x1bb   : > { %v11643_v28 = vpop.f32.mrf.mxu3  ;;  %v1964_v53 = vpop.f32.mrf.mxu0 }
 0x1bc   : > { %v2064_v44 = vadd.f32 %v11387_v21, %v1964_v53  ;;  %v8215_v41 = vld [vmem:[#allocation3 + $0x8] sm:$0xf]  ;;  %v7975_v21 = vld [vmem:[#allocation3 + $0xb0] sm:$0xf] }
 0x1bd   : > { %v8216_v13 = vor.u32 %v9702_v1, %v8215_v41 }
 0x1be   : > { %v11646_v50 = vadd.f32 %v2162_v33, %v2064_v44  ;;  %2111 = vmatmul.bf16.gmra.mxu0 %v7964_v54  ;;  %v9798_v33 = vld [vmem:[#allocation3 + $0xb8] sm:$0xf0]  ;;  %v2167_v54 = vpop.f32.mrf.mxu2  ;;  %v9705_v44 = vld [vmem:[#allocation3 + $0x28] sm:$0xf0] }
 0x1bf   : > { %2815 = vmatmul.bf16.vlgmr.msrb.gmra.mxu1 %v8216_v13  ;;  %v7976_v0 = vor.u32 %v9798_v33, %v7975_v21  ;;  %v8228_v41 = vor.u32 %v9705_v44, %v8227_v3  ;;  %v8209_v21 = vld [vmem:[#allocation3 + $0xc] sm:$0xf0] }
 0x1c0   : > { %2697 = vmatmul.bf16.gmra.mxu3 %v8400_v6 }
 0x1c3   : > { %v2658_v58 = vpop.f32.mrf.mxu3  ;;  %v11653_v35 = vpop.f32.mrf.mxu0 }
 0x1c4   : > { %v11651_v12 = vadd.f32 %v2658_v58, %v11476_v31  ;;  %13225 = vst [vmem:[#allocation54_spill] sm:$0xff] %v11653_v35  ;;  %v9700_v58 = vld [vmem:[#allocation3 + $0x4] sm:$0xf] }
 0x1cb   : > { %v11655_v39 = vpop.f32.mrf.mxu3  ;;  %v1969_v55 = vpop.f32.mrf.mxu0 }
 0x1cc   : > { %v2069_v53 = vadd.f32 %v11411_v24, %v1969_v55  ;;  %v8212_v24 = vor.u32 %v9700_v58, %v8209_v21 }
 0x1ce   : > { %v11658_v6 = vadd.f32 %v2167_v54, %v2069_v53  ;;  %2116 = vmatmul.bf16.gmra.mxu0 %v7976_v0  ;;  %v9924_v54 = vld [vmem:[#allocation6 + $0x1f0] sm:$0xff]  ;;  %v8239_v0 = vld [vmem:[#allocation3 + $0x38] sm:$0xf] }
 0x1cf   : > { %2820 = vmatmul.bf16.gmra.mxu1 %v8228_v41  ;;  %3560 = vmatpush.bf16.msra.mxu3 %v9924_v54  ;;  %v9708_v53 = vld [vmem:[#allocation3 + $0x40] sm:$0xf0]  ;;  %v9711_v54 = vld [vmem:[#allocation3 + $0x58] sm:$0xf0] }
 0x1d0   : > { %v8240_v3 = vor.u32 %v9708_v53, %v8239_v0  ;;  %v9932_v41 = vld [vmem:[#allocation6 + $0x230] sm:$0xff] }
 0x1d1   : > { %3659 = vmatpush.bf16.msrb.mxu0 %v9932_v41 }
 0x1d3   : > { %v2663_v31 = vpop.f32.mrf.mxu3  ;;  %v11663_v13 = vpop.f32.mrf.mxu0 }
 0x1d4   : > { %v11661_v1 = vadd.f32 %v2663_v31, %v11502_v19  ;;  %13226 = vst [vmem:[#allocation55_spill] sm:$0xff] %v11663_v13  ;;  %v9916_v31 = vld [vmem:[#allocation6 + $0x1b0] sm:$0xff]  ;;  %v9703_v13 = vld [vmem:[#allocation3 + $0x1c] sm:$0xf] }
 0x1d5   : > { %3461 = vmatpush.bf16.msrb.mxu2 %v9916_v31  ;;  %v8224_v21 = vor.u32 %v9703_v13, %v8221_v10  ;;  %v9915_v10 = vld [vmem:[#allocation6 + $0x1a8] sm:$0xff] }
 0x1d6   : > { %v9923_v13 = vld [vmem:[#allocation6 + $0x1e8] sm:$0xff] }
 0x1d7   : > { %3561 = vmatpush.bf16.msra.mxu3 %v9923_v13 }
 0x1d9   : > { %3462 = vmatpush.bf16.msrb.mxu2 %v9915_v10 }
 0x1db   : > { %v11665_v33 = vpop.f32.mrf.mxu3  ;;  %v1974_v55 = vpop.f32.mrf.mxu0 }
 0x1de   : > { %2716 = vmatmul.bf16.vlgmr.msra.gmra.mxu0 %v8212_v24  ;;  %v8251_v24 = vld [vmem:[#allocation3 + $0x50] sm:$0xf] }
 0x1df   : > { %2825 = vmatmul.bf16.gmra.mxu1 %v8240_v3  ;;  %v8252_v0 = vor.u32 %v9711_v54, %v8251_v24 }
 0x1e3   : > { %v2668_v44 = vpop.f32.mrf.mxu3  ;;  %v1976_v19 = vpop.f32.mrf.mxu0 }
 0x1e4   : > { %v11668_v29 = vadd.f32 %v2668_v44, %v11528_v52  ;;  %v9706_v44 = vld [vmem:[#allocation3 + $0x34] sm:$0xf]  ;;  %v8233_v19 = vld [vmem:[#allocation3 + $0x3c] sm:$0xf0] }
 0x1e5   : > { %v8236_v31 = vor.u32 %v9706_v44, %v8233_v19  ;;  %v8245_v44 = vld [vmem:[#allocation3 + $0x54] sm:$0xf0] }
 0x1eb   : > { %v11670_v58 = vpop.f32.mrf.mxu3  ;;  %v2087_v55 = vpop.f32.mrf.mxu0 }
 0x1ec   : > { %v9714_v55 = vld [vmem:[#allocation3 + $0x70] sm:$0xf0] }
 0x1ee   : > { %2721 = vmatmul.bf16.gmra.mxu0 %v8224_v21  ;;  %v8263_v21 = vld [vmem:[#allocation3 + $0x68] sm:$0xf] }
 0x1ef   : > { %2830 = vmatmul.bf16.gmra.mxu1 %v8252_v0  ;;  %v8264_v24 = vor.u32 %v9714_v55, %v8263_v21 }
 0x1f3   : > { %v2673_v53 = vpop.f32.mrf.mxu3  ;;  %v2089_v3 = vpop.f32.mrf.mxu0 }
 0x1f4   : > { %v11673_v52 = vadd.f32 %v2673_v53, %v11553_v30  ;;  %v1996_v30 = vadd.f32 %v11310_v11, %v11308_v8  ;;  %v8275_v8 = vld [vmem:[#allocation3 + $0x80] sm:$0xf]  ;;  %v9717_v11 = vld [vmem:[#allocation3 + $0x88] sm:$0xf0] }
 0x1f5   : > { %v8276_v21 = vor.u32 %v9717_v11, %v8275_v8  ;;  %v13228_v11 = vld [vmem:[#allocation30_spill] sm:$0xff] }
 0x1fb   : > { %v11675_v41 = vpop.f32.mrf.mxu3  ;;  %v2092_v35 = vpop.f32.mrf.mxu0 }
 0x1fc   : > { %v11678_v14 = vadd.f32 %v2092_v35, %v11290_v15  ;;  %v9931_v15 = vld [vmem:[#allocation6 + $0x228] sm:$0xff]  ;;  %v9709_v35 = vld [vmem:[#allocation3 + $0x4c] sm:$0xf] }
 0x1fd   : > { %3660 = vmatpush.bf16.msrb.mxu0 %v9931_v15  ;;  %v9712_v15 = vld [vmem:[#allocation3 + $0x64] sm:$0xf] }
 0x1fe   : > { %2726 = vmatmul.bf16.gmra.mxu0 %v8236_v31  ;;  %v8248_v31 = vor.u32 %v9709_v35, %v8245_v44 }
 0x1ff   : > { %2835 = vmatmul.bf16.gmra.mxu1 %v8264_v24 }
 0x203   : > { %v2678_v54 = vpop.f32.mrf.mxu3  ;;  %v2094_v53 = vpop.f32.mrf.mxu0 }
 0x204   : > { %v11683_v0 = vadd.f32 %v2678_v54, %v11578_v2  ;;  %v11685_v3 = vadd.f32 %v2094_v53, %v1996_v30  ;;  %v2001_v2 = vadd.f32 %v11340_v7, %v11338_v22  ;;  %v9914_v54 = vld [vmem:[#allocation6 + $0x1a0] sm:$0xff]  ;;  %v8287_v22 = vld [vmem:[#allocation3 + $0x98] sm:$0xf]  ;;  %v9720_v7 = vld [vmem:[#allocation3 + $0xa0] sm:$0xf0] }
 0x205   : > { %3463 = vmatpush.bf16.msrb.mxu2 %v9914_v54  ;;  %v8288_v8 = vor.u32 %v9720_v7, %v8287_v22  ;;  %v9922_v54 = vld [vmem:[#allocation6 + $0x1e0] sm:$0xff] }
 0x206   : > { %3562 = vmatpush.bf16.msra.mxu3 %v9922_v54  ;;  %v9930_v7 = vld [vmem:[#allocation6 + $0x220] sm:$0xff] }
 0x207   : > { %3661 = vmatpush.bf16.msrb.mxu0 %v9930_v7 }
 0x20b   : > { %v11687_v19 = vpop.f32.mrf.mxu3  ;;  %v2097_v10 = vpop.f32.mrf.mxu0 }
 0x20c   : > { %v11690_v13 = vadd.f32 %v2097_v10, %v11324_v43  ;;  %v8257_v43 = vld [vmem:[#allocation3 + $0x6c] sm:$0xf0] }
 0x20d   : > { %v8260_v44 = vor.u32 %v9712_v15, %v8257_v43  ;;  %v9913_v15 = vld [vmem:[#allocation6 + $0x198] sm:$0xff] }
 0x20e   : > { %2731 = vmatmul.bf16.gmra.mxu0 %v8248_v31  ;;  %3464 = vmatpush.bf16.msrb.mxu2 %v9913_v15  ;;  %v8269_v43 = vld [vmem:[#allocation3 + $0x84] sm:$0xf0] }
 0x20f   : > { %2840 = vmatmul.bf16.gmra.mxu1 %v8276_v21 }
 0x213   : > { %v2683_v55 = vpop.f32.mrf.mxu3  ;;  %v2099_v30 = vpop.f32.mrf.mxu0 }
 0x214   : > { %v11695_v24 = vadd.f32 %v2683_v55, %v11603_v56  ;;  %v11697_v53 = vadd.f32 %v2099_v30, %v2001_v2  ;;  %v13227_v56 = vld [vmem:[#allocation29_spill] sm:$0xff] }
 0x215   : > { %v2006_v21 = vadd.f32 %v13228_v11, %v13227_v56 }
 0x21b   : > { %v11699_v35 = vpop.f32.mrf.mxu3  ;;  %v2102_v31 = vpop.f32.mrf.mxu0 }
 0x21c   : > { %v11702_v10 = vadd.f32 %v2102_v31, %v11353_v49  ;;  %v9715_v49 = vld [vmem:[#allocation3 + $0x7c] sm:$0xf] }
 0x21d   : > { %v8272_v31 = vor.u32 %v9715_v49, %v8269_v43  ;;  %v11723_v49 = vpop.f32.mrf.mxu1  ;;  %v8281_v43 = vld [vmem:[#allocation3 + $0x9c] sm:$0xf0] }
 0x21e   : > { %2736 = vmatmul.bf16.gmra.mxu0 %v8260_v44 }
 0x21f   : > { %2845 = vmatmul.bf16.gmra.mxu1 %v8288_v8  ;;  %v9723_v8 = vld [vmem:[#allocation3 + $0xb8] sm:$0xf0] }
 0x223   : > { %v2688_v55 = vpop.f32.mrf.mxu3  ;;  %v2104_v30 = vpop.f32.mrf.mxu0 }
 0x224   : > { %v11707_v2 = vadd.f32 %v2688_v55, %v11628_v61  ;;  %v11709_v37 = vadd.f32 %v2104_v30, %v2006_v21  ;;  %v8299_v61 = vld [vmem:[#allocation3 + $0xb0] sm:$0xf]  ;;  %v2011_v21 = vadd.f32 %v11392_v57, %v11390_v45  ;;  %v9912_v45 = vld [vmem:[#allocation6 + $0x190] sm:$0xff]  ;;  %v8311_v57 = vld [vmem:[#allocation3 + $0xc8] sm:$0xf] }
 0x225   : > { %v8300_v11 = vor.u32 %v9723_v8, %v8299_v61  ;;  %v9726_v8 = vld [vmem:[#allocation3 + $0xd0] sm:$0xf0]  ;;  %3465 = vmatpush.bf16.msrb.mxu2 %v9912_v45 }
 0x22b   : > { %v11711_v44 = vpop.f32.mrf.mxu3  ;;  %v2107_v22 = vpop.f32.mrf.mxu0 }
 0x22c   : > { %v11714_v56 = vadd.f32 %v2107_v22, %v11379_v26  ;;  %v9718_v26 = vld [vmem:[#allocation3 + $0x94] sm:$0xf] }
 0x22e   : > { %2741 = vmatmul.bf16.gmra.mxu0 %v8272_v31  ;;  %v8284_v31 = vor.u32 %v9718_v26, %v8281_v43  ;;  %v9921_v43 = vld [vmem:[#allocation6 + $0x1d8] sm:$0xff] }
 0x22f   : > { %2850 = vmatmul.bf16.gmra.mxu1 %v8300_v11  ;;  %v8312_v11 = vor.u32 %v9726_v8, %v8311_v57  ;;  %3563 = vmatpush.bf16.msra.mxu3 %v9921_v43  ;;  %v9929_v57 = vld [vmem:[#allocation6 + $0x218] sm:$0xff] }
 0x230   : > { %v9729_v8 = vld [vmem:[#allocation3 + $0xe8] sm:$0xf0]  ;;  %3662 = vmatpush.bf16.msrb.mxu0 %v9929_v57 }
 0x233   : > { %v2693_v55 = vpop.f32.mrf.mxu3  ;;  %v2109_v54 = vpop.f32.mrf.mxu0  ;;  %3564 = vmatpush.bf16.msra.mxu3 %v9920_v32  ;;  %v9918_v32 = vld [vmem:[#allocation6 + $0x1c0] sm:$0xff] }
 0x234   : > { %v11719_v30 = vadd.f32 %v2693_v55, %v11646_v50  ;;  %v11721_v15 = vadd.f32 %v2109_v54, %v2011_v21  ;;  %v2016_v21 = vadd.f32 %v11418_v18, %v11416_v25  ;;  %v13232_v25 = vshrl.u32 %v11127_v60, 16  ;;  %3663 = vmatpush.bf16.msrb.mxu0 %v9928_v23 }
 0x235   : > { %v2629_v23 = vadd.f32 %v11508_v63, %v11690_v13  ;;  %v10061_v13 = vld [vmem:[#allocation9 + $0xf8] sm:$0xff] }
 0x236   : > { %13229 = vst [vmem:[#allocation29_spill] sm:$0xff] %v11719_v30  ;;  %v1010_v18 = vrot.slane %v13232_v25, 4  ;;  %5666 = vmatpush.bf16.msra.mxu1 %v10061_v13  ;;  %v9863_v13 = vld [vmem:[#allocation3 + $0x68] sm:$0xf0] }
 0x23b   : > { %v11725_v22 = vpop.f32.mrf.mxu3  ;;  %v2112_v7 = vpop.f32.mrf.mxu0 }
 0x23c   : > { %13230 = vst [vmem:[#allocation30_spill] sm:$0xff] %v11725_v22  ;;  %v11728_v61 = vadd.f32 %v2112_v7, %v11404_v42  ;;  %v2816_v50 = vpop.f32.mrf.mxu1  ;;  %v9721_v42 = vld [vmem:[#allocation3 + $0xac] sm:$0xf] }
 0x23e   : > { %2746 = vmatmul.bf16.gmra.mxu0 %v8284_v31  ;;  %v8293_v31 = vld [vmem:[#allocation3 + $0xb4] sm:$0xf0] }
 0x23f   : > { %2855 = vmatmul.bf16.gmra.mxu1 %v8312_v11  ;;  %v8296_v30 = vor.u32 %v9721_v42, %v8293_v31  ;;  %v2021_v42 = vadd.f32 %v11442_v48, %v11440_v51  ;;  %v8305_v51 = vld [vmem:[#allocation3 + $0xcc] sm:$0xf0] }
 0x243   : > { %v2698_v55 = vpop.f32.mrf.mxu3  ;;  %v2114_v26 = vpop.f32.mrf.mxu0 }
 0x244   : > { %v11733_v54 = vadd.f32 %v2698_v55, %v11658_v6  ;;  %v11735_v22 = vadd.f32 %v2114_v26, %v2016_v21  ;;  %v2818_v7 = vpop.f32.mrf.mxu1  ;;  %v8323_v6 = vld [vmem:[#allocation3 + $0xe0] sm:$0xf]  ;;  %v13233_v21 = vshll.u32 %v11127_v60, 16  ;;  %v13235_v60 = vshll.u32 %v11125_v16, 16 }
 0x245   : > { %v8324_v55 = vor.u32 %v9729_v8, %v8323_v6  ;;  %v13234_v6 = vshrl.u32 %v11125_v16, 16 }
 0x246   : > { %13231 = vst [vmem:[#allocation56_spill] sm:$0xff] %v11733_v54  ;;  %v1008_v26 = vrot.slane %v13233_v21, 5  ;;  %v1005_v57 = vrot.slane %v13235_v60, 5  ;;  %v8335_v54 = vld [vmem:[#allocation3 + $0xf8] sm:$0xf] }
 0x247   : > { %v1004_v8 = vrot.slane %v13234_v6, 4  ;;  %v9727_v6 = vld [vmem:[#allocation3 + $0xdc] sm:$0xf] }
 0x248   : > { %v1011_v43 = vor.u32 %v1010_v18, %v1008_v26  ;;  %v9724_v18 = vld [vmem:[#allocation3 + $0xc4] sm:$0xf] }
 0x249   : > { %v1006_v21 = vor.u32 %v1005_v57, %v1004_v8  ;;  %v8317_v8 = vld [vmem:[#allocation3 + $0xe4] sm:$0xf0]  ;;  %v8411_v57 = vld [vmem:[#allocation3 + $0x198] sm:$0xf] }
 0x24a   : > { %v1012_v31 = vrot.slane %v1011_v43, 4 }
 0x24b   : > { %v2117_v50 = vpop.f32.mrf.mxu0 }
 0x24c   : > { %v11738_v45 = vadd.f32 %v2117_v50, %v11434_v40  ;;  %v2821_v11 = vpop.f32.mrf.mxu1  ;;  %v9911_v50 = vld [vmem:[#allocation6 + $0x188] sm:$0xff] }
 0x24d   : > { %3466 = vmatpush.bf16.msrb.mxu2 %v9911_v50  ;;  %v8336_v50 = vor.u32 %v9732_v46, %v8335_v54  ;;  %v2624_v46 = vadd.f32 %v11482_v17, %v11678_v14  ;;  %v8320_v54 = vor.u32 %v9727_v6, %v8317_v8  ;;  %v9857_v8 = vld [vmem:[#allocation3 + $0x38] sm:$0xf0] }
 0x24e   : > { %2751 = vmatmul.bf16.gmra.mxu0 %v8296_v30  ;;  %v1136_v30 = vld [vmem:[#allocation3 + $0x1c4] sm:$0xf] }
 0x24f   : > { %2860 = vmatmul.bf16.gmra.mxu1 %v8324_v55  ;;  %v1137_v25 = vsel %vm11148_vm9, %v1012_v31, %v1136_v30  ;;  %v8308_v55 = vor.u32 %v9724_v18, %v8305_v51  ;;  %v9752_v18 = vld [vmem:[#allocation3 + $0x1a0] sm:$0xf0] }
 0x250   : > { %1138 = vst [vmem:[#allocation3 + $0x1c4] sm:$0xf] %v1137_v25 }
 0x253   : > { %v2119_v40 = vpop.f32.mrf.mxu0 }
 0x254   : > { %v11746_v7 = vadd.f32 %v2119_v40, %v2021_v42  ;;  %v2823_v48 = vpop.f32.mrf.mxu1  ;;  %v1007_v42 = vrot.slane %v1006_v21, 4  ;;  %v8412_v21 = vor.u32 %v9752_v18, %v8411_v57 }
 0x256   : > { %v1009_v31 = vsel %vm11168_vm11, %v1007_v42, %v1008_v26  ;;  %2702 = vmatmul.bf16.gmra.mxu3 %v8412_v21  ;;  %v9730_v21 = vld [vmem:[#allocation3 + $0xf4] sm:$0xf] }
 0x257   : > { %v1200_v40 = vld [vmem:[#allocation3 + $0x1c4] sm:$0x8]  ;;  %1135 = vst [vmem:[#allocation3 + $0x1b8] sm:$0xf] %v1009_v31 }
 0x258   : > { %v1201_v16 = vsel %vm11179_vm14, 0, %v1200_v40 }
 0x259   : > { %1202 = vst [vmem:[#allocation3 + $0x1c4] sm:$0x8] %v1201_v16  ;;  %v8347_v16 = vld [vmem:[#allocation3 + $0x110] sm:$0xf] }
 0x25b   : > { %v2717_v43 = vpop.f32.mrf.mxu0 }
 0x25c   : > { %v2826_v30 = vpop.f32.mrf.mxu1  ;;  %v9910_v43 = vld [vmem:[#allocation6 + $0x180] sm:$0xff] }
 0x25d   : > { %3467 = vmatpush.bf16.msrb.mxu2 %v9910_v43  ;;  %v8329_v43 = vld [vmem:[#allocation3 + $0xfc] sm:$0xf0] }
 0x25e   : > { %2756 = vmatmul.bf16.gmra.mxu0 %v8308_v55  ;;  %v8107_v60 = vld [vmem:[#allocation3 + $0x1b8] sm:$0xf] }
 0x25f   : > { %2865 = vmatmul.bf16.gmra.mxu1 %v8336_v50  ;;  %v9735_v50 = vld [vmem:[#allocation3 + $0x118] sm:$0xf0] }
 0x260   : > { %v9831_v55 = vld [vmem:[#allocation3 + $0x1c0] sm:$0xf0]  ;;  %v8348_v18 = vor.u32 %v9735_v50, %v8347_v16  ;;  %v8359_v16 = vld [vmem:[#allocation3 + $0x128] sm:$0xf]  ;;  %v9738_v50 = vld [vmem:[#allocation3 + $0x130] sm:$0xf0] }
 0x261   : > { %v8108_v26 = vor.u32 %v9831_v55, %v8107_v60  ;;  %v2626_v60 = vadd.f32 %v11498_v38, %v11685_v3  ;;  %v9856_v55 = vld [vmem:[#allocation3 + $0x34] sm:$0xf]  ;;  %v8332_v38 = vor.u32 %v9730_v21, %v8329_v43  ;;  %v8341_v21 = vld [vmem:[#allocation3 + $0x114] sm:$0xf0] }
 0x263   : > { %v2719_v25 = vpop.f32.mrf.mxu0  ;;  %2171 = vmatmul.bf16.gmra.mxu2 %v8108_v26 }
 0x264   : > { %v2828_v51 = vpop.f32.mrf.mxu1  ;;  %v9919_v25 = vld [vmem:[#allocation6 + $0x1c8] sm:$0xff] }
 0x265   : > { %3565 = vmatpush.bf16.msra.mxu3 %v9919_v25  ;;  %v10069_v25 = vld [vmem:[#allocation9 + $0x138] sm:$0xff] }
 0x266   : > { %5755 = vmatpush.bf16.msra.mxu2 %v10069_v25  ;;  %v2636_v25 = vadd.f32 %v11548_v9, %v11709_v37  ;;  %v2639_v9 = vadd.f32 %v11559_v36, %v11714_v56  ;;  %v9739_v36 = vld [vmem:[#allocation3 + $0x13c] sm:$0xf] }
 0x269   : > { %3566 = vmatpush.bf16.msra.mxu3 %v9918_v32 }
 0x26b   : > { %v2722_v42 = vpop.f32.mrf.mxu0 }
 0x26c   : > { %v2723_v40 = vadd.f32 %v2722_v42, %v2624_v46  ;;  %v2831_v57 = vpop.f32.mrf.mxu1 }
 0x26e   : > { %v11760_v31 = vadd.f32 %v2821_v11, %v2723_v40  ;;  %2761 = vmatmul.bf16.gmra.mxu0 %v8320_v54  ;;  %v8519_v11 = vld [vmem:[#allocation3 + $0x30] sm:$0xf]  ;;  %v8521_v54 = vld [vmem:[#allocation3 + $0x3c] sm:$0xf0] }
 0x26f   : > { %2870 = vmatmul.bf16.gmra.mxu1 %v8348_v18  ;;  %v8520_v46 = vor.u32 %v9857_v8, %v8519_v11  ;;  %v8524_v42 = vor.u32 %v9856_v55, %v8521_v54  ;;  %v8531_v11 = vld [vmem:[#allocation3 + $0x48] sm:$0xf]  ;;  %v9859_v8 = vld [vmem:[#allocation3 + $0x4c] sm:$0xf]  ;;  %v8533_v54 = vld [vmem:[#allocation3 + $0x54] sm:$0xf0] }
 0x270   : > { %v9733_v55 = vld [vmem:[#allocation3 + $0x10c] sm:$0xf] }
 0x271   : > { %3567 = vmatmul.bf16.vlgmr.msra.gmra.mxu3 %v8524_v42  ;;  %v8536_v42 = vor.u32 %v9859_v8, %v8533_v54  ;;  %v9862_v8 = vld [vmem:[#allocation3 + $0x64] sm:$0xf] }
 0x273   : > { %v2724_v17 = vpop.f32.mrf.mxu0  ;;  %3468 = vmatmul.bf16.vlgmr.msrb.gmra.mxu2 %v8520_v46 }
 0x274   : > { %v2725_v14 = vadd.f32 %v2724_v17, %v2626_v60  ;;  %v2833_v26 = vpop.f32.mrf.mxu1  ;;  %v8360_v60 = vor.u32 %v9738_v50, %v8359_v16  ;;  %v2631_v17 = vadd.f32 %v11524_v5, %v11697_v53  ;;  %v8344_v5 = vor.u32 %v9733_v55, %v8341_v21  ;;  %v8545_v55 = vld [vmem:[#allocation3 + $0x6c] sm:$0xf0] }
 0x275   : > { %v8548_v21 = vor.u32 %v9862_v8, %v8545_v55  ;;  %v8395_v55 = vld [vmem:[#allocation3 + $0x170] sm:$0xf] }
 0x276   : > { %v11764_v6 = vadd.f32 %v2823_v48, %v2725_v14 }
 0x27b   : > { %v2727_v3 = vpop.f32.mrf.mxu0 }
 0x27c   : > { %v2728_v40 = vadd.f32 %v2727_v3, %v2629_v23  ;;  %v2836_v18 = vpop.f32.mrf.mxu1  ;;  %v2634_v23 = vadd.f32 %v11534_v62, %v11702_v10  ;;  %v8371_v3 = vld [vmem:[#allocation3 + $0x140] sm:$0xf]  ;;  %v9927_v10 = vld [vmem:[#allocation6 + $0x208] sm:$0xff] }
 0x27d   : > { %3664 = vmatpush.bf16.msrb.mxu0 %v9927_v10 }
 0x27e   : > { %v11768_v48 = vadd.f32 %v2826_v30, %v2728_v40  ;;  %2766 = vmatmul.bf16.gmra.mxu0 %v8332_v38  ;;  %v9860_v30 = vld [vmem:[#allocation3 + $0x50] sm:$0xf0]  ;;  %v9741_v40 = vld [vmem:[#allocation3 + $0x148] sm:$0xf0] }
 0x27f   : > { %2875 = vmatmul.bf16.gmra.mxu1 %v8360_v60  ;;  %v8532_v46 = vor.u32 %v9860_v30, %v8531_v11  ;;  %v8372_v50 = vor.u32 %v9741_v40, %v8371_v3  ;;  %v8353_v11 = vld [vmem:[#allocation3 + $0x12c] sm:$0xf0] }
 0x281   : > { %3572 = vmatmul.bf16.gmra.mxu3 %v8536_v42  ;;  %v8383_v42 = vld [vmem:[#allocation3 + $0x158] sm:$0xf] }
 0x283   : > { %v2729_v14 = vpop.f32.mrf.mxu0  ;;  %3473 = vmatmul.bf16.gmra.mxu2 %v8532_v46 }
 0x284   : > { %v2730_v63 = vadd.f32 %v2729_v14, %v2631_v17  ;;  %v2838_v43 = vpop.f32.mrf.mxu1  ;;  %v9736_v14 = vld [vmem:[#allocation3 + $0x124] sm:$0xf] }
 0x285   : > { %v8356_v37 = vor.u32 %v9736_v14, %v8353_v11 }
 0x286   : > { %v11772_v32 = vadd.f32 %v2828_v51, %v2730_v63  ;;  %v8543_v63 = vld [vmem:[#allocation3 + $0x60] sm:$0xf] }
 0x287   : > { %v8544_v30 = vor.u32 %v9863_v13, %v8543_v63  ;;  %v8557_v63 = vld [vmem:[#allocation3 + $0x84] sm:$0xf0]  ;;  %v10060_v13 = vld [vmem:[#allocation9 + $0xf0] sm:$0xff] }
 0x288   : > { %5667 = vmatpush.bf16.msra.mxu1 %v10060_v13 }
 0x28b   : > { %v2732_v53 = vpop.f32.mrf.mxu0 }
 0x28c   : > { %v2733_v38 = vadd.f32 %v2732_v53, %v2634_v23  ;;  %v2841_v16 = vpop.f32.mrf.mxu1  ;;  %v9744_v23 = vld [vmem:[#allocation3 + $0x160] sm:$0xf0] }
 0x28d   : > { %v8384_v53 = vor.u32 %v9744_v23, %v8383_v42  ;;  %v9869_v23 = vld [vmem:[#allocation3 + $0x98] sm:$0xf0] }
 0x28e   : > { %v11776_v51 = vadd.f32 %v2831_v57, %v2733_v38  ;;  %2771 = vmatmul.bf16.gmra.mxu0 %v8344_v5  ;;  %v2641_v38 = vadd.f32 %v11573_v20, %v11721_v15  ;;  %v2644_v20 = vadd.f32 %v11584_v27, %v11728_v61  ;;  %v9742_v27 = vld [vmem:[#allocation3 + $0x154] sm:$0xf]  ;;  %v8567_v61 = vld [vmem:[#allocation3 + $0x90] sm:$0xf] }
 0x28f   : > { %2880 = vmatmul.bf16.gmra.mxu1 %v8372_v50  ;;  %v10068_v50 = vld [vmem:[#allocation9 + $0x130] sm:$0xff] }
 0x290   : > { %5756 = vmatpush.bf16.msra.mxu2 %v10068_v50  ;;  %v9926_v50 = vld [vmem:[#allocation6 + $0x200] sm:$0xff] }
 0x291   : > { %3577 = vmatmul.bf16.gmra.mxu3 %v8548_v21  ;;  %v9747_v21 = vld [vmem:[#allocation3 + $0x178] sm:$0xf0]  ;;  %3665 = vmatpush.bf16.msrb.mxu0 %v9926_v50  ;;  %v13238_v50 = vld [vmem:[#allocation34_spill] sm:$0xff] }
 0x293   : > { %v2734_v60 = vpop.f32.mrf.mxu0  ;;  %3478 = vmatmul.bf16.gmra.mxu2 %v8544_v30 }
 0x294   : > { %v2735_v17 = vadd.f32 %v2734_v60, %v2636_v25  ;;  %v11782_v57 = vpop.f32.mrf.mxu1  ;;  %v8555_v25 = vld [vmem:[#allocation3 + $0x78] sm:$0xf]  ;;  %v9866_v60 = vld [vmem:[#allocation3 + $0x80] sm:$0xf0] }
 0x295   : > { %v8556_v10 = vor.u32 %v9866_v60, %v8555_v25  ;;  %v2649_v25 = vadd.f32 %v11609_v4, %v11738_v45  ;;  %v9745_v4 = vld [vmem:[#allocation3 + $0x16c] sm:$0xf]  ;;  %v8579_v45 = vld [vmem:[#allocation3 + $0xa8] sm:$0xf] }
 0x296   : > { %v11780_v62 = vadd.f32 %v2833_v26, %v2735_v17  ;;  %v8365_v17 = vld [vmem:[#allocation3 + $0x144] sm:$0xf0] }
 0x297   : > { %v8368_v15 = vor.u32 %v9739_v36, %v8365_v17  ;;  %v8407_v17 = vld [vmem:[#allocation3 + $0x188] sm:$0xf] }
 0x29b   : > { %v2737_v46 = vpop.f32.mrf.mxu0 }
 0x29c   : > { %v2738_v26 = vadd.f32 %v2737_v46, %v2639_v9  ;;  %v2846_v5 = vpop.f32.mrf.mxu1  ;;  %v2646_v46 = vadd.f32 %v11598_v59, %v11735_v22 }
 0x29e   : > { %v11786_v54 = vadd.f32 %v2836_v18, %v2738_v26  ;;  %2776 = vmatmul.bf16.gmra.mxu0 %v8356_v37  ;;  %v9865_v18 = vld [vmem:[#allocation3 + $0x7c] sm:$0xf]  ;;  %v8396_v37 = vor.u32 %v9747_v21, %v8395_v55  ;;  %v8389_v55 = vld [vmem:[#allocation3 + $0x174] sm:$0xf0] }
 0x29f   : > { %2885 = vmatmul.bf16.gmra.mxu1 %v8384_v53  ;;  %v8560_v11 = vor.u32 %v9865_v18, %v8557_v63  ;;  %v9868_v53 = vld [vmem:[#allocation3 + $0x94] sm:$0xf] }
 0x2a1   : > { %3582 = vmatmul.bf16.gmra.mxu3 %v8560_v11  ;;  %v2651_v11 = vadd.f32 %v11621_v47, %v11746_v7  ;;  %v13236_v7 = vld [vmem:[#allocation36_spill] sm:$0xff] }
 0x2a3   : > { %v2739_v3 = vpop.f32.mrf.mxu0  ;;  %3483 = vmatmul.bf16.gmra.mxu2 %v8556_v10  ;;  %v9750_v10 = vld [vmem:[#allocation3 + $0x190] sm:$0xf0] }
 0x2a4   : > { %v2740_v40 = vadd.f32 %v2739_v3, %v2641_v38  ;;  %v11792_v14 = vpop.f32.mrf.mxu1  ;;  %v8377_v38 = vld [vmem:[#allocation3 + $0x15c] sm:$0xf0]  ;;  %v8408_v13 = vor.u32 %v9750_v10, %v8407_v17  ;;  %v9875_v17 = vld [vmem:[#allocation3 + $0xc8] sm:$0xf0]  ;;  %v9874_v10 = vld [vmem:[#allocation3 + $0xc4] sm:$0xf] }
 0x2a5   : > { %v8380_v59 = vor.u32 %v9742_v27, %v8377_v38  ;;  %v8392_v27 = vor.u32 %v9745_v4, %v8389_v55  ;;  %v10059_v38 = vld [vmem:[#allocation9 + $0xe8] sm:$0xff]  ;;  %v13241_v55 = vld [vmem:[#allocation40_spill] sm:$0xff] }
 0x2a6   : > { %v11790_v56 = vadd.f32 %v2838_v43, %v2740_v40  ;;  %v8569_v40 = vld [vmem:[#allocation3 + $0x9c] sm:$0xf0]  ;;  %5668 = vmatpush.bf16.msra.mxu1 %v10059_v38  ;;  %v8603_v38 = vld [vmem:[#allocation3 + $0xd8] sm:$0xf] }
 0x2a7   : > { %v8572_v36 = vor.u32 %v9868_v53, %v8569_v40 }
 0x2ab   : > { %v2742_v43 = vpop.f32.mrf.mxu0 }
 0x2ac   : > { %v2743_v30 = vadd.f32 %v2742_v43, %v2644_v20  ;;  %v2851_v9 = vpop.f32.mrf.mxu1  ;;  %v9872_v43 = vld [vmem:[#allocation3 + $0xb0] sm:$0xf0] }
 0x2ae   : > { %v11796_v8 = vadd.f32 %v2841_v16, %v2743_v30  ;;  %2781 = vmatmul.bf16.gmra.mxu0 %v8368_v15  ;;  %v8568_v16 = vor.u32 %v9869_v23, %v8567_v61  ;;  %v9871_v30 = vld [vmem:[#allocation3 + $0xac] sm:$0xf]  ;;  %v13237_v61 = vld [vmem:[#allocation37_spill] sm:$0xff] }
 0x2af   : > { %2890 = vmatmul.bf16.gmra.mxu1 %v8396_v37  ;;  %v8581_v37 = vld [vmem:[#allocation3 + $0xb4] sm:$0xf0]  ;;  %v2026_v23 = vadd.f32 %v13237_v61, %v13236_v7  ;;  %v11832_v61 = vpop.f32.mrf.mxu3 }
 0x2b1   : > { %3587 = vmatmul.bf16.gmra.mxu3 %v8572_v36  ;;  %v2125_v36 = vadd.f32 %v13238_v50, %v2026_v23  ;;  %v9878_v50 = vld [vmem:[#allocation3 + $0xe0] sm:$0xf0] }
 0x2b3   : > { %v2744_v26 = vpop.f32.mrf.mxu0  ;;  %3488 = vmatmul.bf16.gmra.mxu2 %v8568_v16 }
 0x2b4   : > { %v11800_v42 = vadd.f32 %v2744_v26, %v2646_v46  ;;  %v11802_v3 = vpop.f32.mrf.mxu1  ;;  %v10067_v46 = vld [vmem:[#allocation9 + $0x128] sm:$0xff]  ;;  %v8584_v26 = vor.u32 %v9871_v30, %v8581_v37  ;;  %v13240_v30 = vld [vmem:[#allocation39_spill] sm:$0xff] }
 0x2b5   : > { %5757 = vmatpush.bf16.msra.mxu2 %v10067_v46  ;;  %v13242_v46 = vld [vmem:[#allocation35_spill] sm:$0xff] }
 0x2bb   : > { %v2747_v22 = vpop.f32.mrf.mxu0 }
 0x2bc   : > { %v2748_v60 = vadd.f32 %v2747_v22, %v2649_v25  ;;  %v2856_v63 = vpop.f32.mrf.mxu1  ;;  %v2656_v25 = vadd.f32 %v11643_v28, %v2125_v36  ;;  %v2031_v28 = vadd.f32 %v13241_v55, %v13240_v30  ;;  %v9877_v36 = vld [vmem:[#allocation3 + $0xdc] sm:$0xf]  ;;  %v10058_v55 = vld [vmem:[#allocation9 + $0xe0] sm:$0xff] }
 0x2bd   : > { %5669 = vmatpush.bf16.msra.mxu1 %v10058_v55 }
 0x2be   : > { %v11806_v18 = vadd.f32 %v2846_v5, %v2748_v60  ;;  %2786 = vmatmul.bf16.gmra.mxu0 %v8380_v59  ;;  %v8580_v5 = vor.u32 %v9872_v43, %v8579_v45  ;;  %v8591_v60 = vld [vmem:[#allocation3 + $0xc0] sm:$0xf] }
 0x2bf   : > { %2895 = vmatmul.bf16.gmra.mxu1 %v8408_v13  ;;  %v9748_v13 = vld [vmem:[#allocation3 + $0x184] sm:$0xf] }
 0x2c1   : > { %3592 = vmatmul.bf16.gmra.mxu3 %v8584_v26  ;;  %v2130_v26 = vadd.f32 %v13242_v46, %v2031_v28  ;;  %v13247_v28 = vld [vmem:[#allocation38_spill] sm:$0xff] }
 0x2c3   : > { %v2749_v20 = vpop.f32.mrf.mxu0  ;;  %3493 = vmatmul.bf16.gmra.mxu2 %v8580_v5 }
 0x2c4   : > { %v11810_v15 = vadd.f32 %v2749_v20, %v2651_v11  ;;  %v11812_v21 = vpop.f32.mrf.mxu1  ;;  %v8401_v11 = vld [vmem:[#allocation3 + $0x18c] sm:$0xf0]  ;;  %v8592_v20 = vor.u32 %v9875_v17, %v8591_v60 }
 0x2c5   : > { %v8404_v45 = vor.u32 %v9748_v13, %v8401_v11  ;;  %v13244_v13 = vld [vmem:[#allocation43_spill] sm:$0xff] }
 0x2cb   : > { %v2752_v47 = vpop.f32.mrf.mxu0 }
 0x2cc   : > { %v2753_v53 = vadd.f32 %v2752_v47, %v11635_v34  ;;  %v2861_v40 = vpop.f32.mrf.mxu1  ;;  %v8593_v34 = vld [vmem:[#allocation3 + $0xcc] sm:$0xf0] }
 0x2ce   : > { %v11817_v16 = vadd.f32 %v2851_v9, %v2753_v53  ;;  %2791 = vmatmul.bf16.gmra.mxu0 %v8392_v27  ;;  %v8596_v9 = vor.u32 %v9874_v10, %v8593_v34  ;;  %v2661_v27 = vadd.f32 %v11655_v39, %v2130_v26  ;;  %v11836_v53 = vpop.f32.mrf.mxu2  ;;  %v13243_v10 = vld [vmem:[#allocation42_spill] sm:$0xff] }
 0x2cf   : > { %v2036_v11 = vadd.f32 %v13244_v13, %v13243_v10  ;;  %v13249_v10 = vld [vmem:[#allocation45_spill] sm:$0xff] }
 0x2d1   : > { %3597 = vmatmul.bf16.gmra.mxu3 %v8596_v9 }
 0x2d3   : > { %v2754_v59 = vpop.f32.mrf.mxu0  ;;  %3498 = vmatmul.bf16.gmra.mxu2 %v8592_v20 }
 0x2d4   : > { %v11821_v22 = vadd.f32 %v2754_v59, %v2656_v25  ;;  %v11823_v4 = vpop.f32.mrf.mxu1  ;;  %v9751_v25 = vld [vmem:[#allocation3 + $0x19c] sm:$0xf]  ;;  %v8605_v59 = vld [vmem:[#allocation3 + $0xe4] sm:$0xf0] }
 0x2d5   : > { %13239 = vst [vmem:[#allocation36_spill] sm:$0xff] %v11823_v4  ;;  %v8608_v60 = vor.u32 %v9877_v36, %v8605_v59  ;;  %v9881_v36 = vld [vmem:[#allocation3 + $0xf8] sm:$0xf0]  ;;  %v8617_v59 = vld [vmem:[#allocation3 + $0xfc] sm:$0xf0] }
 0x2d9   : > { %v2703_v9 = vpop.f32.mrf.mxu3 }
 0x2db   : > { %v2757_v43 = vpop.f32.mrf.mxu0 }
 0x2dc   : > { %v2758_v5 = vadd.f32 %v2757_v43, %v11651_v12  ;;  %v2866_v47 = vpop.f32.mrf.mxu1  ;;  %v8413_v12 = vld [vmem:[#allocation3 + $0x1a4] sm:$0xf0] }
 0x2dd   : > { %v8416_v17 = vor.u32 %v9751_v25, %v8413_v12  ;;  %v9880_v25 = vld [vmem:[#allocation3 + $0xf4] sm:$0xf]  ;;  %v8527_v12 = vld [vmem:[#allocation3 + $0x38] sm:$0xf] }
 0x2de   : > { %v11828_v37 = vadd.f32 %v2856_v63, %v2758_v5  ;;  %2796 = vmatmul.bf16.gmra.mxu0 %v8404_v45  ;;  %v8604_v63 = vor.u32 %v9878_v50, %v8603_v38  ;;  %v10066_v45 = vld [vmem:[#allocation9 + $0x120] sm:$0xff]  ;;  %v2135_v5 = vadd.f32 %v13247_v28, %v2036_v11 }
 0x2df   : > { %5758 = vmatpush.bf16.msra.mxu2 %v10066_v45  ;;  %v8615_v50 = vld [vmem:[#allocation3 + $0xf0] sm:$0xf]  ;;  %v13251_v45 = vld [vmem:[#allocation41_spill] sm:$0xff] }
 0x2e0   : > { %v2666_v46 = vadd.f32 %v11665_v33, %v2135_v5  ;;  %v2041_v33 = vadd.f32 %v11723_v49, %v13249_v10  ;;  %v9884_v49 = vld [vmem:[#allocation3 + $0x110] sm:$0xf0] }
 0x2e1   : > { %3602 = vmatmul.bf16.gmra.mxu3 %v8608_v60  ;;  %v8620_v60 = vor.u32 %v9880_v25, %v8617_v59 }
 0x2e3   : > { %v2759_v7 = vpop.f32.mrf.mxu0  ;;  %3503 = vmatmul.bf16.gmra.mxu2 %v8604_v63  ;;  %v8616_v63 = vor.u32 %v9881_v36, %v8615_v50  ;;  %v9883_v50 = vld [vmem:[#allocation3 + $0x10c] sm:$0xf]  ;;  %v9861_v36 = vld [vmem:[#allocation3 + $0x58] sm:$0xf0] }
 0x2e4   : > { %v11834_v23 = vadd.f32 %v2759_v7, %v2661_v27  ;;  %v11841_v34 = vpop.f32.mrf.mxu1  ;;  %v2705_v7 = vpop.f32.mrf.mxu3 }
 0x2e5   : > { %13245 = vst [vmem:[#allocation37_spill] sm:$0xff] %v11841_v34 }
 0x2e6   : > { %v2172_v43 = vpop.f32.mrf.mxu2 }
 0x2e7   : > { %v2140_v43 = vadd.f32 %v13251_v45, %v2041_v33  ;;  %v13257_v45 = vld [vmem:[#allocation44_spill] sm:$0xff] }
 0x2e9   : > { %v2671_v28 = vadd.f32 %v11670_v58, %v2140_v43  ;;  %v13255_v58 = vld [vmem:[#allocation26_spill] sm:$0xff] }
 0x2eb   : > { %v2762_v39 = vpop.f32.mrf.mxu0 }
 0x2ec   : > { %v2763_v20 = vadd.f32 %v2762_v39, %v11661_v1  ;;  %v2871_v38 = vpop.f32.mrf.mxu1 }
 0x2ee   : > { %v11843_v30 = vadd.f32 %v2861_v40, %v2763_v20  ;;  %2801 = vmatmul.bf16.gmra.mxu0 %v8416_v17  ;;  %v2174_v1 = vpop.f32.mrf.mxu2  ;;  %v9858_v40 = vld [vmem:[#allocation3 + $0x40] sm:$0xf0] }
 0x2ef   : > { %v8528_v17 = vor.u32 %v9858_v40, %v8527_v12  ;;  %v8627_v1 = vld [vmem:[#allocation3 + $0x108] sm:$0xf] }
 0x2f0   : > { %13246 = vst [vmem:[#allocation34_spill] sm:$0xff] %v11843_v30  ;;  %v8628_v25 = vor.u32 %v9884_v49, %v8627_v1  ;;  %v10057_v1 = vld [vmem:[#allocation9 + $0xd8] sm:$0xff] }
 0x2f1   : > { %3607 = vmatmul.bf16.gmra.mxu3 %v8620_v60  ;;  %v13254_v60 = vld [vmem:[#allocation46_spill] sm:$0xff]  ;;  %5670 = vmatpush.bf16.msra.mxu1 %v10057_v1  ;;  %v4919_v30 = vld [vmem:[#allocation4 + $0x2c] sm:$0xf] }
 0x2f3   : > { %v2764_v26 = vpop.f32.mrf.mxu0  ;;  %3508 = vmatmul.bf16.gmra.mxu2 %v8616_v63 }
 0x2f4   : > { %v11847_v27 = vadd.f32 %v2764_v26, %v2666_v46  ;;  %v3568_v20 = vpop.f32.mrf.mxu3  ;;  %v11855_v55 = vpop.f32.mrf.mxu1 }
 0x2f5   : > { %13252 = vst [vmem:[#allocation35_spill] sm:$0xff] %v11855_v55  ;;  %v10065_v20 = vld [vmem:[#allocation9 + $0x118] sm:$0xff] }
 0x2f6   : > { %13248 = vst [vmem:[#allocation39_spill] sm:$0xff] %v11847_v27  ;;  %v3469_v11 = vpop.f32.mrf.mxu2  ;;  %5759 = vmatpush.bf16.msra.mxu2 %v10065_v20 }
 0x2fb   : > { %v2767_v39 = vpop.f32.mrf.mxu0 }
 0x2fc   : > { %v2768_v13 = vadd.f32 %v2767_v39, %v11668_v29  ;;  %v3570_v7 = vpop.f32.mrf.mxu3  ;;  %v8539_v29 = vld [vmem:[#allocation3 + $0x50] sm:$0xf]  ;;  %v2876_v63 = vpop.f32.mrf.mxu1 }
 0x2fd   : > { %v8540_v40 = vor.u32 %v9861_v36, %v8539_v29  ;;  %v9887_v29 = vld [vmem:[#allocation3 + $0x128] sm:$0xf0]  ;;  %v9886_v36 = vld [vmem:[#allocation3 + $0x124] sm:$0xf] }
 0x2fe   : > { %v11852_v9 = vadd.f32 %v2866_v47, %v2768_v13  ;;  %3666 = vmatmul.bf16.vlgmr.msrb.gmra.mxu0 %v8528_v17  ;;  %v3471_v26 = vpop.f32.mrf.mxu2  ;;  %v8629_v47 = vld [vmem:[#allocation3 + $0x114] sm:$0xf0]  ;;  %v2046_v17 = vadd.f32 %v13255_v58, %v13254_v60  ;;  %v13260_v58 = vld [vmem:[#allocation48_spill] sm:$0xff] }
 0x2ff   : > { %v8632_v12 = vor.u32 %v9883_v50, %v8629_v47  ;;  %v9864_v47 = vld [vmem:[#allocation3 + $0x70] sm:$0xf0] }
 0x300   : > { %13250 = vst [vmem:[#allocation40_spill] sm:$0xff] %v11852_v9  ;;  %v2145_v43 = vadd.f32 %v13257_v45, %v2046_v17  ;;  %v13261_v17 = vld [vmem:[#allocation27_spill] sm:$0xff] }
 0x301   : > { %3612 = vmatmul.bf16.gmra.mxu3 %v8632_v12  ;;  %v10077_v9 = vld [vmem:[#allocation9 + $0x178] sm:$0xff] }
 0x302   : > { %5844 = vmatpush.bf16.msrb.mxu3 %v10077_v9 }
 0x303   : > { %v2769_v5 = vpop.f32.mrf.mxu0  ;;  %3513 = vmatmul.bf16.gmra.mxu2 %v8628_v25  ;;  %v8551_v25 = vld [vmem:[#allocation3 + $0x68] sm:$0xf] }
 0x304   : > { %v11858_v46 = vadd.f32 %v2769_v5, %v2671_v28  ;;  %v3573_v33 = vpop.f32.mrf.mxu3  ;;  %v2676_v28 = vadd.f32 %v11675_v41, %v2145_v43  ;;  %v11871_v7 = vpop.f32.mrf.mxu1  ;;  %v8552_v41 = vor.u32 %v9864_v47, %v8551_v25  ;;  %v9890_v47 = vld [vmem:[#allocation3 + $0x140] sm:$0xf0] }
 0x305   : > { %13259 = vst [vmem:[#allocation45_spill] sm:$0xff] %v11871_v7 }
 0x306   : > { %13253 = vst [vmem:[#allocation42_spill] sm:$0xff] %v11858_v46  ;;  %v3474_v10 = vpop.f32.mrf.mxu2 }
 0x307   : > { %v11865_v11 = vadd.f32 %v3573_v33, %v3474_v10 }
 0x30b   : > { %v2772_v59 = vpop.f32.mrf.mxu0 }
 0x30c   : > { %v2773_v39 = vadd.f32 %v2772_v59, %v11673_v52  ;;  %v3575_v49 = vpop.f32.mrf.mxu3  ;;  %v2881_v43 = vpop.f32.mrf.mxu1 }
 0x30e   : > { %v11863_v13 = vadd.f32 %v2871_v38, %v2773_v39  ;;  %3671 = vmatmul.bf16.gmra.mxu0 %v8540_v40  ;;  %v3476_v52 = vpop.f32.mrf.mxu2  ;;  %v8639_v38 = vld [vmem:[#allocation3 + $0x120] sm:$0xf]  ;;  %v8641_v40 = vld [vmem:[#allocation3 + $0x12c] sm:$0xf0]  ;;  %v2051_v39 = vadd.f32 %v13261_v17, %v13260_v58 }
 0x30f   : > { %v11873_v50 = vadd.f32 %v3575_v49, %v3476_v52  ;;  %v8640_v12 = vor.u32 %v9887_v29, %v8639_v38  ;;  %v8644_v59 = vor.u32 %v9886_v36, %v8641_v40  ;;  %v9867_v40 = vld [vmem:[#allocation3 + $0x88] sm:$0xf0] }
 0x310   : > { %13256 = vst [vmem:[#allocation43_spill] sm:$0xff] %v11863_v13 }
 0x311   : > { %3617 = vmatmul.bf16.gmra.mxu3 %v8644_v59 }
 0x313   : > { %v2774_v5 = vpop.f32.mrf.mxu0  ;;  %3518 = vmatmul.bf16.gmra.mxu2 %v8640_v12  ;;  %v9889_v12 = vld [vmem:[#allocation3 + $0x13c] sm:$0xf] }
 0x314   : > { %v11869_v26 = vadd.f32 %v2774_v5, %v2676_v28  ;;  %v3578_v20 = vpop.f32.mrf.mxu3  ;;  %v13263_v5 = vld [vmem:[#allocation47_spill] sm:$0xff] }
 0x315   : > { %v2150_v1 = vadd.f32 %v13263_v5, %v2051_v39  ;;  %v13266_v39 = vld [vmem:[#allocation50_spill] sm:$0xff] }
 0x316   : > { %13258 = vst [vmem:[#allocation38_spill] sm:$0xff] %v11869_v26  ;;  %v3479_v33 = vpop.f32.mrf.mxu2 }
 0x317   : > { %v11880_v28 = vadd.f32 %v3578_v20, %v3479_v33  ;;  %v2681_v52 = vadd.f32 %v11687_v19, %v2150_v1 }
 0x31b   : > { %v2777_v60 = vpop.f32.mrf.mxu0 }
 0x31c   : > { %v2778_v10 = vadd.f32 %v2777_v60, %v11683_v0  ;;  %v3580_v36 = vpop.f32.mrf.mxu3  ;;  %v8651_v0 = vld [vmem:[#allocation3 + $0x138] sm:$0xf]  ;;  %v11888_v60 = vpop.f32.mrf.mxu1 }
 0x31d   : > { %v8652_v59 = vor.u32 %v9890_v47, %v8651_v0  ;;  %13265 = vst [vmem:[#allocation26_spill] sm:$0xff] %v11888_v60 }
 0x31e   : > { %v11878_v45 = vadd.f32 %v2876_v63, %v2778_v10  ;;  %3676 = vmatmul.bf16.gmra.mxu0 %v8552_v41  ;;  %v3481_v29 = vpop.f32.mrf.mxu2  ;;  %v8563_v63 = vld [vmem:[#allocation3 + $0x80] sm:$0xf]  ;;  %v8653_v41 = vld [vmem:[#allocation3 + $0x144] sm:$0xf0]  ;;  %v13267_v10 = vld [vmem:[#allocation28_spill] sm:$0xff] }
 0x31f   : > { %v11886_v25 = vadd.f32 %v3580_v36, %v3481_v29  ;;  %v8656_v58 = vor.u32 %v9889_v12, %v8653_v41  ;;  %v8564_v17 = vor.u32 %v9867_v40, %v8563_v63  ;;  %v2056_v33 = vadd.f32 %v13267_v10, %v13266_v39  ;;  %v13269_v29 = vld [vmem:[#allocation49_spill] sm:$0xff]  ;;  %v10064_v40 = vld [vmem:[#allocation9 + $0x110] sm:$0xff] }
 0x320   : > { %13262 = vst [vmem:[#allocation41_spill] sm:$0xff] %v11878_v45  ;;  %5760 = vmatpush.bf16.msra.mxu2 %v10064_v40  ;;  %v9870_v39 = vld [vmem:[#allocation3 + $0xa0] sm:$0xf0] }
 0x321   : > { %3622 = vmatmul.bf16.gmra.mxu3 %v8656_v58  ;;  %v2155_v36 = vadd.f32 %v13269_v29, %v2056_v33  ;;  %v10056_v33 = vld [vmem:[#allocation9 + $0xd0] sm:$0xff]  ;;  %v13271_v29 = vld [vmem:[#allocation52_spill] sm:$0xff] }
 0x322   : > { %5671 = vmatpush.bf16.msra.mxu1 %v10056_v33 }
 0x323   : > { %v2779_v49 = vpop.f32.mrf.mxu0  ;;  %3523 = vmatmul.bf16.gmra.mxu2 %v8652_v59  ;;  %v2686_v0 = vadd.f32 %v11699_v35, %v2155_v36  ;;  %v8575_v59 = vld [vmem:[#allocation3 + $0x98] sm:$0xf]  ;;  %v13272_v36 = vld [vmem:[#allocation31_spill] sm:$0xff] }
 0x324   : > { %v11884_v38 = vadd.f32 %v2779_v49, %v2681_v52  ;;  %v3583_v1 = vpop.f32.mrf.mxu3  ;;  %v2886_v47 = vpop.f32.mrf.mxu1  ;;  %v8576_v35 = vor.u32 %v9870_v39, %v8575_v59 }
 0x326   : > { %13264 = vst [vmem:[#allocation46_spill] sm:$0xff] %v11884_v38  ;;  %v3484_v5 = vpop.f32.mrf.mxu2 }
 0x327   : > { %v11895_v49 = vadd.f32 %v3583_v1, %v3484_v5 }
 0x32b   : > { %v2782_v19 = vpop.f32.mrf.mxu0 }
 0x32c   : > { %v2783_v20 = vadd.f32 %v2782_v19, %v11695_v24  ;;  %v3585_v58 = vpop.f32.mrf.mxu3  ;;  %v9893_v19 = vld [vmem:[#allocation3 + $0x158] sm:$0xf0] }
 0x32e   : > { %v11893_v52 = vadd.f32 %v2881_v43, %v2783_v20  ;;  %3681 = vmatmul.bf16.gmra.mxu0 %v8564_v17  ;;  %v3486_v41 = vpop.f32.mrf.mxu2  ;;  %v8663_v43 = vld [vmem:[#allocation3 + $0x150] sm:$0xf]  ;;  %v9892_v17 = vld [vmem:[#allocation3 + $0x154] sm:$0xf]  ;;  %v8665_v20 = vld [vmem:[#allocation3 + $0x15c] sm:$0xf0] }
 0x32f   : > { %v11901_v24 = vadd.f32 %v3585_v58, %v3486_v41  ;;  %v8664_v10 = vor.u32 %v9893_v19, %v8663_v43  ;;  %v8668_v5 = vor.u32 %v9892_v17, %v8665_v20  ;;  %v11906_v41 = vpop.f32.mrf.mxu1  ;;  %v13275_v19 = vld [vmem:[#allocation51_spill] sm:$0xff] }
 0x330   : > { %13268 = vst [vmem:[#allocation44_spill] sm:$0xff] %v11893_v52 }
 0x331   : > { %3627 = vmatmul.bf16.gmra.mxu3 %v8668_v5  ;;  %13273 = vst [vmem:[#allocation27_spill] sm:$0xff] %v11906_v41 }
 0x333   : > { %v2784_v12 = vpop.f32.mrf.mxu0  ;;  %3528 = vmatmul.bf16.gmra.mxu2 %v8664_v10 }
 0x334   : > { %v11899_v63 = vadd.f32 %v2784_v12, %v2686_v0  ;;  %v2061_v0 = vadd.f32 %v13272_v36, %v13271_v29  ;;  %v3588_v58 = vpop.f32.mrf.mxu3  ;;  %v9895_v29 = vld [vmem:[#allocation3 + $0x16c] sm:$0xf] }
 0x336   : > { %13270 = vst [vmem:[#allocation48_spill] sm:$0xff] %v11899_v63  ;;  %v3489_v40 = vpop.f32.mrf.mxu2  ;;  %v2160_v17 = vadd.f32 %v13275_v19, %v2061_v0  ;;  %v13277_v0 = vld [vmem:[#allocation54_spill] sm:$0xff]  ;;  %v13278_v19 = vld [vmem:[#allocation32_spill] sm:$0xff]  ;;  %v13281_v63 = vld [vmem:[#allocation53_spill] sm:$0xff] }
 0x337   : > { %v11910_v43 = vadd.f32 %v3588_v58, %v3489_v40  ;;  %v2891_v36 = vpop.f32.mrf.mxu1  ;;  %v8677_v40 = vld [vmem:[#allocation3 + $0x174] sm:$0xf0] }
 0x338   : > { %v2691_v59 = vadd.f32 %v11711_v44, %v2160_v17  ;;  %v8680_v58 = vor.u32 %v9895_v29, %v8677_v40  ;;  %v2066_v17 = vadd.f32 %v13278_v19, %v13277_v0  ;;  %v13283_v29 = vld [vmem:[#allocation30_spill] sm:$0xff]  ;;  %v9899_v40 = vld [vmem:[#allocation3 + $0x188] sm:$0xf0]  ;;  %v10063_v19 = vld [vmem:[#allocation9 + $0x108] sm:$0xff] }
 0x339   : > { %5761 = vmatpush.bf16.msra.mxu2 %v10063_v19  ;;  %v8699_v19 = vld [vmem:[#allocation3 + $0x198] sm:$0xf] }
 0x33b   : > { %v2787_v1 = vpop.f32.mrf.mxu0 }
 0x33c   : > { %v2788_v12 = vadd.f32 %v2787_v1, %v11707_v2  ;;  %v3590_v33 = vpop.f32.mrf.mxu3  ;;  %v8675_v2 = vld [vmem:[#allocation3 + $0x168] sm:$0xf]  ;;  %v9896_v1 = vld [vmem:[#allocation3 + $0x170] sm:$0xf0] }
 0x33e   : > { %v11908_v60 = vadd.f32 %v2886_v47, %v2788_v12  ;;  %3686 = vmatmul.bf16.gmra.mxu0 %v8576_v35  ;;  %v3491_v20 = vpop.f32.mrf.mxu2  ;;  %v8587_v47 = vld [vmem:[#allocation3 + $0xb0] sm:$0xf]  ;;  %v9873_v12 = vld [vmem:[#allocation3 + $0xb8] sm:$0xf0]  ;;  %v8676_v35 = vor.u32 %v9896_v1, %v8675_v2  ;;  %v2165_v2 = vadd.f32 %v13281_v63, %v2066_v17  ;;  %v8599_v63 = vld [vmem:[#allocation3 + $0xc8] sm:$0xf] }
 0x33f   : > { %v11916_v5 = vadd.f32 %v3590_v33, %v3491_v20  ;;  %v8588_v41 = vor.u32 %v9873_v12, %v8587_v47  ;;  %v11926_v1 = vpop.f32.mrf.mxu1  ;;  %v9876_v17 = vld [vmem:[#allocation3 + $0xd0] sm:$0xf0] }
 0x340   : > { %13274 = vst [vmem:[#allocation47_spill] sm:$0xff] %v11908_v60  ;;  %v2696_v47 = vadd.f32 %v13283_v29, %v2165_v2  ;;  %v10055_v29 = vld [vmem:[#allocation9 + $0xc8] sm:$0xff] }
 0x341   : > { %3632 = vmatmul.bf16.gmra.mxu3 %v8680_v58  ;;  %13282 = vst [vmem:[#allocation49_spill] sm:$0xff] %v11926_v1  ;;  %v9898_v58 = vld [vmem:[#allocation3 + $0x184] sm:$0xf]  ;;  %v13285_v1 = vld [vmem:[#allocation55_spill] sm:$0xff]  ;;  %5672 = vmatpush.bf16.msra.mxu1 %v10055_v29 }
 0x343   : > { %v2789_v39 = vpop.f32.mrf.mxu0  ;;  %3533 = vmatmul.bf16.gmra.mxu2 %v8676_v35  ;;  %v8687_v35 = vld [vmem:[#allocation3 + $0x180] sm:$0xf] }
 0x344   : > { %v11914_v10 = vadd.f32 %v2789_v39, %v2691_v59  ;;  %v13279_v59 = vld [vmem:[#allocation29_spill] sm:$0xff]  ;;  %v3593_v33 = vpop.f32.mrf.mxu3 }
 0x346   : > { %13276 = vst [vmem:[#allocation50_spill] sm:$0xff] %v11914_v10  ;;  %v3494_v20 = vpop.f32.mrf.mxu2 }
 0x347   : > { %v11923_v60 = vadd.f32 %v3593_v33, %v3494_v20  ;;  %v8600_v20 = vor.u32 %v9876_v17, %v8599_v63  ;;  %v2896_v2 = vpop.f32.mrf.mxu1 }
 0x34b   : > { %v2792_v44 = vpop.f32.mrf.mxu0 }
 0x34c   : > { %v2793_v39 = vadd.f32 %v2792_v44, %v13279_v59  ;;  %v8689_v44 = vld [vmem:[#allocation3 + $0x18c] sm:$0xf0] }
 0x34e   : > { %v11921_v10 = vadd.f32 %v2891_v36, %v2793_v39  ;;  %3691 = vmatmul.bf16.gmra.mxu0 %v8588_v41  ;;  %v11931_v59 = vpop.f32.mrf.mxu2  ;;  %v11933_v36 = vpop.f32.mrf.mxu3  ;;  %v8688_v41 = vor.u32 %v9899_v40, %v8687_v35  ;;  %v8692_v39 = vor.u32 %v9898_v58, %v8689_v44 }
 0x350   : > { %13280 = vst [vmem:[#allocation28_spill] sm:$0xff] %v11921_v10 }
 0x351   : > { %3637 = vmatmul.bf16.gmra.mxu3 %v8692_v39  ;;  %v9901_v39 = vld [vmem:[#allocation3 + $0x19c] sm:$0xf] }
 0x353   : > { %v2794_v12 = vpop.f32.mrf.mxu0  ;;  %3538 = vmatmul.bf16.gmra.mxu2 %v8688_v41  ;;  %v9902_v41 = vld [vmem:[#allocation3 + $0x1a0] sm:$0xf0] }
 0x354   : > { %v11929_v0 = vadd.f32 %v2794_v12, %v2696_v47  ;;  %v13286_v47 = vld [vmem:[#allocation33_spill] sm:$0xff] }
 0x355   : > { %v2071_v12 = vadd.f32 %v13286_v47, %v13285_v1  ;;  %v8701_v1 = vld [vmem:[#allocation3 + $0x1a4] sm:$0xf0]  ;;  %v11952_v47 = vld [vmem:[#allocation2 + $0x98] sm:$0xf] }
 0x356   : > { %13284 = vst [vmem:[#allocation52_spill] sm:$0xff] %v11929_v0  ;;  %v13287_v0 = vld [vmem:[#allocation56_spill] sm:$0xff]  ;;  %v3499_v52 = vpop.f32.mrf.mxu2  ;;  %v3598_v7 = vpop.f32.mrf.mxu3 }
 0x357   : > { %v11940_v35 = vadd.f32 %v3598_v7, %v3499_v52  ;;  %v2170_v40 = vadd.f32 %v11836_v53, %v2071_v12  ;;  %v9879_v7 = vld [vmem:[#allocation3 + $0xe8] sm:$0xf0]  ;;  %v13137_v12 = vshrl.u32 %v11952_v47, 16  ;;  %329 = vst [vmem:[#allocation3 + $0x1cc] sm:$0xf] %v11952_v47 }
 0x359   : > { %v2701_v58 = vadd.f32 %v11832_v61, %v2170_v40 }
 0x35b   : > { %v2797_v33 = vpop.f32.mrf.mxu0 }
 0x35c   : > { %v2798_v10 = vadd.f32 %v2797_v33, %v13287_v0  ;;  %v8704_v33 = vor.u32 %v9901_v39, %v8701_v1 }
 0x35e   : > { %v11938_v38 = vadd.f32 %v2896_v2, %v2798_v10  ;;  %3696 = vmatmul.bf16.gmra.mxu0 %v8600_v20  ;;  %v11946_v0 = vpop.f32.mrf.mxu2  ;;  %v11948_v17 = vpop.f32.mrf.mxu3  ;;  %v8700_v10 = vor.u32 %v9902_v41, %v8699_v19  ;;  %v8611_v20 = vld [vmem:[#allocation3 + $0xe0] sm:$0xf]  ;;  %v8623_v19 = vld [vmem:[#allocation3 + $0xf8] sm:$0xf]  ;;  %v9907_v27 = vld [vmem:[#allocation3 + $0x1cc] sm:$0xf] }
 0x35f   : > { %v8612_v52 = vor.u32 %v9879_v7, %v8611_v20  ;;  %v9904_v20 = vld [vmem:[#allocation3 + $0x1b4] sm:$0xf]  ;;  %v9882_v7 = vld [vmem:[#allocation3 + $0x100] sm:$0xf0] }
 0x360   : > { %13288 = vst [vmem:[#allocation31_spill] sm:$0xff] %v11938_v38  ;;  %v8624_v38 = vor.u32 %v9882_v7, %v8623_v19  ;;  %v9999_v19 = vld [vmem:[#allocation9 + $0x88] sm:$0xff] }
 0x361   : > { %3642 = vmatmul.bf16.gmra.mxu3 %v8704_v33  ;;  %v9905_v33 = vld [vmem:[#allocation3 + $0x1b8] sm:$0xf0] }
 0x363   : > { %v2799_v44 = vpop.f32.mrf.mxu0  ;;  %3543 = vmatmul.bf16.gmra.mxu2 %v8700_v10  ;;  %v8711_v10 = vld [vmem:[#allocation3 + $0x1b0] sm:$0xf] }
 0x364   : > { %v11944_v63 = vadd.f32 %v2799_v44, %v2701_v58  ;;  %v641_v58 = vrot.slane %v13137_v12, 7  ;;  %v13138_v44 = vshll.u32 %v11952_v47, 16 }
 0x366   : > { %13289 = vst [vmem:[#allocation51_spill] sm:$0xff] %v11944_v63  ;;  %v3504_v61 = vpop.f32.mrf.mxu2  ;;  %v3603_v2 = vpop.f32.mrf.mxu3  ;;  %v644_v1 = vor.u32 %v13138_v44, %v641_v58  ;;  %v11967_v63 = vld [vmem:[#allocation2 + $0x9c] sm:$0xf] }
 0x367   : > { %v11950_v29 = vadd.f32 %v3603_v2, %v3504_v61  ;;  %v773_v61 = vld [vmem:[#allocation3 + $0x1c8] sm:$0xf]  ;;  %v13139_v45 = vshrl.u32 %v11967_v63, 16  ;;  %330 = vst [vmem:[#allocation3 + $0x1d8] sm:$0xf] %v11967_v63 }
 0x368   : > { %v774_v12 = vsel %vm10920_vm5, %v644_v1, %v773_v61  ;;  %v645_v1 = vrot.slane %v641_v58, 4  ;;  %v9885_v58 = vld [vmem:[#allocation3 + $0x118] sm:$0xf0] }
 0x369   : > { %775 = vst [vmem:[#allocation3 + $0x1c8] sm:$0xf] %v774_v12 }
 0x36b   : > { %v2802_v53 = vpop.f32.mrf.mxu0 }
 0x36c   : > { %v8713_v53 = vld [vmem:[#allocation3 + $0x1bc] sm:$0xf0] }
 0x36d   : > { %v8716_v2 = vor.u32 %v9904_v20, %v8713_v53 }
 0x36e   : > { %3701 = vmatmul.bf16.gmra.mxu0 %v8612_v52  ;;  %v11959_v41 = vpop.f32.mrf.mxu2  ;;  %v11961_v39 = vpop.f32.mrf.mxu3  ;;  %v8712_v52 = vor.u32 %v9905_v33, %v8711_v10  ;;  %v649_v10 = vrot.slane %v13139_v45, 7  ;;  %v13140_v33 = vshll.u32 %v11967_v63, 16 }
 0x370   : > { %v652_v12 = vor.u32 %v13140_v33, %v649_v10 }
 0x371   : > { %3647 = vmatmul.bf16.gmra.mxu3 %v8716_v2 }
 0x372   : > { %v653_v7 = vsel %vm10912_vm4, %v645_v1, %v652_v12 }
 0x373   : > { %v2804_v40 = vpop.f32.mrf.mxu0  ;;  %3548 = vmatmul.bf16.gmra.mxu2 %v8712_v52  ;;  %v836_v52 = vld [vmem:[#allocation3 + $0x1c8] sm:$0x1]  ;;  %776 = vst [vmem:[#allocation3 + $0x1d4] sm:$0xf] %v653_v7  ;;  %v11990_v7 = vld [vmem:[%s13086_s2] ss:$0 sm:$0xff] }
 0x376   : > { %v3509_v20 = vpop.f32.mrf.mxu2  ;;  %v3608_v53 = vpop.f32.mrf.mxu3 }
 0x377   : > { %v11980_v45 = vadd.f32 %v3608_v53, %v3509_v20  ;;  %v8419_v20 = vld [vmem:[#allocation3 + $0x1a0] sm:$0xf]  ;;  %v9753_v53 = vld [vmem:[#allocation3 + $0x1a8] sm:$0xf0] }
 0x37a   : > { %v9908_v13 = vld [vmem:[#allocation3 + $0x1d0] sm:$0xf0] }
 0x37b   : > { %v3667_v44 = vpop.f32.mrf.mxu0 }
 0x37c   : > { %v837_v44 = vsel %vm10957_vm7, 0, %v836_v52  ;;  %v8420_v52 = vor.u32 %v9753_v53, %v8419_v20 }
 0x37d   : > { %838 = vst [vmem:[#allocation3 + $0x1c8] sm:$0x1] %v837_v44 }
 0x37e   : > { %3706 = vmatmul.bf16.gmra.mxu0 %v8624_v38  ;;  %v11982_v55 = vpop.f32.mrf.mxu2  ;;  %v11984_v26 = vpop.f32.mrf.mxu3  ;;  %v8635_v38 = vld [vmem:[#allocation3 + $0x110] sm:$0xf]  ;;  %2900 = vmatmul.bf16.gmra.mxu1 %v8420_v52  ;;  %v10075_v52 = vld [vmem:[#allocation9 + $0x168] sm:$0xff] }
 0x37f   : > { %v8636_v33 = vor.u32 %v9885_v58, %v8635_v38 }
 0x383   : > { %v3669_v2 = vpop.f32.mrf.mxu0 }
 0x384   : > { %v8723_v10 = vld [vmem:[#allocation3 + $0x1c8] sm:$0xf] }
 0x385   : > { %v8724_v34 = vor.u32 %v9908_v13, %v8723_v10 }
 0x386   : > { %v3514_v2 = vpop.f32.mrf.mxu2  ;;  %v3613_v46 = vpop.f32.mrf.mxu3 }
 0x387   : > { %3553 = vmatmul.bf16.gmra.mxu2 %v8724_v34  ;;  %v12000_v53 = vadd.f32 %v3613_v46, %v3514_v2 }
 0x389   : > { %13295 = vst [vmem:[#allocation29_spill] sm:$0xff] %v12000_v53 }
 0x38b   : > { %v3672_v1 = vpop.f32.mrf.mxu0 }
 0x38c   : > { %v3673_v12 = vadd.f32 %v3672_v1, %v11865_v11  ;;  %v10076_v1 = vld [vmem:[#allocation9 + $0x170] sm:$0xff] }
 0x38d   : > { %5845 = vmatpush.bf16.msrb.mxu3 %v10076_v1  ;;  %v10074_v1 = vld [vmem:[#allocation9 + $0x160] sm:$0xff] }
 0x38e   : > { %v3759_v44 = vadd.f32 %v3673_v12, %v11760_v31  ;;  %3711 = vmatmul.bf16.gmra.mxu0 %v8636_v33  ;;  %v11996_v20 = vpop.f32.mrf.mxu2  ;;  %v11998_v31 = vpop.f32.mrf.mxu3  ;;  %v8647_v33 = vld [vmem:[#allocation3 + $0x128] sm:$0xf]  ;;  %v9888_v12 = vld [vmem:[#allocation3 + $0x130] sm:$0xf0] }
 0x38f   : > { %13293 = vst [vmem:[#allocation54_spill] sm:$0xff] %v11996_v20 }
 0x390   : > { %v3799_v13 = vadd.f32 %v11990_v7, %v3759_v44  ;;  %13294 = vst [vmem:[#allocation32_spill] sm:$0xff] %v11998_v31  ;;  %v10062_v44 = vld [vmem:[#allocation9 + $0x100] sm:$0xff]  ;;  %v8725_v31 = vld [vmem:[#allocation3 + $0x1d4] sm:$0xf0] }
 0x391   : > { %5846 = vmatpush.bf16.msrb.mxu3 %v10075_v52  ;;  %5762 = vmatpush.bf16.msra.mxu2 %v10062_v44  ;;  %v10073_v52 = vld [vmem:[#allocation9 + $0x158] sm:$0xff]  ;;  %v10054_v44 = vld [vmem:[#allocation9 + $0xc0] sm:$0xff] }
 0x392   : > { %v3835_v11 = vsub.f32 0.0, %v3799_v13  ;;  %5673 = vmatpush.bf16.msra.mxu1 %v10054_v44 }
 0x393   : > { %v3674_v38 = vpop.f32.mrf.mxu0 }
 0x394   : > { %v3873_v58 = vmul.f32 1.442695, %v3835_v11  ;;  %v3675_v10 = vadd.f32 %v3674_v38, %v11873_v50  ;;  %v8648_v11 = vor.u32 %v9888_v12, %v8647_v33  ;;  %v8728_v33 = vor.u32 %v9907_v27, %v8725_v31 }
 0x395   : > { %5847 = vmatpush.bf16.msrb.mxu3 %v10074_v1 }
 0x396   : > { %10331 = vpow2.f32 %v3873_v58  ;;  %v3760_v34 = vadd.f32 %v3675_v10, %v11764_v6  ;;  %v3519_v2 = vpop.f32.mrf.mxu2  ;;  %3652 = vmatmul.bf16.gmra.mxu3 %v8728_v33  ;;  %v9891_v33 = vld [vmem:[#allocation3 + $0x148] sm:$0xf0] }
 0x398   : > { %v12003_v9 = vadd.f32 %v11990_v7, %v3760_v34  ;;  %v3618_v34 = vpop.f32.mrf.mxu3 }
 0x399   : > { %5848 = vmatpush.bf16.msrb.mxu3 %v10073_v52  ;;  %v12018_v52 = vadd.f32 %v3618_v34, %v3519_v2 }
 0x39a   : > { %v3836_v50 = vsub.f32 0.0, %v12003_v9 }
 0x39b   : > { %v3677_v38 = vpop.f32.mrf.mxu0  ;;  %13298 = vst [vmem:[#allocation55_spill] sm:$0xff] %v12018_v52 }
 0x39c   : > { %v10332_v6 = vpop.eup %10331  ;;  %v3875_v58 = vmul.f32 1.442695, %v3836_v50  ;;  %v3678_v10 = vadd.f32 %v3677_v38, %v11880_v28 }
 0x39d   : > { %v3943_v4 = vadd.f32 1.0, %v10332_v6 }
 0x39e   : > { %10333 = vpow2.f32 %v3875_v58  ;;  %v3761_v46 = vadd.f32 %v3678_v10, %v11768_v48  ;;  %3716 = vmatmul.bf16.gmra.mxu0 %v8648_v11  ;;  %v10072_v10 = vld [vmem:[#allocation9 + $0x150] sm:$0xff]  ;;  %v12014_v31 = vpop.f32.mrf.mxu2 }
 0x39f   : > { %10335 = vrcp.f32 %v3943_v4  ;;  %13296 = vst [vmem:[#allocation53_spill] sm:$0xff] %v12014_v31  ;;  %5849 = vmatpush.bf16.msrb.mxu3 %v10072_v10  ;;  %v4594_v10 = vld [vmem:[#allocation4 + $0x18] sm:$0xf]  ;;  %v10070_v31 = vld [vmem:[#allocation9 + $0x140] sm:$0xff] }
 0x3a0   : > { %v12009_v12 = vadd.f32 %v11990_v7, %v3761_v46  ;;  %v12016_v1 = vpop.f32.mrf.mxu3  ;;  %v8659_v46 = vld [vmem:[#allocation3 + $0x140] sm:$0xf] }
 0x3a1   : > { %13297 = vst [vmem:[#allocation30_spill] sm:$0xff] %v12016_v1 }
 0x3a2   : > { %v3837_v28 = vsub.f32 0.0, %v12009_v12 }
 0x3a3   : > { %v3679_v50 = vpop.f32.mrf.mxu0 }
 0x3a4   : > { %v10334_v48 = vpop.eup %10333  ;;  %v3877_v11 = vmul.f32 1.442695, %v3837_v28  ;;  %v3680_v38 = vadd.f32 %v3679_v50, %v11886_v25  ;;  %v10071_v28 = vld [vmem:[#allocation9 + $0x148] sm:$0xff] }
 0x3a5   : > { %v10336_v6 = vpop.eup %10335  ;;  %v3944_v58 = vadd.f32 1.0, %v10334_v48  ;;  %v8660_v48 = vor.u32 %v9891_v33, %v8659_v46  ;;  %5850 = vmatpush.bf16.msrb.mxu3 %v10071_v28 }
 0x3a6   : > { %v4015_v4 = vmul.f32 %v10336_v6, %v3799_v13  ;;  %10337 = vpow2.f32 %v3877_v11  ;;  %v3762_v27 = vadd.f32 %v3680_v38, %v11772_v32  ;;  %v3524_v33 = vpop.f32.mrf.mxu2 }
 0x3a7   : > { %10339 = vrcp.f32 %v3944_v58 }
 0x3a8   : > { %v4196_v44 = vpack.c.bf16 %v4015_v4, %v4015_v4  ;;  %v12021_v25 = vadd.f32 %v11990_v7, %v3762_v27  ;;  %v3623_v28 = vpop.f32.mrf.mxu3 }
 0x3a9   : > { %5851 = vmatpush.bf16.msrb.mxu3 %v10070_v31 }
 0x3aa   : > { %4232 = vst [vmem:[#allocation4 + $0x1c] sm:$0xf] %v4196_v44  ;;  %v4283_v13 = vshrl.u32 %v4196_v44, 16  ;;  %v4286_v50 = vshll.u32 %v4196_v44, 16  ;;  %v3838_v32 = vsub.f32 0.0, %v12021_v25 }
 0x3ab   : > { %v3682_v11 = vpop.f32.mrf.mxu0 }
 0x3ac   : > { %v10338_v38 = vpop.eup %10337  ;;  %v4285_v6 = vrot.slane %v4283_v13, 7  ;;  %v4725_v58 = vrot.slane %v4283_v13, 4  ;;  %v4726_v1 = vrot.slane %v4286_v50, 5  ;;  %v3879_v2 = vmul.f32 1.442695, %v3838_v32 }
 0x3ad   : > { %v10340_v34 = vpop.eup %10339  ;;  %v3945_v4 = vadd.f32 1.0, %v10338_v38  ;;  %v3683_v27 = vadd.f32 %v3682_v11, %v11895_v49 }
 0x3ae   : > { %v4288_v52 = vor.u32 %v4286_v50, %v4285_v6  ;;  %v4016_v20 = vmul.f32 %v10340_v34, %v12003_v9  ;;  %3721 = vmatmul.bf16.gmra.mxu0 %v8660_v48  ;;  %v4727_v44 = vor.u32 %v4726_v1, %v4725_v58 }
 0x3af   : > { %10341 = vrcp.f32 %v3945_v4  ;;  %v3763_v46 = vadd.f32 %v3683_v27, %v11776_v51 }
 0x3b0   : > { %v4595_v13 = vsel %vm10920_vm5, %v4288_v52, %v4594_v10  ;;  %v4197_v32 = vpack.c.bf16 %v4016_v20, %v4016_v20  ;;  %10343 = vpow2.f32 %v3879_v2  ;;  %v4728_v48 = vrot.slane %v4727_v44, 4  ;;  %v8671_v44 = vld [vmem:[#allocation3 + $0x158] sm:$0xf] }
 0x3b1   : > { %4596 = vst [vmem:[#allocation4 + $0x18] sm:$0xf] %v4595_v13  ;;  %v12030_v49 = vadd.f32 %v11990_v7, %v3763_v46  ;;  %v4289_v52 = vrot.slane %v4285_v6, 4  ;;  %v12040_v6 = vpop.f32.mrf.mxu3 }
 0x3b2   : > { %4233 = vst [vmem:[#allocation4 + $0x28] sm:$0xf] %v4197_v32  ;;  %v4291_v50 = vshrl.u32 %v4197_v32, 16  ;;  %v4294_v9 = vshll.u32 %v4197_v32, 16  ;;  %v9894_v32 = vld [vmem:[#allocation3 + $0x160] sm:$0xf0] }
 0x3b3   : > { %v3839_v1 = vsub.f32 0.0, %v12030_v49  ;;  %v3684_v11 = vpop.f32.mrf.mxu0  ;;  %13300 = vst [vmem:[#allocation33_spill] sm:$0xff] %v12040_v6  ;;  %v9897_v6 = vld [vmem:[#allocation3 + $0x178] sm:$0xf0] }
 0x3b4   : > { %v4293_v51 = vrot.slane %v4291_v50, 7  ;;  %v4729_v38 = vrot.slane %v4294_v9, 5  ;;  %v4731_v58 = vrot.slane %v4291_v50, 4  ;;  %v3685_v31 = vadd.f32 %v3684_v11, %v11901_v24  ;;  %v12038_v24 = vpop.f32.mrf.mxu2 }
 0x3b5   : > { %v10342_v34 = vpop.eup %10341  ;;  %v3881_v20 = vmul.f32 1.442695, %v3839_v1 }
 0x3b6   : > { %v10344_v2 = vpop.eup %10343  ;;  %v4296_v10 = vor.u32 %v4294_v9, %v4293_v51  ;;  %v4730_v27 = vsel %vm11168_vm11, %v4728_v48, %v4729_v38  ;;  %v4732_v46 = vor.u32 %v4731_v58, %v4729_v38  ;;  %v4017_v13 = vmul.f32 %v10342_v34, %v12009_v12  ;;  %v10006_v51 = vld [vmem:[#allocation4 + $0x1c] sm:$0xf] }
 0x3b7   : > { %4918 = vst [vmem:[#allocation4 + $0x20] sm:$0xf] %v4730_v27  ;;  %v3946_v53 = vadd.f32 1.0, %v10344_v2  ;;  %10345 = vpow2.f32 %v3881_v20  ;;  %v3764_v50 = vadd.f32 %v3685_v31, %v11780_v62  ;;  %v12044_v12 = vadd.f32 %v3623_v28, %v3524_v33 }
 0x3b8   : > { %v4665_v1 = vld [vmem:[#allocation4 + $0x18] sm:$0x1]  ;;  %v4297_v9 = vsel %vm10912_vm4, %v4289_v52, %v4296_v10  ;;  %v4733_v48 = vrot.slane %v4732_v46, 4  ;;  %v4198_v11 = vpack.c.bf16 %v4017_v13, %v4017_v13  ;;  %v8672_v31 = vor.u32 %v9894_v32, %v8671_v44  ;;  %v4598_v13 = vld [vmem:[#allocation4 + $0x30] sm:$0xf] }
 0x3b9   : > { %v4666_v38 = vsel %vm10957_vm7, 0, %v4665_v1  ;;  %4597 = vst [vmem:[#allocation4 + $0x24] sm:$0xf] %v4297_v9  ;;  %10347 = vrcp.f32 %v3946_v53  ;;  %v12049_v62 = vadd.f32 %v11990_v7, %v3764_v50  ;;  %v8833_v58 = vld [vmem:[#allocation4 + $0x24] sm:$0xf0] }
 0x3ba   : > { %4667 = vst [vmem:[#allocation4 + $0x18] sm:$0x1] %v4666_v38  ;;  %v4920_v20 = vsel %vm11148_vm9, %v4733_v48, %v4919_v30  ;;  %v4299_v52 = vshrl.u32 %v4198_v11, 16  ;;  %v4302_v2 = vshll.u32 %v4198_v11, 16  ;;  %v8836_v10 = vor.u32 %v10006_v51, %v8833_v58 }
 0x3bb   : > { %4921 = vst [vmem:[#allocation4 + $0x2c] sm:$0xf] %v4920_v20  ;;  %v3840_v33 = vsub.f32 0.0, %v12049_v62  ;;  %v3687_v28 = vpop.f32.mrf.mxu0 }
 0x3bc   : > { %4234 = vst [vmem:[#allocation4 + $0x34] sm:$0xf] %v4198_v11  ;;  %v12054_v27 = vrot.slane %v4299_v52, 7  ;;  %v3688_v53 = vadd.f32 %v3687_v28, %v11910_v43  ;;  %5763 = vmatmul.bf16.vlgmr.msra.gmra.mxu2 %v8836_v10  ;;  %v4734_v44 = vrot.slane %v4299_v52, 4  ;;  %v4735_v32 = vrot.slane %v4302_v2, 5  ;;  %v3529_v51 = vpop.f32.mrf.mxu2  ;;  %v3628_v11 = vpop.f32.mrf.mxu3 }
 0x3bd   : > { %v10346_v46 = vpop.eup %10345  ;;  %v3883_v50 = vmul.f32 1.442695, %v3840_v33 }
 0x3be   : > { %v4304_v30 = vor.u32 %v4302_v2, %v12054_v27  ;;  %v3947_v1 = vadd.f32 1.0, %v10346_v46  ;;  %3726 = vmatmul.bf16.gmra.mxu0 %v8672_v31  ;;  %v3765_v48 = vadd.f32 %v3688_v53, %v11786_v54  ;;  %v4736_v20 = vor.u32 %v4735_v32, %v4734_v44 }
 0x3bf   : > { %v10348_v9 = vpop.eup %10347  ;;  %10349 = vpow2.f32 %v3883_v50 }
 0x3c0   : > { %v4599_v38 = vsel %vm10920_vm5, %v4304_v30, %v4598_v13  ;;  %v4018_v43 = vmul.f32 %v10348_v9, %v12021_v25  ;;  %10351 = vrcp.f32 %v3947_v1  ;;  %v10007_v58 = vld [vmem:[#allocation4 + $0x20] sm:$0xf0]  ;;  %v12063_v52 = vadd.f32 %v11990_v7, %v3765_v48 }
 0x3c1   : > { %4600 = vst [vmem:[#allocation4 + $0x30] sm:$0xf] %v4599_v38  ;;  %v8831_v2 = vld [vmem:[#allocation4 + $0x18] sm:$0xf]  ;;  %v4737_v32 = vrot.slane %v4736_v20, 4 }
 0x3c2   : > { %v4989_v31 = vld [vmem:[#allocation4 + $0x2c] sm:$0x8]  ;;  %v4199_v10 = vpack.c.bf16 %v4018_v43, %v4018_v43  ;;  %v8832_v33 = vor.u32 %v10007_v58, %v8831_v2  ;;  %v3841_v53 = vsub.f32 0.0, %v12063_v52  ;;  %v4305_v58 = vrot.slane %v12054_v27, 4 }
 0x3c3   : > { %v4990_v54 = vsel %vm11179_vm14, 0, %v4989_v31  ;;  %v3689_v46 = vpop.f32.mrf.mxu0 }
 0x3c4   : > { %4991 = vst [vmem:[#allocation4 + $0x2c] sm:$0x8] %v4990_v54  ;;  %v4307_v13 = vshrl.u32 %v4199_v10, 16  ;;  %v4310_v25 = vshll.u32 %v4199_v10, 16  ;;  %v3690_v50 = vadd.f32 %v3689_v46, %v11916_v5  ;;  %5674 = vmatmul.bf16.vlgmr.msra.gmra.mxu1 %v8832_v33  ;;  %v3885_v30 = vmul.f32 1.442695, %v3841_v53  ;;  %v12072_v5 = vpop.f32.mrf.mxu2  ;;  %v12074_v33 = vpop.f32.mrf.mxu3 }
 0x3c5   : > { %v10350_v44 = vpop.eup %10349  ;;  %4235 = vst [vmem:[#allocation4 + $0x40] sm:$0xf] %v4199_v10  ;;  %v8683_v54 = vld [vmem:[#allocation3 + $0x170] sm:$0xf] }
 0x3c6   : > { %v10352_v1 = vpop.eup %10351  ;;  %v4309_v9 = vrot.slane %v4307_v13, 7  ;;  %v4738_v48 = vrot.slane %v4310_v25, 5  ;;  %v4740_v38 = vrot.slane %v4307_v13, 4  ;;  %v3948_v43 = vadd.f32 1.0, %v10350_v44 }
 0x3c7   : > { %v4019_v2 = vmul.f32 %v10352_v1, %v12030_v49  ;;  %10353 = vpow2.f32 %v3885_v30  ;;  %v3766_v31 = vadd.f32 %v3690_v50, %v11790_v56  ;;  %v4923_v49 = vld [vmem:[#allocation4 + $0x44] sm:$0xf]  ;;  %v12083_v50 = vadd.f32 %v3628_v11, %v3529_v51  ;;  %v10009_v11 = vld [vmem:[#allocation4 + $0x34] sm:$0xf] }
 0x3c8   : > { %v4668_v20 = vld [vmem:[#allocation4 + $0x30] sm:$0x1]  ;;  %v4312_v10 = vor.u32 %v4310_v25, %v4309_v9  ;;  %v4739_v53 = vsel %vm11168_vm11, %v4737_v32, %v4738_v48  ;;  %v4741_v46 = vor.u32 %v4740_v38, %v4738_v48  ;;  %10355 = vrcp.f32 %v3948_v43  ;;  %v9997_v9 = vld [vmem:[#allocation9 + $0x78] sm:$0xff] }
 0x3c9   : > { %v4669_v27 = vsel %vm10957_vm7, 0, %v4668_v20  ;;  %4922 = vst [vmem:[#allocation4 + $0x38] sm:$0xf] %v4739_v53  ;;  %v4200_v13 = vpack.c.bf16 %v4019_v2, %v4019_v2  ;;  %v12081_v56 = vadd.f32 %v11990_v7, %v3766_v31  ;;  %v8684_v30 = vor.u32 %v9897_v6, %v8683_v54  ;;  %v4602_v2 = vld [vmem:[#allocation4 + $0x48] sm:$0xf]  ;;  %6422 = vmatpush.bf16.msrb.mxu2 %v9997_v9 }
 0x3ca   : > { %4670 = vst [vmem:[#allocation4 + $0x30] sm:$0x1] %v4669_v27  ;;  %v4313_v25 = vsel %vm10912_vm4, %v4305_v58, %v4312_v10  ;;  %v4742_v44 = vrot.slane %v4741_v46, 4 }
 0x3cb   : > { %4601 = vst [vmem:[#allocation4 + $0x3c] sm:$0xf] %v4313_v25  ;;  %v4315_v32 = vshrl.u32 %v4200_v13, 16  ;;  %v4318_v1 = vshll.u32 %v4200_v13, 16  ;;  %v3842_v48 = vsub.f32 0.0, %v12081_v56  ;;  %v3692_v38 = vpop.f32.mrf.mxu0 }
 0x3cc   : > { %v4924_v43 = vsel %vm11148_vm9, %v4742_v44, %v4923_v49  ;;  %4236 = vst [vmem:[#allocation4 + $0x4c] sm:$0xf] %v4200_v13  ;;  %v3693_v51 = vadd.f32 %v3692_v38, %v11923_v60  ;;  %v8845_v31 = vld [vmem:[#allocation4 + $0x3c] sm:$0xf0]  ;;  %v10008_v49 = vld [vmem:[#allocation4 + $0x28] sm:$0xf0] }
 0x3cd   : > { %v10354_v20 = vpop.eup %10353  ;;  %4925 = vst [vmem:[#allocation4 + $0x44] sm:$0xf] %v4924_v43  ;;  %v12091_v58 = vrot.slane %v4315_v32, 7  ;;  %v4743_v6 = vrot.slane %v4315_v32, 4  ;;  %v4744_v54 = vrot.slane %v4318_v1, 5  ;;  %v8848_v10 = vor.u32 %v10009_v11, %v8845_v31  ;;  %v3534_v43 = vpop.f32.mrf.mxu2 }
 0x3ce   : > { %v10356_v53 = vpop.eup %10355  ;;  %v3949_v46 = vadd.f32 1.0, %v10354_v20  ;;  %v3887_v27 = vmul.f32 1.442695, %v3842_v48  ;;  %v3767_v25 = vadd.f32 %v3693_v51, %v11796_v8  ;;  %3731 = vmatmul.bf16.gmra.mxu0 %v8684_v30  ;;  %v8839_v44 = vld [vmem:[#allocation4 + $0x20] sm:$0xf]  ;;  %v3633_v11 = vpop.f32.mrf.mxu3 }
 0x3cf   : > { %v4320_v13 = vor.u32 %v4318_v1, %v12091_v58  ;;  %v4020_v60 = vmul.f32 %v10356_v53, %v12049_v62  ;;  %5768 = vmatmul.bf16.gmra.mxu2 %v8848_v10  ;;  %v4745_v38 = vor.u32 %v4744_v54, %v4743_v6  ;;  %v8840_v9 = vor.u32 %v10008_v49, %v8839_v44 }
 0x3d0   : > { %10357 = vrcp.f32 %v3949_v46  ;;  %v12097_v32 = vadd.f32 %v11990_v7, %v3767_v25  ;;  %v3596_v1 = vadd.f32 %v11933_v36, %v11931_v59  ;;  %v2844_v10 = vadd.f32 %v11782_v57, %v11800_v42 }
 0x3d1   : > { %v4603_v48 = vsel %vm10920_vm5, %v4320_v13, %v4602_v2  ;;  %v4201_v8 = vpack.c.bf16 %v4020_v60, %v4020_v60  ;;  %10359 = vpow2.f32 %v3887_v27  ;;  %v8843_v30 = vld [vmem:[#allocation4 + $0x30] sm:$0xf]  ;;  %5852 = vmatmul.bf16.vlgmr.msrb.gmra.mxu3 %v8840_v9  ;;  %v4746_v53 = vrot.slane %v4745_v38, 4 }
 0x3d2   : > { %4604 = vst [vmem:[#allocation4 + $0x48] sm:$0xf] %v4603_v48  ;;  %v3843_v62 = vsub.f32 0.0, %v12097_v32  ;;  %v10010_v51 = vld [vmem:[#allocation4 + $0x38] sm:$0xf0]  ;;  %v4321_v60 = vrot.slane %v12091_v58, 4  ;;  %v12115_v58 = vadd.f32 %v3633_v11, %v3534_v43 }
 0x3d3   : > { %4237 = vst [vmem:[#allocation4 + $0x58] sm:$0xf] %v4201_v8  ;;  %v4323_v31 = vshrl.u32 %v4201_v8, 16  ;;  %v4326_v20 = vshll.u32 %v4201_v8, 16  ;;  %v3694_v6 = vpop.f32.mrf.mxu0  ;;  %v8844_v54 = vor.u32 %v10010_v51, %v8843_v30  ;;  %v9989_v8 = vld [vmem:[#allocation9 + $0x38] sm:$0xff] }
 0x3d4   : > { %v4992_v2 = vld [vmem:[#allocation4 + $0x44] sm:$0x8]  ;;  %v3889_v46 = vmul.f32 1.442695, %v3843_v62  ;;  %v3695_v27 = vadd.f32 %v3694_v6, %v3596_v1  ;;  %v8695_v30 = vld [vmem:[#allocation3 + $0x188] sm:$0xf]  ;;  %6333 = vmatpush.bf16.msrb.mxu1 %v9989_v8 }
 0x3d5   : > { %v4993_v59 = vsel %vm11179_vm14, 0, %v4992_v2  ;;  %v4325_v36 = vrot.slane %v4323_v31, 7  ;;  %v4747_v25 = vrot.slane %v4326_v20, 5  ;;  %v4749_v49 = vrot.slane %v4323_v31, 4  ;;  %5679 = vmatmul.bf16.gmra.mxu1 %v8844_v54  ;;  %v9900_v1 = vld [vmem:[#allocation3 + $0x190] sm:$0xf0] }
 0x3d6   : > { %v10358_v13 = vpop.eup %10357  ;;  %4994 = vst [vmem:[#allocation4 + $0x44] sm:$0x8] %v4993_v59  ;;  %10361 = vpow2.f32 %v3889_v46  ;;  %v3768_v44 = vadd.f32 %v3695_v27, %v2844_v10  ;;  %v4927_v62 = vld [vmem:[#allocation4 + $0x5c] sm:$0xf]  ;;  %v8696_v46 = vor.u32 %v9900_v1, %v8695_v30  ;;  %v12122_v27 = vpop.f32.mrf.mxu2  ;;  %v4606_v1 = vld [vmem:[#allocation4 + $0x60] sm:$0xf] }
 0x3d7   : > { %v10360_v9 = vpop.eup %10359  ;;  %v4328_v48 = vor.u32 %v4326_v20, %v4325_v36  ;;  %v4748_v57 = vsel %vm11168_vm11, %v4746_v53, %v4747_v25  ;;  %v4750_v42 = vor.u32 %v4749_v49, %v4747_v25  ;;  %v4021_v38 = vmul.f32 %v10358_v13, %v12063_v52  ;;  %v10012_v53 = vld [vmem:[#allocation4 + $0x4c] sm:$0xf]  ;;  %v12124_v43 = vpop.f32.mrf.mxu3 }
 0x3d8   : > { %4926 = vst [vmem:[#allocation4 + $0x50] sm:$0xf] %v4748_v57  ;;  %v3950_v51 = vadd.f32 1.0, %v10360_v9  ;;  %v12113_v31 = vadd.f32 %v11990_v7, %v3768_v44 }
 0x3d9   : > { %v4671_v6 = vld [vmem:[#allocation4 + $0x48] sm:$0x1]  ;;  %v4329_v20 = vsel %vm10912_vm4, %v4321_v60, %v4328_v48  ;;  %v4751_v54 = vrot.slane %v4750_v42, 4  ;;  %v4202_v10 = vpack.c.bf16 %v4021_v38, %v4021_v38  ;;  %v13303_v48 = vshll.u32 %v11967_v63, 16 }
 0x3da   : > { %v4672_v52 = vsel %vm10957_vm7, 0, %v4671_v6  ;;  %4605 = vst [vmem:[#allocation4 + $0x54] sm:$0xf] %v4329_v20  ;;  %10363 = vrcp.f32 %v3950_v51  ;;  %v3844_v2 = vsub.f32 0.0, %v12113_v31  ;;  %v8857_v49 = vld [vmem:[#allocation4 + $0x54] sm:$0xf0] }
 0x3db   : > { %4673 = vst [vmem:[#allocation4 + $0x48] sm:$0x1] %v4672_v52  ;;  %v4928_v11 = vsel %vm11148_vm9, %v4751_v54, %v4927_v62  ;;  %v4331_v59 = vshrl.u32 %v4202_v10, 16  ;;  %v4334_v36 = vshll.u32 %v4202_v10, 16  ;;  %v3697_v25 = vpop.f32.mrf.mxu0  ;;  %v8860_v9 = vor.u32 %v10012_v53, %v8857_v49 }
 0x3dc   : > { %v10362_v13 = vpop.eup %10361  ;;  %4929 = vst [vmem:[#allocation4 + $0x5c] sm:$0xf] %v4928_v11  ;;  %v3891_v60 = vmul.f32 1.442695, %v3844_v2  ;;  %v3698_v44 = vadd.f32 %v3697_v25, %v11940_v35  ;;  %v12131_v57 = vrot.slane %v13303_v48, 5  ;;  %v13304_v6 = vshrl.u32 %v11967_v63, 16 }
 0x3dd   : > { %4238 = vst [vmem:[#allocation4 + $0x64] sm:$0xf] %v4202_v10  ;;  %v12133_v42 = vrot.slane %v4331_v59, 7  ;;  %v4752_v38 = vrot.slane %v4331_v59, 4  ;;  %v4753_v8 = vrot.slane %v4334_v36, 5  ;;  %v3951_v30 = vadd.f32 1.0, %v10362_v13 }
 0x3de   : > { %10365 = vpow2.f32 %v3891_v60  ;;  %v3769_v62 = vadd.f32 %v3698_v44, %v11806_v18  ;;  %3736 = vmatmul.bf16.gmra.mxu0 %v8696_v46  ;;  %v10011_v51 = vld [vmem:[#allocation4 + $0x40] sm:$0xf0]  ;;  %v1019_v35 = vrot.slane %v13304_v6, 4  ;;  %v8851_v10 = vld [vmem:[#allocation4 + $0x38] sm:$0xf]  ;;  %v3539_v13 = vpop.f32.mrf.mxu2 }
 0x3df   : > { %v4336_v20 = vor.u32 %v4334_v36, %v12133_v42  ;;  %v4754_v54 = vor.u32 %v4753_v8, %v4752_v38  ;;  %10367 = vrcp.f32 %v3951_v30  ;;  %5773 = vmatmul.bf16.gmra.mxu2 %v8860_v9  ;;  %v8852_v53 = vor.u32 %v10011_v51, %v8851_v10  ;;  %v1140_v59 = vld [vmem:[#allocation3 + $0x1dc] sm:$0xf]  ;;  %v3638_v60 = vpop.f32.mrf.mxu3  ;;  %v12155_v6 = vld [vmem:[#allocation3 + $0x1a8] sm:$0xf0] }
 0x3e0   : > { %v10364_v52 = vpop.eup %10363  ;;  %v12140_v2 = vadd.f32 %v11990_v7, %v3769_v62  ;;  %v1020_v11 = vor.u32 %v1019_v35, %v12131_v57  ;;  %v3601_v36 = vadd.f32 %v11948_v17, %v11946_v0  ;;  %v2849_v9 = vadd.f32 %v11792_v14, %v11810_v15  ;;  %v10133_v35 = vld [vmem:[#allocation9 + $0x1b8] sm:$0xff] }
 0x3e1   : > { %v4607_v18 = vsel %vm10920_vm5, %v4336_v20, %v4606_v1  ;;  %v4022_v46 = vmul.f32 %v10364_v52, %v12081_v56  ;;  %v10013_v63 = vld [vmem:[#allocation4 + $0x50] sm:$0xf0]  ;;  %5857 = vmatmul.bf16.gmra.mxu3 %v8852_v53  ;;  %v4755_v38 = vrot.slane %v4754_v54, 4  ;;  %v12151_v1 = vld [vmem:[#allocation3 + $0x1a0] sm:$0xf]  ;;  %v13305_v52 = vshrl.u32 %v11952_v47, 16  ;;  %7114 = vmatpush.bf16.msra.mxu0 %v10133_v35 }
 0x3e2   : > { %4608 = vst [vmem:[#allocation4 + $0x60] sm:$0xf] %v4607_v18  ;;  %v3845_v25 = vsub.f32 0.0, %v12140_v2  ;;  %v8855_v49 = vld [vmem:[#allocation4 + $0x48] sm:$0xf]  ;;  %v1021_v44 = vrot.slane %v1020_v11, 4 }
 0x3e3   : > { %v4995_v48 = vld [vmem:[#allocation4 + $0x5c] sm:$0x8]  ;;  %v4203_v8 = vpack.c.bf16 %v4022_v46, %v4022_v46  ;;  %v3699_v56 = vpop.f32.mrf.mxu0  ;;  %v8856_v30 = vor.u32 %v10013_v63, %v8855_v49  ;;  %v1013_v53 = vrot.slane %v13305_v52, 4  ;;  %v13306_v46 = vshll.u32 %v11952_v47, 16 }
 0x3e4   : > { %v10366_v62 = vpop.eup %10365  ;;  %v4996_v0 = vsel %vm11179_vm14, 0, %v4995_v48  ;;  %v3893_v17 = vmul.f32 1.442695, %v3845_v25  ;;  %v3700_v51 = vadd.f32 %v3699_v56, %v3601_v36  ;;  %v1141_v20 = vsel %vm11148_vm9, %v1021_v44, %v1140_v59 }
 0x3e5   : > { %v10368_v14 = vpop.eup %10367  ;;  %4997 = vst [vmem:[#allocation4 + $0x5c] sm:$0x8] %v4996_v0  ;;  %v4339_v15 = vshrl.u32 %v4203_v8, 16  ;;  %v4342_v54 = vshll.u32 %v4203_v8, 16  ;;  %v3952_v10 = vadd.f32 1.0, %v10366_v62  ;;  %5684 = vmatmul.bf16.gmra.mxu1 %v8856_v30  ;;  %v1014_v63 = vrot.slane %v13306_v46, 5 }
 0x3e6   : > { %4239 = vst [vmem:[#allocation4 + $0x70] sm:$0xf] %v4203_v8  ;;  %v4023_v11 = vmul.f32 %v10368_v14, %v12097_v32  ;;  %10369 = vpow2.f32 %v3893_v17  ;;  %v3770_v18 = vadd.f32 %v3700_v51, %v2849_v9  ;;  %v4337_v49 = vrot.slane %v12133_v42, 4  ;;  %v10132_v8 = vld [vmem:[#allocation9 + $0x1b0] sm:$0xff]  ;;  %v4931_v62 = vld [vmem:[#allocation4 + $0x74] sm:$0xf] }
 0x3e7   : > { %v4341_v36 = vrot.slane %v4339_v15, 7  ;;  %v4756_v59 = vrot.slane %v4342_v54, 5  ;;  %v4758_v25 = vrot.slane %v4339_v15, 4  ;;  %10371 = vrcp.f32 %v3952_v10  ;;  %1142 = vst [vmem:[#allocation3 + $0x1dc] sm:$0xf] %v1141_v20  ;;  %v12175_v20 = vpop.f32.mrf.mxu2  ;;  %7115 = vmatpush.bf16.msra.mxu0 %v10132_v8  ;;  %v9996_v14 = vld [vmem:[#allocation9 + $0x70] sm:$0xff]  ;;  %v12184_v46 = vpop.f32.mrf.mxu3 }
 0x3e8   : > { %v4204_v44 = vpack.c.bf16 %v4023_v11, %v4023_v11  ;;  %v12166_v48 = vadd.f32 %v11990_v7, %v3770_v18  ;;  %v8708_v32 = vor.u32 %v12155_v6, %v12151_v1  ;;  %v1015_v0 = vor.u32 %v1014_v63, %v1013_v53  ;;  %v10131_v63 = vld [vmem:[#allocation9 + $0x1a8] sm:$0xff]  ;;  %6423 = vmatpush.bf16.msrb.mxu2 %v9996_v14 }
 0x3e9   : > { %v4674_v9 = vld [vmem:[#allocation4 + $0x60] sm:$0x1]  ;;  %v4344_v56 = vor.u32 %v4342_v54, %v4341_v36  ;;  %v4757_v47 = vsel %vm11168_vm11, %v4755_v38, %v4756_v59  ;;  %v4759_v30 = vor.u32 %v4758_v25, %v4756_v59  ;;  %v4610_v38 = vld [vmem:[#allocation4 + $0x78] sm:$0xf]  ;;  %v12179_v54 = vadd.f32 %v3638_v60, %v3539_v13 }
 0x3ea   : > { %v4675_v17 = vsel %vm10957_vm7, 0, %v4674_v9  ;;  %4930 = vst [vmem:[#allocation4 + $0x68] sm:$0xf] %v4757_v47  ;;  %v4347_v42 = vshrl.u32 %v4204_v44, 16  ;;  %v4350_v51 = vshll.u32 %v4204_v44, 16  ;;  %v3846_v35 = vsub.f32 0.0, %v12166_v48 }
 0x3eb   : > { %4676 = vst [vmem:[#allocation4 + $0x60] sm:$0x1] %v4675_v17  ;;  %v4345_v1 = vsel %vm10912_vm4, %v4337_v49, %v4344_v56  ;;  %v4760_v6 = vrot.slane %v4759_v30, 4  ;;  %v3702_v15 = vpop.f32.mrf.mxu0  ;;  %v1016_v60 = vrot.slane %v1015_v0, 4  ;;  %v8863_v9 = vld [vmem:[#allocation4 + $0x50] sm:$0xf]  ;;  %7116 = vmatpush.bf16.msra.mxu0 %v10131_v63 }
 0x3ec   : > { %v10370_v10 = vpop.eup %10369  ;;  %4609 = vst [vmem:[#allocation4 + $0x6c] sm:$0xf] %v4345_v1  ;;  %v12181_v52 = vrot.slane %v4347_v42, 7  ;;  %v4761_v53 = vrot.slane %v4347_v42, 4  ;;  %v4762_v11 = vrot.slane %v4350_v51, 5  ;;  %v3703_v18 = vadd.f32 %v3702_v15, %v11950_v29 }
 0x3ed   : > { %v10372_v36 = vpop.eup %10371  ;;  %v4932_v59 = vsel %vm11148_vm9, %v4760_v6, %v4931_v62  ;;  %4240 = vst [vmem:[#allocation4 + $0x7c] sm:$0xf] %v4204_v44  ;;  %v3953_v25 = vadd.f32 1.0, %v10370_v10  ;;  %v3895_v13 = vmul.f32 1.442695, %v3846_v35  ;;  %v1018_v44 = vsel %vm11168_vm11, %v1016_v60, %v12131_v57 }
 0x3ee   : > { %4933 = vst [vmem:[#allocation4 + $0x74] sm:$0xf] %v4932_v59  ;;  %v4352_v49 = vor.u32 %v4350_v51, %v12181_v52  ;;  %v4024_v8 = vmul.f32 %v10372_v36, %v12113_v31  ;;  %3741 = vmatmul.bf16.gmra.mxu0 %v8708_v32  ;;  %v4763_v29 = vor.u32 %v4762_v11, %v4761_v53  ;;  %v8869_v47 = vld [vmem:[#allocation4 + $0x6c] sm:$0xf0]  ;;  %v10014_v30 = vld [vmem:[#allocation4 + $0x58] sm:$0xf0] }
 0x3ef   : > { %10373 = vrcp.f32 %v3953_v25  ;;  %v3771_v56 = vadd.f32 %v3703_v18, %v11817_v16  ;;  %v1203_v62 = vld [vmem:[#allocation3 + $0x1dc] sm:$0x8]  ;;  %v10015_v31 = vld [vmem:[#allocation4 + $0x64] sm:$0xf]  ;;  %v10130_v32 = vld [vmem:[#allocation9 + $0x1a0] sm:$0xff]  ;;  %v8864_v51 = vor.u32 %v10014_v30, %v8863_v9  ;;  %v3606_v57 = vadd.f32 %v11961_v39, %v11959_v41  ;;  %v3544_v14 = vpop.f32.mrf.mxu2 }
 0x3f0   : > { %v4611_v0 = vsel %vm10920_vm5, %v4352_v49, %v4610_v38  ;;  %v4205_v17 = vpack.c.bf16 %v4024_v8, %v4024_v8  ;;  %10375 = vpow2.f32 %v3895_v13  ;;  %1139 = vst [vmem:[#allocation3 + $0x1d0] sm:$0xf] %v1018_v44  ;;  %v8872_v16 = vor.u32 %v10015_v31, %v8869_v47  ;;  %7117 = vmatpush.bf16.msra.mxu0 %v10130_v32  ;;  %v10129_v41 = vld [vmem:[#allocation9 + $0x198] sm:$0xff]  ;;  %v9988_v44 = vld [vmem:[#allocation9 + $0x30] sm:$0xff] }
 0x3f1   : > { %4612 = vst [vmem:[#allocation4 + $0x78] sm:$0xf] %v4611_v0  ;;  %v12197_v42 = vadd.f32 %v11990_v7, %v3771_v56  ;;  %v1204_v35 = vsel %vm11179_vm14, 0, %v1203_v62  ;;  %v4353_v15 = vrot.slane %v12181_v52, 4  ;;  %v4764_v10 = vrot.slane %v4763_v29, 4  ;;  %5862 = vmatmul.bf16.gmra.mxu3 %v8864_v51  ;;  %v3643_v0 = vpop.f32.mrf.mxu3  ;;  %6334 = vmatpush.bf16.msrb.mxu1 %v9988_v44 }
 0x3f2   : > { %4241 = vst [vmem:[#allocation4 + $0x88] sm:$0xf] %v4205_v17  ;;  %v4355_v1 = vshrl.u32 %v4205_v17, 16  ;;  %v4358_v6 = vshll.u32 %v4205_v17, 16  ;;  %v8867_v38 = vld [vmem:[#allocation4 + $0x60] sm:$0xf]  ;;  %5778 = vmatmul.bf16.gmra.mxu2 %v8872_v16  ;;  %v2854_v13 = vadd.f32 %v11802_v3, %v11821_v22 }
 0x3f3   : > { %v3847_v53 = vsub.f32 0.0, %v12197_v42  ;;  %v3704_v11 = vpop.f32.mrf.mxu0  ;;  %v10016_v18 = vld [vmem:[#allocation4 + $0x68] sm:$0xf0]  ;;  %1205 = vst [vmem:[#allocation3 + $0x1dc] sm:$0x8] %v1204_v35  ;;  %v10128_v35 = vld [vmem:[#allocation9 + $0x190] sm:$0xff] }
 0x3f4   : > { %v4357_v63 = vrot.slane %v4355_v1, 7  ;;  %v4765_v36 = vrot.slane %v4358_v6, 5  ;;  %v4767_v59 = vrot.slane %v4355_v1, 4  ;;  %v3705_v25 = vadd.f32 %v3704_v11, %v3606_v57  ;;  %v4935_v30 = vld [vmem:[#allocation4 + $0x8c] sm:$0xf]  ;;  %7118 = vmatpush.bf16.msra.mxu0 %v10129_v41 }
 0x3f5   : > { %v10374_v39 = vpop.eup %10373  ;;  %v4998_v60 = vld [vmem:[#allocation4 + $0x74] sm:$0x8]  ;;  %v3897_v49 = vmul.f32 1.442695, %v3847_v53  ;;  %v8868_v52 = vor.u32 %v10016_v18, %v8867_v38  ;;  %v8719_v62 = vld [vmem:[#allocation3 + $0x1b8] sm:$0xf] }
 0x3f6   : > { %v10376_v8 = vpop.eup %10375  ;;  %v4999_v9 = vsel %vm11179_vm14, 0, %v4998_v60  ;;  %v4360_v29 = vor.u32 %v4358_v6, %v4357_v63  ;;  %v4766_v56 = vsel %vm11168_vm11, %v4764_v10, %v4765_v36  ;;  %v4768_v47 = vor.u32 %v4767_v59, %v4765_v36  ;;  %v9906_v31 = vld [vmem:[#allocation3 + $0x1c0] sm:$0xf0]  ;;  %v4614_v36 = vld [vmem:[#allocation4 + $0x90] sm:$0xf] }
 0x3f7   : > { %5000 = vst [vmem:[#allocation4 + $0x74] sm:$0x8] %v4999_v9  ;;  %v4025_v3 = vmul.f32 %v10374_v39, %v12140_v2  ;;  %v3954_v22 = vadd.f32 1.0, %v10376_v8  ;;  %10377 = vpow2.f32 %v3897_v49  ;;  %v3772_v17 = vadd.f32 %v3705_v25, %v2854_v13  ;;  %5689 = vmatmul.bf16.gmra.mxu1 %v8868_v52  ;;  %v10127_v49 = vld [vmem:[#allocation9 + $0x188] sm:$0xff]  ;;  %v12235_v44 = vld [vmem:[%s13086_s2] ss:$0 sm:$0xff] }
 0x3f8   : > { %v4677_v32 = vld [vmem:[#allocation4 + $0x78] sm:$0x1]  ;;  %v4361_v16 = vsel %vm10912_vm4, %v4353_v15, %v4360_v29  ;;  %v4769_v51 = vrot.slane %v4768_v47, 4  ;;  %4934 = vst [vmem:[#allocation4 + $0x80] sm:$0xf] %v4766_v56  ;;  %v8720_v38 = vor.u32 %v9906_v31, %v8719_v62  ;;  %v12221_v15 = vpop.f32.mrf.mxu2  ;;  %v12224_v63 = vadd.f32 %v3643_v0, %v3544_v14  ;;  %7119 = vmatpush.bf16.msra.mxu0 %v10128_v35 }
 0x3f9   : > { %v4678_v57 = vsel %vm10957_vm7, 0, %v4677_v32  ;;  %4613 = vst [vmem:[#allocation4 + $0x84] sm:$0xf] %v4361_v16  ;;  %v4206_v1 = vpack.c.bf16 %v4025_v3, %v4025_v3  ;;  %10379 = vrcp.f32 %v3954_v22  ;;  %v12217_v2 = vadd.f32 %v11990_v7, %v3772_v17  ;;  %v8881_v59 = vld [vmem:[#allocation4 + $0x84] sm:$0xf0]  ;;  %v12240_v3 = vpop.f32.mrf.mxu3  ;;  %v10126_v22 = vld [vmem:[#allocation9 + $0x180] sm:$0xff] }
 0x3fa   : > { %4679 = vst [vmem:[#allocation4 + $0x78] sm:$0x1] %v4678_v57  ;;  %v4936_v6 = vsel %vm11148_vm9, %v4769_v51, %v4935_v30  ;;  %v10018_v9 = vld [vmem:[#allocation4 + $0x7c] sm:$0xf]  ;;  %v8875_v47 = vld [vmem:[#allocation4 + $0x68] sm:$0xf]  ;;  %v3611_v32 = vadd.f32 %v11984_v26, %v11982_v55 }
 0x3fb   : > { %4937 = vst [vmem:[#allocation4 + $0x8c] sm:$0xf] %v4936_v6  ;;  %v4363_v10 = vshrl.u32 %v4206_v1, 16  ;;  %v4366_v53 = vshll.u32 %v4206_v1, 16  ;;  %v3848_v11 = vsub.f32 0.0, %v12217_v2  ;;  %v3707_v18 = vpop.f32.mrf.mxu0 }
 0x3fc   : > { %4242 = vst [vmem:[#allocation4 + $0x94] sm:$0xf] %v4206_v1  ;;  %v3708_v7 = vadd.f32 %v3707_v18, %v11980_v45  ;;  %v8884_v45 = vor.u32 %v10018_v9, %v8881_v59  ;;  %7120 = vmatpush.bf16.msra.mxu0 %v10127_v49  ;;  %v8731_v9 = vld [vmem:[#allocation3 + $0x1d0] sm:$0xf] }
 0x3fd   : > { %v10378_v25 = vpop.eup %10377  ;;  %v12227_v41 = vrot.slane %v4363_v10, 7  ;;  %v4770_v39 = vrot.slane %v4363_v10, 4  ;;  %v4771_v13 = vrot.slane %v4366_v53, 5  ;;  %v3899_v60 = vmul.f32 1.442695, %v3848_v11  ;;  %v12249_v10 = vpop.f32.mrf.mxu1 }
 0x3fe   : > { %v3955_v52 = vadd.f32 1.0, %v10378_v25  ;;  %v3773_v8 = vadd.f32 %v3708_v7, %v11828_v37  ;;  %3746 = vmatmul.bf16.gmra.mxu0 %v8720_v38  ;;  %v10017_v14 = vld [vmem:[#allocation4 + $0x70] sm:$0xf0] }
 0x3ff   : > { %v10380_v29 = vpop.eup %10379  ;;  %v4368_v56 = vor.u32 %v4366_v53, %v12227_v41  ;;  %10381 = vpow2.f32 %v3899_v60  ;;  %v8876_v37 = vor.u32 %v10017_v14, %v8875_v47  ;;  %v4772_v31 = vor.u32 %v4771_v13, %v4770_v39  ;;  %v9909_v14 = vld [vmem:[#allocation3 + $0x1d8] sm:$0xf0] }
 0x400   : > { %v4026_v30 = vmul.f32 %v10380_v29, %v12166_v48  ;;  %10383 = vrcp.f32 %v3955_v52  ;;  %v12238_v62 = vadd.f32 %v12235_v44, %v3773_v8  ;;  %v10019_v0 = vld [vmem:[#allocation4 + $0x80] sm:$0xf0]  ;;  %v3549_v57 = vpop.f32.mrf.mxu2  ;;  %7121 = vmatpush.bf16.msra.mxu0 %v10126_v22  ;;  %v4369_v49 = vrot.slane %v12227_v41, 4 }
 0x401   : > { %v4615_v17 = vsel %vm10920_vm5, %v4368_v56, %v4614_v36  ;;  %v8879_v48 = vld [vmem:[#allocation4 + $0x78] sm:$0xf]  ;;  %5867 = vmatmul.bf16.gmra.mxu3 %v8876_v37  ;;  %v2859_v36 = vadd.f32 %v11812_v21, %v11834_v23  ;;  %v4773_v7 = vrot.slane %v4772_v31, 4  ;;  %v3648_v22 = vpop.f32.mrf.mxu3 }
 0x402   : > { %v5001_v16 = vld [vmem:[#allocation4 + $0x8c] sm:$0x8]  ;;  %4616 = vst [vmem:[#allocation4 + $0x90] sm:$0xf] %v4615_v17  ;;  %v4207_v51 = vpack.c.bf16 %v4026_v30, %v4026_v30  ;;  %v3849_v35 = vsub.f32 0.0, %v12238_v62  ;;  %5783 = vmatmul.bf16.gmra.mxu2 %v8884_v45  ;;  %v8880_v38 = vor.u32 %v10019_v0, %v8879_v48  ;;  %v8732_v0 = vor.u32 %v9909_v14, %v8731_v9 }
 0x403   : > { %v5002_v1 = vsel %vm11179_vm14, 0, %v5001_v16  ;;  %v3709_v6 = vpop.f32.mrf.mxu0  ;;  %v4939_v45 = vld [vmem:[#allocation4 + $0xa4] sm:$0xf]  ;;  %v8887_v9 = vld [vmem:[#allocation4 + $0x80] sm:$0xf] }
 0x404   : > { %5003 = vst [vmem:[#allocation4 + $0x8c] sm:$0x8] %v5002_v1  ;;  %v4371_v53 = vshrl.u32 %v4207_v51, 16  ;;  %v4374_v11 = vshll.u32 %v4207_v51, 16  ;;  %v3901_v18 = vmul.f32 1.442695, %v3849_v35  ;;  %v3710_v55 = vadd.f32 %v3709_v6, %v3611_v32 }
 0x405   : > { %v10382_v26 = vpop.eup %10381  ;;  %4243 = vst [vmem:[#allocation4 + $0xa0] sm:$0xf] %v4207_v51  ;;  %v9995_v32 = vld [vmem:[#allocation9 + $0x68] sm:$0xff]  ;;  %v12267_v35 = vadd.f32 %v3648_v22, %v3549_v57  ;;  %v4618_v6 = vld [vmem:[#allocation4 + $0xa8] sm:$0xf] }
 0x406   : > { %v10384_v59 = vpop.eup %10383  ;;  %v4373_v25 = vrot.slane %v4371_v53, 7  ;;  %v4774_v39 = vrot.slane %v4374_v11, 5  ;;  %v4776_v13 = vrot.slane %v4371_v53, 4  ;;  %v3956_v60 = vadd.f32 1.0, %v10382_v26  ;;  %6424 = vmatpush.bf16.msrb.mxu2 %v9995_v32  ;;  %v13311_v22 = vld [vmem:[#allocation39_spill] sm:$0xff] }
 0x407   : > { %v4027_v52 = vmul.f32 %v10384_v59, %v12197_v42  ;;  %10385 = vpow2.f32 %v3901_v18  ;;  %v3774_v8 = vadd.f32 %v3710_v55, %v2859_v36  ;;  %5694 = vmatmul.bf16.gmra.mxu1 %v8880_v38  ;;  %v13307_v38 = vld [vmem:[#allocation29_spill] sm:$0xff]  ;;  %v2901_v55 = vpop.f32.mrf.mxu1 }
 0x408   : > { %v4376_v29 = vor.u32 %v4374_v11, %v4373_v25  ;;  %v4775_v21 = vsel %vm11168_vm11, %v4773_v7, %v4774_v39  ;;  %v4777_v23 = vor.u32 %v4776_v13, %v4774_v39  ;;  %10387 = vrcp.f32 %v3956_v60  ;;  %v12264_v17 = vpop.f32.mrf.mxu2  ;;  %v10021_v11 = vld [vmem:[#allocation4 + $0x94] sm:$0xf]  ;;  %v13308_v13 = vld [vmem:[#allocation34_spill] sm:$0xff] }
 0x409   : > { %v4680_v56 = vld [vmem:[#allocation4 + $0x90] sm:$0x1]  ;;  %4938 = vst [vmem:[#allocation4 + $0x98] sm:$0xf] %v4775_v21  ;;  %v4208_v47 = vpack.c.bf16 %v4027_v52, %v4027_v52  ;;  %v12258_v30 = vadd.f32 %v12235_v44, %v3774_v8 }
 0x40a   : > { %v4681_v42 = vsel %vm10957_vm7, 0, %v4680_v56  ;;  %v4377_v41 = vsel %vm10912_vm4, %v4369_v49, %v4376_v29  ;;  %v4778_v37 = vrot.slane %v4777_v23, 4 }
 0x40b   : > { %4682 = vst [vmem:[#allocation4 + $0x90] sm:$0x1] %v4681_v42  ;;  %v4379_v31 = vshrl.u32 %v4208_v47, 16  ;;  %v4382_v48 = vshll.u32 %v4208_v47, 16  ;;  %v3850_v16 = vsub.f32 0.0, %v12258_v30  ;;  %v3712_v51 = vpop.f32.mrf.mxu0  ;;  %v13310_v42 = vld [vmem:[#allocation32_spill] sm:$0xff] }
 0x40c   : > { %4617 = vst [vmem:[#allocation4 + $0x9c] sm:$0xf] %v4377_v41  ;;  %v4940_v1 = vsel %vm11148_vm9, %v4778_v37, %v4939_v45  ;;  %v3713_v53 = vadd.f32 %v3712_v51, %v13307_v38  ;;  %v8893_v18 = vld [vmem:[#allocation4 + $0x9c] sm:$0xf0]  ;;  %v10020_v14 = vld [vmem:[#allocation4 + $0x88] sm:$0xf0] }
 0x40d   : > { %v10386_v26 = vpop.eup %10385  ;;  %4941 = vst [vmem:[#allocation4 + $0xa4] sm:$0xf] %v4940_v1  ;;  %v12272_v36 = vrot.slane %v4379_v31, 7  ;;  %v4779_v7 = vrot.slane %v4379_v31, 4  ;;  %v4780_v59 = vrot.slane %v4382_v48, 5  ;;  %v8896_v8 = vor.u32 %v10021_v11, %v8893_v18  ;;  %v13312_v31 = vld [vmem:[#allocation36_spill] sm:$0xff] }
 0x40e   : > { %v10388_v25 = vpop.eup %10387  ;;  %4244 = vst [vmem:[#allocation4 + $0xac] sm:$0xf] %v4208_v47  ;;  %v3957_v57 = vadd.f32 1.0, %v10386_v26  ;;  %v3903_v39 = vmul.f32 1.442695, %v3850_v16  ;;  %v3775_v60 = vadd.f32 %v3713_v53, %v13308_v13  ;;  %3751 = vmatmul.bf16.gmra.mxu0 %v8732_v0  ;;  %v8888_v23 = vor.u32 %v10020_v14, %v8887_v9  ;;  %v13309_v47 = vld [vmem:[#allocation54_spill] sm:$0xff] }
 0x40f   : > { %v4384_v49 = vor.u32 %v4382_v48, %v12272_v36  ;;  %v4028_v52 = vmul.f32 %v10388_v25, %v12217_v2  ;;  %v4781_v29 = vor.u32 %v4780_v59, %v4779_v7  ;;  %v3616_v41 = vadd.f32 %v13310_v42, %v13309_v47  ;;  %v2903_v55 = vpop.f32.mrf.mxu1  ;;  %v9987_v14 = vld [vmem:[#allocation9 + $0x28] sm:$0xff] }
 0x410   : > { %10389 = vrcp.f32 %v3957_v57  ;;  %v12278_v21 = vadd.f32 %v12235_v44, %v3775_v60  ;;  %v3554_v0 = vpop.f32.mrf.mxu2  ;;  %v2864_v48 = vadd.f32 %v13312_v31, %v13311_v22  ;;  %6335 = vmatpush.bf16.msrb.mxu1 %v9987_v14  ;;  %v4622_v55 = vld [vmem:[#allocation4 + $0xc0] sm:$0xf] }
 0x411   : > { %v4619_v56 = vsel %vm10920_vm5, %v4384_v49, %v4618_v6  ;;  %v4209_v45 = vpack.c.bf16 %v4028_v52, %v4028_v52  ;;  %10391 = vpow2.f32 %v3903_v39  ;;  %5872 = vmatmul.bf16.gmra.mxu3 %v8888_v23  ;;  %v4782_v38 = vrot.slane %v4781_v29, 4  ;;  %v9407_v29 = vld [vmem:[#allocation4 + $0x30] sm:$0xf]  ;;  %v4943_v23 = vld [vmem:[#allocation4 + $0xbc] sm:$0xf] }
 0x412   : > { %4620 = vst [vmem:[#allocation4 + $0xa8] sm:$0xf] %v4619_v56  ;;  %v3851_v2 = vsub.f32 0.0, %v12278_v21  ;;  %v8891_v37 = vld [vmem:[#allocation4 + $0x90] sm:$0xf]  ;;  %5788 = vmatmul.bf16.gmra.mxu2 %v8896_v8  ;;  %v4385_v39 = vrot.slane %v12272_v36, 4 }
 0x413   : > { %4245 = vst [vmem:[#allocation4 + $0xb8] sm:$0xf] %v4209_v45  ;;  %v4387_v32 = vshrl.u32 %v4209_v45, 16  ;;  %v4390_v16 = vshll.u32 %v4209_v45, 16  ;;  %v3714_v51 = vpop.f32.mrf.mxu0  ;;  %v10022_v1 = vld [vmem:[#allocation4 + $0x98] sm:$0xf0] }
 0x414   : > { %v5004_v6 = vld [vmem:[#allocation4 + $0xa4] sm:$0x8]  ;;  %v3905_v53 = vmul.f32 1.442695, %v3851_v2  ;;  %v3715_v11 = vadd.f32 %v3714_v51, %v3616_v41  ;;  %v8892_v18 = vor.u32 %v10022_v1, %v8891_v37  ;;  %v10079_v2 = vld [vmem:[#allocation4 + $0x38] sm:$0xf0] }
 0x415   : > { %v5005_v26 = vsel %vm11179_vm14, 0, %v5004_v6  ;;  %v4389_v7 = vrot.slane %v4387_v32, 7  ;;  %v4783_v59 = vrot.slane %v4390_v16, 5  ;;  %v4785_v25 = vrot.slane %v4387_v32, 4  ;;  %v13313_v1 = vld [vmem:[#allocation55_spill] sm:$0xff] }
 0x416   : > { %v10390_v57 = vpop.eup %10389  ;;  %5006 = vst [vmem:[#allocation4 + $0xa4] sm:$0x8] %v5005_v26  ;;  %10393 = vpow2.f32 %v3905_v53  ;;  %v3776_v13 = vadd.f32 %v3715_v11, %v2864_v48  ;;  %v9408_v53 = vor.u32 %v10079_v2, %v9407_v29  ;;  %v12304_v11 = vpop.f32.mrf.mxu3 }
 0x417   : > { %v10392_v60 = vpop.eup %10391  ;;  %v4392_v49 = vor.u32 %v4390_v16, %v4389_v7  ;;  %v4784_v52 = vsel %vm11168_vm11, %v4782_v38, %v4783_v59  ;;  %v4786_v8 = vor.u32 %v4785_v25, %v4783_v59  ;;  %v4029_v9 = vmul.f32 %v10390_v57, %v12238_v62  ;;  %5699 = vmatmul.bf16.gmra.mxu1 %v8892_v18  ;;  %v13314_v25 = vld [vmem:[#allocation40_spill] sm:$0xff] }
 0x418   : > { %4942 = vst [vmem:[#allocation4 + $0xb0] sm:$0xf] %v4784_v52  ;;  %v3958_v56 = vadd.f32 1.0, %v10392_v60  ;;  %v12294_v45 = vadd.f32 %v12235_v44, %v3776_v13  ;;  %v3556_v0 = vpop.f32.mrf.mxu2  ;;  %v8899_v52 = vld [vmem:[#allocation4 + $0x98] sm:$0xf] }
 0x419   : > { %v4683_v36 = vld [vmem:[#allocation4 + $0xa8] sm:$0x1]  ;;  %v4393_v47 = vsel %vm10912_vm4, %v4385_v39, %v4392_v49  ;;  %v4787_v42 = vrot.slane %v4786_v8, 4  ;;  %v4210_v41 = vpack.c.bf16 %v4029_v9, %v4029_v9  ;;  %v10024_v39 = vld [vmem:[#allocation4 + $0xac] sm:$0xf] }
 0x41a   : > { %v4684_v62 = vsel %vm10957_vm7, 0, %v4683_v36  ;;  %4621 = vst [vmem:[#allocation4 + $0xb4] sm:$0xf] %v4393_v47  ;;  %10395 = vrcp.f32 %v3958_v56  ;;  %v3852_v37 = vsub.f32 0.0, %v12294_v45  ;;  %v8905_v38 = vld [vmem:[#allocation4 + $0xb4] sm:$0xf0] }
 0x41b   : > { %4685 = vst [vmem:[#allocation4 + $0xa8] sm:$0x1] %v4684_v62  ;;  %v4944_v22 = vsel %vm11148_vm9, %v4787_v42, %v4943_v23  ;;  %v4395_v31 = vshrl.u32 %v4210_v41, 16  ;;  %v4398_v48 = vshll.u32 %v4210_v41, 16  ;;  %v3717_v32 = vpop.f32.mrf.mxu0  ;;  %v8908_v49 = vor.u32 %v10024_v39, %v8905_v38  ;;  %v13315_v36 = vld [vmem:[#allocation53_spill] sm:$0xff]  ;;  %v13316_v47 = vld [vmem:[#allocation30_spill] sm:$0xff] }
 0x41c   : > { %v10394_v16 = vpop.eup %10393  ;;  %4945 = vst [vmem:[#allocation4 + $0xbc] sm:$0xf] %v4944_v22  ;;  %v3907_v51 = vmul.f32 1.442695, %v3852_v37  ;;  %v3718_v6 = vadd.f32 %v3717_v32, %v13313_v1  ;;  %v3621_v42 = vadd.f32 %v13316_v47, %v13315_v36  ;;  %v13317_v32 = vld [vmem:[#allocation42_spill] sm:$0xff] }
 0x41d   : > { %4246 = vst [vmem:[#allocation4 + $0xc4] sm:$0xf] %v4210_v41  ;;  %v12306_v18 = vrot.slane %v4395_v31, 7  ;;  %v3959_v26 = vadd.f32 1.0, %v10394_v16  ;;  %v4788_v7 = vrot.slane %v4395_v31, 4  ;;  %v4789_v59 = vrot.slane %v4398_v48, 5 }
 0x41e   : > { %10397 = vpow2.f32 %v3907_v51  ;;  %v3777_v57 = vadd.f32 %v3718_v6, %v13314_v25  ;;  %v10023_v13 = vld [vmem:[#allocation4 + $0xa0] sm:$0xf0]  ;;  %7122 = vmatmul.bf16.vlgmr.msra.gmra.mxu0 %v9408_v53  ;;  %v13318_v16 = vld [vmem:[#allocation37_spill] sm:$0xff]  ;;  %v3653_v38 = vpop.f32.mrf.mxu3  ;;  %v4947_v47 = vld [vmem:[#allocation4 + $0xd4] sm:$0xf] }
 0x41f   : > { %v4400_v60 = vor.u32 %v4398_v48, %v12306_v18  ;;  %10399 = vrcp.f32 %v3959_v26  ;;  %v8900_v14 = vor.u32 %v10023_v13, %v8899_v52  ;;  %v4790_v41 = vor.u32 %v4789_v59, %v4788_v7 }
 0x420   : > { %v10396_v8 = vpop.eup %10395  ;;  %v12311_v9 = vadd.f32 %v12235_v44, %v3777_v57  ;;  %v2869_v51 = vadd.f32 %v13318_v16, %v13317_v32 }
 0x421   : > { %v4623_v29 = vsel %vm10920_vm5, %v4400_v60, %v4622_v55  ;;  %v4030_v23 = vmul.f32 %v10396_v8, %v12258_v30  ;;  %v10025_v56 = vld [vmem:[#allocation4 + $0xb0] sm:$0xf0]  ;;  %5877 = vmatmul.bf16.gmra.mxu3 %v8900_v14  ;;  %v4791_v59 = vrot.slane %v4790_v41, 4  ;;  %v9419_v8 = vld [vmem:[#allocation4 + $0x48] sm:$0xf] }
 0x422   : > { %4624 = vst [vmem:[#allocation4 + $0xc0] sm:$0xf] %v4623_v29  ;;  %v3853_v2 = vsub.f32 0.0, %v12311_v9  ;;  %v8903_v62 = vld [vmem:[#allocation4 + $0xa8] sm:$0xf]  ;;  %5793 = vmatmul.bf16.gmra.mxu2 %v8908_v49  ;;  %v4401_v29 = vrot.slane %v12306_v18, 4 }
 0x423   : > { %v5007_v37 = vld [vmem:[#allocation4 + $0xbc] sm:$0x8]  ;;  %v4211_v0 = vpack.c.bf16 %v4030_v23, %v4030_v23  ;;  %v3719_v22 = vpop.f32.mrf.mxu0  ;;  %v8904_v31 = vor.u32 %v10025_v56, %v8903_v62  ;;  %v10082_v14 = vld [vmem:[#allocation4 + $0x50] sm:$0xf0] }
 0x424   : > { %v10398_v48 = vpop.eup %10397  ;;  %v5008_v30 = vsel %vm11179_vm14, 0, %v5007_v37  ;;  %v3909_v1 = vmul.f32 1.442695, %v3853_v2  ;;  %v3720_v6 = vadd.f32 %v3719_v22, %v3621_v42  ;;  %v9994_v22 = vld [vmem:[#allocation9 + $0x60] sm:$0xff] }
 0x425   : > { %v10400_v53 = vpop.eup %10399  ;;  %5009 = vst [vmem:[#allocation4 + $0xbc] sm:$0x8] %v5008_v30  ;;  %v4403_v55 = vshrl.u32 %v4211_v0, 16  ;;  %v4406_v26 = vshll.u32 %v4211_v0, 16  ;;  %v3960_v7 = vadd.f32 1.0, %v10398_v48  ;;  %v9420_v48 = vor.u32 %v10082_v14, %v9419_v8  ;;  %6425 = vmatpush.bf16.msrb.mxu2 %v9994_v22 }
 0x426   : > { %4247 = vst [vmem:[#allocation4 + $0xd0] sm:$0xf] %v4211_v0  ;;  %v4031_v25 = vmul.f32 %v10400_v53, %v12278_v21  ;;  %10401 = vpow2.f32 %v3909_v1  ;;  %v3778_v57 = vadd.f32 %v3720_v6, %v2869_v51  ;;  %v4626_v0 = vld [vmem:[#allocation4 + $0xd8] sm:$0xf]  ;;  %v3655_v6 = vpop.f32.mrf.mxu3  ;;  %v8911_v14 = vld [vmem:[#allocation4 + $0xb0] sm:$0xf] }
 0x427   : > { %v4405_v39 = vrot.slane %v4403_v55, 7  ;;  %v4792_v13 = vrot.slane %v4406_v26, 5  ;;  %v4794_v60 = vrot.slane %v4403_v55, 4  ;;  %10403 = vrcp.f32 %v3960_v7  ;;  %5704 = vmatmul.bf16.gmra.mxu1 %v8904_v31 }
 0x428   : > { %v4212_v49 = vpack.c.bf16 %v4031_v25, %v4031_v25  ;;  %v12325_v52 = vadd.f32 %v12235_v44, %v3778_v57  ;;  %v13319_v57 = vld [vmem:[#allocation43_spill] sm:$0xff] }
 0x429   : > { %v4686_v23 = vld [vmem:[#allocation4 + $0xc0] sm:$0x1]  ;;  %v4408_v56 = vor.u32 %v4406_v26, %v4405_v39  ;;  %v4793_v21 = vsel %vm11168_vm11, %v4791_v59, %v4792_v13  ;;  %v4795_v36 = vor.u32 %v4794_v60, %v4792_v13 }
 0x42a   : > { %v4687_v42 = vsel %vm10957_vm7, 0, %v4686_v23  ;;  %4946 = vst [vmem:[#allocation4 + $0xc8] sm:$0xf] %v4793_v21  ;;  %v4411_v41 = vshrl.u32 %v4212_v49, 16  ;;  %v4414_v2 = vshll.u32 %v4212_v49, 16  ;;  %v3854_v62 = vsub.f32 0.0, %v12325_v52 }
 0x42b   : > { %4688 = vst [vmem:[#allocation4 + $0xc0] sm:$0x1] %v4687_v42  ;;  %v4409_v37 = vsel %vm10912_vm4, %v4401_v29, %v4408_v56  ;;  %v4796_v18 = vrot.slane %v4795_v36, 4  ;;  %v3722_v31 = vpop.f32.mrf.mxu0  ;;  %v13320_v56 = vld [vmem:[#allocation33_spill] sm:$0xff] }
 0x42c   : > { %v10402_v32 = vpop.eup %10401  ;;  %4625 = vst [vmem:[#allocation4 + $0xcc] sm:$0xf] %v4409_v37  ;;  %v12335_v16 = vrot.slane %v4411_v41, 7  ;;  %v4797_v51 = vrot.slane %v4411_v41, 4  ;;  %v4798_v30 = vrot.slane %v4414_v2, 5  ;;  %v3723_v1 = vadd.f32 %v3722_v31, %v12044_v12 }
 0x42d   : > { %v10404_v38 = vpop.eup %10403  ;;  %v4948_v53 = vsel %vm11148_vm9, %v4796_v18, %v4947_v47  ;;  %4248 = vst [vmem:[#allocation4 + $0xdc] sm:$0xf] %v4212_v49  ;;  %v3961_v55 = vadd.f32 1.0, %v10402_v32  ;;  %v3911_v26 = vmul.f32 1.442695, %v3854_v62  ;;  %v3626_v21 = vadd.f32 %v13320_v56, %v12038_v24  ;;  %v13321_v32 = vld [vmem:[#allocation38_spill] sm:$0xff] }
 0x42e   : > { %4949 = vst [vmem:[#allocation4 + $0xd4] sm:$0xf] %v4948_v53  ;;  %v4416_v7 = vor.u32 %v4414_v2, %v12335_v16  ;;  %v4032_v59 = vmul.f32 %v10404_v38, %v12294_v45  ;;  %7127 = vmatmul.bf16.gmra.mxu0 %v9420_v48  ;;  %v4799_v25 = vor.u32 %v4798_v30, %v4797_v51  ;;  %v8917_v12 = vld [vmem:[#allocation4 + $0xcc] sm:$0xf0]  ;;  %v10026_v13 = vld [vmem:[#allocation4 + $0xb8] sm:$0xf0] }
 0x42f   : > { %10405 = vrcp.f32 %v3961_v55  ;;  %v3779_v39 = vadd.f32 %v3723_v1, %v13319_v57  ;;  %v10027_v49 = vld [vmem:[#allocation4 + $0xc4] sm:$0xf]  ;;  %v8912_v45 = vor.u32 %v10026_v13, %v8911_v14  ;;  %v13322_v51 = vld [vmem:[#allocation35_spill] sm:$0xff]  ;;  %v4417_v1 = vrot.slane %v12335_v16, 4  ;;  %v9431_v16 = vld [vmem:[#allocation4 + $0x60] sm:$0xf] }
 0x430   : > { %v4627_v60 = vsel %vm10920_vm5, %v4416_v7, %v4626_v0  ;;  %v4213_v8 = vpack.c.bf16 %v4032_v59, %v4032_v59  ;;  %10407 = vpow2.f32 %v3911_v26  ;;  %v8920_v23 = vor.u32 %v10027_v49, %v8917_v12  ;;  %v4951_v57 = vld [vmem:[#allocation4 + $0xec] sm:$0xf] }
 0x431   : > { %4628 = vst [vmem:[#allocation4 + $0xd8] sm:$0xf] %v4627_v60  ;;  %v12346_v29 = vadd.f32 %v12235_v44, %v3779_v39  ;;  %v4800_v41 = vrot.slane %v4799_v25, 4  ;;  %5882 = vmatmul.bf16.gmra.mxu3 %v8912_v45  ;;  %v2874_v30 = vadd.f32 %v13322_v51, %v13321_v32  ;;  %v9986_v25 = vld [vmem:[#allocation9 + $0x20] sm:$0xff]  ;;  %v10085_v45 = vld [vmem:[#allocation4 + $0x68] sm:$0xf0] }
 0x432   : > { %4249 = vst [vmem:[#allocation4 + $0xe8] sm:$0xf] %v4213_v8  ;;  %v4419_v36 = vshrl.u32 %v4213_v8, 16  ;;  %v4422_v47 = vshll.u32 %v4213_v8, 16  ;;  %v8915_v42 = vld [vmem:[#allocation4 + $0xc0] sm:$0xf]  ;;  %5798 = vmatmul.bf16.gmra.mxu2 %v8920_v23  ;;  %6336 = vmatpush.bf16.msrb.mxu1 %v9986_v25 }
 0x433   : > { %v3855_v2 = vsub.f32 0.0, %v12346_v29  ;;  %v3724_v62 = vpop.f32.mrf.mxu0  ;;  %v10028_v37 = vld [vmem:[#allocation4 + $0xc8] sm:$0xf0]  ;;  %v13323_v51 = vld [vmem:[#allocation41_spill] sm:$0xff] }
 0x434   : > { %v4421_v18 = vrot.slane %v4419_v36, 7  ;;  %v4801_v0 = vrot.slane %v4422_v47, 5  ;;  %v4803_v22 = vrot.slane %v4419_v36, 4  ;;  %v3725_v31 = vadd.f32 %v3724_v62, %v3626_v21 }
 0x435   : > { %v10406_v48 = vpop.eup %10405  ;;  %v5010_v24 = vld [vmem:[#allocation4 + $0xd4] sm:$0x8]  ;;  %v3913_v6 = vmul.f32 1.442695, %v3855_v2  ;;  %v8916_v38 = vor.u32 %v10028_v37, %v8915_v42  ;;  %v9432_v37 = vor.u32 %v10085_v45, %v9431_v16  ;;  %v3631_v16 = vadd.f32 %v12074_v33, %v12072_v5  ;;  %v13324_v33 = vld [vmem:[#allocation46_spill] sm:$0xff] }
 0x436   : > { %v10408_v53 = vpop.eup %10407  ;;  %v5011_v55 = vsel %vm11179_vm14, 0, %v5010_v24  ;;  %v4424_v26 = vor.u32 %v4422_v47, %v4421_v18  ;;  %v4802_v7 = vsel %vm11168_vm11, %v4800_v41, %v4801_v0  ;;  %v4804_v59 = vor.u32 %v4803_v22, %v4801_v0  ;;  %v4630_v41 = vld [vmem:[#allocation4 + $0xf0] sm:$0xf]  ;;  %v10030_v24 = vld [vmem:[#allocation4 + $0xdc] sm:$0xf] }
 0x437   : > { %5012 = vst [vmem:[#allocation4 + $0xd4] sm:$0x8] %v5011_v55  ;;  %v4033_v39 = vmul.f32 %v10406_v48, %v12311_v9  ;;  %v3962_v12 = vadd.f32 1.0, %v10408_v53  ;;  %10409 = vpow2.f32 %v3913_v6  ;;  %v3780_v13 = vadd.f32 %v3725_v31, %v2874_v30  ;;  %5709 = vmatmul.bf16.gmra.mxu1 %v8916_v38 }
 0x438   : > { %v4689_v60 = vld [vmem:[#allocation4 + $0xd8] sm:$0x1]  ;;  %v4425_v8 = vsel %vm10912_vm4, %v4417_v1, %v4424_v26  ;;  %v4805_v49 = vrot.slane %v4804_v59, 4  ;;  %4950 = vst [vmem:[#allocation4 + $0xe0] sm:$0xf] %v4802_v7 }
 0x439   : > { %v4690_v14 = vsel %vm10957_vm7, 0, %v4689_v60  ;;  %4629 = vst [vmem:[#allocation4 + $0xe4] sm:$0xf] %v4425_v8  ;;  %v4214_v23 = vpack.c.bf16 %v4033_v39, %v4033_v39  ;;  %10411 = vrcp.f32 %v3962_v12  ;;  %v12364_v9 = vadd.f32 %v12235_v44, %v3780_v13  ;;  %v8929_v62 = vld [vmem:[#allocation4 + $0xe4] sm:$0xf0] }
 0x43a   : > { %4691 = vst [vmem:[#allocation4 + $0xd8] sm:$0x1] %v4690_v14  ;;  %v4952_v56 = vsel %vm11148_vm9, %v4805_v49, %v4951_v57  ;;  %v8932_v53 = vor.u32 %v10030_v24, %v8929_v62 }
 0x43b   : > { %4953 = vst [vmem:[#allocation4 + $0xec] sm:$0xf] %v4952_v56  ;;  %v4427_v21 = vshrl.u32 %v4214_v23, 16  ;;  %v4430_v36 = vshll.u32 %v4214_v23, 16  ;;  %v3856_v47 = vsub.f32 0.0, %v12364_v9  ;;  %v3727_v42 = vpop.f32.mrf.mxu0 }
 0x43c   : > { %4250 = vst [vmem:[#allocation4 + $0xf4] sm:$0xf] %v4214_v23  ;;  %v3728_v2 = vadd.f32 %v3727_v42, %v12083_v50  ;;  %v8923_v50 = vld [vmem:[#allocation4 + $0xc8] sm:$0xf]  ;;  %v13325_v42 = vld [vmem:[#allocation45_spill] sm:$0xff] }
 0x43d   : > { %v10410_v18 = vpop.eup %10409  ;;  %v12370_v0 = vrot.slane %v4427_v21, 7  ;;  %v4806_v22 = vrot.slane %v4427_v21, 4  ;;  %v4807_v31 = vrot.slane %v4430_v36, 5  ;;  %v3915_v48 = vmul.f32 1.442695, %v3856_v47 }
 0x43e   : > { %v3963_v32 = vadd.f32 1.0, %v10410_v18  ;;  %v3781_v30 = vadd.f32 %v3728_v2, %v13323_v51  ;;  %v10029_v1 = vld [vmem:[#allocation4 + $0xd0] sm:$0xf0]  ;;  %7132 = vmatmul.bf16.gmra.mxu0 %v9432_v37 }
 0x43f   : > { %v10412_v6 = vpop.eup %10411  ;;  %v4432_v38 = vor.u32 %v4430_v36, %v12370_v0  ;;  %10413 = vpow2.f32 %v3915_v48  ;;  %v5764_v55 = vpop.f32.mrf.mxu2  ;;  %v8924_v59 = vor.u32 %v10029_v1, %v8923_v50  ;;  %v4808_v39 = vor.u32 %v4807_v31, %v4806_v22 }
 0x440   : > { %v4034_v26 = vmul.f32 %v10412_v6, %v12325_v52  ;;  %10415 = vrcp.f32 %v3963_v32  ;;  %v12376_v7 = vadd.f32 %v12235_v44, %v3781_v30  ;;  %v10031_v25 = vld [vmem:[#allocation4 + $0xe0] sm:$0xf0]  ;;  %v4433_v48 = vrot.slane %v12370_v0, 4 }
 0x441   : > { %v4631_v57 = vsel %vm10920_vm5, %v4432_v38, %v4630_v41  ;;  %v5675_v12 = vpop.f32.mrf.mxu1  ;;  %v8927_v13 = vld [vmem:[#allocation4 + $0xd8] sm:$0xf]  ;;  %5887 = vmatmul.bf16.gmra.mxu3 %v8924_v59  ;;  %v2879_v41 = vadd.f32 %v13325_v42, %v13324_v33  ;;  %v4809_v2 = vrot.slane %v4808_v39, 4 }
 0x442   : > { %v5013_v60 = vld [vmem:[#allocation4 + $0xec] sm:$0x8]  ;;  %4632 = vst [vmem:[#allocation4 + $0xf0] sm:$0xf] %v4631_v57  ;;  %v4215_v8 = vpack.c.bf16 %v4034_v26, %v4034_v26  ;;  %v3857_v52 = vsub.f32 0.0, %v12376_v7  ;;  %v12383_v49 = vadd.f32 %v5764_v55, %v5675_v12  ;;  %5803 = vmatmul.bf16.gmra.mxu2 %v8932_v53  ;;  %v8928_v45 = vor.u32 %v10031_v25, %v8927_v13 }
 0x443   : > { %v5014_v14 = vsel %vm11179_vm14, 0, %v5013_v60  ;;  %v3729_v23 = vpop.f32.mrf.mxu0  ;;  %v9443_v38 = vld [vmem:[#allocation4 + $0x78] sm:$0xf]  ;;  %v10088_v53 = vld [vmem:[#allocation4 + $0x80] sm:$0xf0] }
 0x444   : > { %5015 = vst [vmem:[#allocation4 + $0xec] sm:$0x8] %v5014_v14  ;;  %v4435_v56 = vshrl.u32 %v4215_v8, 16  ;;  %v4438_v21 = vshll.u32 %v4215_v8, 16  ;;  %v3917_v36 = vmul.f32 1.442695, %v3857_v52  ;;  %v3730_v47 = vadd.f32 %v3729_v23, %v3631_v16 }
 0x445   : > { %v10414_v5 = vpop.eup %10413  ;;  %4251 = vst [vmem:[#allocation4 + $0x100] sm:$0xf] %v4215_v8  ;;  %v4955_v55 = vld [vmem:[#allocation4 + $0x104] sm:$0xf]  ;;  %v9993_v16 = vld [vmem:[#allocation9 + $0x58] sm:$0xff] }
 0x446   : > { %v10416_v62 = vpop.eup %10415  ;;  %v4437_v37 = vrot.slane %v4435_v56, 7  ;;  %v4810_v18 = vrot.slane %v4438_v21, 5  ;;  %v4812_v22 = vrot.slane %v4435_v56, 4  ;;  %v3964_v31 = vadd.f32 1.0, %v10414_v5  ;;  %v4634_v14 = vld [vmem:[#allocation4 + $0x108] sm:$0xf]  ;;  %6426 = vmatpush.bf16.msrb.mxu2 %v9993_v16 }
 0x447   : > { %v4035_v32 = vmul.f32 %v10416_v62, %v12346_v29  ;;  %10417 = vpow2.f32 %v3917_v36  ;;  %v3782_v51 = vadd.f32 %v3730_v47, %v2879_v41  ;;  %5714 = vmatmul.bf16.gmra.mxu1 %v8928_v45  ;;  %v5766_v6 = vpop.f32.mrf.mxu2  ;;  %v10033_v45 = vld [vmem:[#allocation4 + $0xf4] sm:$0xf] }
 0x448   : > { %v4440_v30 = vor.u32 %v4438_v21, %v4437_v37  ;;  %v4811_v24 = vsel %vm11168_vm11, %v4809_v2, %v4810_v18  ;;  %v4813_v1 = vor.u32 %v4812_v22, %v4810_v18  ;;  %10419 = vrcp.f32 %v3964_v31  ;;  %v13326_v62 = vld [vmem:[#allocation44_spill] sm:$0xff]  ;;  %v8935_v31 = vld [vmem:[#allocation4 + $0xe0] sm:$0xf] }
 0x449   : > { %v4692_v50 = vld [vmem:[#allocation4 + $0xf0] sm:$0x1]  ;;  %4954 = vst [vmem:[#allocation4 + $0xf8] sm:$0xf] %v4811_v24  ;;  %v4216_v26 = vpack.c.bf16 %v4035_v32, %v4035_v32  ;;  %v12394_v0 = vadd.f32 %v12235_v44, %v3782_v51  ;;  %v5677_v29 = vpop.f32.mrf.mxu1  ;;  %v9444_v21 = vor.u32 %v10088_v53, %v9443_v38 }
 0x44a   : > { %v4693_v59 = vsel %vm10957_vm7, 0, %v4692_v50  ;;  %v4441_v25 = vsel %vm10912_vm4, %v4433_v48, %v4440_v30  ;;  %v4814_v57 = vrot.slane %v4813_v1, 4  ;;  %v12400_v39 = vadd.f32 %v5766_v6, %v5677_v29 }
 0x44b   : > { %4694 = vst [vmem:[#allocation4 + $0xf0] sm:$0x1] %v4693_v59  ;;  %v4443_v12 = vshrl.u32 %v4216_v26, 16  ;;  %v4446_v13 = vshll.u32 %v4216_v26, 16  ;;  %v3858_v60 = vsub.f32 0.0, %v12394_v0  ;;  %v3732_v8 = vpop.f32.mrf.mxu0  ;;  %v3636_v6 = vadd.f32 %v12124_v43, %v12122_v27 }
 0x44c   : > { %4633 = vst [vmem:[#allocation4 + $0xfc] sm:$0xf] %v4441_v25  ;;  %v4956_v52 = vsel %vm11148_vm9, %v4814_v57, %v4955_v55  ;;  %v3733_v23 = vadd.f32 %v3732_v8, %v12115_v58  ;;  %v8941_v56 = vld [vmem:[#allocation4 + $0xfc] sm:$0xf0]  ;;  %v10032_v48 = vld [vmem:[#allocation4 + $0xe8] sm:$0xf0] }
 0x44d   : > { %v10418_v36 = vpop.eup %10417  ;;  %4957 = vst [vmem:[#allocation4 + $0x104] sm:$0xf] %v4956_v52  ;;  %v12406_v47 = vrot.slane %v4443_v12, 7  ;;  %v4815_v5 = vrot.slane %v4443_v12, 4  ;;  %v4816_v33 = vrot.slane %v4446_v13, 5  ;;  %v8944_v22 = vor.u32 %v10033_v45, %v8941_v56  ;;  %v13327_v55 = vld [vmem:[#allocation48_spill] sm:$0xff] }
 0x44e   : > { %v10420_v42 = vpop.eup %10419  ;;  %4252 = vst [vmem:[#allocation4 + $0x10c] sm:$0xf] %v4216_v26  ;;  %v3965_v41 = vadd.f32 1.0, %v10418_v36  ;;  %v3919_v2 = vmul.f32 1.442695, %v3858_v60  ;;  %v3783_v37 = vadd.f32 %v3733_v23, %v13326_v62  ;;  %7137 = vmatmul.bf16.gmra.mxu0 %v9444_v21  ;;  %v8936_v30 = vor.u32 %v10032_v48, %v8935_v31  ;;  %v13328_v26 = vld [vmem:[#allocation26_spill] sm:$0xff] }
 0x44f   : > { %v4448_v18 = vor.u32 %v4446_v13, %v12406_v47  ;;  %v4036_v58 = vmul.f32 %v10420_v42, %v12364_v9  ;;  %v4817_v32 = vor.u32 %v4816_v33, %v4815_v5  ;;  %v2884_v29 = vadd.f32 %v13328_v26, %v13327_v55 }
 0x450   : > { %10421 = vrcp.f32 %v3965_v41  ;;  %v12412_v51 = vadd.f32 %v12235_v44, %v3783_v37  ;;  %v4449_v36 = vrot.slane %v12406_v47, 4 }
 0x451   : > { %v4635_v24 = vsel %vm10920_vm5, %v4448_v18, %v4634_v14  ;;  %v4217_v1 = vpack.c.bf16 %v4036_v58, %v4036_v58  ;;  %10423 = vpow2.f32 %v3919_v2  ;;  %5892 = vmatmul.bf16.gmra.mxu3 %v8936_v30  ;;  %v4818_v27 = vrot.slane %v4817_v32, 4  ;;  %v9985_v18 = vld [vmem:[#allocation9 + $0x18] sm:$0xff]  ;;  %v9455_v58 = vld [vmem:[#allocation4 + $0x90] sm:$0xf] }
 0x452   : > { %4636 = vst [vmem:[#allocation4 + $0x108] sm:$0xf] %v4635_v24  ;;  %v3859_v9 = vsub.f32 0.0, %v12412_v51  ;;  %v5769_v38 = vpop.f32.mrf.mxu2  ;;  %v5680_v53 = vpop.f32.mrf.mxu1  ;;  %v8939_v50 = vld [vmem:[#allocation4 + $0xf0] sm:$0xf]  ;;  %5808 = vmatmul.bf16.gmra.mxu2 %v8944_v22  ;;  %6337 = vmatpush.bf16.msrb.mxu1 %v9985_v18 }
 0x453   : > { %4253 = vst [vmem:[#allocation4 + $0x118] sm:$0xf] %v4217_v1  ;;  %v4451_v59 = vshrl.u32 %v4217_v1, 16  ;;  %v4454_v25 = vshll.u32 %v4217_v1, 16  ;;  %v12421_v57 = vadd.f32 %v5769_v38, %v5680_v53  ;;  %v3734_v12 = vpop.f32.mrf.mxu0  ;;  %v10034_v13 = vld [vmem:[#allocation4 + $0xf8] sm:$0xf0] }
 0x454   : > { %v5016_v16 = vld [vmem:[#allocation4 + $0x104] sm:$0x8]  ;;  %v3921_v43 = vmul.f32 1.442695, %v3859_v9  ;;  %v3735_v60 = vadd.f32 %v3734_v12, %v3636_v6  ;;  %v8940_v8 = vor.u32 %v10034_v13, %v8939_v50  ;;  %v5853_v56 = vpop.f32.mrf.mxu3  ;;  %v4959_v22 = vld [vmem:[#allocation4 + $0x11c] sm:$0xf] }
 0x455   : > { %v5017_v52 = vsel %vm11179_vm14, 0, %v5016_v16  ;;  %v4453_v14 = vrot.slane %v4451_v59, 7  ;;  %v4819_v23 = vrot.slane %v4454_v25, 5  ;;  %v4821_v45 = vrot.slane %v4451_v59, 4  ;;  %v10091_v24 = vld [vmem:[#allocation4 + $0x98] sm:$0xf0] }
 0x456   : > { %v10422_v21 = vpop.eup %10421  ;;  %5018 = vst [vmem:[#allocation4 + $0x104] sm:$0x8] %v5017_v52  ;;  %10425 = vpow2.f32 %v3921_v43  ;;  %v12427_v5 = vadd.f32 %v5853_v56, %v12383_v49  ;;  %v3784_v33 = vadd.f32 %v3735_v60, %v2884_v29  ;;  %v9456_v12 = vor.u32 %v10091_v24, %v9455_v58 }
 0x457   : > { %v10424_v42 = vpop.eup %10423  ;;  %v4456_v41 = vor.u32 %v4454_v25, %v4453_v14  ;;  %v4820_v2 = vsel %vm11168_vm11, %v4818_v27, %v4819_v23  ;;  %v4822_v62 = vor.u32 %v4821_v45, %v4819_v23  ;;  %v4037_v37 = vmul.f32 %v10422_v21, %v12376_v7  ;;  %5719 = vmatmul.bf16.gmra.mxu1 %v8940_v8  ;;  %v4638_v8 = vld [vmem:[#allocation4 + $0x120] sm:$0xf]  ;;  %v13329_v14 = vld [vmem:[#allocation47_spill] sm:$0xff] }
 0x458   : > { %4958 = vst [vmem:[#allocation4 + $0x110] sm:$0xf] %v4820_v2  ;;  %v3966_v31 = vadd.f32 1.0, %v10424_v42  ;;  %v12433_v47 = vadd.f32 %v12235_v44, %v3784_v33  ;;  %v10036_v45 = vld [vmem:[#allocation4 + $0x10c] sm:$0xf]  ;;  %v3641_v58 = vadd.f32 %v12184_v46, %v12175_v20 }
 0x459   : > { %v4695_v49 = vld [vmem:[#allocation4 + $0x108] sm:$0x1]  ;;  %v4457_v48 = vsel %vm10912_vm4, %v4449_v36, %v4456_v41  ;;  %v4823_v32 = vrot.slane %v4822_v62, 4  ;;  %v4218_v30 = vpack.c.bf16 %v4037_v37, %v4037_v37  ;;  %v8947_v36 = vld [vmem:[#allocation4 + $0xf8] sm:$0xf] }
 0x45a   : > { %v4696_v7 = vsel %vm10957_vm7, 0, %v4695_v49  ;;  %4637 = vst [vmem:[#allocation4 + $0x114] sm:$0xf] %v4457_v48  ;;  %10427 = vrcp.f32 %v3966_v31  ;;  %v3860_v1 = vsub.f32 0.0, %v12433_v47  ;;  %v5771_v6 = vpop.f32.mrf.mxu2  ;;  %v5682_v9 = vpop.f32.mrf.mxu1  ;;  %v8953_v25 = vld [vmem:[#allocation4 + $0x114] sm:$0xf0] }
 0x45b   : > { %4697 = vst [vmem:[#allocation4 + $0x108] sm:$0x1] %v4696_v7  ;;  %v4960_v44 = vsel %vm11148_vm9, %v4823_v32, %v4959_v22  ;;  %v4459_v38 = vshrl.u32 %v4218_v30, 16  ;;  %v4462_v53 = vshll.u32 %v4218_v30, 16  ;;  %v12442_v50 = vadd.f32 %v5771_v6, %v5682_v9  ;;  %v3737_v55 = vpop.f32.mrf.mxu0  ;;  %v12455_v42 = vld [vmem:[%s13086_s2] ss:$0 sm:$0xff] }
 0x45c   : > { %v10426_v26 = vpop.eup %10425  ;;  %4961 = vst [vmem:[#allocation4 + $0x11c] sm:$0xf] %v4960_v44  ;;  %v3923_v29 = vmul.f32 1.442695, %v3860_v1  ;;  %v3738_v59 = vadd.f32 %v3737_v55, %v12179_v54  ;;  %v5855_v60 = vpop.f32.mrf.mxu3  ;;  %v8956_v21 = vor.u32 %v10036_v45, %v8953_v25  ;;  %v13331_v9 = vld [vmem:[#allocation27_spill] sm:$0xff] }
 0x45d   : > { %4254 = vst [vmem:[#allocation4 + $0x124] sm:$0xf] %v4218_v30  ;;  %v12445_v13 = vrot.slane %v4459_v38, 7  ;;  %v4824_v16 = vrot.slane %v4459_v38, 4  ;;  %v4825_v27 = vrot.slane %v4462_v53, 5  ;;  %v3967_v43 = vadd.f32 1.0, %v10426_v26 }
 0x45e   : > { %10429 = vpow2.f32 %v3923_v29  ;;  %v12448_v52 = vadd.f32 %v5855_v60, %v12400_v39  ;;  %v3785_v23 = vadd.f32 %v3738_v59, %v13329_v14  ;;  %v10035_v56 = vld [vmem:[#allocation4 + $0x100] sm:$0xf0]  ;;  %7142 = vmatmul.bf16.gmra.mxu0 %v9456_v12  ;;  %v9467_v45 = vld [vmem:[#allocation4 + $0xa8] sm:$0xf] }
 0x45f   : > { %v4464_v54 = vor.u32 %v4462_v53, %v12445_v13  ;;  %10431 = vrcp.f32 %v3967_v43  ;;  %v8948_v39 = vor.u32 %v10035_v56, %v8947_v36  ;;  %v4826_v62 = vor.u32 %v4825_v27, %v4824_v16  ;;  %v10094_v56 = vld [vmem:[#allocation4 + $0xb0] sm:$0xf0] }
 0x460   : > { %v10428_v33 = vpop.eup %10427  ;;  %v12458_v41 = vadd.f32 %v12455_v42, %v3785_v23 }
 0x461   : > { %v4639_v2 = vsel %vm10920_vm5, %v4464_v54, %v4638_v8  ;;  %v4038_v37 = vmul.f32 %v10428_v33, %v12394_v0  ;;  %v10037_v18 = vld [vmem:[#allocation4 + $0x110] sm:$0xf0]  ;;  %5897 = vmatmul.bf16.gmra.mxu3 %v8948_v39  ;;  %v13330_v0 = vld [vmem:[#allocation50_spill] sm:$0xff]  ;;  %v4827_v55 = vrot.slane %v4826_v62, 4  ;;  %v4465_v54 = vrot.slane %v12445_v13, 4 }
 0x462   : > { %4640 = vst [vmem:[#allocation4 + $0x120] sm:$0xf] %v4639_v2  ;;  %v3861_v22 = vsub.f32 0.0, %v12458_v41  ;;  %v5774_v31 = vpop.f32.mrf.mxu2  ;;  %v5685_v49 = vpop.f32.mrf.mxu1  ;;  %v8951_v48 = vld [vmem:[#allocation4 + $0x108] sm:$0xf]  ;;  %5813 = vmatmul.bf16.gmra.mxu2 %v8956_v21  ;;  %v2889_v44 = vadd.f32 %v13331_v9, %v13330_v0 }
 0x463   : > { %v5019_v32 = vld [vmem:[#allocation4 + $0x11c] sm:$0x8]  ;;  %v4219_v30 = vpack.c.bf16 %v4038_v37, %v4038_v37  ;;  %v12466_v24 = vadd.f32 %v5774_v31, %v5685_v49  ;;  %v3739_v7 = vpop.f32.mrf.mxu0  ;;  %v8952_v1 = vor.u32 %v10037_v18, %v8951_v48  ;;  %v4963_v33 = vld [vmem:[#allocation4 + $0x134] sm:$0xf]  ;;  %v4642_v31 = vld [vmem:[#allocation4 + $0x138] sm:$0xf] }
 0x464   : > { %v10430_v6 = vpop.eup %10429  ;;  %v5020_v20 = vsel %vm11179_vm14, 0, %v5019_v32  ;;  %v3925_v46 = vmul.f32 1.442695, %v3861_v22  ;;  %v3740_v38 = vadd.f32 %v3739_v7, %v3641_v58  ;;  %v5858_v25 = vpop.f32.mrf.mxu3  ;;  %v9992_v49 = vld [vmem:[#allocation9 + $0x50] sm:$0xff] }
 0x465   : > { %v10432_v53 = vpop.eup %10431  ;;  %5021 = vst [vmem:[#allocation4 + $0x11c] sm:$0x8] %v5020_v20  ;;  %v4467_v26 = vshrl.u32 %v4219_v30, 16  ;;  %v4470_v29 = vshll.u32 %v4219_v30, 16  ;;  %v3968_v59 = vadd.f32 1.0, %v10430_v6  ;;  %v12474_v16 = vadd.f32 %v5858_v25, %v12421_v57  ;;  %6427 = vmatpush.bf16.msrb.mxu2 %v9992_v49 }
 0x466   : > { %4255 = vst [vmem:[#allocation4 + $0x130] sm:$0xf] %v4219_v30  ;;  %v4039_v12 = vmul.f32 %v10432_v53, %v12412_v51  ;;  %10433 = vpow2.f32 %v3925_v46  ;;  %v3786_v27 = vadd.f32 %v3740_v38, %v2889_v44  ;;  %v9468_v30 = vor.u32 %v10094_v56, %v9467_v45 }
 0x467   : > { %v4469_v43 = vrot.slane %v4467_v26, 7  ;;  %v4828_v60 = vrot.slane %v4470_v29, 5  ;;  %v4830_v8 = vrot.slane %v4467_v26, 4  ;;  %10435 = vrcp.f32 %v3968_v59  ;;  %5724 = vmatmul.bf16.gmra.mxu1 %v8952_v1 }
 0x468   : > { %v4220_v14 = vpack.c.bf16 %v4039_v12, %v4039_v12  ;;  %v12477_v23 = vadd.f32 %v12455_v42, %v3786_v27 }
 0x469   : > { %v4698_v21 = vld [vmem:[#allocation4 + $0x120] sm:$0x1]  ;;  %v4472_v51 = vor.u32 %v4470_v29, %v4469_v43  ;;  %v4829_v57 = vsel %vm11168_vm11, %v4827_v55, %v4828_v60  ;;  %v4831_v36 = vor.u32 %v4830_v8, %v4828_v60  ;;  %v10039_v8 = vld [vmem:[#allocation4 + $0x124] sm:$0xf] }
 0x46a   : > { %v4699_v39 = vsel %vm10957_vm7, 0, %v4698_v21  ;;  %4962 = vst [vmem:[#allocation4 + $0x128] sm:$0xf] %v4829_v57  ;;  %v4475_v2 = vshrl.u32 %v4220_v14, 16  ;;  %v4478_v62 = vshll.u32 %v4220_v14, 16  ;;  %v3862_v37 = vsub.f32 0.0, %v12477_v23  ;;  %v5776_v18 = vpop.f32.mrf.mxu2  ;;  %v5687_v58 = vpop.f32.mrf.mxu1 }
 0x46b   : > { %4700 = vst [vmem:[#allocation4 + $0x120] sm:$0x1] %v4699_v39  ;;  %v4473_v13 = vsel %vm10912_vm4, %v4465_v54, %v4472_v51  ;;  %v4832_v22 = vrot.slane %v4831_v36, 4  ;;  %v12487_v48 = vadd.f32 %v5776_v18, %v5687_v58  ;;  %v3742_v32 = vpop.f32.mrf.mxu0 }
 0x46c   : > { %v10434_v7 = vpop.eup %10433  ;;  %4641 = vst [vmem:[#allocation4 + $0x12c] sm:$0xf] %v4473_v13  ;;  %v12489_v1 = vrot.slane %v4475_v2, 7  ;;  %v4833_v6 = vrot.slane %v4475_v2, 4  ;;  %v4834_v0 = vrot.slane %v4478_v62, 5  ;;  %v3743_v9 = vadd.f32 %v3742_v32, %v12224_v63  ;;  %v5860_v53 = vpop.f32.mrf.mxu3  ;;  %v13332_v63 = vld [vmem:[#allocation28_spill] sm:$0xff] }
 0x46d   : > { %v10436_v44 = vpop.eup %10435  ;;  %v4964_v20 = vsel %vm11148_vm9, %v4832_v22, %v4963_v33  ;;  %4256 = vst [vmem:[#allocation4 + $0x13c] sm:$0xf] %v4220_v14  ;;  %v3969_v46 = vadd.f32 1.0, %v10434_v7  ;;  %v3927_v38 = vmul.f32 1.442695, %v3862_v37  ;;  %v12497_v59 = vadd.f32 %v5860_v53, %v12442_v50  ;;  %v13333_v22 = vld [vmem:[#allocation52_spill] sm:$0xff] }
 0x46e   : > { %4965 = vst [vmem:[#allocation4 + $0x134] sm:$0xf] %v4964_v20  ;;  %v4480_v55 = vor.u32 %v4478_v62, %v12489_v1  ;;  %v4040_v26 = vmul.f32 %v10436_v44, %v12433_v47  ;;  %7147 = vmatmul.bf16.gmra.mxu0 %v9468_v30  ;;  %v4835_v29 = vor.u32 %v4834_v0, %v4833_v6  ;;  %v8965_v12 = vld [vmem:[#allocation4 + $0x12c] sm:$0xf0]  ;;  %v10038_v27 = vld [vmem:[#allocation4 + $0x118] sm:$0xf0] }
 0x46f   : > { %10437 = vrcp.f32 %v3969_v46  ;;  %v3787_v25 = vadd.f32 %v3743_v9, %v13332_v63  ;;  %v8959_v14 = vld [vmem:[#allocation4 + $0x110] sm:$0xf]  ;;  %v8968_v45 = vor.u32 %v10039_v8, %v8965_v12  ;;  %v3646_v50 = vadd.f32 %v12240_v3, %v12221_v15  ;;  %v9984_v20 = vld [vmem:[#allocation9 + $0x10] sm:$0xff]  ;;  %v4967_v53 = vld [vmem:[#allocation4 + $0x14c] sm:$0xf] }
 0x470   : > { %v4643_v43 = vsel %vm10920_vm5, %v4480_v55, %v4642_v31  ;;  %v4221_v60 = vpack.c.bf16 %v4040_v26, %v4040_v26  ;;  %10439 = vpow2.f32 %v3927_v38  ;;  %v8960_v56 = vor.u32 %v10038_v27, %v8959_v14  ;;  %v13334_v31 = vld [vmem:[#allocation49_spill] sm:$0xff]  ;;  %6338 = vmatpush.bf16.msrb.mxu1 %v9984_v20  ;;  %v10097_v8 = vld [vmem:[#allocation4 + $0xc8] sm:$0xf0] }
 0x471   : > { %4644 = vst [vmem:[#allocation4 + $0x138] sm:$0xf] %v4643_v43  ;;  %v12503_v47 = vadd.f32 %v12455_v42, %v3787_v25  ;;  %v4836_v57 = vrot.slane %v4835_v29, 4  ;;  %v2894_v15 = vadd.f32 %v13334_v31, %v13333_v22  ;;  %v4481_v49 = vrot.slane %v12489_v1, 4  ;;  %v9479_v29 = vld [vmem:[#allocation4 + $0xc0] sm:$0xf] }
 0x472   : > { %4257 = vst [vmem:[#allocation4 + $0x148] sm:$0xf] %v4221_v60  ;;  %v4483_v54 = vshrl.u32 %v4221_v60, 16  ;;  %v4486_v21 = vshll.u32 %v4221_v60, 16  ;;  %v8963_v51 = vld [vmem:[#allocation4 + $0x120] sm:$0xf]  ;;  %5818 = vmatmul.bf16.gmra.mxu2 %v8968_v45  ;;  %5902 = vmatmul.bf16.gmra.mxu3 %v8960_v56 }
 0x473   : > { %v3863_v36 = vsub.f32 0.0, %v12503_v47  ;;  %v3744_v33 = vpop.f32.mrf.mxu0  ;;  %v10040_v39 = vld [vmem:[#allocation4 + $0x128] sm:$0xf0] }
 0x474   : > { %v4485_v2 = vrot.slane %v4483_v54, 7  ;;  %v4837_v62 = vrot.slane %v4486_v21, 5  ;;  %v4839_v37 = vrot.slane %v4483_v54, 4  ;;  %v5690_v18 = vpop.f32.mrf.mxu1  ;;  %v3745_v58 = vadd.f32 %v3744_v33, %v3646_v50  ;;  %v5863_v38 = vpop.f32.mrf.mxu3  ;;  %v4646_v54 = vld [vmem:[#allocation4 + $0x150] sm:$0xf] }
 0x475   : > { %v10438_v13 = vpop.eup %10437  ;;  %v5022_v3 = vld [vmem:[#allocation4 + $0x134] sm:$0x8]  ;;  %v3929_v32 = vmul.f32 1.442695, %v3863_v36  ;;  %v8964_v30 = vor.u32 %v10040_v39, %v8963_v51  ;;  %v5779_v46 = vpop.f32.mrf.mxu2  ;;  %v12521_v27 = vadd.f32 %v5863_v38, %v12466_v24  ;;  %v9480_v33 = vor.u32 %v10097_v8, %v9479_v29 }
 0x476   : > { %v10440_v7 = vpop.eup %10439  ;;  %v5023_v6 = vsel %vm11179_vm14, 0, %v5022_v3  ;;  %v4488_v0 = vor.u32 %v4486_v21, %v4485_v2  ;;  %v4838_v9 = vsel %vm11168_vm11, %v4836_v57, %v4837_v62  ;;  %v4840_v44 = vor.u32 %v4839_v37, %v4837_v62 }
 0x477   : > { %5024 = vst [vmem:[#allocation4 + $0x134] sm:$0x8] %v5023_v6  ;;  %v4041_v55 = vmul.f32 %v10438_v13, %v12458_v41  ;;  %v3970_v26 = vadd.f32 1.0, %v10440_v7  ;;  %10441 = vpow2.f32 %v3929_v32  ;;  %v12516_v1 = vadd.f32 %v5779_v46, %v5690_v18  ;;  %5729 = vmatmul.bf16.gmra.mxu1 %v8964_v30  ;;  %v10042_v18 = vld [vmem:[#allocation4 + $0x13c] sm:$0xf] }
 0x478   : > { %v4701_v63 = vld [vmem:[#allocation4 + $0x138] sm:$0x1]  ;;  %v4489_v25 = vsel %vm10912_vm4, %v4481_v49, %v4488_v0  ;;  %v4841_v12 = vrot.slane %v4840_v44, 4  ;;  %4966 = vst [vmem:[#allocation4 + $0x140] sm:$0xf] %v4838_v9  ;;  %v3788_v43 = vadd.f32 %v3745_v58, %v2894_v15  ;;  %v13335_v15 = vld [vmem:[#allocation31_spill] sm:$0xff] }
 0x479   : > { %v4702_v41 = vsel %vm10957_vm7, 0, %v4701_v63  ;;  %4645 = vst [vmem:[#allocation4 + $0x144] sm:$0xf] %v4489_v25  ;;  %v4222_v60 = vpack.c.bf16 %v4041_v55, %v4041_v55  ;;  %10443 = vrcp.f32 %v3970_v26  ;;  %v8977_v36 = vld [vmem:[#allocation4 + $0x144] sm:$0xf0]  ;;  %v3651_v26 = vadd.f32 %v12304_v11, %v12264_v17 }
 0x47a   : > { %4703 = vst [vmem:[#allocation4 + $0x138] sm:$0x1] %v4702_v41  ;;  %v4968_v14 = vsel %vm11148_vm9, %v4841_v12, %v4967_v53  ;;  %v12528_v45 = vadd.f32 %v12455_v42, %v3788_v43  ;;  %v8980_v7 = vor.u32 %v10042_v18, %v8977_v36  ;;  %v8971_v44 = vld [vmem:[#allocation4 + $0x128] sm:$0xf] }
 0x47b   : > { %4969 = vst [vmem:[#allocation4 + $0x14c] sm:$0xf] %v4968_v14  ;;  %v4491_v56 = vshrl.u32 %v4222_v60, 16  ;;  %v4494_v50 = vshll.u32 %v4222_v60, 16  ;;  %v3747_v24 = vpop.f32.mrf.mxu0 }
 0x47c   : > { %4258 = vst [vmem:[#allocation4 + $0x154] sm:$0xf] %v4222_v60  ;;  %v3864_v21 = vsub.f32 0.0, %v12528_v45  ;;  %v5692_v51 = vpop.f32.mrf.mxu1  ;;  %v3748_v57 = vadd.f32 %v3747_v24, %v12267_v35  ;;  %v5865_v31 = vpop.f32.mrf.mxu3 }
 0x47d   : > { %v10442_v39 = vpop.eup %10441  ;;  %v12532_v2 = vrot.slane %v4491_v56, 7  ;;  %v4842_v62 = vrot.slane %v4491_v56, 4  ;;  %v4843_v37 = vrot.slane %v4494_v50, 5  ;;  %v5781_v22 = vpop.f32.mrf.mxu2  ;;  %v12540_v0 = vadd.f32 %v5865_v31, %v12487_v48  ;;  %v13336_v56 = vld [vmem:[#allocation51_spill] sm:$0xff]  ;;  %v10100_v31 = vld [vmem:[#allocation4 + $0xe0] sm:$0xf0] }
 0x47e   : > { %v3971_v58 = vadd.f32 1.0, %v10442_v39  ;;  %v3931_v13 = vmul.f32 1.442695, %v3864_v21  ;;  %v3789_v3 = vadd.f32 %v3748_v57, %v13335_v15  ;;  %v10041_v49 = vld [vmem:[#allocation4 + $0x130] sm:$0xf0]  ;;  %7152 = vmatmul.bf16.gmra.mxu0 %v9480_v33  ;;  %v12536_v35 = vadd.f32 %v5781_v22, %v5692_v51 }
 0x47f   : > { %v10444_v32 = vpop.eup %10443  ;;  %v4496_v30 = vor.u32 %v4494_v50, %v12532_v2  ;;  %v4844_v38 = vor.u32 %v4843_v37, %v4842_v62  ;;  %v8972_v53 = vor.u32 %v10041_v49, %v8971_v44  ;;  %v2899_v17 = vadd.f32 %v12249_v10, %v13336_v56  ;;  %v9491_v22 = vld [vmem:[#allocation4 + $0xd8] sm:$0xf] }
 0x480   : > { %v4042_v6 = vmul.f32 %v10444_v32, %v12477_v23  ;;  %10445 = vrcp.f32 %v3971_v58  ;;  %v12543_v9 = vadd.f32 %v12455_v42, %v3789_v3  ;;  %v10043_v20 = vld [vmem:[#allocation4 + $0x140] sm:$0xf0]  ;;  %v4497_v11 = vrot.slane %v12532_v2, 4 }
 0x481   : > { %v4647_v46 = vsel %vm10920_vm5, %v4496_v30, %v4646_v54  ;;  %10447 = vpow2.f32 %v3931_v13  ;;  %v8975_v55 = vld [vmem:[#allocation4 + $0x138] sm:$0xf]  ;;  %v4845_v50 = vrot.slane %v4844_v38, 4  ;;  %v4971_v3 = vld [vmem:[#allocation4 + $0x164] sm:$0xf] }
 0x482   : > { %v5025_v23 = vld [vmem:[#allocation4 + $0x14c] sm:$0x8]  ;;  %4648 = vst [vmem:[#allocation4 + $0x150] sm:$0xf] %v4647_v46  ;;  %v4223_v29 = vpack.c.bf16 %v4042_v6, %v4042_v6  ;;  %v3865_v48 = vsub.f32 0.0, %v12543_v9  ;;  %5823 = vmatmul.bf16.gmra.mxu2 %v8980_v7  ;;  %5907 = vmatmul.bf16.gmra.mxu3 %v8972_v53  ;;  %v8976_v12 = vor.u32 %v10043_v20, %v8975_v55  ;;  %v9991_v7 = vld [vmem:[#allocation9 + $0x48] sm:$0xff] }
 0x483   : > { %v5026_v63 = vsel %vm11179_vm14, 0, %v5025_v23  ;;  %v3749_v25 = vpop.f32.mrf.mxu0  ;;  %v4650_v53 = vld [vmem:[#allocation4 + $0x168] sm:$0xf]  ;;  %6428 = vmatpush.bf16.msrb.mxu2 %v9991_v7 }
 0x484   : > { %5027 = vst [vmem:[#allocation4 + $0x14c] sm:$0x8] %v5026_v63  ;;  %v4499_v43 = vshrl.u32 %v4223_v29, 16  ;;  %v4502_v41 = vshll.u32 %v4223_v29, 16  ;;  %v3933_v60 = vmul.f32 1.442695, %v3865_v48  ;;  %v5695_v8 = vpop.f32.mrf.mxu1  ;;  %v3750_v14 = vadd.f32 %v3749_v25, %v3651_v26  ;;  %v5868_v36 = vpop.f32.mrf.mxu3 }
 0x485   : > { %4259 = vst [vmem:[#allocation4 + $0x160] sm:$0xf] %v4223_v29  ;;  %v5784_v57 = vpop.f32.mrf.mxu2  ;;  %v12559_v37 = vadd.f32 %v5868_v36, %v12516_v1  ;;  %v10045_v26 = vld [vmem:[#allocation4 + $0x154] sm:$0xf]  ;;  %v9492_v29 = vor.u32 %v10100_v31, %v9491_v22 }
 0x486   : > { %v10446_v24 = vpop.eup %10445  ;;  %v4501_v54 = vrot.slane %v4499_v43, 7  ;;  %v4846_v21 = vrot.slane %v4502_v41, 5  ;;  %v4848_v51 = vrot.slane %v4499_v43, 4  ;;  %10449 = vpow2.f32 %v3933_v60 }
 0x487   : > { %v10448_v33 = vpop.eup %10447  ;;  %v4043_v39 = vmul.f32 %v10446_v24, %v12503_v47  ;;  %v12556_v62 = vadd.f32 %v5784_v57, %v5695_v8  ;;  %v3790_v10 = vadd.f32 %v3750_v14, %v2899_v17  ;;  %5734 = vmatmul.bf16.gmra.mxu1 %v8976_v12  ;;  %v8983_v17 = vld [vmem:[#allocation4 + $0x140] sm:$0xf] }
 0x488   : > { %v4504_v2 = vor.u32 %v4502_v41, %v4501_v54  ;;  %v4847_v18 = vsel %vm11168_vm11, %v4845_v50, %v4846_v21  ;;  %v4849_v58 = vor.u32 %v4848_v51, %v4846_v21  ;;  %v3972_v13 = vadd.f32 1.0, %v10448_v33 }
 0x489   : > { %v4704_v15 = vld [vmem:[#allocation4 + $0x150] sm:$0x1]  ;;  %4970 = vst [vmem:[#allocation4 + $0x158] sm:$0xf] %v4847_v18  ;;  %v4224_v49 = vpack.c.bf16 %v4043_v39, %v4043_v39  ;;  %v12564_v47 = vadd.f32 %v12455_v42, %v3790_v10 }
 0x48a   : > { %v4705_v1 = vsel %vm10957_vm7, 0, %v4704_v15  ;;  %v4505_v32 = vsel %vm10912_vm4, %v4497_v11, %v4504_v2  ;;  %v4850_v30 = vrot.slane %v4849_v58, 4  ;;  %10451 = vrcp.f32 %v3972_v13  ;;  %v10005_v13 = vld [vmem:[#allocation9 + $0xb8] sm:$0xff] }
 0x48b   : > { %4706 = vst [vmem:[#allocation4 + $0x150] sm:$0x1] %v4705_v1  ;;  %v4507_v6 = vshrl.u32 %v4224_v49, 16  ;;  %v4510_v44 = vshll.u32 %v4224_v49, 16  ;;  %v3866_v20 = vsub.f32 0.0, %v12564_v47  ;;  %v3752_v46 = vpop.f32.mrf.mxu0  ;;  %6511 = vmatpush.bf16.msra.mxu3 %v10005_v13 }
 0x48c   : > { %v10450_v38 = vpop.eup %10449  ;;  %4649 = vst [vmem:[#allocation4 + $0x15c] sm:$0xf] %v4505_v32  ;;  %v4972_v42 = vsel %vm11148_vm9, %v4850_v30, %v4971_v3  ;;  %v5697_v55 = vpop.f32.mrf.mxu1  ;;  %v8989_v23 = vld [vmem:[#allocation4 + $0x15c] sm:$0xf0]  ;;  %v10044_v8 = vld [vmem:[#allocation4 + $0x148] sm:$0xf0] }
 0x48d   : > { %4973 = vst [vmem:[#allocation4 + $0x164] sm:$0xf] %v4972_v42  ;;  %v12573_v48 = vrot.slane %v4507_v6, 7  ;;  %v4851_v63 = vrot.slane %v4507_v6, 4  ;;  %v4852_v25 = vrot.slane %v4510_v44, 5  ;;  %v3973_v12 = vadd.f32 1.0, %v10450_v38  ;;  %v5786_v41 = vpop.f32.mrf.mxu2  ;;  %v5870_v60 = vpop.f32.mrf.mxu3 }
 0x48e   : > { %4260 = vst [vmem:[#allocation4 + $0x16c] sm:$0xf] %v4224_v49  ;;  %v3935_v43 = vmul.f32 1.442695, %v3866_v20  ;;  %7157 = vmatmul.bf16.gmra.mxu0 %v9492_v29  ;;  %v8992_v56 = vor.u32 %v10045_v26, %v8989_v23  ;;  %v12576_v50 = vadd.f32 %v5786_v41, %v5697_v55  ;;  %v12579_v24 = vadd.f32 %v5870_v60, %v12536_v35  ;;  %v9983_v32 = vld [vmem:[#allocation9 + $0x8] sm:$0xff]  ;;  %v9990_v6 = vld [vmem:[#allocation9 + $0x40] sm:$0xff] }
 0x48f   : > { %v4512_v14 = vor.u32 %v4510_v44, %v12573_v48  ;;  %10453 = vrcp.f32 %v3973_v12  ;;  %v8984_v54 = vor.u32 %v10044_v8, %v8983_v17  ;;  %v4853_v57 = vor.u32 %v4852_v25, %v4851_v63  ;;  %v10004_v42 = vld [vmem:[#allocation9 + $0xb0] sm:$0xff]  ;;  %6339 = vmatpush.bf16.msrb.mxu1 %v9983_v32  ;;  %v9503_v23 = vld [vmem:[#allocation4 + $0xf0] sm:$0xf]  ;;  %6429 = vmatpush.bf16.msrb.mxu2 %v9990_v6 }
 0x490   : > { %v10452_v11 = vpop.eup %10451  ;;  %10455 = vpow2.f32 %v3935_v43  ;;  %v4513_v31 = vrot.slane %v12573_v48, 4  ;;  %v9982_v29 = vld [vmem:[#allocation9] sm:$0xff]  ;;  %v4975_v43 = vld [vmem:[#allocation4 + $0x17c] sm:$0xf]  ;;  %v10769_v41 = vmov 0.0|0.0   ;;  %6512 = vmatpush.bf16.msra.mxu3 %v10004_v42 }
 0x491   : > { %v4651_v21 = vsel %vm10920_vm5, %v4512_v14, %v4650_v53  ;;  %v4044_v51 = vmul.f32 %v10452_v11, %v12528_v45  ;;  %v4854_v49 = vrot.slane %v4853_v57, 4  ;;  %4230 = vst [vmem:[#allocation4 + $0x4] sm:$0xf] %v10769_v41  ;;  %v10770_v14 = vmov 0  }
 0x492   : > { %4652 = vst [vmem:[#allocation4 + $0x168] sm:$0xf] %v4651_v21  ;;  %v8987_v36 = vld [vmem:[#allocation4 + $0x150] sm:$0xf]  ;;  %5828 = vmatmul.bf16.gmra.mxu2 %v8992_v56  ;;  %5912 = vmatmul.bf16.gmra.mxu3 %v8984_v54  ;;  %v12597_v56 = vrot.slane %v10770_v14, 7 }
 0x493   : > { %v4225_v33 = vpack.c.bf16 %v4044_v51, %v4044_v51  ;;  %v3754_v39 = vpop.f32.mrf.mxu0  ;;  %v10046_v10 = vld [vmem:[#allocation4 + $0x158] sm:$0xf0]  ;;  %v4654_v54 = vld [vmem:[#allocation4 + $0x180] sm:$0xf]  ;;  %6340 = vmatpush.bf16.msrb.mxu1 %v9982_v29  ;;  %4231 = vst [vmem:[#allocation4 + $0x10] sm:$0xf] %v10769_v41 }
 0x494   : > { %v5028_v2 = vld [vmem:[#allocation4 + $0x164] sm:$0x8]  ;;  %v5700_v18 = vpop.f32.mrf.mxu1  ;;  %v8988_v58 = vor.u32 %v10046_v10, %v8987_v36  ;;  %v4590_v51 = vld [vmem:[#allocation4] sm:$0xf]  ;;  %4264 = vst [vmem:[#allocation4 + $0x19c] sm:$0xf] %v10769_v41 }
 0x495   : > { %v10454_v35 = vpop.eup %10453  ;;  %v5029_v22 = vsel %vm11179_vm14, 0, %v5028_v2  ;;  %4261 = vst [vmem:[#allocation4 + $0x178] sm:$0xf] %v4225_v33  ;;  %v4515_v45 = vshrl.u32 %v4225_v33, 16  ;;  %v4518_v15 = vshll.u32 %v4225_v33, 16  ;;  %v5789_v30 = vpop.f32.mrf.mxu2  ;;  %v10003_v2 = vld [vmem:[#allocation9 + $0xa8] sm:$0xff] }
 0x496   : > { %v10456_v3 = vpop.eup %10455  ;;  %5030 = vst [vmem:[#allocation4 + $0x164] sm:$0x8] %v5029_v22  ;;  %v4045_v1 = vmul.f32 %v10454_v35, %v12543_v9  ;;  %v5873_v7 = vpop.f32.mrf.mxu3  ;;  %v12588_v55 = vadd.f32 %v5789_v30, %v5700_v18  ;;  %v10103_v9 = vld [vmem:[#allocation4 + $0xf8] sm:$0xf0]  ;;  %v10048_v21 = vld [vmem:[#allocation4 + $0x16c] sm:$0xf]  ;;  %6513 = vmatpush.bf16.msra.mxu3 %v10003_v2 }
 0x497   : > { %v4517_v44 = vrot.slane %v4515_v45, 7  ;;  %v4855_v20 = vrot.slane %v4518_v15, 5  ;;  %v4857_v46 = vrot.slane %v4515_v45, 4  ;;  %v3974_v38 = vadd.f32 1.0, %v10456_v3  ;;  %5739 = vmatmul.bf16.gmra.mxu1 %v8988_v58  ;;  %4265 = vst [vmem:[#allocation4 + $0x1a8] sm:$0xf] %v10769_v41 }
 0x498   : > { %v4226_v53 = vpack.c.bf16 %v4045_v1, %v4045_v1  ;;  %v12591_v26 = vadd.f32 %v5873_v7, %v12556_v62  ;;  %v9504_v10 = vor.u32 %v10103_v9, %v9503_v23  ;;  %v4591_v3 = vsel %vm10920_vm5, %v12597_v56, %v4590_v51  ;;  %v10141_v2 = vld [vmem:[#allocation9 + $0x1f8] sm:$0xff] }
 0x499   : > { %v4707_v48 = vld [vmem:[#allocation4 + $0x168] sm:$0x1]  ;;  %v4520_v63 = vor.u32 %v4518_v15, %v4517_v44  ;;  %v4856_v25 = vsel %vm11168_vm11, %v4854_v49, %v4855_v20  ;;  %v4858_v12 = vor.u32 %v4857_v46, %v4855_v20  ;;  %10457 = vrcp.f32 %v3974_v38  ;;  %v8995_v15 = vld [vmem:[#allocation4 + $0x158] sm:$0xf]  ;;  %v10002_v20 = vld [vmem:[#allocation9 + $0xa0] sm:$0xff]  ;;  %7203 = vmatpush.bf16.msra.mxu1 %v10141_v2 }
 0x49a   : > { %v4708_v60 = vsel %vm10957_vm7, 0, %v4707_v48  ;;  %4974 = vst [vmem:[#allocation4 + $0x170] sm:$0xf] %v4856_v25  ;;  %v4523_v62 = vshrl.u32 %v4226_v53, 16  ;;  %v4526_v8 = vshll.u32 %v4226_v53, 16  ;;  %v4273_v7 = vrot.slane %v12597_v56, 4  ;;  %6514 = vmatpush.bf16.msra.mxu3 %v10002_v20 }
 0x49b   : > { %4709 = vst [vmem:[#allocation4 + $0x168] sm:$0x1] %v4708_v60  ;;  %v4521_v17 = vsel %vm10912_vm4, %v4513_v31, %v4520_v63  ;;  %v4859_v11 = vrot.slane %v4858_v12, 4  ;;  %v4716_v46 = vrot.slane %v10770_v14, 4  ;;  %v4717_v38 = vrot.slane %v10770_v14, 5  ;;  %v10001_v60 = vld [vmem:[#allocation9 + $0x98] sm:$0xff] }
 0x49c   : > { %4653 = vst [vmem:[#allocation4 + $0x174] sm:$0xf] %v4521_v17  ;;  %v12601_v57 = vrot.slane %v4523_v62, 7  ;;  %v4860_v36 = vrot.slane %v4523_v62, 4  ;;  %v4861_v33 = vrot.slane %v4526_v8, 5  ;;  %v5702_v39 = vpop.f32.mrf.mxu1 }
 0x49d   : > { %v4976_v18 = vsel %vm11148_vm9, %v4859_v11, %v4975_v43  ;;  %4262 = vst [vmem:[#allocation4 + $0x184] sm:$0xf] %v4226_v53  ;;  %v9001_v58 = vld [vmem:[#allocation4 + $0x174] sm:$0xf0]  ;;  %v10047_v13 = vld [vmem:[#allocation4 + $0x160] sm:$0xf0]  ;;  %v5791_v22 = vpop.f32.mrf.mxu2  ;;  %v4718_v25 = vor.u32 %v4717_v38, %v4716_v46 }
 0x49e   : > { %4977 = vst [vmem:[#allocation4 + $0x17c] sm:$0xf] %v4976_v18  ;;  %v4528_v35 = vor.u32 %v4526_v8, %v12601_v57  ;;  %v5875_v31 = vpop.f32.mrf.mxu3  ;;  %v9004_v45 = vor.u32 %v10048_v21, %v9001_v58  ;;  %7162 = vmatmul.bf16.gmra.mxu0 %v9504_v10  ;;  %v12609_v1 = vadd.f32 %v5791_v22, %v5702_v39  ;;  %v4979_v21 = vld [vmem:[#allocation4 + $0x194] sm:$0xf]  ;;  %v10149_v10 = vld [vmem:[#allocation9 + $0x238] sm:$0xff]  ;;  %v10000_v22 = vld [vmem:[#allocation9 + $0x90] sm:$0xff] }
 0x49f   : > { %v10458_v49 = vpop.eup %10457  ;;  %v12612_v32 = vadd.f32 %v5875_v31, %v12576_v50  ;;  %v8996_v30 = vor.u32 %v10047_v13, %v8995_v15  ;;  %v4862_v42 = vor.u32 %v4861_v33, %v4860_v36  ;;  %v4281_v50 = vsel %vm10912_vm4, %v4273_v7, %v12597_v56  ;;  %4592 = vst [vmem:[#allocation4] sm:$0xf] %v4591_v3  ;;  %v9515_v33 = vld [vmem:[#allocation4 + $0x108] sm:$0xf]  ;;  %v10106_v39 = vld [vmem:[#allocation4 + $0x110] sm:$0xf0] }
 0x4a0   : > { %v4655_v6 = vsel %vm10920_vm5, %v4528_v35, %v4654_v54  ;;  %v4046_v44 = vmul.f32 %v10458_v49, %v12564_v47  ;;  %4593 = vst [vmem:[#allocation4 + $0xc] sm:$0xf] %v4281_v50  ;;  %v4529_v54 = vrot.slane %v12601_v57, 4  ;;  %6515 = vmatpush.bf16.msra.mxu3 %v10001_v60  ;;  %v12631_v57 = vrot.slane %v4718_v25, 4  ;;  %7292 = vmatpush.bf16.msra.mxu2 %v10149_v10  ;;  %v4915_v31 = vld [vmem:[#allocation4 + $0x14] sm:$0xf] }
 0x4a1   : > { %4656 = vst [vmem:[#allocation4 + $0x180] sm:$0xf] %v4655_v6  ;;  %v4863_v43 = vrot.slane %v4862_v42, 4  ;;  %v9516_v20 = vor.u32 %v10106_v39, %v9515_v33  ;;  %v9007_v42 = vld [vmem:[#allocation4 + $0x170] sm:$0xf] }
 0x4a2   : > { %v4227_v53 = vpack.c.bf16 %v4046_v44, %v4046_v44  ;;  %v8999_v23 = vld [vmem:[#allocation4 + $0x168] sm:$0xf]  ;;  %5833 = vmatmul.bf16.gmra.mxu2 %v9004_v45  ;;  %5917 = vmatmul.bf16.gmra.mxu3 %v8996_v30  ;;  %4661 = vst [vmem:[#allocation4 + $0x1a4] sm:$0xf] %v4281_v50  ;;  %v4721_v30 = vsel %vm11168_vm11, %v12631_v57, %v4717_v38  ;;  %v9934_v39 = vld [vmem:[#allocation4 + $0x4] sm:$0xf] }
 0x4a3   : > { %v10049_v9 = vld [vmem:[#allocation4 + $0x170] sm:$0xf0]  ;;  %v4916_v46 = vsel %vm11148_vm9, %v12631_v57, %v4915_v31  ;;  %4914 = vst [vmem:[#allocation4 + $0x8] sm:$0xf] %v4721_v30  ;;  %v9121_v10 = vld [vmem:[#allocation4 + $0xc] sm:$0xf0] }
 0x4a4   : > { %4263 = vst [vmem:[#allocation4 + $0x190] sm:$0xf] %v4227_v53  ;;  %v4531_v29 = vshrl.u32 %v4227_v53, 16  ;;  %v4534_v47 = vshll.u32 %v4227_v53, 16  ;;  %v5705_v48 = vpop.f32.mrf.mxu1  ;;  %v9000_v63 = vor.u32 %v10049_v9, %v8999_v23  ;;  %6516 = vmatpush.bf16.msra.mxu3 %v10000_v22  ;;  %v10051_v50 = vld [vmem:[#allocation4 + $0x184] sm:$0xf] }
 0x4a5   : > { %v5031_v12 = vld [vmem:[#allocation4 + $0x17c] sm:$0x8]  ;;  %v5794_v17 = vpop.f32.mrf.mxu2  ;;  %4917 = vst [vmem:[#allocation4 + $0x14] sm:$0xf] %v4916_v46  ;;  %v9539_v46 = vld [vmem:[#allocation4 + $0x138] sm:$0xf] }
 0x4a6   : > { %v5032_v41 = vsel %vm11179_vm14, 0, %v5031_v12  ;;  %v4533_v62 = vrot.slane %v4531_v29, 7  ;;  %v4864_v8 = vrot.slane %v4534_v47, 5  ;;  %v4866_v14 = vrot.slane %v4531_v29, 4  ;;  %v5878_v11 = vpop.f32.mrf.mxu3  ;;  %v4662_v3 = vld [vmem:[#allocation4] sm:$0x1] }
 0x4a7   : > { %5033 = vst [vmem:[#allocation4 + $0x17c] sm:$0x8] %v5032_v41  ;;  %v12624_v51 = vadd.f32 %v5794_v17, %v5705_v48  ;;  %v12627_v36 = vadd.f32 %v5878_v11, %v12588_v55  ;;  %5744 = vmatmul.bf16.gmra.mxu1 %v9000_v63  ;;  %v4663_v49 = vsel %vm10957_vm7, 0, %v4662_v3  ;;  %v9998_v48 = vld [vmem:[#allocation9 + $0x80] sm:$0xff] }
 0x4a8   : > { %v4710_v18 = vld [vmem:[#allocation4 + $0x180] sm:$0x1]  ;;  %v4536_v58 = vor.u32 %v4534_v47, %v4533_v62  ;;  %v4865_v13 = vsel %vm11168_vm11, %v4863_v43, %v4864_v8  ;;  %v4867_v35 = vor.u32 %v4866_v14, %v4864_v8  ;;  %4664 = vst [vmem:[#allocation4] sm:$0x1] %v4663_v49  ;;  %6517 = vmatpush.bf16.msra.mxu3 %v9999_v19 }
 0x4a9   : > { %v4711_v55 = vsel %vm10957_vm7, 0, %v4710_v18  ;;  %4978 = vst [vmem:[#allocation4 + $0x188] sm:$0xf] %v4865_v13  ;;  %v10140_v19 = vld [vmem:[#allocation9 + $0x1f0] sm:$0xff] }
 0x4aa   : > { %4712 = vst [vmem:[#allocation4 + $0x180] sm:$0x1] %v4711_v55  ;;  %v4537_v45 = vsel %vm10912_vm4, %v4529_v54, %v4536_v58  ;;  %v4868_v15 = vrot.slane %v4867_v35, 4  ;;  %v9527_v54 = vld [vmem:[#allocation4 + $0x120] sm:$0xf]  ;;  %7204 = vmatpush.bf16.msra.mxu1 %v10140_v19 }
 0x4ab   : > { %4657 = vst [vmem:[#allocation4 + $0x18c] sm:$0xf] %v4537_v45  ;;  %v9013_v44 = vld [vmem:[#allocation4 + $0x18c] sm:$0xf0] }
 0x4ac   : > { %v4980_v7 = vsel %vm11148_vm9, %v4868_v15, %v4979_v21  ;;  %v5707_v6 = vpop.f32.mrf.mxu1  ;;  %v9016_v29 = vor.u32 %v10051_v50, %v9013_v44  ;;  %4982 = vst [vmem:[#allocation4 + $0x1a0] sm:$0xf] %v4721_v30  ;;  %6518 = vmatpush.bf16.msra.mxu3 %v9998_v48  ;;  %v4986_v8 = vld [vmem:[#allocation4 + $0x14] sm:$0x8]  ;;  %v10109_v21 = vld [vmem:[#allocation4 + $0x128] sm:$0xf0] }
 0x4ad   : > { %4981 = vst [vmem:[#allocation4 + $0x194] sm:$0xf] %v4980_v7  ;;  %v5796_v53 = vpop.f32.mrf.mxu2  ;;  %v4987_v11 = vsel %vm11179_vm14, 0, %v4986_v8  ;;  %v9528_v2 = vor.u32 %v10109_v21, %v9527_v54  ;;  %v9935_v15 = vld [vmem:[#allocation4 + $0x8] sm:$0xf0] }
 0x4ae   : > { %v5880_v23 = vpop.f32.mrf.mxu3  ;;  %v10050_v4 = vld [vmem:[#allocation4 + $0x178] sm:$0xf0]  ;;  %7167 = vmatmul.bf16.gmra.mxu0 %v9516_v20  ;;  %v5797_v38 = vadd.f32 %v5796_v53, %v5707_v6  ;;  %4988 = vst [vmem:[#allocation4 + $0x14] sm:$0x8] %v4987_v11  ;;  %v10148_v6 = vld [vmem:[#allocation9 + $0x230] sm:$0xff]  ;;  %v12661_v53 = vpop.f32.mrf.mxu0 }
 0x4af   : > { %v12648_v9 = vadd.f32 %v5880_v23, %v12609_v1  ;;  %v9008_v47 = vor.u32 %v10050_v4, %v9007_v42  ;;  %v9119_v45 = vld [vmem:[#allocation4] sm:$0xf]  ;;  %7293 = vmatpush.bf16.msra.mxu2 %v10148_v6  ;;  %v10112_v42 = vld [vmem:[#allocation4 + $0x140] sm:$0xf0]  ;;  %v9127_v50 = vld [vmem:[#allocation4 + $0x8] sm:$0xf] }
 0x4b0   : > { %v9019_v35 = vld [vmem:[#allocation4 + $0x188] sm:$0xf]  ;;  %v9120_v3 = vor.u32 %v9935_v15, %v9119_v45  ;;  %v9940_v15 = vld [vmem:[#allocation4 + $0x34] sm:$0xf]  ;;  %v9941_v6 = vld [vmem:[#allocation4 + $0x38] sm:$0xf0] }
 0x4b1   : > { %v9011_v63 = vld [vmem:[#allocation4 + $0x180] sm:$0xf]  ;;  %v9133_v48 = vld [vmem:[#allocation4 + $0x24] sm:$0xf0] }
 0x4b2   : > { %v10052_v25 = vld [vmem:[#allocation4 + $0x188] sm:$0xf0]  ;;  %5838 = vmatmul.bf16.gmra.mxu2 %v9016_v29  ;;  %5922 = vmatmul.bf16.gmra.mxu3 %v9008_v47 }
 0x4b3   : > { %v9012_v12 = vor.u32 %v10052_v25, %v9011_v63 }
 0x4b4   : > { %v5034_v43 = vld [vmem:[#allocation4 + $0x194] sm:$0x8]  ;;  %v5710_v60 = vpop.f32.mrf.mxu1 }
 0x4b5   : > { %v5035_v41 = vsel %vm11179_vm14, 0, %v5034_v43  ;;  %v5799_v1 = vpop.f32.mrf.mxu2  ;;  %v9936_v4 = vld [vmem:[#allocation4 + $0x10] sm:$0xf0]  ;;  %v9937_v43 = vld [vmem:[#allocation4 + $0x1c] sm:$0xf] }
 0x4b6   : > { %5036 = vst [vmem:[#allocation4 + $0x194] sm:$0x8] %v5035_v41  ;;  %v5883_v62 = vpop.f32.mrf.mxu3  ;;  %v5800_v14 = vadd.f32 %v5799_v1, %v5710_v60  ;;  %v9136_v60 = vor.u32 %v9937_v43, %v9133_v48  ;;  %v9131_v41 = vld [vmem:[#allocation4 + $0x18] sm:$0xf]  ;;  %v9938_v1 = vld [vmem:[#allocation4 + $0x20] sm:$0xf0]  ;;  %v12665_v8 = vpop.f32.mrf.mxu0 }
 0x4b7   : > { %v12653_v17 = vadd.f32 %v5883_v62, %v12624_v51  ;;  %5749 = vmatmul.bf16.gmra.mxu1 %v9012_v12  ;;  %v9124_v51 = vor.u32 %v9934_v39, %v9121_v10  ;;  %v9128_v12 = vor.u32 %v9936_v4, %v9127_v50  ;;  %v9551_v39 = vld [vmem:[#allocation4 + $0x150] sm:$0xf]  ;;  %v10115_v10 = vld [vmem:[#allocation4 + $0x158] sm:$0xf0]  ;;  %v10118_v48 = vld [vmem:[#allocation4 + $0x170] sm:$0xf0] }
 0x4bc   : > { %v5712_v33 = vpop.f32.mrf.mxu1 }
 0x4bd   : > { %v10053_v18 = vld [vmem:[#allocation4 + $0x190] sm:$0xf0]  ;;  %v5801_v58 = vpop.f32.mrf.mxu2 }
 0x4be   : > { %v5885_v13 = vpop.f32.mrf.mxu3  ;;  %7172 = vmatmul.bf16.gmra.mxu0 %v9528_v2  ;;  %v5802_v22 = vadd.f32 %v5801_v58, %v5712_v33  ;;  %v9020_v31 = vor.u32 %v10053_v18, %v9019_v35  ;;  %v9552_v18 = vor.u32 %v10115_v10, %v9551_v39  ;;  %v9145_v35 = vld [vmem:[#allocation4 + $0x3c] sm:$0xf0]  ;;  %v9155_v10 = vld [vmem:[#allocation4 + $0x48] sm:$0xf] }
 0x4bf   : > { %v12657_v55 = vadd.f32 %v5885_v13, %v5797_v38  ;;  %v9540_v38 = vor.u32 %v10112_v42, %v9539_v46 }
 0x4c2   : > { %6430 = vmatmul.bf16.vlgmr.msrb.gmra.mxu2 %v9124_v51  ;;  %5927 = vmatmul.bf16.gmra.mxu3 %v9020_v31  ;;  %v12669_v51 = vpop.f32.mrf.mxu0 }
 0x4c4   : > { %v5715_v49 = vpop.f32.mrf.mxu1 }
 0x4c5   : > { %v5804_v30 = vpop.f32.mrf.mxu2 }
 0x4c6   : > { %v5888_v7 = vpop.f32.mrf.mxu3  ;;  %v5805_v44 = vadd.f32 %v5804_v30, %v5715_v49  ;;  %v9148_v49 = vor.u32 %v9940_v15, %v9145_v35 }
 0x4c7   : > { %v12659_v20 = vadd.f32 %v5888_v7, %v5800_v14  ;;  %6341 = vmatmul.bf16.vlgmr.msrb.gmra.mxu1 %v9120_v3  ;;  %v9132_v14 = vor.u32 %v9938_v1, %v9131_v41  ;;  %v9139_v3 = vld [vmem:[#allocation4 + $0x20] sm:$0xf]  ;;  %v9143_v7 = vld [vmem:[#allocation4 + $0x30] sm:$0xf]  ;;  %v9157_v41 = vld [vmem:[#allocation4 + $0x54] sm:$0xf0] }
 0x4c8   : > { %v9144_v19 = vor.u32 %v9941_v6, %v9143_v7  ;;  %v9942_v1 = vld [vmem:[#allocation4 + $0x40] sm:$0xf0] }
 0x4cc   : > { %v5717_v23 = vpop.f32.mrf.mxu1 }
 0x4cd   : > { %v5806_v29 = vpop.f32.mrf.mxu2 }
 0x4ce   : > { %v5890_v47 = vpop.f32.mrf.mxu3  ;;  %7177 = vmatmul.bf16.gmra.mxu0 %v9540_v38  ;;  %v5807_v63 = vadd.f32 %v5806_v29, %v5717_v23  ;;  %v10147_v23 = vld [vmem:[#allocation9 + $0x228] sm:$0xff]  ;;  %v12675_v29 = vpop.f32.mrf.mxu0 }
 0x4cf   : > { %v12663_v25 = vadd.f32 %v5890_v47, %v5802_v22  ;;  %v9939_v22 = vld [vmem:[#allocation4 + $0x28] sm:$0xf0]  ;;  %v10139_v38 = vld [vmem:[#allocation9 + $0x1e8] sm:$0xff]  ;;  %7294 = vmatpush.bf16.msra.mxu2 %v10147_v23  ;;  %v9563_v47 = vld [vmem:[#allocation4 + $0x168] sm:$0xf] }
 0x4d0   : > { %v9140_v30 = vor.u32 %v9939_v22, %v9139_v3  ;;  %7205 = vmatpush.bf16.msra.mxu1 %v10139_v38 }
 0x4d2   : > { %6435 = vmatmul.bf16.gmra.mxu2 %v9136_v60  ;;  %6519 = vmatmul.bf16.vlgmr.msra.gmra.mxu3 %v9128_v12  ;;  %v9564_v12 = vor.u32 %v10118_v48, %v9563_v47  ;;  %v9946_v47 = vld [vmem:[#allocation4 + $0x64] sm:$0xf]  ;;  %v9163_v48 = vld [vmem:[#allocation4 + $0x50] sm:$0xf] }
 0x4d4   : > { %v5720_v62 = vpop.f32.mrf.mxu1 }
 0x4d5   : > { %v5809_v11 = vpop.f32.mrf.mxu2 }
 0x4d6   : > { %v5893_v54 = vpop.f32.mrf.mxu3  ;;  %v5810_v21 = vadd.f32 %v5809_v11, %v5720_v62  ;;  %v9943_v11 = vld [vmem:[#allocation4 + $0x4c] sm:$0xf] }
 0x4d7   : > { %v12667_v33 = vadd.f32 %v5893_v54, %v5805_v44  ;;  %6346 = vmatmul.bf16.gmra.mxu1 %v9132_v14  ;;  %v9151_v54 = vld [vmem:[#allocation4 + $0x38] sm:$0xf] }
 0x4d8   : > { %v9152_v39 = vor.u32 %v9942_v1, %v9151_v54  ;;  %v10146_v54 = vld [vmem:[#allocation9 + $0x220] sm:$0xff] }
 0x4d9   : > { %7295 = vmatpush.bf16.msra.mxu2 %v10146_v54  ;;  %v9952_v54 = vld [vmem:[#allocation4 + $0x94] sm:$0xf] }
 0x4dc   : > { %v5722_v2 = vpop.f32.mrf.mxu1 }
 0x4dd   : > { %v5811_v58 = vpop.f32.mrf.mxu2 }
 0x4de   : > { %v5895_v13 = vpop.f32.mrf.mxu3  ;;  %7182 = vmatmul.bf16.gmra.mxu0 %v9552_v18  ;;  %v5812_v31 = vadd.f32 %v5811_v58, %v5722_v2  ;;  %v9944_v2 = vld [vmem:[#allocation4 + $0x50] sm:$0xf0]  ;;  %v12679_v18 = vpop.f32.mrf.mxu0 }
 0x4df   : > { %v12671_v45 = vadd.f32 %v5895_v13, %v5807_v63  ;;  %v9156_v13 = vor.u32 %v9944_v2, %v9155_v10  ;;  %v10138_v10 = vld [vmem:[#allocation9 + $0x1e0] sm:$0xff] }
 0x4e0   : > { %7206 = vmatpush.bf16.msra.mxu1 %v10138_v10  ;;  %v9187_v10 = vld [vmem:[#allocation4 + $0x80] sm:$0xf] }
 0x4e2   : > { %6440 = vmatmul.bf16.gmra.mxu2 %v9148_v49  ;;  %6524 = vmatmul.bf16.gmra.mxu3 %v9140_v30  ;;  %v10121_v49 = vld [vmem:[#allocation4 + $0x188] sm:$0xf0] }
 0x4e4   : > { %v5725_v44 = vpop.f32.mrf.mxu1 }
 0x4e5   : > { %v5814_v46 = vpop.f32.mrf.mxu2 }
 0x4e6   : > { %v5898_v42 = vpop.f32.mrf.mxu3  ;;  %v5815_v50 = vadd.f32 %v5814_v46, %v5725_v44  ;;  %v12683_v6 = vpop.f32.mrf.mxu0  ;;  %v9169_v46 = vld [vmem:[#allocation4 + $0x6c] sm:$0xf0] }
 0x4e7   : > { %v12673_v4 = vadd.f32 %v5898_v42, %v5810_v21  ;;  %6351 = vmatmul.bf16.gmra.mxu1 %v9144_v19  ;;  %v9160_v21 = vor.u32 %v9943_v11, %v9157_v41  ;;  %v9945_v42 = vld [vmem:[#allocation4 + $0x58] sm:$0xf0] }
 0x4ec   : > { %v5727_v63 = vpop.f32.mrf.mxu1 }
 0x4ed   : > { %v5816_v43 = vpop.f32.mrf.mxu2 }
 0x4ee   : > { %v5900_v60 = vpop.f32.mrf.mxu3  ;;  %7187 = vmatmul.bf16.gmra.mxu0 %v9564_v12  ;;  %v5817_v62 = vadd.f32 %v5816_v43, %v5727_v63  ;;  %v9172_v63 = vor.u32 %v9946_v47, %v9169_v46  ;;  %v9167_v12 = vld [vmem:[#allocation4 + $0x60] sm:$0xf]  ;;  %v9947_v43 = vld [vmem:[#allocation4 + $0x68] sm:$0xf0]  ;;  %v9950_v46 = vld [vmem:[#allocation4 + $0x80] sm:$0xf0] }
 0x4ef   : > { %v12677_v14 = vadd.f32 %v5900_v60, %v5812_v31  ;;  %v9575_v31 = vld [vmem:[#allocation4 + $0x180] sm:$0xf]  ;;  %v9168_v41 = vor.u32 %v9947_v43, %v9167_v12 }
 0x4f0   : > { %v9576_v7 = vor.u32 %v10121_v49, %v9575_v31  ;;  %v9949_v49 = vld [vmem:[#allocation4 + $0x7c] sm:$0xf] }
 0x4f2   : > { %6445 = vmatmul.bf16.gmra.mxu2 %v9160_v21  ;;  %6529 = vmatmul.bf16.gmra.mxu3 %v9152_v39 }
 0x4f4   : > { %v5730_v58 = vpop.f32.mrf.mxu1 }
 0x4f5   : > { %v5819_v35 = vpop.f32.mrf.mxu2 }
 0x4f6   : > { %v5903_v22 = vpop.f32.mrf.mxu3  ;;  %v5820_v15 = vadd.f32 %v5819_v35, %v5730_v58  ;;  %v9948_v35 = vld [vmem:[#allocation4 + $0x70] sm:$0xf0] }
 0x4f7   : > { %v12681_v3 = vadd.f32 %v5903_v22, %v5815_v50  ;;  %6356 = vmatmul.bf16.gmra.mxu1 %v9156_v13  ;;  %v9164_v50 = vor.u32 %v9945_v42, %v9163_v48  ;;  %v9181_v13 = vld [vmem:[#allocation4 + $0x84] sm:$0xf0] }
 0x4fc   : > { %v5732_v30 = vpop.f32.mrf.mxu1 }
 0x4fd   : > { %v5821_v44 = vpop.f32.mrf.mxu2 }
 0x4fe   : > { %v5905_v19 = vpop.f32.mrf.mxu3  ;;  %7192 = vmatmul.bf16.gmra.mxu0 %v9576_v7  ;;  %v5822_v23 = vadd.f32 %v5821_v44, %v5732_v30  ;;  %v9175_v30 = vld [vmem:[#allocation4 + $0x68] sm:$0xf]  ;;  %v9184_v7 = vor.u32 %v9949_v49, %v9181_v13  ;;  %v9953_v13 = vld [vmem:[#allocation4 + $0x98] sm:$0xf0] }
 0x4ff   : > { %v12685_v38 = vadd.f32 %v5905_v19, %v5817_v62  ;;  %v9176_v44 = vor.u32 %v9948_v35, %v9175_v30  ;;  %v9179_v19 = vld [vmem:[#allocation4 + $0x78] sm:$0xf] }
 0x500   : > { %v9180_v42 = vor.u32 %v9950_v46, %v9179_v19  ;;  %v10137_v46 = vld [vmem:[#allocation9 + $0x1d8] sm:$0xff] }
 0x501   : > { %7207 = vmatpush.bf16.msra.mxu1 %v10137_v46  ;;  %v9957_v46 = vld [vmem:[#allocation4 + $0xb8] sm:$0xf0] }
 0x502   : > { %6450 = vmatmul.bf16.gmra.mxu2 %v9172_v63  ;;  %6534 = vmatmul.bf16.gmra.mxu3 %v9164_v50 }
 0x504   : > { %v5735_v60 = vpop.f32.mrf.mxu1 }
 0x505   : > { %v5824_v1 = vpop.f32.mrf.mxu2 }
 0x506   : > { %v5908_v11 = vpop.f32.mrf.mxu3  ;;  %v5825_v21 = vadd.f32 %v5824_v1, %v5735_v60  ;;  %v9193_v60 = vld [vmem:[#allocation4 + $0x9c] sm:$0xf0] }
 0x507   : > { %v12687_v39 = vadd.f32 %v5908_v11, %v5820_v15  ;;  %6361 = vmatmul.bf16.gmra.mxu1 %v9168_v41  ;;  %v9951_v41 = vld [vmem:[#allocation4 + $0x88] sm:$0xf0] }
 0x50c   : > { %v5737_v62 = vpop.f32.mrf.mxu1 }
 0x50d   : > { %v5826_v2 = vpop.f32.mrf.mxu2 }
 0x50e   : > { %v5910_v58 = vpop.f32.mrf.mxu3  ;;  %v5827_v22 = vadd.f32 %v5826_v2, %v5737_v62  ;;  %v9196_v62 = vor.u32 %v9952_v54, %v9193_v60  ;;  %v9188_v2 = vor.u32 %v9951_v41, %v9187_v10  ;;  %v9199_v60 = vld [vmem:[#allocation4 + $0x98] sm:$0xf]  ;;  %v9203_v10 = vld [vmem:[#allocation4 + $0xa8] sm:$0xf] }
 0x50f   : > { %v12689_v31 = vadd.f32 %v5910_v58, %v5822_v23  ;;  %v9191_v58 = vld [vmem:[#allocation4 + $0x90] sm:$0xf] }
 0x512   : > { %6455 = vmatmul.bf16.gmra.mxu2 %v9184_v7  ;;  %6539 = vmatmul.bf16.gmra.mxu3 %v9176_v44  ;;  %v10145_v7 = vld [vmem:[#allocation9 + $0x218] sm:$0xff] }
 0x513   : > { %7296 = vmatpush.bf16.msra.mxu2 %v10145_v7  ;;  %v9217_v7 = vld [vmem:[#allocation4 + $0xcc] sm:$0xf0] }
 0x514   : > { %v5740_v15 = vpop.f32.mrf.mxu1 }
 0x515   : > { %v5829_v47 = vpop.f32.mrf.mxu2 }
 0x516   : > { %v5913_v48 = vpop.f32.mrf.mxu3  ;;  %v5830_v63 = vadd.f32 %v5829_v47, %v5740_v15  ;;  %v9205_v47 = vld [vmem:[#allocation4 + $0xb4] sm:$0xf0] }
 0x517   : > { %v12691_v50 = vadd.f32 %v5913_v48, %v5825_v21  ;;  %6366 = vmatmul.bf16.gmra.mxu1 %v9180_v42  ;;  %v9192_v21 = vor.u32 %v9953_v13, %v9191_v58  ;;  %v9954_v48 = vld [vmem:[#allocation4 + $0xa0] sm:$0xf0] }
 0x518   : > { %v9200_v54 = vor.u32 %v9954_v48, %v9199_v60  ;;  %v9215_v60 = vld [vmem:[#allocation4 + $0xc0] sm:$0xf] }
 0x51c   : > { %v5742_v12 = vpop.f32.mrf.mxu1 }
 0x51d   : > { %v5831_v43 = vpop.f32.mrf.mxu2 }
 0x51e   : > { %v5915_v23 = vpop.f32.mrf.mxu3  ;;  %v5832_v1 = vadd.f32 %v5831_v43, %v5742_v12 }
 0x51f   : > { %v12693_v11 = vadd.f32 %v5915_v23, %v5827_v22  ;;  %v9955_v23 = vld [vmem:[#allocation4 + $0xac] sm:$0xf] }
 0x520   : > { %v9208_v41 = vor.u32 %v9955_v23, %v9205_v47  ;;  %v9211_v47 = vld [vmem:[#allocation4 + $0xb0] sm:$0xf] }
 0x521   : > { %v9212_v23 = vor.u32 %v9957_v46, %v9211_v47  ;;  %v9229_v46 = vld [vmem:[#allocation4 + $0xe4] sm:$0xf0] }
 0x522   : > { %6460 = vmatmul.bf16.gmra.mxu2 %v9196_v62  ;;  %6544 = vmatmul.bf16.gmra.mxu3 %v9188_v2  ;;  %v9956_v62 = vld [vmem:[#allocation4 + $0xb0] sm:$0xf0] }
 0x523   : > { %v9204_v2 = vor.u32 %v9956_v62, %v9203_v10 }
 0x524   : > { %v5745_v35 = vpop.f32.mrf.mxu1 }
 0x525   : > { %v5834_v49 = vpop.f32.mrf.mxu2 }
 0x526   : > { %v5918_v30 = vpop.f32.mrf.mxu3  ;;  %v5835_v44 = vadd.f32 %v5834_v49, %v5745_v35 }
 0x527   : > { %v12695_v19 = vadd.f32 %v5918_v30, %v5830_v63  ;;  %6371 = vmatmul.bf16.gmra.mxu1 %v9192_v21 }
 0x52c   : > { %v5747_v22 = vpop.f32.mrf.mxu1 }
 0x52d   : > { %v5836_v15 = vpop.f32.mrf.mxu2 }
 0x52e   : > { %v5920_v42 = vpop.f32.mrf.mxu3  ;;  %v5837_v12 = vadd.f32 %v5836_v15, %v5747_v22 }
 0x52f   : > { %v12697_v43 = vadd.f32 %v5920_v42, %v5832_v1  ;;  %v9958_v42 = vld [vmem:[#allocation4 + $0xc4] sm:$0xf] }
 0x530   : > { %v9220_v48 = vor.u32 %v9958_v42, %v9217_v7  ;;  %v9960_v42 = vld [vmem:[#allocation4 + $0xd0] sm:$0xf0] }
 0x532   : > { %6465 = vmatmul.bf16.gmra.mxu2 %v9208_v41  ;;  %6549 = vmatmul.bf16.gmra.mxu3 %v9200_v54  ;;  %v9959_v41 = vld [vmem:[#allocation4 + $0xc8] sm:$0xf0] }
 0x533   : > { %v9216_v10 = vor.u32 %v9959_v41, %v9215_v60  ;;  %v9227_v41 = vld [vmem:[#allocation4 + $0xd8] sm:$0xf] }
 0x534   : > { %v5750_v63 = vpop.f32.mrf.mxu1 }
 0x535   : > { %v5839_v58 = vpop.f32.mrf.mxu2 }
 0x536   : > { %v5923_v13 = vpop.f32.mrf.mxu3  ;;  %v5840_v35 = vadd.f32 %v5839_v58, %v5750_v63 }
 0x537   : > { %v12699_v21 = vadd.f32 %v5923_v13, %v5835_v44  ;;  %6376 = vmatmul.bf16.gmra.mxu1 %v9204_v2  ;;  %v10144_v2 = vld [vmem:[#allocation9 + $0x210] sm:$0xff] }
 0x538   : > { %v10136_v13 = vld [vmem:[#allocation9 + $0x1d0] sm:$0xff]  ;;  %7297 = vmatpush.bf16.msra.mxu2 %v10144_v2 }
 0x539   : > { %7208 = vmatpush.bf16.msra.mxu1 %v10136_v13 }
 0x53c   : > { %v5752_v49 = vpop.f32.mrf.mxu1 }
 0x53d   : > { %v5841_v30 = vpop.f32.mrf.mxu2 }
 0x53e   : > { %v5925_v1 = vpop.f32.mrf.mxu3  ;;  %v5842_v22 = vadd.f32 %v5841_v30, %v5752_v49 }
 0x53f   : > { %v12701_v15 = vadd.f32 %v5925_v1, %v5837_v12 }
 0x542   : > { %6470 = vmatmul.bf16.gmra.mxu2 %v9220_v48  ;;  %6554 = vmatmul.bf16.gmra.mxu3 %v9212_v23  ;;  %v9961_v48 = vld [vmem:[#allocation4 + $0xdc] sm:$0xf]  ;;  %v9223_v23 = vld [vmem:[#allocation4 + $0xc8] sm:$0xf] }
 0x543   : > { %v9232_v60 = vor.u32 %v9961_v48, %v9229_v46  ;;  %v9963_v46 = vld [vmem:[#allocation4 + $0xe8] sm:$0xf0] }
 0x544   : > { %v6342_v54 = vpop.f32.mrf.mxu1 }
 0x545   : > { %v6343_v44 = vadd.f32 %v6342_v54, %v12427_v5  ;;  %v6431_v62 = vpop.f32.mrf.mxu2  ;;  %v9962_v54 = vld [vmem:[#allocation4 + $0xe0] sm:$0xf0] }
 0x546   : > { %v5928_v63 = vpop.f32.mrf.mxu3 }
 0x547   : > { %v12704_v58 = vadd.f32 %v5928_v63, %v5840_v35  ;;  %6381 = vmatmul.bf16.gmra.mxu1 %v9216_v10  ;;  %v6432_v12 = vadd.f32 %v6431_v62, %v6343_v44  ;;  %v9224_v35 = vor.u32 %v9960_v42, %v9223_v23  ;;  %v9228_v62 = vor.u32 %v9962_v54, %v9227_v41  ;;  %v9964_v23 = vld [vmem:[#allocation4 + $0xf4] sm:$0xf]  ;;  %v9239_v41 = vld [vmem:[#allocation4 + $0xf0] sm:$0xf]  ;;  %v9965_v54 = vld [vmem:[#allocation4 + $0xf8] sm:$0xf0] }
 0x54c   : > { %v6344_v49 = vpop.f32.mrf.mxu1 }
 0x54d   : > { %v6345_v30 = vadd.f32 %v6344_v49, %v12448_v52  ;;  %v6433_v1 = vpop.f32.mrf.mxu2 }
 0x54e   : > { %v5930_v7 = vpop.f32.mrf.mxu3 }
 0x54f   : > { %v12707_v47 = vadd.f32 %v5930_v7, %v5842_v22  ;;  %v6434_v5 = vadd.f32 %v6433_v1, %v6345_v30  ;;  %v9241_v7 = vld [vmem:[#allocation4 + $0xfc] sm:$0xf0] }
 0x552   : > { %6475 = vmatmul.bf16.gmra.mxu2 %v9232_v60  ;;  %6559 = vmatmul.bf16.gmra.mxu3 %v9224_v35  ;;  %v9235_v60 = vld [vmem:[#allocation4 + $0xe0] sm:$0xf] }
 0x553   : > { %v9236_v35 = vor.u32 %v9963_v46, %v9235_v60  ;;  %v9253_v46 = vld [vmem:[#allocation4 + $0x114] sm:$0xf0] }
 0x554   : > { %v6347_v44 = vpop.f32.mrf.mxu1 }
 0x555   : > { %v6348_v10 = vadd.f32 %v6347_v44, %v12474_v16  ;;  %v6436_v52 = vpop.f32.mrf.mxu2  ;;  %v9244_v16 = vor.u32 %v9964_v23, %v9241_v7  ;;  %v9966_v23 = vld [vmem:[#allocation4 + $0x100] sm:$0xf0] }
 0x556   : > { %v6520_v63 = vpop.f32.mrf.mxu3 }
 0x557   : > { %v12710_v2 = vadd.f32 %v6520_v63, %v6432_v12  ;;  %6386 = vmatmul.bf16.gmra.mxu1 %v9228_v62  ;;  %v6437_v22 = vadd.f32 %v6436_v52, %v6348_v10  ;;  %v9240_v10 = vor.u32 %v9965_v54, %v9239_v41  ;;  %v10143_v52 = vld [vmem:[#allocation9 + $0x208] sm:$0xff]  ;;  %v9251_v54 = vld [vmem:[#allocation4 + $0x108] sm:$0xf] }
 0x558   : > { %7298 = vmatpush.bf16.msra.mxu2 %v10143_v52 }
 0x55c   : > { %v6349_v13 = vpop.f32.mrf.mxu1 }
 0x55d   : > { %v6350_v49 = vadd.f32 %v6349_v13, %v12497_v59  ;;  %v6438_v30 = vpop.f32.mrf.mxu2  ;;  %v10135_v13 = vld [vmem:[#allocation9 + $0x1c8] sm:$0xff] }
 0x55e   : > { %v6522_v1 = vpop.f32.mrf.mxu3  ;;  %7209 = vmatpush.bf16.msra.mxu1 %v10135_v13 }
 0x55f   : > { %v12713_v42 = vadd.f32 %v6522_v1, %v6434_v5  ;;  %v6439_v48 = vadd.f32 %v6438_v30, %v6350_v49 }
 0x562   : > { %6480 = vmatmul.bf16.gmra.mxu2 %v9244_v16  ;;  %6564 = vmatmul.bf16.gmra.mxu3 %v9236_v35  ;;  %v9967_v16 = vld [vmem:[#allocation4 + $0x10c] sm:$0xf]  ;;  %v9247_v35 = vld [vmem:[#allocation4 + $0xf8] sm:$0xf] }
 0x563   : > { %v9256_v41 = vor.u32 %v9967_v16, %v9253_v46  ;;  %v9969_v46 = vld [vmem:[#allocation4 + $0x118] sm:$0xf0] }
 0x564   : > { %v6352_v12 = vpop.f32.mrf.mxu1 }
 0x565   : > { %v6353_v44 = vadd.f32 %v6352_v12, %v12521_v27  ;;  %v6441_v59 = vpop.f32.mrf.mxu2  ;;  %v9968_v12 = vld [vmem:[#allocation4 + $0x110] sm:$0xf0] }
 0x566   : > { %v6525_v62 = vpop.f32.mrf.mxu3 }
 0x567   : > { %v12716_v63 = vadd.f32 %v6525_v62, %v6437_v22  ;;  %6391 = vmatmul.bf16.gmra.mxu1 %v9240_v10  ;;  %v6442_v5 = vadd.f32 %v6441_v59, %v6353_v44  ;;  %v9248_v22 = vor.u32 %v9966_v23, %v9247_v35  ;;  %v9252_v59 = vor.u32 %v9968_v12, %v9251_v54  ;;  %v9970_v35 = vld [vmem:[#allocation4 + $0x124] sm:$0xf]  ;;  %v9263_v54 = vld [vmem:[#allocation4 + $0x120] sm:$0xf]  ;;  %v9971_v12 = vld [vmem:[#allocation4 + $0x128] sm:$0xf0] }
 0x56c   : > { %v6354_v49 = vpop.f32.mrf.mxu1 }
 0x56d   : > { %v6355_v30 = vadd.f32 %v6354_v49, %v12540_v0  ;;  %v6443_v1 = vpop.f32.mrf.mxu2 }
 0x56e   : > { %v6527_v7 = vpop.f32.mrf.mxu3 }
 0x56f   : > { %v12719_v60 = vadd.f32 %v6527_v7, %v6439_v48  ;;  %v6444_v27 = vadd.f32 %v6443_v1, %v6355_v30  ;;  %v9265_v7 = vld [vmem:[#allocation4 + $0x12c] sm:$0xf0] }
 0x572   : > { %6485 = vmatmul.bf16.gmra.mxu2 %v9256_v41  ;;  %6569 = vmatmul.bf16.gmra.mxu3 %v9248_v22  ;;  %v9259_v41 = vld [vmem:[#allocation4 + $0x110] sm:$0xf] }
 0x573   : > { %v9260_v22 = vor.u32 %v9969_v46, %v9259_v41  ;;  %v9277_v46 = vld [vmem:[#allocation4 + $0x144] sm:$0xf0] }
 0x574   : > { %v6357_v44 = vpop.f32.mrf.mxu1 }
 0x575   : > { %v6358_v10 = vadd.f32 %v6357_v44, %v12559_v37  ;;  %v6446_v0 = vpop.f32.mrf.mxu2  ;;  %v9268_v37 = vor.u32 %v9970_v35, %v9265_v7  ;;  %v9972_v35 = vld [vmem:[#allocation4 + $0x130] sm:$0xf0] }
 0x576   : > { %v6530_v62 = vpop.f32.mrf.mxu3 }
 0x577   : > { %v12722_v52 = vadd.f32 %v6530_v62, %v6442_v5  ;;  %6396 = vmatmul.bf16.gmra.mxu1 %v9252_v59  ;;  %v6447_v48 = vadd.f32 %v6446_v0, %v6358_v10  ;;  %v9264_v10 = vor.u32 %v9971_v12, %v9263_v54  ;;  %v10142_v0 = vld [vmem:[#allocation9 + $0x200] sm:$0xff]  ;;  %v9275_v12 = vld [vmem:[#allocation4 + $0x138] sm:$0xf] }
 0x578   : > { %7299 = vmatpush.bf16.msra.mxu2 %v10142_v0 }
 0x57c   : > { %v6359_v13 = vpop.f32.mrf.mxu1 }
 0x57d   : > { %v6360_v49 = vadd.f32 %v6359_v13, %v12579_v24  ;;  %v6448_v30 = vpop.f32.mrf.mxu2  ;;  %v10134_v13 = vld [vmem:[#allocation9 + $0x1c0] sm:$0xff] }
 0x57e   : > { %v6532_v1 = vpop.f32.mrf.mxu3  ;;  %7210 = vmatpush.bf16.msra.mxu1 %v10134_v13 }
 0x57f   : > { %v12725_v23 = vadd.f32 %v6532_v1, %v6444_v27  ;;  %v6449_v16 = vadd.f32 %v6448_v30, %v6360_v49 }
 0x582   : > { %6490 = vmatmul.bf16.gmra.mxu2 %v9268_v37  ;;  %6574 = vmatmul.bf16.gmra.mxu3 %v9260_v22  ;;  %v9973_v37 = vld [vmem:[#allocation4 + $0x13c] sm:$0xf] }
 0x583   : > { %v9280_v22 = vor.u32 %v9973_v37, %v9277_v46  ;;  %v9283_v46 = vld [vmem:[#allocation4 + $0x140] sm:$0xf] }
 0x584   : > { %v6362_v5 = vpop.f32.mrf.mxu1 }
 0x585   : > { %v6363_v44 = vadd.f32 %v6362_v5, %v12591_v26  ;;  %v6451_v24 = vpop.f32.mrf.mxu2  ;;  %v9974_v5 = vld [vmem:[#allocation4 + $0x140] sm:$0xf0] }
 0x586   : > { %v6535_v59 = vpop.f32.mrf.mxu3 }
 0x587   : > { %v12728_v62 = vadd.f32 %v6535_v59, %v6447_v48  ;;  %6401 = vmatmul.bf16.gmra.mxu1 %v9264_v10  ;;  %v12730_v27 = vadd.f32 %v6451_v24, %v6363_v44  ;;  %v9271_v48 = vld [vmem:[#allocation4 + $0x128] sm:$0xf] }
 0x588   : > { %v9272_v54 = vor.u32 %v9972_v35, %v9271_v48  ;;  %v9287_v48 = vld [vmem:[#allocation4 + $0x150] sm:$0xf] }
 0x58c   : > { %v6364_v49 = vpop.f32.mrf.mxu1 }
 0x58d   : > { %v6365_v30 = vadd.f32 %v6364_v49, %v12612_v32  ;;  %v6453_v1 = vpop.f32.mrf.mxu2  ;;  %v9276_v32 = vor.u32 %v9974_v5, %v9275_v12  ;;  %v9289_v49 = vld [vmem:[#allocation4 + $0x15c] sm:$0xf0] }
 0x58e   : > { %v6537_v7 = vpop.f32.mrf.mxu3 }
 0x58f   : > { %v12733_v26 = vadd.f32 %v6537_v7, %v6449_v16  ;;  %v12735_v41 = vadd.f32 %v6453_v1, %v6365_v30  ;;  %v9975_v30 = vld [vmem:[#allocation4 + $0x148] sm:$0xf0]  ;;  %v9976_v7 = vld [vmem:[#allocation4 + $0x154] sm:$0xf] }
 0x590   : > { %v9292_v35 = vor.u32 %v9976_v7, %v9289_v49  ;;  %v9284_v37 = vor.u32 %v9975_v30, %v9283_v46  ;;  %v9295_v49 = vld [vmem:[#allocation4 + $0x158] sm:$0xf]  ;;  %v9299_v46 = vld [vmem:[#allocation4 + $0x168] sm:$0xf] }
 0x592   : > { %6495 = vmatmul.bf16.gmra.mxu2 %v9280_v22  ;;  %6579 = vmatmul.bf16.gmra.mxu3 %v9272_v54  ;;  %v9977_v22 = vld [vmem:[#allocation4 + $0x158] sm:$0xf0] }
 0x593   : > { %v9288_v12 = vor.u32 %v9977_v22, %v9287_v48 }
 0x594   : > { %v6367_v44 = vpop.f32.mrf.mxu1 }
 0x595   : > { %v6368_v10 = vadd.f32 %v6367_v44, %v12627_v36  ;;  %v6456_v24 = vpop.f32.mrf.mxu2 }
 0x597   : > { %6406 = vmatmul.bf16.gmra.mxu1 %v9276_v32  ;;  %v12738_v59 = vadd.f32 %v6456_v24, %v6368_v10  ;;  %v9301_v24 = vld [vmem:[#allocation4 + $0x174] sm:$0xf0] }
 0x59c   : > { %v6369_v16 = vpop.f32.mrf.mxu1 }
 0x59d   : > { %v6370_v0 = vadd.f32 %v6369_v16, %v12648_v9  ;;  %v6458_v13 = vpop.f32.mrf.mxu2  ;;  %v9978_v16 = vld [vmem:[#allocation4 + $0x160] sm:$0xf0] }
 0x59e   : > { %v9296_v7 = vor.u32 %v9978_v16, %v9295_v49  ;;  %v9409_v49 = vld [vmem:[#allocation4 + $0x3c] sm:$0xf0] }
 0x59f   : > { %v12741_v1 = vadd.f32 %v6458_v13, %v6370_v0  ;;  %v9979_v13 = vld [vmem:[#allocation4 + $0x16c] sm:$0xf] }
 0x5a0   : > { %v9304_v30 = vor.u32 %v9979_v13, %v9301_v24  ;;  %v9307_v24 = vld [vmem:[#allocation4 + $0x170] sm:$0xf] }
 0x5a2   : > { %6500 = vmatmul.bf16.gmra.mxu2 %v9292_v35  ;;  %6584 = vmatmul.bf16.gmra.mxu3 %v9284_v37  ;;  %v9980_v35 = vld [vmem:[#allocation4 + $0x170] sm:$0xf0] }
 0x5a3   : > { %v9300_v48 = vor.u32 %v9980_v35, %v9299_v46 }
 0x5a4   : > { %v6372_v36 = vpop.f32.mrf.mxu1 }
 0x5a5   : > { %v6373_v54 = vadd.f32 %v6372_v36, %v12653_v17  ;;  %v6461_v5 = vpop.f32.mrf.mxu2 }
 0x5a7   : > { %6411 = vmatmul.bf16.gmra.mxu1 %v9288_v12  ;;  %v12744_v9 = vadd.f32 %v6461_v5, %v6373_v54  ;;  %v10080_v5 = vld [vmem:[#allocation4 + $0x40] sm:$0xf0] }
 0x5ac   : > { %v6374_v44 = vpop.f32.mrf.mxu1 }
 0x5ad   : > { %v6375_v10 = vadd.f32 %v6374_v44, %v12657_v55  ;;  %v6463_v32 = vpop.f32.mrf.mxu2  ;;  %v9981_v44 = vld [vmem:[#allocation4 + $0x178] sm:$0xf0] }
 0x5ae   : > { %v9308_v13 = vor.u32 %v9981_v44, %v9307_v24 }
 0x5af   : > { %v12747_v0 = vadd.f32 %v6463_v32, %v6375_v10  ;;  %v9415_v32 = vld [vmem:[#allocation4 + $0x38] sm:$0xf] }
 0x5b0   : > { %v9416_v16 = vor.u32 %v10080_v5, %v9415_v32  ;;  %v9421_v5 = vld [vmem:[#allocation4 + $0x54] sm:$0xf0]  ;;  %v10081_v32 = vld [vmem:[#allocation4 + $0x4c] sm:$0xf] }
 0x5b1   : > { %v9424_v24 = vor.u32 %v10081_v32, %v9421_v5  ;;  %v10089_v32 = vld [vmem:[#allocation4 + $0x88] sm:$0xf0] }
 0x5b2   : > { %6505 = vmatmul.bf16.gmra.mxu2 %v9304_v30  ;;  %6589 = vmatmul.bf16.gmra.mxu3 %v9296_v7  ;;  %v10078_v30 = vld [vmem:[#allocation4 + $0x34] sm:$0xf] }
 0x5b3   : > { %v9412_v46 = vor.u32 %v10078_v30, %v9409_v49  ;;  %v10086_v30 = vld [vmem:[#allocation4 + $0x70] sm:$0xf0] }
 0x5b4   : > { %v6377_v17 = vpop.f32.mrf.mxu1 }
 0x5b5   : > { %v6378_v37 = vadd.f32 %v6377_v17, %v12659_v20  ;;  %v6466_v22 = vpop.f32.mrf.mxu2 }
 0x5b7   : > { %6416 = vmatmul.bf16.gmra.mxu1 %v9300_v48  ;;  %v12750_v55 = vadd.f32 %v6466_v22, %v6378_v37  ;;  %v10083_v22 = vld [vmem:[#allocation4 + $0x58] sm:$0xf0] }
 0x5bc   : > { %v6379_v36 = vpop.f32.mrf.mxu1 }
 0x5bd   : > { %v6380_v54 = vadd.f32 %v6379_v36, %v12663_v25  ;;  %v6468_v12 = vpop.f32.mrf.mxu2 }
 0x5bf   : > { %v12753_v10 = vadd.f32 %v6468_v12, %v6380_v54  ;;  %v9427_v54 = vld [vmem:[#allocation4 + $0x50] sm:$0xf] }
 0x5c0   : > { %v9428_v12 = vor.u32 %v10083_v22, %v9427_v54 }
 0x5c2   : > { %7300 = vmatmul.bf16.vlgmr.msra.gmra.mxu2 %v9416_v16  ;;  %6594 = vmatmul.bf16.gmra.mxu3 %v9308_v13 }
 0x5c4   : > { %v6382_v20 = vpop.f32.mrf.mxu1 }
 0x5c5   : > { %v6383_v7 = vadd.f32 %v6382_v20, %v12667_v33  ;;  %v6471_v35 = vpop.f32.mrf.mxu2 }
 0x5c7   : > { %7211 = vmatmul.bf16.vlgmr.msra.gmra.mxu1 %v9412_v46  ;;  %v12756_v25 = vadd.f32 %v6471_v35, %v6383_v7  ;;  %v9439_v46 = vld [vmem:[#allocation4 + $0x68] sm:$0xf] }
 0x5c8   : > { %v9440_v35 = vor.u32 %v10086_v30, %v9439_v46 }
 0x5cc   : > { %v6384_v17 = vpop.f32.mrf.mxu1 }
 0x5cd   : > { %v6385_v37 = vadd.f32 %v6384_v17, %v12671_v45  ;;  %v6473_v48 = vpop.f32.mrf.mxu2  ;;  %v9433_v17 = vld [vmem:[#allocation4 + $0x6c] sm:$0xf0] }
 0x5cf   : > { %v12759_v36 = vadd.f32 %v6473_v48, %v6385_v37  ;;  %v10084_v48 = vld [vmem:[#allocation4 + $0x64] sm:$0xf] }
 0x5d0   : > { %v9436_v22 = vor.u32 %v10084_v48, %v9433_v17  ;;  %v10092_v48 = vld [vmem:[#allocation4 + $0xa0] sm:$0xf0] }
 0x5d2   : > { %7305 = vmatmul.bf16.gmra.mxu2 %v9428_v12 }
 0x5d4   : > { %v6387_v44 = vpop.f32.mrf.mxu1 }
 0x5d5   : > { %v6388_v33 = vadd.f32 %v6387_v44, %v12673_v4  ;;  %v6476_v16 = vpop.f32.mrf.mxu2 }
 0x5d7   : > { %7216 = vmatmul.bf16.gmra.mxu1 %v9424_v24  ;;  %v12762_v13 = vadd.f32 %v6476_v16, %v6388_v33  ;;  %v9451_v24 = vld [vmem:[#allocation4 + $0x80] sm:$0xf] }
 0x5d8   : > { %v9452_v16 = vor.u32 %v10089_v32, %v9451_v24 }
 0x5dc   : > { %v6389_v49 = vpop.f32.mrf.mxu1 }
 0x5dd   : > { %v6390_v45 = vadd.f32 %v6389_v49, %v12677_v14  ;;  %v6478_v20 = vpop.f32.mrf.mxu2  ;;  %v9445_v49 = vld [vmem:[#allocation4 + $0x84] sm:$0xf0] }
 0x5df   : > { %v12765_v7 = vadd.f32 %v6478_v20, %v6390_v45  ;;  %v10087_v20 = vld [vmem:[#allocation4 + $0x7c] sm:$0xf] }
 0x5e0   : > { %v9448_v30 = vor.u32 %v10087_v20, %v9445_v49  ;;  %v10095_v20 = vld [vmem:[#allocation4 + $0xb8] sm:$0xf0] }
 0x5e2   : > { %7310 = vmatmul.bf16.gmra.mxu2 %v9440_v35 }
 0x5e4   : > { %v6392_v37 = vpop.f32.mrf.mxu1 }
 0x5e5   : > { %v6393_v4 = vadd.f32 %v6392_v37, %v12681_v3  ;;  %v6481_v54 = vpop.f32.mrf.mxu2 }
 0x5e7   : > { %7221 = vmatmul.bf16.gmra.mxu1 %v9436_v22  ;;  %v12768_v12 = vadd.f32 %v6481_v54, %v6393_v4  ;;  %v9463_v22 = vld [vmem:[#allocation4 + $0x98] sm:$0xf] }
 0x5e8   : > { %v9464_v54 = vor.u32 %v10092_v48, %v9463_v22 }
 0x5ec   : > { %v6394_v5 = vpop.f32.mrf.mxu1 }
 0x5ed   : > { %v6395_v14 = vadd.f32 %v6394_v5, %v12685_v38  ;;  %v6483_v44 = vpop.f32.mrf.mxu2  ;;  %v9457_v5 = vld [vmem:[#allocation4 + $0x9c] sm:$0xf0] }
 0x5ef   : > { %v12771_v33 = vadd.f32 %v6483_v44, %v6395_v14  ;;  %v10090_v44 = vld [vmem:[#allocation4 + $0x94] sm:$0xf] }
 0x5f0   : > { %v9460_v32 = vor.u32 %v10090_v44, %v9457_v5  ;;  %v10098_v44 = vld [vmem:[#allocation4 + $0xd0] sm:$0xf0] }
 0x5f2   : > { %7315 = vmatmul.bf16.gmra.mxu2 %v9452_v16 }
 0x5f4   : > { %v6397_v45 = vpop.f32.mrf.mxu1 }
 0x5f5   : > { %v6398_v3 = vadd.f32 %v6397_v45, %v12687_v39  ;;  %v6486_v46 = vpop.f32.mrf.mxu2 }
 0x5f7   : > { %7226 = vmatmul.bf16.gmra.mxu1 %v9448_v30  ;;  %v12774_v35 = vadd.f32 %v6486_v46, %v6398_v3  ;;  %v9475_v30 = vld [vmem:[#allocation4 + $0xb0] sm:$0xf] }
 0x5f8   : > { %v9476_v46 = vor.u32 %v10095_v20, %v9475_v30 }
 0x5fc   : > { %v6399_v17 = vpop.f32.mrf.mxu1 }
 0x5fd   : > { %v6400_v38 = vadd.f32 %v6399_v17, %v12689_v31  ;;  %v6488_v37 = vpop.f32.mrf.mxu2  ;;  %v9469_v17 = vld [vmem:[#allocation4 + $0xb4] sm:$0xf0] }
 0x5ff   : > { %v12777_v4 = vadd.f32 %v6488_v37, %v6400_v38  ;;  %v10093_v37 = vld [vmem:[#allocation4 + $0xac] sm:$0xf] }
 0x600   : > { %v9472_v48 = vor.u32 %v10093_v37, %v9469_v17  ;;  %v10101_v37 = vld [vmem:[#allocation4 + $0xe8] sm:$0xf0] }
 0x602   : > { %7320 = vmatmul.bf16.gmra.mxu2 %v9464_v54 }
 0x604   : > { %v6402_v14 = vpop.f32.mrf.mxu1 }
 0x605   : > { %v6403_v39 = vadd.f32 %v6402_v14, %v12691_v50  ;;  %v6491_v24 = vpop.f32.mrf.mxu2 }
 0x607   : > { %7231 = vmatmul.bf16.gmra.mxu1 %v9460_v32  ;;  %v12780_v16 = vadd.f32 %v6491_v24, %v6403_v39  ;;  %v9487_v32 = vld [vmem:[#allocation4 + $0xc8] sm:$0xf] }
 0x608   : > { %v9488_v24 = vor.u32 %v10098_v44, %v9487_v32 }
 0x60c   : > { %v6404_v49 = vpop.f32.mrf.mxu1 }
 0x60d   : > { %v6405_v31 = vadd.f32 %v6404_v49, %v12693_v11  ;;  %v6493_v45 = vpop.f32.mrf.mxu2  ;;  %v9481_v49 = vld [vmem:[#allocation4 + $0xcc] sm:$0xf0] }
 0x60f   : > { %v12783_v3 = vadd.f32 %v6493_v45, %v6405_v31  ;;  %v10096_v45 = vld [vmem:[#allocation4 + $0xc4] sm:$0xf] }
 0x610   : > { %v9484_v20 = vor.u32 %v10096_v45, %v9481_v49  ;;  %v10104_v45 = vld [vmem:[#allocation4 + $0x100] sm:$0xf0] }
 0x612   : > { %7325 = vmatmul.bf16.gmra.mxu2 %v9476_v46 }
 0x614   : > { %v6407_v38 = vpop.f32.mrf.mxu1 }
 0x615   : > { %v6408_v50 = vadd.f32 %v6407_v38, %v12695_v19  ;;  %v6496_v22 = vpop.f32.mrf.mxu2 }
 0x617   : > { %7236 = vmatmul.bf16.gmra.mxu1 %v9472_v48  ;;  %v12786_v54 = vadd.f32 %v6496_v22, %v6408_v50  ;;  %v9499_v48 = vld [vmem:[#allocation4 + $0xe0] sm:$0xf] }
 0x618   : > { %v9500_v22 = vor.u32 %v10101_v37, %v9499_v48 }
 0x61c   : > { %v6409_v5 = vpop.f32.mrf.mxu1 }
 0x61d   : > { %v6410_v11 = vadd.f32 %v6409_v5, %v12697_v43  ;;  %v6498_v14 = vpop.f32.mrf.mxu2  ;;  %v9493_v5 = vld [vmem:[#allocation4 + $0xe4] sm:$0xf0] }
 0x61f   : > { %v12789_v39 = vadd.f32 %v6498_v14, %v6410_v11  ;;  %v10099_v14 = vld [vmem:[#allocation4 + $0xdc] sm:$0xf] }
 0x620   : > { %v9496_v44 = vor.u32 %v10099_v14, %v9493_v5 }
 0x622   : > { %7330 = vmatmul.bf16.gmra.mxu2 %v9488_v24 }
 0x624   : > { %v6412_v31 = vpop.f32.mrf.mxu1 }
 0x625   : > { %v6413_v19 = vadd.f32 %v6412_v31, %v12699_v21  ;;  %v6501_v30 = vpop.f32.mrf.mxu2 }
 0x627   : > { %7241 = vmatmul.bf16.gmra.mxu1 %v9484_v20  ;;  %v12792_v46 = vadd.f32 %v6501_v30, %v6413_v19  ;;  %v9511_v19 = vld [vmem:[#allocation4 + $0xf8] sm:$0xf]  ;;  %v9505_v30 = vld [vmem:[#allocation4 + $0xfc] sm:$0xf0] }
 0x628   : > { %v9512_v20 = vor.u32 %v10104_v45, %v9511_v19  ;;  %v9523_v19 = vld [vmem:[#allocation4 + $0x110] sm:$0xf] }
 0x62c   : > { %v6414_v17 = vpop.f32.mrf.mxu1 }
 0x62d   : > { %v6415_v43 = vadd.f32 %v6414_v17, %v12701_v15  ;;  %v6503_v38 = vpop.f32.mrf.mxu2 }
 0x62f   : > { %v12795_v50 = vadd.f32 %v6503_v38, %v6415_v43  ;;  %v10102_v43 = vld [vmem:[#allocation4 + $0xf4] sm:$0xf]  ;;  %v12801_v38 = vpop.f32.mrf.mxu0 }
 0x630   : > { %v9508_v37 = vor.u32 %v10102_v43, %v9505_v30 }
 0x632   : > { %7335 = vmatmul.bf16.gmra.mxu2 %v9500_v22 }
 0x634   : > { %v6417_v11 = vpop.f32.mrf.mxu1 }
 0x635   : > { %v6418_v21 = vadd.f32 %v6417_v11, %v12704_v58  ;;  %v6506_v32 = vpop.f32.mrf.mxu2 }
 0x637   : > { %7246 = vmatmul.bf16.gmra.mxu1 %v9496_v44  ;;  %v12798_v24 = vadd.f32 %v6506_v32, %v6418_v21 }
 0x63c   : > { %v6419_v49 = vpop.f32.mrf.mxu1 }
 0x63d   : > { %v6420_v15 = vadd.f32 %v6419_v49, %v12707_v47  ;;  %v6508_v31 = vpop.f32.mrf.mxu2  ;;  %v12809_v47 = vld [vmem:[%s13088_s4] ss:$0 sm:$0xff]  ;;  %v10107_v49 = vld [vmem:[#allocation4 + $0x118] sm:$0xf0] }
 0x63e   : > { %v9524_v30 = vor.u32 %v10107_v49, %v9523_v19  ;;  %v12822_v49 = vpop.f32.mrf.mxu3 }
 0x63f   : > { %v12804_v48 = vadd.f32 %v6508_v31, %v6420_v15  ;;  %v12814_v15 = vpop.f32.mrf.mxu0 }
 0x641   : > { %13337 = vst [vmem:[#allocation56_spill] sm:$0xff] %v12804_v48  ;;  %v10111_v48 = vld [vmem:[#allocation4 + $0x13c] sm:$0xf] }
 0x642   : > { %7340 = vmatmul.bf16.gmra.mxu2 %v9512_v20 }
 0x644   : > { %v7212_v17 = vpop.f32.mrf.mxu1 }
 0x645   : > { %v7213_v58 = vadd.f32 %v7212_v17, %v12661_v53  ;;  %v7301_v22 = vpop.f32.mrf.mxu2  ;;  %v9517_v17 = vld [vmem:[#allocation4 + $0x114] sm:$0xf0] }
 0x647   : > { %v7302_v5 = vadd.f32 %v7301_v22, %v7213_v58  ;;  %7251 = vmatmul.bf16.gmra.mxu1 %v9508_v37  ;;  %v10105_v58 = vld [vmem:[#allocation4 + $0x10c] sm:$0xf] }
 0x648   : > { %v9520_v22 = vor.u32 %v10105_v58, %v9517_v17  ;;  %v10110_v17 = vld [vmem:[#allocation4 + $0x130] sm:$0xf0] }
 0x649   : > { %v7381_v11 = vadd.f32 %v7302_v5, %v12710_v2 }
 0x64b   : > { %v7417_v14 = vadd.f32 %v12809_v47, %v7381_v11 }
 0x64c   : > { %v7214_v21 = vpop.f32.mrf.mxu1 }
 0x64d   : > { %v7449_v44 = vsub.f32 0.0, %v7417_v14  ;;  %v7215_v32 = vadd.f32 %v7214_v21, %v12665_v8  ;;  %v7303_v53 = vpop.f32.mrf.mxu2 }
 0x64f   : > { %v7481_v31 = vmul.f32 1.442695, %v7449_v44  ;;  %v7304_v45 = vadd.f32 %v7303_v53, %v7215_v32  ;;  %v12819_v53 = vpop.f32.mrf.mxu0 }
 0x651   : > { %10459 = vpow2.f32 %v7481_v31  ;;  %v7382_v20 = vadd.f32 %v7304_v45, %v12713_v42  ;;  %v10152_v45 = vld [vmem:[#allocation2 + $0x10] sm:$0xff]  }
 0x652   : > { %7345 = vmatmul.bf16.gmra.mxu2 %v9524_v30  ;;  %v10153_v58 = vunpack.c.l.bf16 %v10152_v45 }
 0x653   : > { %v7418_v2 = vadd.f32 %v12809_v47, %v7382_v20 }
 0x654   : > { %v7217_v43 = vpop.f32.mrf.mxu1 }
 0x655   : > { %v7450_v37 = vsub.f32 0.0, %v7418_v2  ;;  %v7218_v8 = vadd.f32 %v7217_v43, %v12669_v51  ;;  %v7306_v5 = vpop.f32.mrf.mxu2 }
 0x657   : > { %v10460_v11 = vpop.eup %10459  ;;  %v7483_v21 = vmul.f32 1.442695, %v7450_v37  ;;  %v7307_v44 = vadd.f32 %v7306_v5, %v7218_v8  ;;  %7256 = vmatmul.bf16.gmra.mxu1 %v9520_v22 }
 0x658   : > { %v7545_v32 = vadd.f32 1.0, %v10460_v11 }
 0x659   : > { %10461 = vpow2.f32 %v7483_v21  ;;  %v7383_v42 = vadd.f32 %v7307_v44, %v12716_v63  ;;  %v9535_v63 = vld [vmem:[#allocation4 + $0x128] sm:$0xf] }
 0x65a   : > { %10463 = vrcp.f32 %v7545_v32  ;;  %v9536_v44 = vor.u32 %v10110_v17, %v9535_v63  ;;  %v9529_v32 = vld [vmem:[#allocation4 + $0x12c] sm:$0xf0] }
 0x65b   : > { %v7419_v31 = vadd.f32 %v12809_v47, %v7383_v42  ;;  %v12827_v42 = vpop.f32.mrf.mxu0 }
 0x65c   : > { %v7219_v19 = vpop.f32.mrf.mxu1 }
 0x65d   : > { %v7451_v51 = vsub.f32 0.0, %v7419_v31  ;;  %v7220_v20 = vadd.f32 %v7219_v19, %v12675_v29  ;;  %v7308_v30 = vpop.f32.mrf.mxu2 }
 0x65f   : > { %v10462_v43 = vpop.eup %10461  ;;  %v7485_v37 = vmul.f32 1.442695, %v7451_v51  ;;  %v7309_v8 = vadd.f32 %v7308_v30, %v7220_v20  ;;  %v12832_v51 = vpop.f32.mrf.mxu3  ;;  %v10108_v30 = vld [vmem:[#allocation4 + $0x124] sm:$0xf] }
 0x660   : > { %v10464_v22 = vpop.eup %10463  ;;  %v7546_v5 = vadd.f32 1.0, %v10462_v43 }
 0x661   : > { %v7609_v11 = vmul.f32 %v10464_v22, %v7417_v14  ;;  %10465 = vpow2.f32 %v7485_v37  ;;  %v7384_v21 = vadd.f32 %v7309_v8, %v12719_v60  ;;  %v9532_v60 = vor.u32 %v10108_v30, %v9529_v32 }
 0x662   : > { %10467 = vrcp.f32 %v7546_v5  ;;  %7350 = vmatmul.bf16.gmra.mxu2 %v9536_v44  ;;  %v10154_v8 = vunpack.c.h.bf16 %v10152_v45 }
 0x663   : > { %v7706_v29 = vadd.f32 %v10153_v58, %v7609_v11  ;;  %v12830_v19 = vadd.f32 %v12809_v47, %v7384_v21 }
 0x664   : > { %v7222_v20 = vpop.f32.mrf.mxu1 }
 0x665   : > { %7738 = vst [vmem:[%s10899_s9] sm:$0xff] %v7706_v29  ;;  %v7452_v14 = vsub.f32 0.0, %v12830_v19  ;;  %v7223_v43 = vadd.f32 %v7222_v20, %v12679_v18  ;;  %v7311_v17 = vpop.f32.mrf.mxu2  ;;  %v10215_v18 = vld [vmem:[#allocation2 + $0x18] sm:$0xff]   ;;  %v12841_v20 = vpop.f32.mrf.mxu0 }
 0x667   : > { %v10466_v37 = vpop.eup %10465  ;;  %v7487_v22 = vmul.f32 1.442695, %v7452_v14  ;;  %v7312_v58 = vadd.f32 %v7311_v17, %v7223_v43  ;;  %7261 = vmatmul.bf16.gmra.mxu1 %v9532_v60  ;;  %v12846_v14 = vpop.f32.mrf.mxu3  ;;  %v10113_v43 = vld [vmem:[#allocation4 + $0x148] sm:$0xf0] }
 0x668   : > { %v10468_v5 = vpop.eup %10467  ;;  %v7547_v63 = vadd.f32 1.0, %v10466_v37 }
 0x669   : > { %v7610_v11 = vmul.f32 %v10468_v5, %v7418_v2  ;;  %10469 = vpow2.f32 %v7487_v22  ;;  %v7385_v21 = vadd.f32 %v7312_v58, %v12722_v52  ;;  %v10157_v52 = vunpack.c.l.bf16 %v10215_v18  ;;  %v9547_v58 = vld [vmem:[#allocation4 + $0x140] sm:$0xf] }
 0x66a   : > { %10471 = vrcp.f32 %v7547_v63 }
 0x66b   : > { %v7707_v44 = vadd.f32 %v10154_v8, %v7610_v11  ;;  %v12839_v29 = vadd.f32 %v12809_v47, %v7385_v21  ;;  %v9548_v11 = vor.u32 %v10113_v43, %v9547_v58  ;;  %v9541_v21 = vld [vmem:[#allocation4 + $0x144] sm:$0xf0] }
 0x66c   : > { %v7224_v32 = vpop.f32.mrf.mxu1 }
 0x66d   : > { %7739 = vst [vmem:[%s10899_s9 + $0x8] sm:$0xff] %v7707_v44  ;;  %v7453_v45 = vsub.f32 0.0, %v12839_v29  ;;  %v7225_v30 = vadd.f32 %v7224_v32, %v12683_v6  ;;  %v7313_v2 = vpop.f32.mrf.mxu2 }
 0x66f   : > { %v10470_v60 = vpop.eup %10469  ;;  %v7489_v17 = vmul.f32 1.442695, %v7453_v45  ;;  %v7314_v37 = vadd.f32 %v7313_v2, %v7225_v30  ;;  %v9544_v2 = vor.u32 %v10111_v48, %v9541_v21 }
 0x670   : > { %v10472_v8 = vpop.eup %10471  ;;  %v7548_v22 = vadd.f32 1.0, %v10470_v60 }
 0x671   : > { %v7611_v5 = vmul.f32 %v10472_v8, %v7419_v31  ;;  %10473 = vpow2.f32 %v7489_v17  ;;  %v7386_v63 = vadd.f32 %v7314_v37, %v12725_v23  ;;  %v12855_v17 = vpop.f32.mrf.mxu0  ;;  %v10158_v23 = vunpack.c.h.bf16 %v10215_v18  ;;  %v12857_v8 = vpop.f32.mrf.mxu3 }
 0x672   : > { %10475 = vrcp.f32 %v7548_v22  ;;  %7355 = vmatmul.bf16.gmra.mxu2 %v9548_v11 }
 0x673   : > { %v7708_v6 = vadd.f32 %v10157_v52, %v7611_v5  ;;  %v12850_v44 = vadd.f32 %v12809_v47, %v7386_v63  ;;  %v10216_v63 = vld [vmem:[#allocation2 + $0x20] sm:$0xff]  }
 0x674   : > { %v7227_v32 = vpop.f32.mrf.mxu1 }
 0x675   : > { %7740 = vst [vmem:[%s10899_s9 + $0x10] sm:$0xff] %v7708_v6  ;;  %v7454_v45 = vsub.f32 0.0, %v12850_v44  ;;  %v7228_v30 = vadd.f32 %v7227_v32, %v12801_v38  ;;  %v7316_v31 = vpop.f32.mrf.mxu2  ;;  %v10116_v32 = vld [vmem:[#allocation4 + $0x160] sm:$0xf0] }
 0x677   : > { %v10474_v60 = vpop.eup %10473  ;;  %v7491_v43 = vmul.f32 1.442695, %v7454_v45  ;;  %v7317_v52 = vadd.f32 %v7316_v31, %v7228_v30  ;;  %7266 = vmatmul.bf16.gmra.mxu1 %v9544_v2  ;;  %v10161_v30 = vunpack.c.l.bf16 %v10216_v63 }
 0x678   : > { %v10476_v37 = vpop.eup %10475  ;;  %v7549_v22 = vadd.f32 1.0, %v10474_v60  ;;  %v9559_v60 = vld [vmem:[#allocation4 + $0x158] sm:$0xf] }
 0x679   : > { %v7612_v58 = vmul.f32 %v10476_v37, %v12830_v19  ;;  %10477 = vpow2.f32 %v7491_v43  ;;  %v7387_v5 = vadd.f32 %v7317_v52, %v12728_v62  ;;  %v9560_v37 = vor.u32 %v10116_v32, %v9559_v60 }
 0x67a   : > { %10479 = vrcp.f32 %v7549_v22  ;;  %v12871_v22 = vpop.f32.mrf.mxu3  ;;  %v6541_v32 = vadd.f32 %v12822_v49, %v12730_v27  ;;  %v10217_v27 = vld [vmem:[#allocation2 + $0x28] sm:$0xff]  }
 0x67b   : > { %v7709_v38 = vadd.f32 %v10158_v23, %v7612_v58  ;;  %v12862_v48 = vadd.f32 %v12809_v47, %v7387_v5  ;;  %v12867_v23 = vpop.f32.mrf.mxu0 }
 0x67c   : > { %v7229_v11 = vpop.f32.mrf.mxu1 }
 0x67d   : > { %7741 = vst [vmem:[%s10899_s9 + $0x18] sm:$0xff] %v7709_v38  ;;  %v7455_v18 = vsub.f32 0.0, %v12862_v48  ;;  %v7230_v21 = vadd.f32 %v7229_v11, %v12814_v15  ;;  %v7318_v6 = vpop.f32.mrf.mxu2  ;;  %v9553_v15 = vld [vmem:[#allocation4 + $0x15c] sm:$0xf0]  ;;  %v10114_v11 = vld [vmem:[#allocation4 + $0x154] sm:$0xf] }
 0x67f   : > { %v10478_v45 = vpop.eup %10477  ;;  %v7493_v19 = vmul.f32 1.442695, %v7455_v18  ;;  %v7319_v2 = vadd.f32 %v7318_v6, %v7230_v21  ;;  %v9556_v21 = vor.u32 %v10114_v11, %v9553_v15  ;;  %v6543_v11 = vadd.f32 %v12832_v51, %v12735_v41  ;;  %v10117_v51 = vld [vmem:[#allocation4 + $0x16c] sm:$0xf] }
 0x680   : > { %v10480_v31 = vpop.eup %10479  ;;  %v7550_v62 = vadd.f32 1.0, %v10478_v45  ;;  %v10162_v45 = vunpack.c.h.bf16 %v10216_v63 }
 0x681   : > { %v7613_v43 = vmul.f32 %v10480_v31, %v12839_v29  ;;  %10481 = vpow2.f32 %v7493_v19  ;;  %v7388_v52 = vadd.f32 %v7319_v2, %v12733_v26 }
 0x682   : > { %10483 = vrcp.f32 %v7550_v62  ;;  %7360 = vmatmul.bf16.gmra.mxu2 %v9560_v37  ;;  %v12887_v37 = vpop.f32.mrf.mxu3 }
 0x683   : > { %v7710_v58 = vadd.f32 %v10161_v30, %v7613_v43  ;;  %v12874_v5 = vadd.f32 %v12809_v47, %v7388_v52  ;;  %v12882_v43 = vpop.f32.mrf.mxu0 }
 0x684   : > { %v7232_v38 = vpop.f32.mrf.mxu1 }
 0x685   : > { %7742 = vst [vmem:[%s10899_s9 + $0x20] sm:$0xff] %v7710_v58  ;;  %v7456_v18 = vsub.f32 0.0, %v12874_v5  ;;  %v7233_v29 = vadd.f32 %v7232_v38, %v12819_v53  ;;  %v7321_v6 = vpop.f32.mrf.mxu2 }
 0x687   : > { %v10482_v26 = vpop.eup %10481  ;;  %v7495_v30 = vmul.f32 1.442695, %v7456_v18  ;;  %v7322_v19 = vadd.f32 %v7321_v6, %v7233_v29  ;;  %7271 = vmatmul.bf16.gmra.mxu1 %v9556_v21  ;;  %v10165_v18 = vunpack.c.l.bf16 %v10217_v27 }
 0x688   : > { %v10484_v2 = vpop.eup %10483  ;;  %v7551_v31 = vadd.f32 1.0, %v10482_v26 }
 0x689   : > { %v7614_v62 = vmul.f32 %v10484_v2, %v12850_v44  ;;  %10485 = vpow2.f32 %v7495_v30  ;;  %v7389_v60 = vadd.f32 %v7322_v19, %v6541_v32  ;;  %v10119_v44 = vld [vmem:[#allocation4 + $0x178] sm:$0xf0]  ;;  %v9571_v32 = vld [vmem:[#allocation4 + $0x170] sm:$0xf] }
 0x68a   : > { %10487 = vrcp.f32 %v7551_v31  ;;  %v9572_v19 = vor.u32 %v10119_v44, %v9571_v32  ;;  %v10166_v44 = vunpack.c.h.bf16 %v10217_v27  ;;  %v10218_v32 = vld [vmem:[#allocation2 + $0x30] sm:$0xff]  }
 0x68b   : > { %v7711_v53 = vadd.f32 %v10162_v45, %v7614_v62  ;;  %v12885_v52 = vadd.f32 %v12809_v47, %v7389_v60  ;;  %v12898_v62 = vpop.f32.mrf.mxu0 }
 0x68c   : > { %v7234_v49 = vpop.f32.mrf.mxu1 }
 0x68d   : > { %7743 = vst [vmem:[%s10899_s9 + $0x28] sm:$0xff] %v7711_v53  ;;  %v7457_v63 = vsub.f32 0.0, %v12885_v52  ;;  %v7235_v15 = vadd.f32 %v7234_v49, %v12827_v42  ;;  %v7323_v58 = vpop.f32.mrf.mxu2  ;;  %v9565_v42 = vld [vmem:[#allocation4 + $0x174] sm:$0xf0]  ;;  %v12903_v49 = vpop.f32.mrf.mxu3 }
 0x68f   : > { %v10486_v38 = vpop.eup %10485  ;;  %v7497_v29 = vmul.f32 1.442695, %v7457_v63  ;;  %v7324_v21 = vadd.f32 %v7323_v58, %v7235_v15  ;;  %v6546_v58 = vadd.f32 %v12846_v14, %v12738_v59 }
 0x690   : > { %v10488_v6 = vpop.eup %10487  ;;  %v7552_v26 = vadd.f32 1.0, %v10486_v38 }
 0x691   : > { %v7615_v45 = vmul.f32 %v10488_v6, %v12862_v48  ;;  %10489 = vpow2.f32 %v7497_v29  ;;  %v7390_v30 = vadd.f32 %v7324_v21, %v6543_v11  ;;  %v9568_v48 = vor.u32 %v10117_v51, %v9565_v42 }
 0x692   : > { %10491 = vrcp.f32 %v7552_v26  ;;  %7365 = vmatmul.bf16.gmra.mxu2 %v9572_v19 }
 0x693   : > { %v7712_v2 = vadd.f32 %v10165_v18, %v7615_v45  ;;  %v12896_v31 = vadd.f32 %v12809_v47, %v7390_v30  ;;  %v10122_v30 = vld [vmem:[#allocation4 + $0x190] sm:$0xf0]  ;;  %v12914_v42 = vpop.f32.mrf.mxu0 }
 0x694   : > { %v7237_v41 = vpop.f32.mrf.mxu1 }
 0x695   : > { %7744 = vst [vmem:[%s10899_s9 + $0x30] sm:$0xff] %v7712_v2  ;;  %v7458_v60 = vsub.f32 0.0, %v12896_v31  ;;  %v7238_v53 = vadd.f32 %v7237_v41, %v12841_v20  ;;  %v7326_v63 = vpop.f32.mrf.mxu2  ;;  %v10169_v2 = vunpack.c.l.bf16 %v10218_v32 }
 0x697   : > { %v10490_v15 = vpop.eup %10489  ;;  %v7499_v38 = vmul.f32 1.442695, %v7458_v60  ;;  %v7327_v11 = vadd.f32 %v7326_v63, %v7238_v53  ;;  %7276 = vmatmul.bf16.gmra.mxu1 %v9568_v48  ;;  %v12918_v53 = vpop.f32.mrf.mxu3  ;;  %v9583_v63 = vld [vmem:[#allocation4 + $0x188] sm:$0xf] }
 0x698   : > { %v10492_v18 = vpop.eup %10491  ;;  %v7553_v29 = vadd.f32 1.0, %v10490_v15 }
 0x699   : > { %v7616_v21 = vmul.f32 %v10492_v18, %v12874_v5  ;;  %10493 = vpow2.f32 %v7499_v38  ;;  %v7391_v6 = vadd.f32 %v7327_v11, %v6546_v58  ;;  %v6548_v5 = vadd.f32 %v12857_v8, %v12741_v1  ;;  %v10120_v8 = vld [vmem:[#allocation4 + $0x184] sm:$0xf] }
 0x69a   : > { %10495 = vrcp.f32 %v7553_v29  ;;  %v9584_v58 = vor.u32 %v10122_v30, %v9583_v63 }
 0x69b   : > { %v7713_v20 = vadd.f32 %v10166_v44, %v7616_v21  ;;  %v12909_v26 = vadd.f32 %v12809_v47, %v7391_v6  ;;  %v9577_v44 = vld [vmem:[#allocation4 + $0x18c] sm:$0xf0] }
 0x69c   : > { %v7239_v45 = vpop.f32.mrf.mxu1  ;;  %v9580_v21 = vor.u32 %v10120_v8, %v9577_v44 }
 0x69d   : > { %7745 = vst [vmem:[%s10899_s9 + $0x38] sm:$0xff] %v7713_v20  ;;  %v7459_v59 = vsub.f32 0.0, %v12909_v26  ;;  %v7240_v14 = vadd.f32 %v7239_v45, %v12855_v17  ;;  %v7328_v27 = vpop.f32.mrf.mxu2  ;;  %v6551_v20 = vadd.f32 %v12871_v22, %v12744_v9  ;;  %v10170_v45 = vunpack.c.h.bf16 %v10218_v32  ;;  %v10219_v9 = vld [vmem:[#allocation2 + $0x38] sm:$0xff]  }
 0x69e   : > { %v10173_v44 = vunpack.c.l.bf16 %v10219_v9 }
 0x69f   : > { %v10494_v19 = vpop.eup %10493  ;;  %v7501_v41 = vmul.f32 1.442695, %v7459_v59  ;;  %v7329_v51 = vadd.f32 %v7328_v27, %v7240_v14 }
 0x6a0   : > { %v10496_v60 = vpop.eup %10495  ;;  %v7554_v48 = vadd.f32 1.0, %v10494_v19  ;;  %v12929_v19 = vpop.f32.mrf.mxu0 }
 0x6a1   : > { %v7617_v15 = vmul.f32 %v10496_v60, %v12885_v52  ;;  %10497 = vpow2.f32 %v7501_v41  ;;  %v7392_v17 = vadd.f32 %v7329_v51, %v6548_v5 }
 0x6a2   : > { %10499 = vrcp.f32 %v7554_v48  ;;  %7370 = vmatmul.bf16.gmra.mxu2 %v9584_v58  ;;  %v4658_v48 = vld [vmem:[#allocation4 + $0x198] sm:$0xf] }
 0x6a3   : > { %v7714_v38 = vadd.f32 %v10169_v2, %v7617_v15  ;;  %v12922_v11 = vadd.f32 %v12809_v47, %v7392_v17  ;;  %v4659_v15 = vsel %vm10920_vm5, %v12597_v56, %v4658_v48  ;;  %v4983_v17 = vld [vmem:[#allocation4 + $0x1ac] sm:$0xf]  ;;  %v10220_v48 = vld [vmem:[#allocation2 + $0x40] sm:$0xff]  }
 0x6a4   : > { %v7242_v1 = vpop.f32.mrf.mxu1  ;;  %4660 = vst [vmem:[#allocation4 + $0x198] sm:$0xf] %v4659_v15  ;;  %v10124_v15 = vld [vmem:[#allocation4 + $0x1a0] sm:$0xf0] }
 0x6a5   : > { %7746 = vst [vmem:[%s10899_s9 + $0x40] sm:$0xff] %v7714_v38  ;;  %v7460_v18 = vsub.f32 0.0, %v12922_v11  ;;  %v7243_v29 = vadd.f32 %v7242_v1, %v12867_v23  ;;  %v7331_v6 = vpop.f32.mrf.mxu2  ;;  %v12932_v23 = vpop.f32.mrf.mxu3 }
 0x6a7   : > { %v10498_v52 = vpop.eup %10497  ;;  %v7503_v59 = vmul.f32 1.442695, %v7460_v18  ;;  %v7332_v14 = vadd.f32 %v7331_v6, %v7243_v29  ;;  %7281 = vmatmul.bf16.gmra.mxu1 %v9580_v21 }
 0x6a8   : > { %v10500_v27 = vpop.eup %10499  ;;  %v7555_v30 = vadd.f32 1.0, %v10498_v52  ;;  %v12949_v40 = vpop.f32.mrf.mxu0  ;;  %v10123_v52 = vld [vmem:[#allocation4 + $0x19c] sm:$0xf] }
 0x6a9   : > { %v7618_v5 = vmul.f32 %v10500_v27, %v12896_v31  ;;  %10501 = vpow2.f32 %v7503_v59  ;;  %v7393_v2 = vadd.f32 %v7332_v14, %v6551_v20  ;;  %v6553_v31 = vadd.f32 %v12887_v37, %v12747_v0  ;;  %v9589_v20 = vld [vmem:[#allocation4 + $0x1a4] sm:$0xf0] }
 0x6aa   : > { %10503 = vrcp.f32 %v7555_v30  ;;  %v9592_v14 = vor.u32 %v10123_v52, %v9589_v20  ;;  %v10174_v30 = vunpack.c.h.bf16 %v10219_v9 }
 0x6ab   : > { %v7715_v41 = vadd.f32 %v10170_v45, %v7618_v5  ;;  %v12935_v51 = vadd.f32 %v12809_v47, %v7393_v2  ;;  %v4713_v45 = vld [vmem:[#allocation4 + $0x198] sm:$0x1] }
 0x6ac   : > { %v7244_v22 = vpop.f32.mrf.mxu1  ;;  %v4714_v2 = vsel %vm10957_vm7, 0, %v4713_v45 }
 0x6ad   : > { %7747 = vst [vmem:[%s10899_s9 + $0x48] sm:$0xff] %v7715_v41  ;;  %v7461_v32 = vsub.f32 0.0, %v12935_v51  ;;  %v7245_v60 = vadd.f32 %v7244_v22, %v12882_v43  ;;  %v7333_v63 = vpop.f32.mrf.mxu2  ;;  %v4984_v43 = vsel %vm11148_vm9, %v12631_v57, %v4983_v17  ;;  %v12954_v21 = vpop.f32.mrf.mxu3 }
 0x6ae   : > { %4985 = vst [vmem:[#allocation4 + $0x1ac] sm:$0xf] %v4984_v43  ;;  %v10177_v43 = vunpack.c.l.bf16 %v10220_v48 }
 0x6af   : > { %v10502_v58 = vpop.eup %10501  ;;  %v7505_v38 = vmul.f32 1.442695, %v7461_v32  ;;  %v7334_v1 = vadd.f32 %v7333_v63, %v7245_v60  ;;  %4715 = vst [vmem:[#allocation4 + $0x198] sm:$0x1] %v4714_v2 }
 0x6b0   : > { %v10504_v8 = vpop.eup %10503  ;;  %v7556_v18 = vadd.f32 1.0, %v10502_v58  ;;  %v12969_v63 = vpop.f32.mrf.mxu0 }
 0x6b1   : > { %v7619_v0 = vmul.f32 %v10504_v8, %v12909_v26  ;;  %10505 = vpow2.f32 %v7505_v38  ;;  %v7394_v37 = vadd.f32 %v7334_v1, %v6553_v31  ;;  %v6556_v26 = vadd.f32 %v12903_v49, %v12750_v55 }
 0x6b2   : > { %10507 = vrcp.f32 %v7556_v18  ;;  %v6558_v1 = vadd.f32 %v12918_v53, %v12753_v10 }
 0x6b3   : > { %v7716_v56 = vadd.f32 %v10173_v44, %v7619_v0  ;;  %v12952_v29 = vadd.f32 %v12809_v47, %v7394_v37 }
 0x6b4   : > { %v7247_v6 = vpop.f32.mrf.mxu1 }
 0x6b5   : > { %7748 = vst [vmem:[%s10899_s9 + $0x50] sm:$0xff] %v7716_v56  ;;  %v7462_v34 = vsub.f32 0.0, %v12952_v29  ;;  %v7248_v57 = vadd.f32 %v7247_v6, %v12898_v62  ;;  %v7336_v59 = vpop.f32.mrf.mxu2  ;;  %v5037_v41 = vld [vmem:[#allocation4 + $0x1ac] sm:$0x8]  ;;  %v12974_v58 = vpop.f32.mrf.mxu3 }
 0x6b6   : > { %v5038_v62 = vsel %vm11179_vm14, 0, %v5037_v41  ;;  %v9587_v8 = vld [vmem:[#allocation4 + $0x198] sm:$0xf] }
 0x6b7   : > { %v10506_v27 = vpop.eup %10505  ;;  %v7507_v5 = vmul.f32 1.442695, %v7462_v34  ;;  %v7337_v22 = vadd.f32 %v7336_v59, %v7248_v57  ;;  %7286 = vmatmul.bf16.gmra.mxu1 %v9592_v14  ;;  %5039 = vst [vmem:[#allocation4 + $0x1ac] sm:$0x8] %v5038_v62  ;;  %v9588_v6 = vor.u32 %v10124_v15, %v9587_v8  ;;  %v6563_v15 = vadd.f32 %v12954_v21, %v12759_v36 }
 0x6b8   : > { %v10508_v32 = vpop.eup %10507  ;;  %v7557_v60 = vadd.f32 1.0, %v10506_v27  ;;  %v7170_v27 = vpop.f32.mrf.mxu0 }
 0x6b9   : > { %v7620_v55 = vmul.f32 %v10508_v32, %v12922_v11  ;;  %10509 = vpow2.f32 %v7507_v5  ;;  %v7395_v49 = vadd.f32 %v7337_v22, %v6556_v26  ;;  %v9595_v11 = vld [vmem:[#allocation4 + $0x1a0] sm:$0xf]  ;;  %7197 = vmatmul.bf16.gmra.mxu0 %v9588_v6  ;;  %v6566_v6 = vadd.f32 %v12974_v58, %v12762_v13 }
 0x6ba   : > { %10511 = vrcp.f32 %v7557_v60 }
 0x6bb   : > { %v7717_v9 = vadd.f32 %v10174_v30, %v7620_v55  ;;  %v12967_v61 = vadd.f32 %v12809_v47, %v7395_v49  ;;  %v10178_v30 = vunpack.c.h.bf16 %v10220_v48  ;;  %v10221_v49 = vld [vmem:[#allocation2 + $0x48] sm:$0xff]  }
 0x6bc   : > { %v7249_v31 = vpop.f32.mrf.mxu1 }
 0x6bd   : > { %7749 = vst [vmem:[%s10899_s9 + $0x58] sm:$0xff] %v7717_v9  ;;  %v7463_v28 = vsub.f32 0.0, %v12967_v61  ;;  %v7250_v17 = vadd.f32 %v7249_v31, %v12914_v42  ;;  %v7338_v44 = vpop.f32.mrf.mxu2  ;;  %v6567_v22 = vpop.f32.mrf.mxu3 }
 0x6be   : > { %v10125_v34 = vld [vmem:[#allocation4 + $0x1a8] sm:$0xf0] }
 0x6bf   : > { %v10510_v38 = vpop.eup %10509  ;;  %v7509_v18 = vmul.f32 1.442695, %v7463_v28  ;;  %v7339_v0 = vadd.f32 %v7338_v44, %v7250_v17  ;;  %v9596_v42 = vor.u32 %v10125_v34, %v9595_v11  ;;  %v10181_v28 = vunpack.c.l.bf16 %v10221_v49 }
 0x6c0   : > { %v10512_v37 = vpop.eup %10511  ;;  %v7558_v56 = vadd.f32 1.0, %v10510_v38  ;;  %v7173_v38 = vpop.f32.mrf.mxu0  ;;  %v10182_v34 = vunpack.c.h.bf16 %v10221_v49 }
 0x6c1   : > { %v7621_v57 = vmul.f32 %v10512_v37, %v12935_v51  ;;  %10513 = vpow2.f32 %v7509_v18  ;;  %v7396_v52 = vadd.f32 %v7339_v0, %v6558_v1  ;;  %7375 = vmatmul.bf16.gmra.mxu2 %v9596_v42  ;;  %v6561_v51 = vadd.f32 %v12932_v23, %v12756_v25 }
 0x6c2   : > { %10515 = vrcp.f32 %v7558_v56 }
 0x6c3   : > { %v7718_v20 = vadd.f32 %v10177_v43, %v7621_v57  ;;  %v7432_v10 = vadd.f32 %v12809_v47, %v7396_v52 }
 0x6c4   : > { %v7252_v53 = vpop.f32.mrf.mxu1 }
 0x6c5   : > { %7750 = vst [vmem:[%s10899_s9 + $0x60] sm:$0xff] %v7718_v20  ;;  %v7464_v26 = vsub.f32 0.0, %v7432_v10  ;;  %v7253_v45 = vadd.f32 %v7252_v53, %v12929_v19  ;;  %v7341_v59 = vpop.f32.mrf.mxu2  ;;  %v6570_v8 = vpop.f32.mrf.mxu3 }
 0x6c7   : > { %v10514_v14 = vpop.eup %10513  ;;  %v7511_v5 = vmul.f32 1.442695, %v7464_v26  ;;  %v7342_v2 = vadd.f32 %v7341_v59, %v7253_v45 }
 0x6c8   : > { %v10516_v41 = vpop.eup %10515  ;;  %v7559_v32 = vadd.f32 1.0, %v10514_v14  ;;  %v7175_v26 = vpop.f32.mrf.mxu0  ;;  %v10222_v14 = vld [vmem:[#allocation2 + $0x50] sm:$0xff]  }
 0x6c9   : > { %v7622_v60 = vmul.f32 %v10516_v41, %v12952_v29  ;;  %10517 = vpow2.f32 %v7511_v5  ;;  %v7397_v62 = vadd.f32 %v7342_v2, %v6561_v51  ;;  %v6568_v2 = vadd.f32 %v6567_v22, %v12765_v7 }
 0x6ca   : > { %10519 = vrcp.f32 %v7559_v32  ;;  %v10185_v41 = vunpack.c.l.bf16 %v10222_v14  ;;  %v6571_v22 = vadd.f32 %v6570_v8, %v12768_v12 }
 0x6cb   : > { %v7719_v55 = vadd.f32 %v10178_v30, %v7622_v60  ;;  %v7433_v19 = vadd.f32 %v12809_v47, %v7397_v62 }
 0x6cc   : > { %v7254_v9 = vpop.f32.mrf.mxu1 }
 0x6cd   : > { %7751 = vst [vmem:[%s10899_s9 + $0x68] sm:$0xff] %v7719_v55  ;;  %v7465_v31 = vsub.f32 0.0, %v7433_v19  ;;  %v7255_v25 = vadd.f32 %v7254_v9, %v12949_v40  ;;  %v7343_v23 = vpop.f32.mrf.mxu2 }
 0x6cf   : > { %v10518_v48 = vpop.eup %10517  ;;  %v7513_v29 = vmul.f32 1.442695, %v7465_v31  ;;  %v7344_v17 = vadd.f32 %v7343_v23, %v7255_v25 }
 0x6d0   : > { %v10520_v11 = vpop.eup %10519  ;;  %v7560_v44 = vadd.f32 1.0, %v10518_v48  ;;  %v7178_v23 = vpop.f32.mrf.mxu0 }
 0x6d1   : > { %v7623_v1 = vmul.f32 %v10520_v11, %v12967_v61  ;;  %10521 = vpow2.f32 %v7513_v29  ;;  %v7398_v43 = vadd.f32 %v7344_v17, %v6563_v15  ;;  %v10186_v29 = vunpack.c.h.bf16 %v10222_v14 }
 0x6d2   : > { %10523 = vrcp.f32 %v7560_v44 }
 0x6d3   : > { %v7720_v18 = vadd.f32 %v10181_v28, %v7623_v1  ;;  %v7434_v40 = vadd.f32 %v12809_v47, %v7398_v43 }
 0x6d4   : > { %v7257_v0 = vpop.f32.mrf.mxu1 }
 0x6d5   : > { %7752 = vst [vmem:[%s10899_s9 + $0x70] sm:$0xff] %v7720_v18  ;;  %v7466_v37 = vsub.f32 0.0, %v7434_v40  ;;  %v7258_v36 = vadd.f32 %v7257_v0, %v12969_v63  ;;  %v7346_v21 = vpop.f32.mrf.mxu2  ;;  %v6572_v63 = vpop.f32.mrf.mxu3 }
 0x6d6   : > { %v6573_v8 = vadd.f32 %v6572_v63, %v12771_v33 }
 0x6d7   : > { %v10522_v56 = vpop.eup %10521  ;;  %v7515_v61 = vmul.f32 1.442695, %v7466_v37  ;;  %v7347_v57 = vadd.f32 %v7346_v21, %v7258_v36  ;;  %v10223_v37 = vld [vmem:[#allocation2 + $0x58] sm:$0xff]  }
 0x6d8   : > { %v10524_v42 = vpop.eup %10523  ;;  %v7561_v52 = vadd.f32 1.0, %v10522_v56  ;;  %v7180_v12 = vpop.f32.mrf.mxu0  ;;  %v10190_v63 = vunpack.c.h.bf16 %v10223_v37 }
 0x6d9   : > { %v7624_v20 = vmul.f32 %v10524_v42, %v7432_v10  ;;  %10525 = vpow2.f32 %v7515_v61  ;;  %v7399_v53 = vadd.f32 %v7347_v57, %v6566_v6 }
 0x6da   : > { %10527 = vrcp.f32 %v7561_v52 }
 0x6db   : > { %v7721_v45 = vadd.f32 %v10182_v34, %v7624_v20  ;;  %v7435_v59 = vadd.f32 %v12809_v47, %v7399_v53  ;;  %v10189_v34 = vunpack.c.l.bf16 %v10223_v37 }
 0x6dc   : > { %v7259_v51 = vpop.f32.mrf.mxu1 }
 0x6dd   : > { %7753 = vst [vmem:[%s10899_s9 + $0x78] sm:$0xff] %v7721_v45  ;;  %v7467_v30 = vsub.f32 0.0, %v7435_v59  ;;  %v7260_v13 = vadd.f32 %v7259_v51, %v7170_v27  ;;  %v7348_v58 = vpop.f32.mrf.mxu2  ;;  %v6575_v15 = vpop.f32.mrf.mxu3 }
 0x6de   : > { %v6576_v33 = vadd.f32 %v6575_v15, %v12774_v35 }
 0x6df   : > { %v10526_v5 = vpop.eup %10525  ;;  %v7517_v10 = vmul.f32 1.442695, %v7467_v30  ;;  %v7349_v32 = vadd.f32 %v7348_v58, %v7260_v13 }
 0x6e0   : > { %v10528_v60 = vpop.eup %10527  ;;  %v7562_v62 = vadd.f32 1.0, %v10526_v5 }
 0x6e1   : > { %v7625_v55 = vmul.f32 %v10528_v60, %v7433_v19  ;;  %10529 = vpow2.f32 %v7517_v10  ;;  %v7400_v49 = vadd.f32 %v7349_v32, %v6568_v2  ;;  %v7183_v10 = vpop.f32.mrf.mxu0 }
 0x6e2   : > { %10531 = vrcp.f32 %v7562_v62 }
 0x6e3   : > { %v7722_v9 = vadd.f32 %v10185_v41, %v7625_v55  ;;  %v7436_v31 = vadd.f32 %v12809_v47, %v7400_v49 }
 0x6e4   : > { %v7262_v25 = vpop.f32.mrf.mxu1 }
 0x6e5   : > { %7754 = vst [vmem:[%s10899_s9 + $0x80] sm:$0xff] %v7722_v9  ;;  %v7468_v27 = vsub.f32 0.0, %v7436_v31  ;;  %v7263_v48 = vadd.f32 %v7262_v25, %v7173_v38  ;;  %v7351_v28 = vpop.f32.mrf.mxu2  ;;  %v6577_v42 = vpop.f32.mrf.mxu3  ;;  %v10224_v9 = vld [vmem:[#allocation2 + $0x60] sm:$0xff]  }
 0x6e6   : > { %v6578_v15 = vadd.f32 %v6577_v42, %v12777_v4  ;;  %v10225_v42 = vld [vmem:[#allocation2 + $0x68] sm:$0xff]  }
 0x6e7   : > { %v10530_v7 = vpop.eup %10529  ;;  %v7519_v17 = vmul.f32 1.442695, %v7468_v27  ;;  %v7352_v19 = vadd.f32 %v7351_v28, %v7263_v48  ;;  %v10193_v28 = vunpack.c.l.bf16 %v10224_v9 }
 0x6e8   : > { %v10532_v11 = vpop.eup %10531  ;;  %v7563_v44 = vadd.f32 1.0, %v10530_v7 }
 0x6e9   : > { %v7626_v1 = vmul.f32 %v10532_v11, %v7434_v40  ;;  %10533 = vpow2.f32 %v7519_v17  ;;  %v7401_v43 = vadd.f32 %v7352_v19, %v6571_v22 }
 0x6ea   : > { %10535 = vrcp.f32 %v7563_v44  ;;  %v13014_v44 = vld [vmem:[%s13088_s4] ss:$0 sm:$0xff] }
 0x6eb   : > { %v7723_v18 = vadd.f32 %v10186_v29, %v7626_v1  ;;  %v7437_v0 = vadd.f32 %v12809_v47, %v7401_v43 }
 0x6ec   : > { %v7264_v38 = vpop.f32.mrf.mxu1 }
 0x6ed   : > { %7755 = vst [vmem:[%s10899_s9 + $0x88] sm:$0xff] %v7723_v18  ;;  %v7469_v36 = vsub.f32 0.0, %v7437_v0  ;;  %v7265_v21 = vadd.f32 %v7264_v38, %v7175_v26  ;;  %v7353_v56 = vpop.f32.mrf.mxu2  ;;  %v6580_v62 = vpop.f32.mrf.mxu3 }
 0x6ef   : > { %v10534_v6 = vpop.eup %10533  ;;  %v7521_v61 = vmul.f32 1.442695, %v7469_v36  ;;  %v7354_v40 = vadd.f32 %v7353_v56, %v7265_v21  ;;  %v10194_v21 = vunpack.c.h.bf16 %v10224_v9 }
 0x6f0   : > { %v10536_v57 = vpop.eup %10535  ;;  %v7564_v52 = vadd.f32 1.0, %v10534_v6 }
 0x6f1   : > { %v7627_v20 = vmul.f32 %v10536_v57, %v7435_v59  ;;  %10537 = vpow2.f32 %v7521_v61  ;;  %v7402_v53 = vadd.f32 %v7354_v40, %v6573_v8 }
 0x6f2   : > { %10539 = vrcp.f32 %v7564_v52 }
 0x6f3   : > { %v7724_v45 = vadd.f32 %v10189_v34, %v7627_v20  ;;  %v7438_v14 = vadd.f32 %v12809_v47, %v7402_v53 }
 0x6f4   : > { %v7267_v26 = vpop.f32.mrf.mxu1 }
 0x6f5   : > { %7756 = vst [vmem:[%s10899_s9 + $0x90] sm:$0xff] %v7724_v45  ;;  %v7470_v51 = vsub.f32 0.0, %v7438_v14  ;;  %v7268_v30 = vadd.f32 %v7267_v26, %v7178_v23  ;;  %v7356_v13 = vpop.f32.mrf.mxu2  ;;  %v6582_v4 = vpop.f32.mrf.mxu3 }
 0x6f7   : > { %v10538_v58 = vpop.eup %10537  ;;  %v7523_v5 = vmul.f32 1.442695, %v7470_v51  ;;  %v7357_v2 = vadd.f32 %v7356_v13, %v7268_v30  ;;  %v6583_v30 = vadd.f32 %v6582_v4, %v12783_v3  ;;  %v10197_v13 = vunpack.c.l.bf16 %v10225_v42 }
 0x6f8   : > { %v10540_v41 = vpop.eup %10539  ;;  %v7565_v59 = vadd.f32 1.0, %v10538_v58 }
 0x6f9   : > { %v7628_v32 = vmul.f32 %v10540_v41, %v7436_v31  ;;  %10541 = vpow2.f32 %v7523_v5  ;;  %v7403_v60 = vadd.f32 %v7357_v2, %v6576_v33 }
 0x6fa   : > { %10543 = vrcp.f32 %v7565_v59 }
 0x6fb   : > { %v7725_v55 = vadd.f32 %v10190_v63, %v7628_v32  ;;  %v7439_v49 = vadd.f32 %v12809_v47, %v7403_v60  ;;  %v7185_v47 = vpop.f32.mrf.mxu0 }
 0x6fc   : > { %v7269_v25 = vpop.f32.mrf.mxu1 }
 0x6fd   : > { %7757 = vst [vmem:[%s10899_s9 + $0x98] sm:$0xff] %v7725_v55  ;;  %v7471_v23 = vsub.f32 0.0, %v7439_v49  ;;  %v7270_v35 = vadd.f32 %v7269_v25, %v7180_v12  ;;  %v7358_v27 = vpop.f32.mrf.mxu2  ;;  %v6585_v26 = vpop.f32.mrf.mxu3  ;;  %v10198_v25 = vunpack.c.h.bf16 %v10225_v42 }
 0x6fe   : > { %v6586_v3 = vadd.f32 %v6585_v26, %v12786_v54 }
 0x6ff   : > { %v10542_v48 = vpop.eup %10541  ;;  %v7525_v7 = vmul.f32 1.442695, %v7471_v23  ;;  %v7359_v31 = vadd.f32 %v7358_v27, %v7270_v35 }
 0x700   : > { %v10544_v22 = vpop.eup %10543  ;;  %v7566_v29 = vadd.f32 1.0, %v10542_v48 }
 0x701   : > { %v7629_v17 = vmul.f32 %v10544_v22, %v7437_v0  ;;  %10545 = vpow2.f32 %v7525_v7  ;;  %v7404_v19 = vadd.f32 %v7359_v31, %v6578_v15  ;;  %v6581_v0 = vadd.f32 %v6580_v62, %v12780_v16  ;;  %v10226_v22 = vld [vmem:[#allocation2 + $0x70] sm:$0xff]  }
 0x702   : > { %10547 = vrcp.f32 %v7566_v29  ;;  %v10201_v4 = vunpack.c.l.bf16 %v10226_v22  ;;  %v10202_v42 = vunpack.c.h.bf16 %v10226_v22 }
 0x703   : > { %v7726_v11 = vadd.f32 %v10193_v28, %v7629_v17  ;;  %v7440_v1 = vadd.f32 %v13014_v44, %v7404_v19  ;;  %v7188_v20 = vpop.f32.mrf.mxu0 }
 0x704   : > { %v7272_v43 = vpop.f32.mrf.mxu1 }
 0x705   : > { %7758 = vst [vmem:[%s10899_s9 + $0xa0] sm:$0xff] %v7726_v11  ;;  %v7472_v18 = vsub.f32 0.0, %v7440_v1  ;;  %v7273_v37 = vadd.f32 %v7272_v43, %v7183_v10  ;;  %v7361_v38 = vpop.f32.mrf.mxu2  ;;  %v6587_v27 = vpop.f32.mrf.mxu3 }
 0x706   : > { %v6588_v11 = vadd.f32 %v6587_v27, %v12789_v39 }
 0x707   : > { %v10546_v36 = vpop.eup %10545  ;;  %v7527_v56 = vmul.f32 1.442695, %v7472_v18  ;;  %v7362_v6 = vadd.f32 %v7361_v38, %v7273_v37 }
 0x708   : > { %v10548_v12 = vpop.eup %10547  ;;  %v7567_v8 = vadd.f32 1.0, %v10546_v36 }
 0x709   : > { %v7630_v34 = vmul.f32 %v10548_v12, %v7438_v14  ;;  %10549 = vpow2.f32 %v7527_v56  ;;  %v7405_v61 = vadd.f32 %v7362_v6, %v6581_v0 }
 0x70a   : > { %10551 = vrcp.f32 %v7567_v8 }
 0x70b   : > { %v7727_v40 = vadd.f32 %v10194_v21, %v7630_v34  ;;  %v7441_v57 = vadd.f32 %v13014_v44, %v7405_v61  ;;  %v7190_v9 = vpop.f32.mrf.mxu0 }
 0x70c   : > { %v7274_v52 = vpop.f32.mrf.mxu1 }
 0x70d   : > { %7759 = vst [vmem:[%s10899_s9 + $0xa8] sm:$0xff] %v7727_v40  ;;  %v7473_v53 = vsub.f32 0.0, %v7441_v57  ;;  %v7275_v45 = vadd.f32 %v7274_v52, %v7185_v47  ;;  %v7363_v16 = vpop.f32.mrf.mxu2  ;;  %v6590_v21 = vpop.f32.mrf.mxu3 }
 0x70e   : > { %v6591_v40 = vadd.f32 %v6590_v21, %v12792_v46 }
 0x70f   : > { %v10550_v51 = vpop.eup %10549  ;;  %v7529_v14 = vmul.f32 1.442695, %v7473_v53  ;;  %v7364_v58 = vadd.f32 %v7363_v16, %v7275_v45 }
 0x710   : > { %v10552_v33 = vpop.eup %10551  ;;  %v7568_v63 = vadd.f32 1.0, %v10550_v51 }
 0x711   : > { %v7631_v5 = vmul.f32 %v10552_v33, %v7439_v49  ;;  %10553 = vpow2.f32 %v7529_v14  ;;  %v7406_v2 = vadd.f32 %v7364_v58, %v6583_v30  ;;  %v10227_v14 = vld [vmem:[#allocation2 + $0x78] sm:$0xff]  }
 0x712   : > { %10555 = vrcp.f32 %v7568_v63 }
 0x713   : > { %v7728_v41 = vadd.f32 %v10197_v13, %v7631_v5  ;;  %v7442_v59 = vadd.f32 %v13014_v44, %v7406_v2  ;;  %v7193_v38 = vpop.f32.mrf.mxu0 }
 0x714   : > { %v7277_v10 = vpop.f32.mrf.mxu1 }
 0x715   : > { %7760 = vst [vmem:[%s10899_s9 + $0xb0] sm:$0xff] %v7728_v41  ;;  %v7474_v32 = vsub.f32 0.0, %v7442_v59  ;;  %v7278_v60 = vadd.f32 %v7277_v10, %v7188_v20  ;;  %v7366_v62 = vpop.f32.mrf.mxu2  ;;  %v6592_v13 = vpop.f32.mrf.mxu3  ;;  %v10205_v41 = vunpack.c.l.bf16 %v10227_v14 }
 0x716   : > { %v6593_v2 = vadd.f32 %v6592_v13, %v12795_v50 }
 0x717   : > { %v10554_v55 = vpop.eup %10553  ;;  %v7531_v23 = vmul.f32 1.442695, %v7474_v32  ;;  %v7367_v35 = vadd.f32 %v7366_v62, %v7278_v60 }
 0x718   : > { %v10556_v49 = vpop.eup %10555  ;;  %v7569_v48 = vadd.f32 1.0, %v10554_v55 }
 0x719   : > { %v7632_v15 = vmul.f32 %v10556_v49, %v7440_v1  ;;  %10557 = vpow2.f32 %v7531_v23  ;;  %v7407_v28 = vadd.f32 %v7367_v35, %v6586_v3  ;;  %v10206_v35 = vunpack.c.h.bf16 %v10227_v14 }
 0x71a   : > { %10559 = vrcp.f32 %v7569_v48 }
 0x71b   : > { %v7729_v7 = vadd.f32 %v10198_v25, %v7632_v15  ;;  %v7443_v31 = vadd.f32 %v13014_v44, %v7407_v28  ;;  %v7195_v16 = vpop.f32.mrf.mxu0  ;;  %v10228_v28 = vld [vmem:[#allocation2 + $0x80] sm:$0xff]  }
 0x71c   : > { %v7279_v29 = vpop.f32.mrf.mxu1  ;;  %v10209_v22 = vunpack.c.l.bf16 %v10228_v28 }
 0x71d   : > { %7761 = vst [vmem:[%s10899_s9 + $0xb8] sm:$0xff] %v7729_v7  ;;  %v7475_v17 = vsub.f32 0.0, %v7443_v31  ;;  %v7280_v19 = vadd.f32 %v7279_v29, %v7190_v9  ;;  %v7368_v47 = vpop.f32.mrf.mxu2 }
 0x71f   : > { %v10558_v54 = vpop.eup %10557  ;;  %v7533_v43 = vmul.f32 1.442695, %v7475_v17  ;;  %v7369_v18 = vadd.f32 %v7368_v47, %v7280_v19 }
 0x720   : > { %v10560_v1 = vpop.eup %10559  ;;  %v7570_v37 = vadd.f32 1.0, %v10558_v54  ;;  %v6595_v54 = vpop.f32.mrf.mxu3 }
 0x721   : > { %v7633_v36 = vmul.f32 %v10560_v1, %v7441_v57  ;;  %10561 = vpow2.f32 %v7533_v43  ;;  %v7408_v0 = vadd.f32 %v7369_v18, %v6588_v11  ;;  %v6596_v18 = vadd.f32 %v6595_v54, %v12798_v24 }
 0x722   : > { %10563 = vrcp.f32 %v7570_v37  ;;  %v10210_v1 = vunpack.c.h.bf16 %v10228_v28 }
 0x723   : > { %v7730_v56 = vadd.f32 %v10201_v4, %v7633_v36  ;;  %v7444_v6 = vadd.f32 %v13014_v44, %v7408_v0 }
 0x724   : > { %v7282_v12 = vpop.f32.mrf.mxu1 }
 0x725   : > { %7762 = vst [vmem:[%s10899_s9 + $0xc0] sm:$0xff] %v7730_v56  ;;  %v7476_v8 = vsub.f32 0.0, %v7444_v6  ;;  %v7283_v34 = vadd.f32 %v7282_v12, %v7193_v38  ;;  %v7371_v61 = vpop.f32.mrf.mxu2 }
 0x727   : > { %v10562_v39 = vpop.eup %10561  ;;  %v7535_v52 = vmul.f32 1.442695, %v7476_v8  ;;  %v7372_v20 = vadd.f32 %v7371_v61, %v7283_v34 }
 0x728   : > { %v10564_v57 = vpop.eup %10563  ;;  %v7571_v53 = vadd.f32 1.0, %v10562_v39  ;;  %v6597_v34 = vpop.f32.mrf.mxu3 }
 0x729   : > { %v7634_v45 = vmul.f32 %v10564_v57, %v7442_v59  ;;  %10565 = vpow2.f32 %v7535_v52  ;;  %v7409_v26 = vadd.f32 %v7372_v20, %v6591_v40  ;;  %v13338_v40 = vld [vmem:[#allocation56_spill] sm:$0xff] }
 0x72a   : > { %10567 = vrcp.f32 %v7571_v53 }
 0x72b   : > { %v7731_v51 = vadd.f32 %v10202_v42, %v7634_v45  ;;  %v7445_v30 = vadd.f32 %v13014_v44, %v7409_v26  ;;  %v6598_v42 = vadd.f32 %v6597_v34, %v13338_v40 }
 0x72c   : > { %v7284_v58 = vpop.f32.mrf.mxu1 }
 0x72d   : > { %7763 = vst [vmem:[%s10899_s9 + $0xc8] sm:$0xff] %v7731_v51  ;;  %v7477_v33 = vsub.f32 0.0, %v7445_v30  ;;  %v7285_v46 = vadd.f32 %v7284_v58, %v7195_v16  ;;  %v7373_v63 = vpop.f32.mrf.mxu2  ;;  %v10229_v51 = vld [vmem:[#allocation2 + $0x88] sm:$0xff]  }
 0x72e   : > { %v10213_v13 = vunpack.c.l.bf16 %v10229_v51 }
 0x72f   : > { %v10566_v5 = vpop.eup %10565  ;;  %v7537_v59 = vmul.f32 1.442695, %v7477_v33  ;;  %v7374_v10 = vadd.f32 %v7373_v63, %v7285_v46 }
 0x730   : > { %v10568_v32 = vpop.eup %10567  ;;  %v7572_v60 = vadd.f32 1.0, %v10566_v5 }
 0x731   : > { %v7635_v62 = vmul.f32 %v10568_v32, %v7443_v31  ;;  %10569 = vpow2.f32 %v7537_v59  ;;  %v7410_v55 = vadd.f32 %v7374_v10, %v6593_v2 }
 0x732   : > { %10571 = vrcp.f32 %v7572_v60 }
 0x733   : > { %v7732_v9 = vadd.f32 %v10205_v41, %v7635_v62  ;;  %v7446_v3 = vadd.f32 %v13014_v44, %v7410_v55 }
 0x734   : > { %v7287_v7 = vpop.f32.mrf.mxu1 }
 0x735   : > { %7764 = vst [vmem:[%s10899_s9 + $0xd0] sm:$0xff] %v7732_v9  ;;  %v7478_v25 = vsub.f32 0.0, %v7446_v3 }
 0x736   : > { %v7198_v17 = vpop.f32.mrf.mxu0 }
 0x737   : > { %v10570_v23 = vpop.eup %10569  ;;  %v7539_v49 = vmul.f32 1.442695, %v7478_v25  ;;  %v7288_v4 = vadd.f32 %v7287_v7, %v7198_v17 }
 0x738   : > { %v10572_v27 = vpop.eup %10571  ;;  %v7573_v50 = vadd.f32 1.0, %v10570_v23 }
 0x739   : > { %v7636_v48 = vmul.f32 %v10572_v27, %v7444_v6  ;;  %10573 = vpow2.f32 %v7539_v49 }
 0x73a   : > { %10575 = vrcp.f32 %v7573_v50 }
 0x73b   : > { %v7733_v15 = vadd.f32 %v10206_v35, %v7636_v48 }
 0x73c   : > { %v7289_v36 = vpop.f32.mrf.mxu1 }
 0x73d   : > { %7765 = vst [vmem:[%s10899_s9 + $0xd8] sm:$0xff] %v7733_v15 }
 0x73e   : > { %v7200_v56 = vpop.f32.mrf.mxu0 }
 0x73f   : > { %v10574_v31 = vpop.eup %10573  ;;  %v7290_v8 = vadd.f32 %v7289_v36, %v7200_v56 }
 0x740   : > { %v10576_v29 = vpop.eup %10575  ;;  %v7574_v19 = vadd.f32 1.0, %v10574_v31 }
 0x741   : > { %v7637_v47 = vmul.f32 %v10576_v29, %v7445_v30 }
 0x742   : > { %10577 = vrcp.f32 %v7574_v19 }
 0x743   : > { %v7734_v11 = vadd.f32 %v10209_v22, %v7637_v47 }
 0x744   : > { %v7376_v43 = vpop.f32.mrf.mxu2 }
 0x745   : > { %7766 = vst [vmem:[%s10899_s9 + $0xe0] sm:$0xff] %v7734_v11  ;;  %v7377_v37 = vadd.f32 %v7376_v43, %v7288_v4 }
 0x747   : > { %v7411_v21 = vadd.f32 %v7377_v37, %v6596_v18 }
 0x748   : > { %v10578_v38 = vpop.eup %10577 }
 0x749   : > { %v7638_v0 = vmul.f32 %v10578_v38, %v7446_v3  ;;  %v7447_v12 = vadd.f32 %v13014_v44, %v7411_v21 }
 0x74b   : > { %v7735_v6 = vadd.f32 %v10210_v1, %v7638_v0  ;;  %v7479_v61 = vsub.f32 0.0, %v7447_v12 }
 0x74c   : > { %v7378_v39 = vpop.f32.mrf.mxu2 }
 0x74d   : > { %7767 = vst [vmem:[%s10899_s9 + $0xe8] sm:$0xff] %v7735_v6  ;;  %v7541_v52 = vmul.f32 1.442695, %v7479_v61  ;;  %v7379_v20 = vadd.f32 %v7378_v39, %v7290_v8 }
 0x74f   : > { %10579 = vpow2.f32 %v7541_v52  ;;  %v7412_v24 = vadd.f32 %v7379_v20, %v6598_v42 }
 0x751   : > { %v7448_v57 = vadd.f32 %v13014_v44, %v7412_v24  ;;  %v10214_v44 = vunpack.c.h.bf16 %v10229_v51 }
 0x753   : > { %v7480_v53 = vsub.f32 0.0, %v7448_v57 }
 0x755   : > { %v10580_v45 = vpop.eup %10579  ;;  %v7543_v26 = vmul.f32 1.442695, %v7480_v53 }
 0x756   : > { %v7575_v16 = vadd.f32 1.0, %v10580_v45 }
 0x757   : > { %10581 = vpow2.f32 %v7543_v26 }
 0x758   : > { %10583 = vrcp.f32 %v7575_v16 }
 0x75d   : > { %v10582_v30 = vpop.eup %10581 }
 0x75e   : > { %v10584_v14 = vpop.eup %10583  ;;  %v7576_v58 = vadd.f32 1.0, %v10582_v30 }
 0x75f   : > { %v7639_v33 = vmul.f32 %v10584_v14, %v7447_v12 }
 0x760   : > { %10585 = vrcp.f32 %v7576_v58 }
 0x761   : > { %v7736_v46 = vadd.f32 %v10213_v13, %v7639_v33 }
 0x763   : > { %7768 = vst [vmem:[%s10899_s9 + $0xf0] sm:$0xff] %v7736_v46 }
 0x766   : > { %v10586_v63 = vpop.eup %10585 }
 0x767   : > { %v7640_v5 = vmul.f32 %v10586_v63, %v7448_v57 }
 0x769   : > { %v7737_v2 = vadd.f32 %v10214_v44, %v7640_v5 }
 0x76b   : > { %7769 = vst [vmem:[%s10899_s9 + $0xf8] sm:$0xff] %v7737_v2 }
 0x76c   : > { %10701 = shalt.err (!%p10698_p13)
}
 0x76d   : > { %s10771_s29 = smov 128   ;;  %s10772_s9 = smov 8  }
 0x76e   : > { %10254 = dma.vmem_to_hbm [thread:$0]  (%p10843_p4), %s7787_s1, 4096, %s7789_s7, %s7771_s10, %s10771_s29, %s10771_s29, %s10772_s9  }
 0x76f PF: > { %p10271_p0 = scmp.ge.s32.totalorder %s10762_s23, 2  ;;  %s7803_s8 = sand.u32 1, %s10742_s18  }
 0x770   : > { %s7804_s17 = scalar_lea.sflag [#allocation8], %s7803_s8 }
 0x771   : > { %p10264_p1 = pnand %p10271_p0, %p10850_p8 }
 0x773   : > { %p10265_p2 = pneg %p10264_p1 }
 0x775   : > { %10737 = dma.done.wait (%p10265_p2), %s7804_s17, 4096  }
 0x776   : > { %10739 = vsyncadd (%p10265_p2), %s7804_s17, 4294963200  ;;  %s20_s23 = sadd.s32 1, %s10762_s23   ;;  %s13339_s18 = smov %s10746_s19 }
 0x777   : > { %p17_p3 = scmp.ge.s32.totalorder %s20_s23, 4   ;;  %s13340_s19 = smov %s10750_s20 }
 0x778   : > { %s13341_s20 = smov %s10856_s6  ;;  %s13342_s21 = smov %s10758_s22 }
 0x779   : > { %s13343_s22 = smov %s13345_s26  ;;  %19 = sbr.rel (!%p17_p3) target bundleno = 8 (0x8), region = 91 }
 0x77e   :  { %7810 = vsyncpa [#allocation7], 1 }
 0x77f   :  { %7812 = vsyncpa [#allocation7 + $0x1], 1 }
 0x780   :  { %7813 = vsyncpa [#allocation10], 1 }
 0x781   :  { %7814 = vsyncpa [#allocation8], 1 }
 0x782   :  { %7816 = vsyncpa [#allocation8 + $0x1], 1 }
 0x783   :  { %7817 = vsyncmov [#allocation5] }
 0x786   :  { %s7818_s28 = vpop.sfrf %7817 }
 0x787   :  { %p9698_p4 = scmp.ne.s32.totalorder %s7818_s28, 0 }
 0x789   :  { %7822 = shalt.err (%p9698_p4)  }

</bundles_post_ra>
